<compile_context>
chip_gen: v5e
topology: v5e:2x2
jax: 0.10.0
libtpu: 0.0.40
codegen_flags: <defaults>
</compile_context>

<pallas_src>
import math

import jax
import jax.numpy as jnp
import numpy as np
from jax.experimental import pallas as pl
from jax.experimental.pallas import tpu as pltpu


def _round_up(v, m):
    return (v + m - 1) // m * m


# ----------------------------------------------------------------------------- kernel


def _make_level_kernel(w_pad, p_flat, q_flat):
    """Kernel processing one batch element of one pyramid level entirely in VMEM.

    Layout: images are zero-padded by 1 pixel on each side and row-flattened to
    (p_flat, C) with p_flat = (H+2)*(W+2).  A 3x3 tap (dh, dw) is then just a
    contiguous row-slice of length q_flat shifted by (dh-1)*(W+2) + (dw-1).
    """
    interior0 = w_pad + 1          # flat index of padded position (1, 1)
    halo = w_pad + 1               # rows in the top / bottom halo strip

    def kernel(x_ref, mask_ref,
               w1_ref, b1_ref, w2_ref, b2_ref, wh_ref, bh_ref,
               out_ref, buf):

        def conv3x3(src_ref, w_ref):
            # 9 shifted-slice matmuls accumulated in f32 (no im2col).
            c_out = w_ref.shape[2]
            acc = jnp.zeros((q_flat, c_out), jnp.float32)
            for dh in range(3):
                for dw in range(3):
                    tap = dh * 3 + dw
                    start = interior0 + (dh - 1) * w_pad + (dw - 1)   # static offset
                    xs = src_ref[pl.ds(start, q_flat), :]
                    acc = acc + jnp.dot(xs, w_ref[tap],
                                        preferred_element_type=jnp.float32)
            return acc

        mask = mask_ref[...]                       # (q_flat, 1) interior-column mask

        def silu_masked(z):
            a = z * (1.0 / (1.0 + jnp.exp(-z)))    # SiLU on the f32 accumulator
            return a * mask                        # zero out the width-halo columns

        # Re-zero only the top/bottom halo row strips of the scratch buffer; the
        # interior rows are always fully overwritten before conv2 reads them.
        zeros_strip = jnp.zeros((halo, buf.shape[1]), jnp.float32)
        buf[pl.ds(0, halo), :] = zeros_strip
        buf[pl.ds(p_flat - halo, halo), :] = zeros_strip

        # Fused reg||cls tower: conv1 -> SiLU -> conv2 (block-diag weight) -> SiLU.
        h1 = silu_masked(conv3x3(x_ref, w1_ref) + b1_ref[...])
        buf[pl.ds(interior0, q_flat), :] = h1
        h2 = silu_masked(conv3x3(buf, w2_ref) + b2_ref[...])
        buf[pl.ds(interior0, q_flat), :] = h2

        # Fused, lane-dense reg+cls 1x1 head: writes the concatenated output slab
        # (reg in cols [0:64], cls in cols [64:64+NC], zeros in the 128-padding).
        out_ref[...] = (jnp.dot(buf[...], wh_ref[...],
                                preferred_element_type=jnp.float32)
                        + bh_ref[...])

    return kernel


# ----------------------------------------------------------------------------- wrapper


def make_level_forward(batch, c_in, height, width, c_reg, c_cls, reg_ch, num_classes):
    c_in_p = _round_up(c_in, 128)
    c_med_p = _round_up(c_reg + c_cls, 128)        # fused tower width (reg || cls)
    c_out = reg_ch + num_classes
    c_out_p = _round_up(c_out, 128)

    h_pad, w_pad = height + 2, width + 2
    p_flat = h_pad * w_pad
    q_flat = p_flat - 2 * (w_pad + 1)

    kernel = _make_level_kernel(w_pad, p_flat, q_flat)

    in_specs = [
        pl.BlockSpec((None, p_flat, c_in_p), lambda n: (n, 0, 0)),     # x (flat, padded)
        pl.BlockSpec((q_flat, 1), lambda n: (0, 0)),                   # interior-col mask
        pl.BlockSpec((9, c_in_p, c_med_p), lambda n: (0, 0, 0)),       # fused conv1 (BN folded)
        pl.BlockSpec((1, c_med_p), lambda n: (0, 0)),
        pl.BlockSpec((9, c_med_p, c_med_p), lambda n: (0, 0, 0)),      # fused conv2 (block-diag)
        pl.BlockSpec((1, c_med_p), lambda n: (0, 0)),
        pl.BlockSpec((c_med_p, c_out_p), lambda n: (0, 0)),            # fused 1x1 head
        pl.BlockSpec((1, c_out_p), lambda n: (0, 0)),                  # fused head bias
    ]

    pallas_fn = pl.pallas_call(
        kernel,
        out_shape=jax.ShapeDtypeStruct((batch, p_flat, c_out_p), jnp.float32),
        grid=(batch,),
        in_specs=in_specs,
        out_specs=pl.BlockSpec((None, p_flat, c_out_p), lambda n: (n, 0, 0)),
        scratch_shapes=[pltpu.VMEM((p_flat, c_med_p), jnp.float32)],
        compiler_params=pltpu.CompilerParams(dimension_semantics=("parallel",)),
    )

    def forward(x_nchw, mask, level_params):
        # NCHW -> zero-padded (spatial +1, channels to 128), row-flattened NHWC.
        x = jnp.transpose(x_nchw, (0, 2, 3, 1))
        x = jnp.pad(x, ((0, 0), (1, 1), (1, 1), (0, c_in_p - c_in)))
        x = x.reshape(batch, p_flat, c_in_p)
        out = pallas_fn(x, mask, *level_params)
        out = out.reshape(batch, h_pad, w_pad, c_out_p)[:, 1:height + 1, 1:width + 1, :c_out]
        return jnp.transpose(out, (0, 3, 1, 2))   # back to NCHW, channels = reg || cls

    return jax.jit(forward)


def make_interior_mask(height, width):
    """(q_flat, 1) mask: 1 for interior columns, 0 for the width halo columns."""
    w_pad = width + 2
    p_flat = (height + 2) * w_pad
    q_flat = p_flat - 2 * (w_pad + 1)
    cols = (np.arange(q_flat) + w_pad + 1) % w_pad
    m = ((cols >= 1) & (cols <= width)).astype(np.float32)
    return jnp.asarray(m.reshape(q_flat, 1))


# --------------------------------------------------------------------- parameter prep


def fold_conv_bn(w_oihw, gamma, beta, mean, var, eps):
    """Fold eval-mode BN into a (3,3) conv; return tap-major (9, Cin, Cout) and bias."""
    c_out, c_in = w_oihw.shape[0], w_oihw.shape[1]
    scale = gamma / jnp.sqrt(var + eps)
    w = w_oihw * scale[:, None, None, None]
    b = beta - mean * scale
    w = jnp.transpose(w, (2, 3, 1, 0)).reshape(9, c_in, c_out)   # tap t = kh*3 + kw
    return w.astype(jnp.float32), b.astype(jnp.float32)


def prepare_level_params(reg_p, cls_p, c_in, c_in_p, c_reg, c_cls, c_med_p, c_out_p,
                         reg_ch, num_classes, eps):
    """Build the fused (reg||cls) tower weights with BN folded in.

    Channel packing in the fused tower:  reg -> cols [0:c_reg], cls -> cols
    [c_reg:c_reg+c_cls], remainder zero padding up to c_med_p.
    """
    w1r, b1r = fold_conv_bn(reg_p["w1"], *reg_p["bn1"], eps)
    w2r, b2r = fold_conv_bn(reg_p["w2"], *reg_p["bn2"], eps)
    w1c, b1c = fold_conv_bn(cls_p["w1"], *cls_p["bn1"], eps)
    w2c, b2c = fold_conv_bn(cls_p["w2"], *cls_p["bn2"], eps)

    # Fused conv1: both branches read the same input channels.
    w1 = jnp.zeros((9, c_in_p, c_med_p), jnp.float32)
    w1 = w1.at[:, :c_in, :c_reg].set(w1r)
    w1 = w1.at[:, :c_in, c_reg:c_reg + c_cls].set(w1c)
    b1 = (jnp.zeros((1, c_med_p), jnp.float32)
          .at[0, :c_reg].set(b1r)
          .at[0, c_reg:c_reg + c_cls].set(b1c))

    # Fused conv2: block-diagonal so each branch only sees its own channels.
    w2 = jnp.zeros((9, c_med_p, c_med_p), jnp.float32)
    w2 = w2.at[:, :c_reg, :c_reg].set(w2r)
    w2 = w2.at[:, c_reg:c_reg + c_cls, c_reg:c_reg + c_cls].set(w2c)
    b2 = (jnp.zeros((1, c_med_p), jnp.float32)
          .at[0, :c_reg].set(b2r)
          .at[0, c_reg:c_reg + c_cls].set(b2c))

    # Fused 1x1 head writing the concatenated (reg || cls) output slab.
    whr = jnp.transpose(reg_p["wh"][:, :, 0, 0], (1, 0))        # (c_reg, reg_ch)
    whc = jnp.transpose(cls_p["wh"][:, :, 0, 0], (1, 0))        # (c_cls, num_classes)
    wh = jnp.zeros((c_med_p, c_out_p), jnp.float32)
    wh = wh.at[:c_reg, :reg_ch].set(whr)
    wh = wh.at[c_reg:c_reg + c_cls, reg_ch:reg_ch + num_classes].set(whc)
    bh = (jnp.zeros((1, c_out_p), jnp.float32)
          .at[0, :reg_ch].set(reg_p["bh"])
          .at[0, reg_ch:reg_ch + num_classes].set(cls_p["bh"]))

    return (w1, b1, w2, b2, wh, bh)


def init_conv_bn(key, c_in, c_out):
    kw, kg, kb, km, kv = jax.random.split(key, 5)
    w = jax.random.normal(kw, (c_out, c_in, 3, 3), jnp.float32) / math.sqrt(9 * c_in)
    gamma = jax.random.uniform(kg, (c_out,), jnp.float32, 0.5, 1.5)
    beta = jax.random.normal(kb, (c_out,), jnp.float32) * 0.1
    mean = jax.random.normal(km, (c_out,), jnp.float32) * 0.1
    var = jax.random.uniform(kv, (c_out,), jnp.float32, 0.5, 1.5)
    return w, (gamma, beta, mean, var)


def init_tower(key, c_in, c_med, c_head):
    k1, k2, k3, k4 = jax.random.split(key, 4)
    w1, bn1 = init_conv_bn(k1, c_in, c_med)
    w2, bn2 = init_conv_bn(k2, c_med, c_med)
    wh = jax.random.normal(k3, (c_head, c_med, 1, 1), jnp.float32) / math.sqrt(c_med)
    bh = jax.random.normal(k4, (c_head,), jnp.float32) * 0.1
    return {"w1": w1, "bn1": bn1, "w2": w2, "bn2": bn2, "wh": wh, "bh": bh}


# ------------------------------------------------------------------ pure-JAX reference


def ref_level_forward(x_nchw, reg_p, cls_p, eps):
    prec = jax.lax.Precision.HIGHEST

    def conv_bn_silu(x, w, bn):
        y = jax.lax.conv_general_dilated(
            x, w, window_strides=(1, 1), padding=((1, 1), (1, 1)),
            dimension_numbers=("NCHW", "OIHW", "NCHW"), precision=prec)
        g, b, m, v = bn
        s = g / jnp.sqrt(v + eps)
        y = y * s[None, :, None, None] + (b - m * s)[None, :, None, None]
        return y * jax.nn.sigmoid(y)

    def tower(x, p):
        h = conv_bn_silu(x, p["w1"], p["bn1"])
        h = conv_bn_silu(h, p["w2"], p["bn2"])
        y = jax.lax.conv_general_dilated(
            h, p["wh"], window_strides=(1, 1), padding=((0, 0), (0, 0)),
            dimension_numbers=("NCHW", "OIHW", "NCHW"), precision=prec)
        return y + p["bh"][None, :, None, None]

    return jnp.concatenate([tower(x_nchw, reg_p), tower(x_nchw, cls_p)], axis=1)


# --------------------------------------------------------------------------------- main


if __name__ == "__main__":
    batch = 2
    num_classes = 16
    reg_max = 16
    reg_ch = reg_max * 4                                   # 64
    in_channels = (32, 64)                                 # per-level input channels
    spatial = ((16, 16), (8, 8))                           # per-level (H, W)
    eps = 1e-3                                             # BN eps (eval mode)

    reg_med = max(16, in_channels[0] // 4, reg_ch)         # 64
    cls_med = max(in_channels[0], min(num_classes, 100))   # 32
    c_out = reg_ch + num_classes
    c_med_p = _round_up(reg_med + cls_med, 128)
    c_out_p = _round_up(c_out, 128)

    key = jax.random.PRNGKey(0)
    kx, kp = jax.random.split(key)

    xs, raw_params = [], []
    for c_in, (h, w) in zip(in_channels, spatial):
        kx, kxi = jax.random.split(kx)
        xs.append(jax.random.normal(kxi, (batch, c_in, h, w), jnp.float32))
        kp, kr, kc = jax.random.split(kp, 3)
        raw_params.append((init_tower(kr, c_in, reg_med, reg_ch),
                           init_tower(kc, c_in, cls_med, num_classes)))

    outs = []
    for lvl, (c_in, (h, w)) in enumerate(zip(in_channels, spatial)):
        c_in_p = _round_up(c_in, 128)
        level_params = prepare_level_params(raw_params[lvl][0], raw_params[lvl][1],
                                            c_in, c_in_p, reg_med, cls_med,
                                            c_med_p, c_out_p,
                                            reg_ch, num_classes, eps)
        mask = make_interior_mask(h, w)
        fwd = make_level_forward(batch, c_in, h, w, reg_med, cls_med,
                                 reg_ch, num_classes)
        outs.append(fwd(xs[lvl], mask, level_params))

    outs = [jax.block_until_ready(o) for o in outs]

    # Correctness check against a pure-JAX reference of the PyTorch forward.
    for lvl, (c_in, (h, w)) in enumerate(zip(in_channels, spatial)):
        if outs[lvl].shape != (batch, c_out, h, w):
            raise AssertionError(f"level {lvl}: bad output shape {outs[lvl].shape}")
        ref = ref_level_forward(xs[lvl], raw_params[lvl][0], raw_params[lvl][1], eps)
        err = float(jnp.max(jnp.abs(outs[lvl] - ref)))
        scale = float(jnp.max(jnp.abs(ref)))
        if not (err <= 1e-2 + 2e-2 * scale):
            raise AssertionError(
                f"level {lvl}: Pallas output mismatch "
                f"(max|diff|={err:.3e}, ref scale={scale:.3e})")

    print("KERNEL_OK")
</pallas_src>

<mosaic_0001>
module attributes {stable_mosaic.version = 11 : i64} {
  func.func @kernel(%arg0: i32, %arg1: memref<1x324x128xf32, #tpu.memory_space<vmem>>, %arg2: memref<286x1xf32, #tpu.memory_space<vmem>>, %arg3: memref<9x128x128xf32, #tpu.memory_space<vmem>>, %arg4: memref<1x128xf32, #tpu.memory_space<vmem>>, %arg5: memref<9x128x128xf32, #tpu.memory_space<vmem>>, %arg6: memref<1x128xf32, #tpu.memory_space<vmem>>, %arg7: memref<128x128xf32, #tpu.memory_space<vmem>>, %arg8: memref<1x128xf32, #tpu.memory_space<vmem>>, %arg9: memref<1x324x128xf32, #tpu.memory_space<vmem>>, %arg10: memref<324x128xf32, #tpu.memory_space<vmem>>) attributes {dimension_semantics = [#tpu.dimension_semantics<parallel>], iteration_bounds = array<i64: 2>, scalar_prefetch = 0 : i64, scratch_operands = 1 : i64, tpu.core_type = #tpu.core_type<tc>, window_params = [{transform_indices = @transform_0, window_bounds = array<i64: 1, 324, 128>}, {pipeline_mode = #tpu.pipeline_mode<synchronous>, transform_indices = @transform_1, window_bounds = array<i64: 286, 1>}, {pipeline_mode = #tpu.pipeline_mode<synchronous>, transform_indices = @transform_2, window_bounds = array<i64: 9, 128, 128>}, {pipeline_mode = #tpu.pipeline_mode<synchronous>, transform_indices = @transform_3, window_bounds = array<i64: 1, 128>}, {pipeline_mode = #tpu.pipeline_mode<synchronous>, transform_indices = @transform_4, window_bounds = array<i64: 9, 128, 128>}, {pipeline_mode = #tpu.pipeline_mode<synchronous>, transform_indices = @transform_5, window_bounds = array<i64: 1, 128>}, {pipeline_mode = #tpu.pipeline_mode<synchronous>, transform_indices = @transform_6, window_bounds = array<i64: 128, 128>}, {pipeline_mode = #tpu.pipeline_mode<synchronous>, transform_indices = @transform_7, window_bounds = array<i64: 1, 128>}, {transform_indices = @transform_8, window_bounds = array<i64: 1, 324, 128>}]} {
    %c0 = arith.constant 0 : index
    %c0_0 = arith.constant 0 : index
    %0 = vector.load %arg2[%c0, %c0_0] : memref<286x1xf32, #tpu.memory_space<vmem>>, vector<286x1xf32>
    %cst = arith.constant 0.000000e+00 : f32
    %1 = vector.broadcast %cst : f32 to vector<19x128xf32>
    %c0_1 = arith.constant 0 : index
    %c0_2 = arith.constant 0 : index
    %2 = vector.load %arg10[%c0_1, %c0_2] : memref<324x128xf32, #tpu.memory_space<vmem>>, vector<19x128xf32>
    tpu.vector_store %arg10[%c0_1, %c0_2], %1 {strides = array<i32>} : memref<324x128xf32, #tpu.memory_space<vmem>>, vector<19x128xf32>,
    %c305 = arith.constant 305 : index
    %c0_3 = arith.constant 0 : index
    %3 = vector.load %arg10[%c305, %c0_3] : memref<324x128xf32, #tpu.memory_space<vmem>>, vector<19x128xf32>
    tpu.vector_store %arg10[%c305, %c0_3], %1 {strides = array<i32>} : memref<324x128xf32, #tpu.memory_space<vmem>>, vector<19x128xf32>,
    %cst_4 = arith.constant 0.000000e+00 : f32
    %4 = vector.broadcast %cst_4 : f32 to vector<286x128xf32>
    %c0_5 = arith.constant 0 : index
    %c0_6 = arith.constant 0 : index
    %c0_7 = arith.constant 0 : index
    %5 = vector.load %arg1[%c0_5, %c0_6, %c0_7] : memref<1x324x128xf32, #tpu.memory_space<vmem>>, vector<1x286x128xf32>
    %6 = vector.shape_cast %5 : vector<1x286x128xf32> to vector<286x128xf32>
    %c0_8 = arith.constant 0 : index
    %c0_9 = arith.constant 0 : index
    %c0_10 = arith.constant 0 : index
    %7 = vector.load %arg3[%c0_8, %c0_9, %c0_10] : memref<9x128x128xf32, #tpu.memory_space<vmem>>, vector<1x128x128xf32>
    %8 = vector.shape_cast %7 : vector<1x128x128xf32> to vector<128x128xf32>
    %cst_11 = arith.constant dense<0.000000e+00> : vector<286x128xf32>
    %9 = tpu.matmul %6, %8, %cst_11 {dimension_numbers = #tpu.dot_dimension_numbers<[1], [0], [0], [1], [0, 0, 1, 1], [], []>} : vector<286x128xf32>, vector<128x128xf32>, vector<286x128xf32> -> vector<286x128xf32>
    %10 = arith.addf %4, %9 : vector<286x128xf32>
    %c0_12 = arith.constant 0 : index
    %c1 = arith.constant 1 : index
    %c0_13 = arith.constant 0 : index
    %11 = vector.load %arg1[%c0_12, %c1, %c0_13] : memref<1x324x128xf32, #tpu.memory_space<vmem>>, vector<1x286x128xf32>
    %12 = vector.shape_cast %11 : vector<1x286x128xf32> to vector<286x128xf32>
    %c1_14 = arith.constant 1 : index
    %c0_15 = arith.constant 0 : index
    %c0_16 = arith.constant 0 : index
    %13 = vector.load %arg3[%c1_14, %c0_15, %c0_16] : memref<9x128x128xf32, #tpu.memory_space<vmem>>, vector<1x128x128xf32>
    %14 = vector.shape_cast %13 : vector<1x128x128xf32> to vector<128x128xf32>
    %cst_17 = arith.constant dense<0.000000e+00> : vector<286x128xf32>
    %15 = tpu.matmul %12, %14, %cst_17 {dimension_numbers = #tpu.dot_dimension_numbers<[1], [0], [0], [1], [0, 0, 1, 1], [], []>} : vector<286x128xf32>, vector<128x128xf32>, vector<286x128xf32> -> vector<286x128xf32>
    %16 = arith.addf %10, %15 : vector<286x128xf32>
    %c0_18 = arith.constant 0 : index
    %c2 = arith.constant 2 : index
    %c0_19 = arith.constant 0 : index
    %17 = vector.load %arg1[%c0_18, %c2, %c0_19] : memref<1x324x128xf32, #tpu.memory_space<vmem>>, vector<1x286x128xf32>
    %18 = vector.shape_cast %17 : vector<1x286x128xf32> to vector<286x128xf32>
    %c2_20 = arith.constant 2 : index
    %c0_21 = arith.constant 0 : index
    %c0_22 = arith.constant 0 : index
    %19 = vector.load %arg3[%c2_20, %c0_21, %c0_22] : memref<9x128x128xf32, #tpu.memory_space<vmem>>, vector<1x128x128xf32>
    %20 = vector.shape_cast %19 : vector<1x128x128xf32> to vector<128x128xf32>
    %cst_23 = arith.constant dense<0.000000e+00> : vector<286x128xf32>
    %21 = tpu.matmul %18, %20, %cst_23 {dimension_numbers = #tpu.dot_dimension_numbers<[1], [0], [0], [1], [0, 0, 1, 1], [], []>} : vector<286x128xf32>, vector<128x128xf32>, vector<286x128xf32> -> vector<286x128xf32>
    %22 = arith.addf %16, %21 : vector<286x128xf32>
    %c0_24 = arith.constant 0 : index
    %c18 = arith.constant 18 : index
    %c0_25 = arith.constant 0 : index
    %23 = vector.load %arg1[%c0_24, %c18, %c0_25] : memref<1x324x128xf32, #tpu.memory_space<vmem>>, vector<1x286x128xf32>
    %24 = vector.shape_cast %23 : vector<1x286x128xf32> to vector<286x128xf32>
    %c3 = arith.constant 3 : index
    %c0_26 = arith.constant 0 : index
    %c0_27 = arith.constant 0 : index
    %25 = vector.load %arg3[%c3, %c0_26, %c0_27] : memref<9x128x128xf32, #tpu.memory_space<vmem>>, vector<1x128x128xf32>
    %26 = vector.shape_cast %25 : vector<1x128x128xf32> to vector<128x128xf32>
    %cst_28 = arith.constant dense<0.000000e+00> : vector<286x128xf32>
    %27 = tpu.matmul %24, %26, %cst_28 {dimension_numbers = #tpu.dot_dimension_numbers<[1], [0], [0], [1], [0, 0, 1, 1], [], []>} : vector<286x128xf32>, vector<128x128xf32>, vector<286x128xf32> -> vector<286x128xf32>
    %28 = arith.addf %22, %27 : vector<286x128xf32>
    %c0_29 = arith.constant 0 : index
    %c19 = arith.constant 19 : index
    %c0_30 = arith.constant 0 : index
    %29 = vector.load %arg1[%c0_29, %c19, %c0_30] : memref<1x324x128xf32, #tpu.memory_space<vmem>>, vector<1x286x128xf32>
    %30 = vector.shape_cast %29 : vector<1x286x128xf32> to vector<286x128xf32>
    %c4 = arith.constant 4 : index
    %c0_31 = arith.constant 0 : index
    %c0_32 = arith.constant 0 : index
    %31 = vector.load %arg3[%c4, %c0_31, %c0_32] : memref<9x128x128xf32, #tpu.memory_space<vmem>>, vector<1x128x128xf32>
    %32 = vector.shape_cast %31 : vector<1x128x128xf32> to vector<128x128xf32>
    %cst_33 = arith.constant dense<0.000000e+00> : vector<286x128xf32>
    %33 = tpu.matmul %30, %32, %cst_33 {dimension_numbers = #tpu.dot_dimension_numbers<[1], [0], [0], [1], [0, 0, 1, 1], [], []>} : vector<286x128xf32>, vector<128x128xf32>, vector<286x128xf32> -> vector<286x128xf32>
    %34 = arith.addf %28, %33 : vector<286x128xf32>
    %c0_34 = arith.constant 0 : index
    %c20 = arith.constant 20 : index
    %c0_35 = arith.constant 0 : index
    %35 = vector.load %arg1[%c0_34, %c20, %c0_35] : memref<1x324x128xf32, #tpu.memory_space<vmem>>, vector<1x286x128xf32>
    %36 = vector.shape_cast %35 : vector<1x286x128xf32> to vector<286x128xf32>
    %c5 = arith.constant 5 : index
    %c0_36 = arith.constant 0 : index
    %c0_37 = arith.constant 0 : index
    %37 = vector.load %arg3[%c5, %c0_36, %c0_37] : memref<9x128x128xf32, #tpu.memory_space<vmem>>, vector<1x128x128xf32>
    %38 = vector.shape_cast %37 : vector<1x128x128xf32> to vector<128x128xf32>
    %cst_38 = arith.constant dense<0.000000e+00> : vector<286x128xf32>
    %39 = tpu.matmul %36, %38, %cst_38 {dimension_numbers = #tpu.dot_dimension_numbers<[1], [0], [0], [1], [0, 0, 1, 1], [], []>} : vector<286x128xf32>, vector<128x128xf32>, vector<286x128xf32> -> vector<286x128xf32>
    %40 = arith.addf %34, %39 : vector<286x128xf32>
    %c0_39 = arith.constant 0 : index
    %c36 = arith.constant 36 : index
    %c0_40 = arith.constant 0 : index
    %41 = vector.load %arg1[%c0_39, %c36, %c0_40] : memref<1x324x128xf32, #tpu.memory_space<vmem>>, vector<1x286x128xf32>
    %42 = vector.shape_cast %41 : vector<1x286x128xf32> to vector<286x128xf32>
    %c6 = arith.constant 6 : index
    %c0_41 = arith.constant 0 : index
    %c0_42 = arith.constant 0 : index
    %43 = vector.load %arg3[%c6, %c0_41, %c0_42] : memref<9x128x128xf32, #tpu.memory_space<vmem>>, vector<1x128x128xf32>
    %44 = vector.shape_cast %43 : vector<1x128x128xf32> to vector<128x128xf32>
    %cst_43 = arith.constant dense<0.000000e+00> : vector<286x128xf32>
    %45 = tpu.matmul %42, %44, %cst_43 {dimension_numbers = #tpu.dot_dimension_numbers<[1], [0], [0], [1], [0, 0, 1, 1], [], []>} : vector<286x128xf32>, vector<128x128xf32>, vector<286x128xf32> -> vector<286x128xf32>
    %46 = arith.addf %40, %45 : vector<286x128xf32>
    %c0_44 = arith.constant 0 : index
    %c37 = arith.constant 37 : index
    %c0_45 = arith.constant 0 : index
    %47 = vector.load %arg1[%c0_44, %c37, %c0_45] : memref<1x324x128xf32, #tpu.memory_space<vmem>>, vector<1x286x128xf32>
    %48 = vector.shape_cast %47 : vector<1x286x128xf32> to vector<286x128xf32>
    %c7 = arith.constant 7 : index
    %c0_46 = arith.constant 0 : index
    %c0_47 = arith.constant 0 : index
    %49 = vector.load %arg3[%c7, %c0_46, %c0_47] : memref<9x128x128xf32, #tpu.memory_space<vmem>>, vector<1x128x128xf32>
    %50 = vector.shape_cast %49 : vector<1x128x128xf32> to vector<128x128xf32>
    %cst_48 = arith.constant dense<0.000000e+00> : vector<286x128xf32>
    %51 = tpu.matmul %48, %50, %cst_48 {dimension_numbers = #tpu.dot_dimension_numbers<[1], [0], [0], [1], [0, 0, 1, 1], [], []>} : vector<286x128xf32>, vector<128x128xf32>, vector<286x128xf32> -> vector<286x128xf32>
    %52 = arith.addf %46, %51 : vector<286x128xf32>
    %c0_49 = arith.constant 0 : index
    %c38 = arith.constant 38 : index
    %c0_50 = arith.constant 0 : index
    %53 = vector.load %arg1[%c0_49, %c38, %c0_50] : memref<1x324x128xf32, #tpu.memory_space<vmem>>, vector<1x286x128xf32>
    %54 = vector.shape_cast %53 : vector<1x286x128xf32> to vector<286x128xf32>
    %c8 = arith.constant 8 : index
    %c0_51 = arith.constant 0 : index
    %c0_52 = arith.constant 0 : index
    %55 = vector.load %arg3[%c8, %c0_51, %c0_52] : memref<9x128x128xf32, #tpu.memory_space<vmem>>, vector<1x128x128xf32>
    %56 = vector.shape_cast %55 : vector<1x128x128xf32> to vector<128x128xf32>
    %cst_53 = arith.constant dense<0.000000e+00> : vector<286x128xf32>
    %57 = tpu.matmul %54, %56, %cst_53 {dimension_numbers = #tpu.dot_dimension_numbers<[1], [0], [0], [1], [0, 0, 1, 1], [], []>} : vector<286x128xf32>, vector<128x128xf32>, vector<286x128xf32> -> vector<286x128xf32>
    %58 = arith.addf %52, %57 : vector<286x128xf32>
    %c0_54 = arith.constant 0 : index
    %c0_55 = arith.constant 0 : index
    %59 = vector.load %arg4[%c0_54, %c0_55] : memref<1x128xf32, #tpu.memory_space<vmem>>, vector<1x128xf32>
    %60 = vector.broadcast %59 : vector<1x128xf32> to vector<286x128xf32>
    %61 = arith.addf %58, %60 : vector<286x128xf32>
    %cst_56 = arith.constant 0.000000e+00 : f32
    %62 = vector.broadcast %cst_56 : f32 to vector<286x128xf32>
    %63 = arith.subf %62, %61 : vector<286x128xf32>
    %64 = math.exp %63 : vector<286x128xf32>
    %cst_57 = arith.constant 1.000000e+00 : f32
    %65 = vector.broadcast %cst_57 : f32 to vector<286x128xf32>
    %66 = arith.addf %65, %64 : vector<286x128xf32>
    %cst_58 = arith.constant 1.000000e+00 : f32
    %67 = vector.broadcast %cst_58 : f32 to vector<286x128xf32>
    %68 = arith.divf %67, %66 : vector<286x128xf32>
    %69 = arith.mulf %61, %68 : vector<286x128xf32>
    %70 = vector.broadcast %0 : vector<286x1xf32> to vector<286x128xf32>
    %71 = arith.mulf %69, %70 : vector<286x128xf32>
    %c19_59 = arith.constant 19 : index
    %c0_60 = arith.constant 0 : index
    %72 = vector.load %arg10[%c19_59, %c0_60] : memref<324x128xf32, #tpu.memory_space<vmem>>, vector<286x128xf32>
    tpu.vector_store %arg10[%c19_59, %c0_60], %71 {strides = array<i32>} : memref<324x128xf32, #tpu.memory_space<vmem>>, vector<286x128xf32>,
    %cst_61 = arith.constant 0.000000e+00 : f32
    %73 = vector.broadcast %cst_61 : f32 to vector<286x128xf32>
    %c0_62 = arith.constant 0 : index
    %c0_63 = arith.constant 0 : index
    %74 = vector.load %arg10[%c0_62, %c0_63] : memref<324x128xf32, #tpu.memory_space<vmem>>, vector<286x128xf32>
    %c0_64 = arith.constant 0 : index
    %c0_65 = arith.constant 0 : index
    %c0_66 = arith.constant 0 : index
    %75 = vector.load %arg5[%c0_64, %c0_65, %c0_66] : memref<9x128x128xf32, #tpu.memory_space<vmem>>, vector<1x128x128xf32>
    %76 = vector.shape_cast %75 : vector<1x128x128xf32> to vector<128x128xf32>
    %cst_67 = arith.constant dense<0.000000e+00> : vector<286x128xf32>
    %77 = tpu.matmul %74, %76, %cst_67 {dimension_numbers = #tpu.dot_dimension_numbers<[1], [0], [0], [1], [0, 0, 1, 1], [], []>} : vector<286x128xf32>, vector<128x128xf32>, vector<286x128xf32> -> vector<286x128xf32>
    %78 = arith.addf %73, %77 : vector<286x128xf32>
    %c1_68 = arith.constant 1 : index
    %c0_69 = arith.constant 0 : index
    %79 = vector.load %arg10[%c1_68, %c0_69] : memref<324x128xf32, #tpu.memory_space<vmem>>, vector<286x128xf32>
    %c1_70 = arith.constant 1 : index
    %c0_71 = arith.constant 0 : index
    %c0_72 = arith.constant 0 : index
    %80 = vector.load %arg5[%c1_70, %c0_71, %c0_72] : memref<9x128x128xf32, #tpu.memory_space<vmem>>, vector<1x128x128xf32>
    %81 = vector.shape_cast %80 : vector<1x128x128xf32> to vector<128x128xf32>
    %cst_73 = arith.constant dense<0.000000e+00> : vector<286x128xf32>
    %82 = tpu.matmul %79, %81, %cst_73 {dimension_numbers = #tpu.dot_dimension_numbers<[1], [0], [0], [1], [0, 0, 1, 1], [], []>} : vector<286x128xf32>, vector<128x128xf32>, vector<286x128xf32> -> vector<286x128xf32>
    %83 = arith.addf %78, %82 : vector<286x128xf32>
    %c2_74 = arith.constant 2 : index
    %c0_75 = arith.constant 0 : index
    %84 = vector.load %arg10[%c2_74, %c0_75] : memref<324x128xf32, #tpu.memory_space<vmem>>, vector<286x128xf32>
    %c2_76 = arith.constant 2 : index
    %c0_77 = arith.constant 0 : index
    %c0_78 = arith.constant 0 : index
    %85 = vector.load %arg5[%c2_76, %c0_77, %c0_78] : memref<9x128x128xf32, #tpu.memory_space<vmem>>, vector<1x128x128xf32>
    %86 = vector.shape_cast %85 : vector<1x128x128xf32> to vector<128x128xf32>
    %cst_79 = arith.constant dense<0.000000e+00> : vector<286x128xf32>
    %87 = tpu.matmul %84, %86, %cst_79 {dimension_numbers = #tpu.dot_dimension_numbers<[1], [0], [0], [1], [0, 0, 1, 1], [], []>} : vector<286x128xf32>, vector<128x128xf32>, vector<286x128xf32> -> vector<286x128xf32>
    %88 = arith.addf %83, %87 : vector<286x128xf32>
    %c18_80 = arith.constant 18 : index
    %c0_81 = arith.constant 0 : index
    %89 = vector.load %arg10[%c18_80, %c0_81] : memref<324x128xf32, #tpu.memory_space<vmem>>, vector<286x128xf32>
    %c3_82 = arith.constant 3 : index
    %c0_83 = arith.constant 0 : index
    %c0_84 = arith.constant 0 : index
    %90 = vector.load %arg5[%c3_82, %c0_83, %c0_84] : memref<9x128x128xf32, #tpu.memory_space<vmem>>, vector<1x128x128xf32>
    %91 = vector.shape_cast %90 : vector<1x128x128xf32> to vector<128x128xf32>
    %cst_85 = arith.constant dense<0.000000e+00> : vector<286x128xf32>
    %92 = tpu.matmul %89, %91, %cst_85 {dimension_numbers = #tpu.dot_dimension_numbers<[1], [0], [0], [1], [0, 0, 1, 1], [], []>} : vector<286x128xf32>, vector<128x128xf32>, vector<286x128xf32> -> vector<286x128xf32>
    %93 = arith.addf %88, %92 : vector<286x128xf32>
    %c19_86 = arith.constant 19 : index
    %c0_87 = arith.constant 0 : index
    %94 = vector.load %arg10[%c19_86, %c0_87] : memref<324x128xf32, #tpu.memory_space<vmem>>, vector<286x128xf32>
    %c4_88 = arith.constant 4 : index
    %c0_89 = arith.constant 0 : index
    %c0_90 = arith.constant 0 : index
    %95 = vector.load %arg5[%c4_88, %c0_89, %c0_90] : memref<9x128x128xf32, #tpu.memory_space<vmem>>, vector<1x128x128xf32>
    %96 = vector.shape_cast %95 : vector<1x128x128xf32> to vector<128x128xf32>
    %cst_91 = arith.constant dense<0.000000e+00> : vector<286x128xf32>
    %97 = tpu.matmul %94, %96, %cst_91 {dimension_numbers = #tpu.dot_dimension_numbers<[1], [0], [0], [1], [0, 0, 1, 1], [], []>} : vector<286x128xf32>, vector<128x128xf32>, vector<286x128xf32> -> vector<286x128xf32>
    %98 = arith.addf %93, %97 : vector<286x128xf32>
    %c20_92 = arith.constant 20 : index
    %c0_93 = arith.constant 0 : index
    %99 = vector.load %arg10[%c20_92, %c0_93] : memref<324x128xf32, #tpu.memory_space<vmem>>, vector<286x128xf32>
    %c5_94 = arith.constant 5 : index
    %c0_95 = arith.constant 0 : index
    %c0_96 = arith.constant 0 : index
    %100 = vector.load %arg5[%c5_94, %c0_95, %c0_96] : memref<9x128x128xf32, #tpu.memory_space<vmem>>, vector<1x128x128xf32>
    %101 = vector.shape_cast %100 : vector<1x128x128xf32> to vector<128x128xf32>
    %cst_97 = arith.constant dense<0.000000e+00> : vector<286x128xf32>
    %102 = tpu.matmul %99, %101, %cst_97 {dimension_numbers = #tpu.dot_dimension_numbers<[1], [0], [0], [1], [0, 0, 1, 1], [], []>} : vector<286x128xf32>, vector<128x128xf32>, vector<286x128xf32> -> vector<286x128xf32>
    %103 = arith.addf %98, %102 : vector<286x128xf32>
    %c36_98 = arith.constant 36 : index
    %c0_99 = arith.constant 0 : index
    %104 = vector.load %arg10[%c36_98, %c0_99] : memref<324x128xf32, #tpu.memory_space<vmem>>, vector<286x128xf32>
    %c6_100 = arith.constant 6 : index
    %c0_101 = arith.constant 0 : index
    %c0_102 = arith.constant 0 : index
    %105 = vector.load %arg5[%c6_100, %c0_101, %c0_102] : memref<9x128x128xf32, #tpu.memory_space<vmem>>, vector<1x128x128xf32>
    %106 = vector.shape_cast %105 : vector<1x128x128xf32> to vector<128x128xf32>
    %cst_103 = arith.constant dense<0.000000e+00> : vector<286x128xf32>
    %107 = tpu.matmul %104, %106, %cst_103 {dimension_numbers = #tpu.dot_dimension_numbers<[1], [0], [0], [1], [0, 0, 1, 1], [], []>} : vector<286x128xf32>, vector<128x128xf32>, vector<286x128xf32> -> vector<286x128xf32>
    %108 = arith.addf %103, %107 : vector<286x128xf32>
    %c37_104 = arith.constant 37 : index
    %c0_105 = arith.constant 0 : index
    %109 = vector.load %arg10[%c37_104, %c0_105] : memref<324x128xf32, #tpu.memory_space<vmem>>, vector<286x128xf32>
    %c7_106 = arith.constant 7 : index
    %c0_107 = arith.constant 0 : index
    %c0_108 = arith.constant 0 : index
    %110 = vector.load %arg5[%c7_106, %c0_107, %c0_108] : memref<9x128x128xf32, #tpu.memory_space<vmem>>, vector<1x128x128xf32>
    %111 = vector.shape_cast %110 : vector<1x128x128xf32> to vector<128x128xf32>
    %cst_109 = arith.constant dense<0.000000e+00> : vector<286x128xf32>
    %112 = tpu.matmul %109, %111, %cst_109 {dimension_numbers = #tpu.dot_dimension_numbers<[1], [0], [0], [1], [0, 0, 1, 1], [], []>} : vector<286x128xf32>, vector<128x128xf32>, vector<286x128xf32> -> vector<286x128xf32>
    %113 = arith.addf %108, %112 : vector<286x128xf32>
    %c38_110 = arith.constant 38 : index
    %c0_111 = arith.constant 0 : index
    %114 = vector.load %arg10[%c38_110, %c0_111] : memref<324x128xf32, #tpu.memory_space<vmem>>, vector<286x128xf32>
    %c8_112 = arith.constant 8 : index
    %c0_113 = arith.constant 0 : index
    %c0_114 = arith.constant 0 : index
    %115 = vector.load %arg5[%c8_112, %c0_113, %c0_114] : memref<9x128x128xf32, #tpu.memory_space<vmem>>, vector<1x128x128xf32>
    %116 = vector.shape_cast %115 : vector<1x128x128xf32> to vector<128x128xf32>
    %cst_115 = arith.constant dense<0.000000e+00> : vector<286x128xf32>
    %117 = tpu.matmul %114, %116, %cst_115 {dimension_numbers = #tpu.dot_dimension_numbers<[1], [0], [0], [1], [0, 0, 1, 1], [], []>} : vector<286x128xf32>, vector<128x128xf32>, vector<286x128xf32> -> vector<286x128xf32>
    %118 = arith.addf %113, %117 : vector<286x128xf32>
    %c0_116 = arith.constant 0 : index
    %c0_117 = arith.constant 0 : index
    %119 = vector.load %arg6[%c0_116, %c0_117] : memref<1x128xf32, #tpu.memory_space<vmem>>, vector<1x128xf32>
    %120 = vector.broadcast %119 : vector<1x128xf32> to vector<286x128xf32>
    %121 = arith.addf %118, %120 : vector<286x128xf32>
    %cst_118 = arith.constant 0.000000e+00 : f32
    %122 = vector.broadcast %cst_118 : f32 to vector<286x128xf32>
    %123 = arith.subf %122, %121 : vector<286x128xf32>
    %124 = math.exp %123 : vector<286x128xf32>
    %cst_119 = arith.constant 1.000000e+00 : f32
    %125 = vector.broadcast %cst_119 : f32 to vector<286x128xf32>
    %126 = arith.addf %125, %124 : vector<286x128xf32>
    %cst_120 = arith.constant 1.000000e+00 : f32
    %127 = vector.broadcast %cst_120 : f32 to vector<286x128xf32>
    %128 = arith.divf %127, %126 : vector<286x128xf32>
    %129 = arith.mulf %121, %128 : vector<286x128xf32>
    %130 = vector.broadcast %0 : vector<286x1xf32> to vector<286x128xf32>
    %131 = arith.mulf %129, %130 : vector<286x128xf32>
    %c19_121 = arith.constant 19 : index
    %c0_122 = arith.constant 0 : index
    %132 = vector.load %arg10[%c19_121, %c0_122] : memref<324x128xf32, #tpu.memory_space<vmem>>, vector<286x128xf32>
    tpu.vector_store %arg10[%c19_121, %c0_122], %131 {strides = array<i32>} : memref<324x128xf32, #tpu.memory_space<vmem>>, vector<286x128xf32>,
    %c0_123 = arith.constant 0 : index
    %c0_124 = arith.constant 0 : index
    %133 = vector.load %arg10[%c0_123, %c0_124] : memref<324x128xf32, #tpu.memory_space<vmem>>, vector<324x128xf32>
    %c0_125 = arith.constant 0 : index
    %c0_126 = arith.constant 0 : index
    %134 = vector.load %arg7[%c0_125, %c0_126] : memref<128x128xf32, #tpu.memory_space<vmem>>, vector<128x128xf32>
    %cst_127 = arith.constant dense<0.000000e+00> : vector<324x128xf32>
    %135 = tpu.matmul %133, %134, %cst_127 {dimension_numbers = #tpu.dot_dimension_numbers<[1], [0], [0], [1], [0, 0, 1, 1], [], []>} : vector<324x128xf32>, vector<128x128xf32>, vector<324x128xf32> -> vector<324x128xf32>
    %c0_128 = arith.constant 0 : index
    %c0_129 = arith.constant 0 : index
    %136 = vector.load %arg8[%c0_128, %c0_129] : memref<1x128xf32, #tpu.memory_space<vmem>>, vector<1x128xf32>
    %137 = vector.broadcast %136 : vector<1x128xf32> to vector<324x128xf32>
    %138 = arith.addf %135, %137 : vector<324x128xf32>
    %c0_130 = arith.constant 0 : index
    %c0_131 = arith.constant 0 : index
    %c0_132 = arith.constant 0 : index
    %139 = vector.load %arg9[%c0_130, %c0_131, %c0_132] : memref<1x324x128xf32, #tpu.memory_space<vmem>>, vector<1x324x128xf32>
    %140 = vector.shape_cast %139 : vector<1x324x128xf32> to vector<324x128xf32>
    %141 = vector.shape_cast %138 : vector<324x128xf32> to vector<1x324x128xf32>
    tpu.vector_store %arg9[%c0_130, %c0_131, %c0_132], %141 {strides = array<i32>} : memref<1x324x128xf32, #tpu.memory_space<vmem>>, vector<1x324x128xf32>,
    return
  }
  func.func @transform_0(%arg0: i32) -> (i32, i32, i32) {
    %c0_i32 = arith.constant 0 : i32
    %c0_i32_0 = arith.constant 0 : i32
    %c0_i32_1 = arith.constant 0 : i32
    return %arg0, %c0_i32, %c0_i32_0 : i32, i32, i32
  }
  func.func @transform_1(%arg0: i32) -> (i32, i32) {
    %c0_i32 = arith.constant 0 : i32
    %c0_i32_0 = arith.constant 0 : i32
    %c0_i32_1 = arith.constant 0 : i32
    return %c0_i32, %c0_i32_0 : i32, i32
  }
  func.func @transform_2(%arg0: i32) -> (i32, i32, i32) {
    %c0_i32 = arith.constant 0 : i32
    %c0_i32_0 = arith.constant 0 : i32
    %c0_i32_1 = arith.constant 0 : i32
    %c0_i32_2 = arith.constant 0 : i32
    return %c0_i32, %c0_i32_0, %c0_i32_1 : i32, i32, i32
  }
  func.func @transform_3(%arg0: i32) -> (i32, i32) {
    %c0_i32 = arith.constant 0 : i32
    %c0_i32_0 = arith.constant 0 : i32
    %c0_i32_1 = arith.constant 0 : i32
    return %c0_i32, %c0_i32_0 : i32, i32
  }
  func.func @transform_4(%arg0: i32) -> (i32, i32, i32) {
    %c0_i32 = arith.constant 0 : i32
    %c0_i32_0 = arith.constant 0 : i32
    %c0_i32_1 = arith.constant 0 : i32
    %c0_i32_2 = arith.constant 0 : i32
    return %c0_i32, %c0_i32_0, %c0_i32_1 : i32, i32, i32
  }
  func.func @transform_5(%arg0: i32) -> (i32, i32) {
    %c0_i32 = arith.constant 0 : i32
    %c0_i32_0 = arith.constant 0 : i32
    %c0_i32_1 = arith.constant 0 : i32
    return %c0_i32, %c0_i32_0 : i32, i32
  }
  func.func @transform_6(%arg0: i32) -> (i32, i32) {
    %c0_i32 = arith.constant 0 : i32
    %c0_i32_0 = arith.constant 0 : i32
    %c0_i32_1 = arith.constant 0 : i32
    return %c0_i32, %c0_i32_0 : i32, i32
  }
  func.func @transform_7(%arg0: i32) -> (i32, i32) {
    %c0_i32 = arith.constant 0 : i32
    %c0_i32_0 = arith.constant 0 : i32
    %c0_i32_1 = arith.constant 0 : i32
    return %c0_i32, %c0_i32_0 : i32, i32
  }
  func.func @transform_8(%arg0: i32) -> (i32, i32, i32) {
    %c0_i32 = arith.constant 0 : i32
    %c0_i32_0 = arith.constant 0 : i32
    %c0_i32_1 = arith.constant 0 : i32
    return %arg0, %c0_i32, %c0_i32_0 : i32, i32, i32
  }
}

</mosaic_0001>

<bundles_post_ra>
// kernel: forward.1
= control target key start
LH: loop header
LB: loop body
LE: loop exit
PB: predicated region body
PF: predicated region fallthrough
CT: control target
= control target key end

     0   :  { %s6874_s27 = smov 0   ;;  %s11366_s0 = inlined_call_operand.vmem [shape: f32[2,324,128], index: 0, kind: input, shape index: {}]   ;;  %s11367_s1 = inlined_call_operand.vmem [shape: f32[286,1], index: 1, kind: input, shape index: {}]   ;;  %s11368_s2 = inlined_call_operand.vmem [shape: f32[9,128,128], index: 2, kind: input, shape index: {}]   ;;  %s11369_s3 = inlined_call_operand.vmem [shape: f32[1,128], index: 3, kind: input, shape index: {}]   ;;  %s11370_s4 = inlined_call_operand.vmem [shape: f32[9,128,128], index: 4, kind: input, shape index: {}]   ;;  %s11371_s5 = inlined_call_operand.vmem [shape: f32[1,128], index: 5, kind: input, shape index: {}]   ;;  %s11372_s6 = inlined_call_operand.vmem [shape: f32[128,128], index: 6, kind: input, shape index: {}]   ;;  %s11373_s7 = inlined_call_operand.vmem [shape: f32[1,128], index: 7, kind: input, shape index: {}]   ;;  %s11374_s8 = inlined_call_operand.vmem [shape: f32[2,324,128], index: 8, kind: output, shape index: {}]  }
   0x1 LB: > { %s6195_s28 = sadd.s32 4294967295, %s6825_s27   ;;  %p6199_p0 = scmp.ge.s32.totalorder %s6825_s27, 1  ;;  %s6825_s27 = sphi %s6874_s27, %s18_s27  }
   0x2   : > { %p262_p1 = scmp.lt.s32.totalorder %s6825_s27, 3 }
   0x4   : > { %p263_p2 = pnand %p6199_p0, %p262_p1 }
   0x6   : > { %266 = sbr.rel (%p263_p2) target bundleno = 1916 (0x77c), region = 52 }
   0xb   : > { %v6217_v0 = vld [vmem:[%s11368_s2 + $0xf8] sm:$0xff]  ;;  %v6216_v3 = vld [vmem:[%s11368_s2 + $0xf0] sm:$0xff]  ;;  %v6215_v6 = vld [vmem:[%s11368_s2 + $0xe8] sm:$0xff]  ;;  %p7015_p3 = scmp.lt.s32.totalorder %s6195_s28, 1 }
   0xc   : > { %v6888_v1 = vld [vmem:[%s11368_s2 + $0x78] sm:$0xff]  ;;  %453 = vmatpush.msra.mxu0 %v6217_v0  ;;  %6460 = vmatpush.msra.mxu3 %v6217_v0  ;;  %v6901_v4 = vld [vmem:[%s11368_s2 + $0x70] sm:$0xff]  ;;  %v6916_v7 = vld [vmem:[%s11368_s2 + $0x68] sm:$0xff] }
   0xd   : > { %v6893_v2 = vld [vmem:[%s11368_s2 + $0x178] sm:$0xff]  ;;  %v6906_v5 = vld [vmem:[%s11368_s2 + $0x170] sm:$0xff]  ;;  %578 = vmatpush.msra.mxu1 %v6888_v1  ;;  %v6921_v8 = vld [vmem:[%s11368_s2 + $0x168] sm:$0xff]  ;;  %s11855_s28 = smov (!%p7015_p3, %s6195_s28), 1 }
   0xe   : > { %756 = vmatpush.msra.mxu2 %v6893_v2  ;;  %454 = vmatpush.msra.mxu0 %v6216_v3  ;;  %v6214_v9 = vld [vmem:[%s11368_s2 + $0xe0] sm:$0xff]  ;;  %v6213_v12 = vld [vmem:[%s11368_s2 + $0xd8] sm:$0xff]  ;;  %v6212_v15 = vld [vmem:[%s11368_s2 + $0xd0] sm:$0xff]  ;;  %s6508_s26 = smul.u32 328, %s11855_s28 }
   0xf   : > { %6461 = vmatpush.msra.mxu3 %v6216_v3  ;;  %579 = vmatpush.msra.mxu1 %v6901_v4  ;;  %v6931_v10 = vld [vmem:[%s11368_s2 + $0x60] sm:$0xff]  ;;  %v6946_v13 = vld [vmem:[%s11368_s2 + $0x58] sm:$0xff]  ;;  %v6961_v16 = vld [vmem:[%s11368_s2 + $0x50] sm:$0xff] }
  0x10   : > { %757 = vmatpush.msra.mxu2 %v6906_v5  ;;  %455 = vmatpush.msra.mxu0 %v6215_v6  ;;  %v6936_v11 = vld [vmem:[%s11368_s2 + $0x160] sm:$0xff]  ;;  %v6951_v14 = vld [vmem:[%s11368_s2 + $0x158] sm:$0xff]  ;;  %v6966_v17 = vld [vmem:[%s11368_s2 + $0x150] sm:$0xff]  ;;  %s7121_s21 = scalar_lea.vmem %s11366_s0, %s6508_s26  ;;  %s10870_s19 = scalar_lea.vmem %s11374_s8, %s6508_s26 }
  0x11   : > { %6462 = vmatpush.msra.mxu3 %v6215_v6  ;;  %580 = vmatpush.msra.mxu1 %v6916_v7  ;;  %v6211_v18 = vld [vmem:[%s11368_s2 + $0xc8] sm:$0xff]  ;;  %v6210_v21 = vld [vmem:[%s11368_s2 + $0xc0] sm:$0xff]  ;;  %v6209_v24 = vld [vmem:[%s11368_s2 + $0xb8] sm:$0xff] }
  0x12   : > { %758 = vmatpush.msra.mxu2 %v6921_v8  ;;  %456 = vmatpush.msra.mxu0 %v6214_v9  ;;  %v6976_v19 = vld [vmem:[%s11368_s2 + $0x48] sm:$0xff]  ;;  %v6991_v22 = vld [vmem:[%s11368_s2 + $0x40] sm:$0xff]  ;;  %v7006_v25 = vld [vmem:[%s11368_s2 + $0x38] sm:$0xff] }
  0x13   : > { %6463 = vmatpush.msra.mxu3 %v6214_v9  ;;  %581 = vmatpush.msra.mxu1 %v6931_v10  ;;  %v6981_v20 = vld [vmem:[%s11368_s2 + $0x148] sm:$0xff]  ;;  %v6996_v23 = vld [vmem:[%s11368_s2 + $0x140] sm:$0xff]  ;;  %v7011_v26 = vld [vmem:[%s11368_s2 + $0x138] sm:$0xff] }
  0x14   : > { %759 = vmatpush.msra.mxu2 %v6936_v11  ;;  %457 = vmatpush.msra.mxu0 %v6213_v12  ;;  %v6208_v27 = vld [vmem:[%s11368_s2 + $0xb0] sm:$0xff]  ;;  %v6207_v30 = vld [vmem:[%s11368_s2 + $0xa8] sm:$0xff]  ;;  %v6206_v33 = vld [vmem:[%s11368_s2 + $0xa0] sm:$0xff] }
  0x15   : > { %6464 = vmatpush.msra.mxu3 %v6213_v12  ;;  %582 = vmatpush.msra.mxu1 %v6946_v13  ;;  %v7027_v28 = vld [vmem:[%s11368_s2 + $0x30] sm:$0xff]  ;;  %v7042_v31 = vld [vmem:[%s11368_s2 + $0x28] sm:$0xff]  ;;  %v7063_v34 = vld [vmem:[%s11368_s2 + $0x20] sm:$0xff] }
  0x16   : > { %760 = vmatpush.msra.mxu2 %v6951_v14  ;;  %458 = vmatpush.msra.mxu0 %v6212_v15  ;;  %v7032_v29 = vld [vmem:[%s11368_s2 + $0x130] sm:$0xff]  ;;  %v7047_v32 = vld [vmem:[%s11368_s2 + $0x128] sm:$0xff]  ;;  %v7068_v35 = vld [vmem:[%s11368_s2 + $0x120] sm:$0xff] }
  0x17   : > { %6465 = vmatpush.msra.mxu3 %v6212_v15  ;;  %583 = vmatpush.msra.mxu1 %v6961_v16  ;;  %v6205_v36 = vld [vmem:[%s11368_s2 + $0x98] sm:$0xff]  ;;  %v6204_v39 = vld [vmem:[%s11368_s2 + $0x90] sm:$0xff]  ;;  %v6203_v42 = vld [vmem:[%s11368_s2 + $0x88] sm:$0xff] }
  0x18   : > { %761 = vmatpush.msra.mxu2 %v6966_v17  ;;  %459 = vmatpush.msra.mxu0 %v6211_v18  ;;  %v7078_v37 = vld [vmem:[%s11368_s2 + $0x18] sm:$0xff]  ;;  %v7094_v40 = vld [vmem:[%s11368_s2 + $0x10] sm:$0xff]  ;;  %v7109_v43 = vld [vmem:[%s11368_s2 + $0x8] sm:$0xff] }
  0x19   : > { %6466 = vmatpush.msra.mxu3 %v6211_v18  ;;  %584 = vmatpush.msra.mxu1 %v6976_v19  ;;  %v7083_v38 = vld [vmem:[%s11368_s2 + $0x118] sm:$0xff]  ;;  %v7099_v41 = vld [vmem:[%s11368_s2 + $0x110] sm:$0xff]  ;;  %v7114_v44 = vld [vmem:[%s11368_s2 + $0x108] sm:$0xff] }
  0x1a   : > { %762 = vmatpush.msra.mxu2 %v6981_v20  ;;  %460 = vmatpush.msra.mxu0 %v6210_v21  ;;  %v6202_v45 = vld [vmem:[%s11368_s2 + $0x80] sm:$0xff]  ;;  %v429_v49 = vld [vmem:[%s7121_s21 + $0xe9] sm:$0xff]  ;;  %v6265_v52 = vld [vmem:[%s11368_s2 + $0x278] sm:$0xff] }
  0x1b   : > { %6467 = vmatpush.msra.mxu3 %v6210_v21  ;;  %585 = vmatpush.msra.mxu1 %v6991_v22  ;;  %v7131_v46 = vld [vmem:[%s11368_s2] sm:$0xff]  ;;  %v6264_v53 = vld [vmem:[%s11368_s2 + $0x270] sm:$0xff]  ;;  %v6263_v54 = vld [vmem:[%s11368_s2 + $0x268] sm:$0xff] }
  0x1c   : > { %763 = vmatpush.msra.mxu2 %v6996_v23  ;;  %461 = vmatpush.msra.mxu0 %v6209_v24  ;;  %v7136_v47 = vld [vmem:[%s11368_s2 + $0x100] sm:$0xff]  ;;  %v401_v55 = vld [vmem:[%s7121_s21 + $0x9] sm:$0xff]  ;;  %v430_v56 = vld [vmem:[%s7121_s21 + $0xf1] sm:$0xff] }
  0x1d   : > { %6468 = vmatpush.msra.mxu3 %v6209_v24  ;;  %586 = vmatpush.msra.mxu1 %v7006_v25  ;;  %v400_v48 = vld [vmem:[%s7121_s21 + $0x1] sm:$0xff]  ;;  %v704_v58 = vld [vmem:[%s7121_s21 + $0xa] sm:$0xff]  ;;  %v431_v61 = vld [vmem:[%s7121_s21 + $0xf9] sm:$0xff] }
  0x1e   : > { %764 = vmatpush.msra.mxu2 %v7011_v26  ;;  %462 = vmatpush.msra.mxu0 %v6208_v27  ;;  %v348_v50 = vld [vmem:[%s7121_s21] sm:$0xff]  ;;  %v349_v57 = vld [vmem:[%s7121_s21 + $0x8] sm:$0xff]  ;;  %v402_v60 = vld [vmem:[%s7121_s21 + $0x11] sm:$0xff] }
  0x1f   : > { %6469 = vmatpush.msra.mxu3 %v6208_v27  ;;  %587 = vmatpush.msra.mxu1 %v7027_v28  ;;  %v703_v51 = vld [vmem:[%s7121_s21 + $0x2] sm:$0xff]  ;;  %v350_v62 = vld [vmem:[%s7121_s21 + $0x10] sm:$0xff]  ;;  %v403_v0 = vld [vmem:[%s7121_s21 + $0x19] sm:$0xff] }
  0x20   : > { %765 = vmatpush.msra.mxu2 %v7032_v29  ;;  %463 = vmatpush.msra.mxu0 %v6207_v30  ;;  %v6262_v59 = vld [vmem:[%s11368_s2 + $0x260] sm:$0xff]  ;;  %v7171_v63 = vld [vmem:[%s7121_s21 + $0x12] sm:$0xff]  ;;  %v433_v9 = vld [vmem:[%s7121_s21 + $0x109] sm:$0xff] }
  0x21   : > { %6470 = vmatpush.msra.mxu3 %v6207_v30  ;;  %588 = vmatpush.msra.mxu1 %v7042_v31  ;;  %v351_v3 = vld [vmem:[%s7121_s21 + $0x18] sm:$0xff]  ;;  %v7194_v12 = vld [vmem:[%s7121_s21 + $0x22] sm:$0xff]  ;;  %v7204_v18 = vld [vmem:[%s7121_s21 + $0x2a] sm:$0xff] }
  0x22   : > { %766 = vmatpush.msra.mxu2 %v7047_v32  ;;  %464 = vmatpush.msra.mxu0 %v6206_v33  ;;  %v6261_v6 = vld [vmem:[%s11368_s2 + $0x258] sm:$0xff]  ;;  %v354_v24 = vld [vmem:[%s7121_s21 + $0x30] sm:$0xff]  ;;  %v356_v30 = vld [vmem:[%s7121_s21 + $0x40] sm:$0xff] }
  0x23   : > { %6471 = vmatpush.msra.mxu3 %v6206_v33  ;;  %589 = vmatpush.msra.mxu1 %v7063_v34  ;;  %v434_v15 = vld [vmem:[%s7121_s21 + $0x111] sm:$0xff] }
  0x24   : > { %767 = vmatpush.msra.mxu2 %v7068_v35  ;;  %465 = vmatpush.msra.mxu0 %v6205_v36  ;;  %v406_v21 = vld [vmem:[%s7121_s21 + $0x31] sm:$0xff] }
  0x25   : > { %6472 = vmatpush.msra.mxu3 %v6205_v36  ;;  %590 = vmatpush.msra.mxu1 %v7078_v37  ;;  %v355_v27 = vld [vmem:[%s7121_s21 + $0x38] sm:$0xff]  ;;  %v7254_v33 = vld [vmem:[%s7121_s21 + $0x4a] sm:$0xff] }
  0x26   : > { %768 = vmatpush.msra.mxu2 %v7083_v38  ;;  %466 = vmatpush.msra.mxu0 %v6204_v39  ;;  %v7264_v36 = vld [vmem:[%s7121_s21 + $0x52] sm:$0xff] }
  0x27   : > { %6473 = vmatpush.msra.mxu3 %v6204_v39  ;;  %591 = vmatpush.msra.mxu1 %v7094_v40  ;;  %v359_v39 = vld [vmem:[%s7121_s21 + $0x58] sm:$0xff] }
  0x28   : > { %769 = vmatpush.msra.mxu2 %v7099_v41  ;;  %467 = vmatpush.msra.mxu0 %v6203_v42 }
  0x29   : > { %6474 = vmatpush.msra.mxu3 %v6203_v42  ;;  %592 = vmatpush.msra.mxu1 %v7109_v43  ;;  %v382_v42 = vld [vmem:[%s7121_s21 + $0x110] sm:$0xff] }
  0x2a   : > { %770 = vmatpush.msra.mxu2 %v7114_v44  ;;  %468 = vmatpush.msra.mxu0 %v6202_v45 }
  0x2b   : > { %6475 = vmatpush.msra.mxu3 %v6202_v45  ;;  %593 = vmatpush.msra.mxu1 %v7131_v46  ;;  %v6249_v45 = vld [vmem:[%s11368_s2 + $0x1f8] sm:$0xff] }
  0x2c   : > { %771 = vmatpush.msra.mxu2 %v7136_v47  ;;  %469 = vmatmul.f32.vlgmr.msra.gmra.mxu0 %v400_v48  ;;  %v6256_v48 = vld [vmem:[%s11368_s2 + $0x230] sm:$0xff] }
  0x2d   : > { %556 = vmatmul.f32.vlgmr.msra.gmra.mxu3 %v429_v49  ;;  %594 = vmatmul.f32.vlgmr.msra.gmra.mxu1 %v348_v50  ;;  %v361_v49 = vld [vmem:[%s7121_s21 + $0x68] sm:$0xff] }
  0x2e   : > { %772 = vmatmul.f32.vlgmr.msra.gmra.mxu2 %v703_v51  ;;  %1184 = vmatpush.msrb.mxu0 %v6265_v52  ;;  %v7296_v50 = vld [vmem:[%s7121_s21 + $0x6a] sm:$0xff] }
  0x2f   : > { %6476 = vmatpush.msrb.mxu3 %v6888_v1  ;;  %v432_v1 = vld [vmem:[%s7121_s21 + $0x101] sm:$0xff]  ;;  %v6248_v51 = vld [vmem:[%s11368_s2 + $0x1f0] sm:$0xff] }
  0x30   : > { %1185 = vmatpush.msrb.mxu0 %v6264_v53  ;;  %v414_v52 = vld [vmem:[%s7121_s21 + $0x71] sm:$0xff]  ;;  %v727_v53 = vld [vmem:[%s7121_s21 + $0xc2] sm:$0xff] }
  0x31   : > { %6477 = vmatpush.msrb.mxu3 %v6901_v4  ;;  %v7181_v4 = vld [vmem:[%s7121_s21 + $0x1a] sm:$0xff] }
  0x32   : > { %1186 = vmatpush.msrb.mxu0 %v6263_v54  ;;  %v6247_v54 = vld [vmem:[%s11368_s2 + $0x1e8] sm:$0xff] }
  0x33   : > { %6478 = vmatpush.msrb.mxu3 %v6916_v7  ;;  %v404_v7 = vld [vmem:[%s7121_s21 + $0x21] sm:$0xff] }
  0x34   : > { %472 = vmatmul.f32.gmra.mxu0 %v401_v55  ;;  %v362_v55 = vld [vmem:[%s7121_s21 + $0x70] sm:$0xff] }
  0x35   : > { %559 = vmatmul.f32.gmra.mxu3 %v430_v56  ;;  %597 = vmatmul.f32.gmra.mxu1 %v349_v57  ;;  %v7309_v56 = vld [vmem:[%s7121_s21 + $0x72] sm:$0xff]  ;;  %v6255_v57 = vld [vmem:[%s11368_s2 + $0x228] sm:$0xff] }
  0x36   : > { %775 = vmatmul.f32.gmra.mxu2 %v704_v58  ;;  %6479 = vmatpush.msrb.mxu3 %v6931_v10  ;;  %v352_v10 = vld [vmem:[%s7121_s21 + $0x20] sm:$0xff] }
  0x37   : > { %1187 = vmatpush.msrb.mxu0 %v6262_v59  ;;  %v6246_v58 = vld [vmem:[%s11368_s2 + $0x1e0] sm:$0xff] }
  0x38   : > { %6480 = vmatpush.msrb.mxu3 %v6946_v13  ;;  %v405_v13 = vld [vmem:[%s7121_s21 + $0x29] sm:$0xff]  ;;  %v415_v59 = vld [vmem:[%s7121_s21 + $0x79] sm:$0xff] }
  0x39   : > { %1188 = vmatpush.msrb.mxu0 %v6261_v6  ;;  %v729_v6 = vld [vmem:[%s7121_s21 + $0xd2] sm:$0xff] }
  0x3a   : > { %6481 = vmatpush.msrb.mxu3 %v6961_v16  ;;  %v353_v16 = vld [vmem:[%s7121_s21 + $0x28] sm:$0xff] }
  0x3c   : > { %475 = vmatmul.f32.gmra.mxu0 %v402_v60  ;;  %6482 = vmatpush.msrb.mxu3 %v6976_v19  ;;  %v6260_v19 = vld [vmem:[%s11368_s2 + $0x250] sm:$0xff] }
  0x3d   : > { %562 = vmatmul.f32.gmra.mxu3 %v431_v61  ;;  %600 = vmatmul.f32.gmra.mxu1 %v350_v62  ;;  %v728_v60 = vld [vmem:[%s7121_s21 + $0xca] sm:$0xff]  ;;  %v363_v61 = vld [vmem:[%s7121_s21 + $0x78] sm:$0xff] }
  0x3e   : > { %778 = vmatmul.f32.gmra.mxu2 %v7171_v63  ;;  %6483 = vmatpush.msrb.mxu3 %v6991_v22  ;;  %v435_v22 = vld [vmem:[%s7121_s21 + $0x119] sm:$0x3f] }
  0x3f   : > { %1189 = vmatpush.msrb.mxu0 %v6260_v19  ;;  %v7322_v62 = vld [vmem:[%s7121_s21 + $0x7a] sm:$0xff] }
  0x40   : > { %6484 = vmatpush.msrb.mxu3 %v7006_v25  ;;  %v7218_v25 = vld [vmem:[%s7121_s21 + $0x32] sm:$0xff] }
  0x42   : > { %6485 = vmatpush.msrb.mxu3 %v7027_v28  ;;  %v7231_v28 = vld [vmem:[%s7121_s21 + $0x3a] sm:$0xff] }
  0x44   : > { %478 = vmatmul.f32.gmra.mxu0 %v403_v0  ;;  %6486 = vmatpush.msrb.mxu3 %v7042_v31  ;;  %v7241_v31 = vld [vmem:[%s7121_s21 + $0x42] sm:$0xff]  ;;  %v6245_v0 = vld [vmem:[%s11368_s2 + $0x1d8] sm:$0xff] }
  0x45   : > { %565 = vmatmul.f32.gmra.mxu3 %v432_v1  ;;  %603 = vmatmul.f32.gmra.mxu1 %v351_v3  ;;  %v416_v3 = vld [vmem:[%s7121_s21 + $0x81] sm:$0xff] }
  0x46   : > { %781 = vmatmul.f32.gmra.mxu2 %v7181_v4  ;;  %6487 = vmatpush.msrb.mxu3 %v7063_v34  ;;  %v358_v34 = vld [vmem:[%s7121_s21 + $0x50] sm:$0xff] }
  0x48   : > { %6488 = vmatpush.msrb.mxu3 %v7078_v37  ;;  %v411_v37 = vld [vmem:[%s7121_s21 + $0x59] sm:$0xff] }
  0x4a   : > { %6489 = vmatpush.msrb.mxu3 %v7094_v40  ;;  %v7276_v40 = vld [vmem:[%s7121_s21 + $0x5a] sm:$0xff] }
  0x4c   : > { %481 = vmatmul.f32.gmra.mxu0 %v404_v7  ;;  %6490 = vmatpush.msrb.mxu3 %v7109_v43  ;;  %v360_v43 = vld [vmem:[%s7121_s21 + $0x60] sm:$0xff]  ;;  %v6281_v7 = vld [vmem:[%s11368_s2 + $0x2f8] sm:$0xff] }
  0x4d   : > { %568 = vmatmul.f32.gmra.mxu3 %v433_v9  ;;  %606 = vmatmul.f32.gmra.mxu1 %v352_v10  ;;  %v364_v10 = vld [vmem:[%s7121_s21 + $0x80] sm:$0xff] }
  0x4e   : > { %784 = vmatmul.f32.gmra.mxu2 %v7194_v12  ;;  %6491 = vmatpush.msrb.mxu3 %v7131_v46  ;;  %v413_v46 = vld [vmem:[%s7121_s21 + $0x69] sm:$0xff] }
  0x4f   : > { %1398 = vmatpush.msrb.mxu1 %v6281_v7 }
  0x50   : > { %6492 = vmatpush.msra.mxu3 %v6893_v2  ;;  %v6259_v2 = vld [vmem:[%s11368_s2 + $0x248] sm:$0xff] }
  0x51   : > { %1190 = vmatpush.msrb.mxu0 %v6259_v2  ;;  %v730_v2 = vld [vmem:[%s7121_s21 + $0xda] sm:$0xff] }
  0x52   : > { %6493 = vmatpush.msra.mxu3 %v6906_v5  ;;  %v407_v5 = vld [vmem:[%s7121_s21 + $0x39] sm:$0xff] }
  0x54   : > { %484 = vmatmul.f32.gmra.mxu0 %v405_v13  ;;  %6494 = vmatpush.msra.mxu3 %v6921_v8  ;;  %v377_v8 = vld [vmem:[%s7121_s21 + $0xe8] sm:$0xff] }
  0x55   : > { %571 = vmatmul.f32.gmra.mxu3 %v434_v15  ;;  %609 = vmatmul.f32.gmra.mxu1 %v353_v16  ;;  %v7339_v13 = vld [vmem:[%s7121_s21 + $0x82] sm:$0xff]  ;;  %v6244_v15 = vld [vmem:[%s11368_s2 + $0x1d0] sm:$0xff] }
  0x56   : > { %787 = vmatmul.f32.gmra.mxu2 %v7204_v18  ;;  %6495 = vmatpush.msra.mxu3 %v6936_v11  ;;  %v408_v11 = vld [vmem:[%s7121_s21 + $0x41] sm:$0xff] }
  0x57   : > { %v6254_v16 = vld [vmem:[%s11368_s2 + $0x220] sm:$0xff] }
  0x58   : > { %6496 = vmatpush.msra.mxu3 %v6951_v14  ;;  %v378_v14 = vld [vmem:[%s7121_s21 + $0xf0] sm:$0xff] }
  0x5a   : > { %6497 = vmatpush.msra.mxu3 %v6966_v17  ;;  %v6258_v17 = vld [vmem:[%s11368_s2 + $0x240] sm:$0xff] }
  0x5b   : > { %1191 = vmatpush.msrb.mxu0 %v6258_v17 }
  0x5c   : > { %487 = vmatmul.f32.gmra.mxu0 %v406_v21  ;;  %6498 = vmatpush.msra.mxu3 %v6981_v20  ;;  %v409_v20 = vld [vmem:[%s7121_s21 + $0x49] sm:$0xff] }
  0x5d   : > { %574 = vmatmul.f32.gmra.mxu3 %v435_v22  ;;  %612 = vmatmul.f32.gmra.mxu1 %v354_v24  ;;  %v417_v24 = vld [vmem:[%s7121_s21 + $0x89] sm:$0xff] }
  0x5e   : > { %790 = vmatmul.f32.gmra.mxu2 %v7218_v25  ;;  %6499 = vmatpush.msra.mxu3 %v6996_v23  ;;  %v379_v23 = vld [vmem:[%s7121_s21 + $0xf8] sm:$0xff] }
  0x60   : > { %6500 = vmatpush.msra.mxu3 %v7011_v26  ;;  %v357_v26 = vld [vmem:[%s7121_s21 + $0x48] sm:$0xff] }
  0x62   : > { %6501 = vmatpush.msra.mxu3 %v7032_v29  ;;  %v410_v29 = vld [vmem:[%s7121_s21 + $0x51] sm:$0xff] }
  0x64   : > { %490 = vmatmul.f32.gmra.mxu0 %v407_v5  ;;  %6502 = vmatpush.msra.mxu3 %v7047_v32  ;;  %v380_v32 = vld [vmem:[%s7121_s21 + $0x100] sm:$0xff]  ;;  %v6243_v5 = vld [vmem:[%s11368_s2 + $0x1c8] sm:$0xff] }
  0x65   : > { %681 = vmatmul.f32.vlgmr.msrb.gmra.mxu3 %v377_v8  ;;  %615 = vmatmul.f32.gmra.mxu1 %v355_v27  ;;  %v365_v27 = vld [vmem:[%s7121_s21 + $0x88] sm:$0xff] }
  0x66   : > { %793 = vmatmul.f32.gmra.mxu2 %v7231_v28  ;;  %6503 = vmatpush.msra.mxu3 %v7068_v35  ;;  %v6257_v35 = vld [vmem:[%s11368_s2 + $0x238] sm:$0xff] }
  0x67   : > { %1192 = vmatpush.msrb.mxu0 %v6257_v35  ;;  %v7384_v35 = vld [vmem:[%s7121_s21 + $0x92] sm:$0xff] }
  0x68   : > { %6504 = vmatpush.msra.mxu3 %v7083_v38  ;;  %v381_v38 = vld [vmem:[%s7121_s21 + $0x108] sm:$0xff] }
  0x69   : > { %1193 = vmatpush.msrb.mxu0 %v6256_v48  ;;  %v7405_v48 = vld [vmem:[%s7121_s21 + $0x9a] sm:$0xff] }
  0x6a   : > { %6505 = vmatpush.msra.mxu3 %v7099_v41  ;;  %v412_v41 = vld [vmem:[%s7121_s21 + $0x61] sm:$0xff] }
  0x6b   : > { %1194 = vmatpush.msrb.mxu0 %v6255_v57  ;;  %v733_v57 = vld [vmem:[%s7121_s21 + $0xf2] sm:$0xff] }
  0x6c   : > { %493 = vmatmul.f32.gmra.mxu0 %v408_v11  ;;  %6506 = vmatpush.msra.mxu3 %v7114_v44  ;;  %v7283_v44 = vld [vmem:[%s7121_s21 + $0x62] sm:$0xff]  ;;  %v7363_v11 = vld [vmem:[%s7121_s21 + $0x8a] sm:$0xff] }
  0x6d   : > { %684 = vmatmul.f32.gmra.mxu3 %v378_v14  ;;  %618 = vmatmul.f32.gmra.mxu1 %v356_v30  ;;  %v6242_v14 = vld [vmem:[%s11368_s2 + $0x1c0] sm:$0xff] }
  0x6e   : > { %796 = vmatmul.f32.gmra.mxu2 %v7241_v31  ;;  %6507 = vmatpush.msra.mxu3 %v7136_v47  ;;  %v383_v47 = vld [vmem:[%s7121_s21 + $0x118] sm:$0x3f] }
  0x6f   : > { %1195 = vmatpush.msrb.mxu0 %v6254_v16  ;;  %v734_v16 = vld [vmem:[%s7121_s21 + $0xfa] sm:$0xff] }
  0x70   : > { %970 = vmatpush.msrb.mxu3 %v6249_v45  ;;  %v732_v45 = vld [vmem:[%s7121_s21 + $0xea] sm:$0xff] }
  0x72   : > { %971 = vmatpush.msrb.mxu3 %v6248_v51  ;;  %v6279_v51 = vld [vmem:[%s11368_s2 + $0x2e8] sm:$0xff] }
  0x74   : > { %496 = vmatmul.f32.gmra.mxu0 %v409_v20  ;;  %972 = vmatpush.msrb.mxu3 %v6247_v54 }
  0x75   : > { %687 = vmatmul.f32.gmra.mxu3 %v379_v23  ;;  %621 = vmatmul.f32.gmra.mxu1 %v357_v26  ;;  %v418_v23 = vld [vmem:[%s7121_s21 + $0x91] sm:$0xff]  ;;  %v731_v26 = vld [vmem:[%s7121_s21 + $0xe2] sm:$0xff] }
  0x76   : > { %799 = vmatmul.f32.gmra.mxu2 %v7254_v33  ;;  %973 = vmatpush.msrb.mxu3 %v6246_v58  ;;  %v6239_v58 = vld [vmem:[%s11368_s2 + $0x1a8] sm:$0xff] }
  0x78   : > { %974 = vmatpush.msrb.mxu3 %v6245_v0  ;;  %v6252_v0 = vld [vmem:[%s11368_s2 + $0x210] sm:$0xff] }
  0x7a   : > { %975 = vmatpush.msrb.mxu3 %v6244_v15  ;;  %v421_v15 = vld [vmem:[%s7121_s21 + $0xa9] sm:$0xff] }
  0x7c   : > { %499 = vmatmul.f32.gmra.mxu0 %v410_v29  ;;  %976 = vmatpush.msrb.mxu3 %v6243_v5  ;;  %v6280_v29 = vld [vmem:[%s11368_s2 + $0x2f0] sm:$0xff] }
  0x7d   : > { %690 = vmatmul.f32.gmra.mxu3 %v380_v32  ;;  %624 = vmatmul.f32.gmra.mxu1 %v358_v34  ;;  %v366_v34 = vld [vmem:[%s7121_s21 + $0x90] sm:$0xff] }
  0x7e   : > { %802 = vmatmul.f32.gmra.mxu2 %v7264_v36  ;;  %977 = vmatpush.msrb.mxu3 %v6242_v14  ;;  %v7450_v5 = vld [vmem:[%s7121_s21 + $0xaa] sm:$0xff]  ;;  %v6237_v14 = vld [vmem:[%s11368_s2 + $0x198] sm:$0xff] }
  0x7f   : > { %1399 = vmatpush.msrb.mxu1 %v6280_v29 }
  0x81   : > { %1400 = vmatpush.msrb.mxu1 %v6279_v51  ;;  %v6235_v51 = vld [vmem:[%s11368_s2 + $0x188] sm:$0xff] }
  0x84   : > { %502 = vmatmul.f32.gmra.mxu0 %v411_v37  ;;  %v6253_v37 = vld [vmem:[%s11368_s2 + $0x218] sm:$0xff] }
  0x85   : > { %693 = vmatmul.f32.gmra.mxu3 %v381_v38  ;;  %627 = vmatmul.f32.gmra.mxu1 %v359_v39  ;;  %v6241_v38 = vld [vmem:[%s11368_s2 + $0x1b8] sm:$0xff] }
  0x86   : > { %805 = vmatmul.f32.gmra.mxu2 %v7276_v40  ;;  %1196 = vmatpush.msrb.mxu0 %v6253_v37  ;;  %v6295_v37 = vld [vmem:[%s11368_s2 + $0x368] sm:$0xff] }
  0x87   : > { %978 = vmatpush.msrb.mxu3 %v6241_v38 }
  0x88   : > { %1197 = vmatpush.msrb.mxu0 %v6252_v0  ;;  %v6234_v0 = vld [vmem:[%s11368_s2 + $0x180] sm:$0xff] }
  0x8c   : > { %505 = vmatmul.f32.gmra.mxu0 %v412_v41 }
  0x8d   : > { %696 = vmatmul.f32.gmra.mxu3 %v382_v42  ;;  %630 = vmatmul.f32.gmra.mxu1 %v360_v43  ;;  %v419_v43 = vld [vmem:[%s7121_s21 + $0x99] sm:$0xff] }
  0x8e   : > { %808 = vmatmul.f32.gmra.mxu2 %v7283_v44 }
  0x94   : > { %508 = vmatmul.f32.gmra.mxu0 %v413_v46 }
  0x95   : > { %699 = vmatmul.f32.gmra.mxu3 %v383_v47  ;;  %633 = vmatmul.f32.gmra.mxu1 %v361_v49  ;;  %v367_v47 = vld [vmem:[%s7121_s21 + $0x98] sm:$0xff]  ;;  %v6240_v49 = vld [vmem:[%s11368_s2 + $0x1b0] sm:$0xff] }
  0x96   : > { %811 = vmatmul.f32.gmra.mxu2 %v7296_v50  ;;  %979 = vmatpush.msrb.mxu3 %v6240_v49  ;;  %v6251_v49 = vld [vmem:[%s11368_s2 + $0x208] sm:$0xff] }
  0x97   : > { %1198 = vmatpush.msrb.mxu0 %v6251_v49  ;;  %v6291_v49 = vld [vmem:[%s11368_s2 + $0x348] sm:$0xff] }
  0x98   : > { %980 = vmatpush.msrb.mxu3 %v6239_v58  ;;  %v7489_v58 = vld [vmem:[%s7121_s21 + $0xb2] sm:$0xff] }
  0x9c   : > { %511 = vmatmul.f32.gmra.mxu0 %v414_v52 }
  0x9d   : > { %844 = vmatmul.f32.vlgmr.msra.gmra.mxu3 %v727_v53  ;;  %636 = vmatmul.f32.gmra.mxu1 %v362_v55  ;;  %v420_v55 = vld [vmem:[%s7121_s21 + $0xa1] sm:$0xff] }
  0x9e   : > { %814 = vmatmul.f32.gmra.mxu2 %v7309_v56 }
  0xa4   : > { %514 = vmatmul.f32.gmra.mxu0 %v415_v59 }
  0xa5   : > { %847 = vmatmul.f32.gmra.mxu3 %v728_v60  ;;  %639 = vmatmul.f32.gmra.mxu1 %v363_v61  ;;  %v368_v60 = vld [vmem:[%s7121_s21 + $0xa0] sm:$0xff] }
  0xa6   : > { %817 = vmatmul.f32.gmra.mxu2 %v7322_v62  ;;  %v7429_v61 = vld [vmem:[%s7121_s21 + $0xa2] sm:$0xff] }
  0xa9   : > { %v7328_v1 = vpop.f32.mrf.mxu0 }
  0xaa   : > { %v7335_v9 = vpop.f32.mrf.mxu1 }
  0xac   : > { %517 = vmatmul.f32.gmra.mxu0 %v416_v3  ;;  %v6238_v3 = vld [vmem:[%s11368_s2 + $0x1a0] sm:$0xff] }
  0xad   : > { %850 = vmatmul.f32.gmra.mxu3 %v729_v6  ;;  %642 = vmatmul.f32.gmra.mxu1 %v364_v10 }
  0xae   : > { %820 = vmatmul.f32.gmra.mxu2 %v7339_v13  ;;  %981 = vmatpush.msrb.mxu3 %v6238_v3  ;;  %v6293_v3 = vld [vmem:[%s11368_s2 + $0x358] sm:$0xff] }
  0xb0   : > { %v7348_v19 = vpop.f32.mrf.mxu3  ;;  %982 = vmatpush.msrb.mxu3 %v6237_v14 }
  0xb1   : > { %v7350_v21 = vpop.f32.mrf.mxu2  ;;  %v7352_v22 = vpop.f32.mrf.mxu0 }
  0xb2   : > { %v7359_v8 = vpop.f32.mrf.mxu1 }
  0xb4   : > { %520 = vmatmul.f32.gmra.mxu0 %v417_v24 }
  0xb5   : > { %853 = vmatmul.f32.gmra.mxu3 %v730_v2  ;;  %645 = vmatmul.f32.gmra.mxu1 %v365_v27  ;;  %v369_v2 = vld [vmem:[%s7121_s21 + $0xa8] sm:$0xff]  ;;  %v6297_v27 = vld [vmem:[%s11368_s2 + $0x378] sm:$0xff] }
  0xb6   : > { %823 = vmatmul.f32.gmra.mxu2 %v7363_v11 }
  0xb7   : > { %1612 = vmatpush.msrb.mxu2 %v6297_v27 }
  0xb8   : > { %v7369_v30 = vpop.f32.mrf.mxu3 }
  0xb9   : > { %v7371_v17 = vpop.f32.mrf.mxu2  ;;  %v7373_v20 = vpop.f32.mrf.mxu0 }
  0xba   : > { %v7380_v32 = vpop.f32.mrf.mxu1 }
  0xbc   : > { %523 = vmatmul.f32.gmra.mxu0 %v418_v23  ;;  %v6278_v23 = vld [vmem:[%s11368_s2 + $0x2e0] sm:$0xff] }
  0xbd   : > { %856 = vmatmul.f32.gmra.mxu3 %v731_v26  ;;  %648 = vmatmul.f32.gmra.mxu1 %v366_v34  ;;  %v6296_v26 = vld [vmem:[%s11368_s2 + $0x370] sm:$0xff] }
  0xbe   : > { %826 = vmatmul.f32.gmra.mxu2 %v7384_v35  ;;  %1401 = vmatpush.msrb.mxu1 %v6278_v23  ;;  %v6236_v34 = vld [vmem:[%s11368_s2 + $0x190] sm:$0xff]  ;;  %v423_v23 = vld [vmem:[%s7121_s21 + $0xb9] sm:$0xff] }
  0xbf   : > { %1613 = vmatpush.msrb.mxu2 %v6296_v26  ;;  %983 = vmatpush.msrb.mxu3 %v6236_v34  ;;  %v736_v26 = vld [vmem:[%s7121_s21 + $0x10a] sm:$0xff] }
  0xc0   : > { %v7393_v39 = vpop.f32.mrf.mxu3  ;;  %v6276_v34 = vld [vmem:[%s11368_s2 + $0x2d0] sm:$0xff] }
  0xc1   : > { %v7395_v41 = vpop.f32.mrf.mxu2  ;;  %v7397_v42 = vpop.f32.mrf.mxu0  ;;  %1614 = vmatpush.msrb.mxu2 %v6295_v37  ;;  %984 = vmatpush.msrb.mxu3 %v6235_v51  ;;  %v6275_v51 = vld [vmem:[%s11368_s2 + $0x2c8] sm:$0xff] }
  0xc2   : > { %v7401_v46 = vpop.f32.mrf.mxu1 }
  0xc3   : > { %985 = vmatpush.msrb.mxu3 %v6234_v0  ;;  %v6250_v0 = vld [vmem:[%s11368_s2 + $0x200] sm:$0xff] }
  0xc4   : > { %526 = vmatmul.f32.gmra.mxu0 %v419_v43  ;;  %v422_v43 = vld [vmem:[%s7121_s21 + $0xb1] sm:$0xff] }
  0xc5   : > { %859 = vmatmul.f32.gmra.mxu3 %v732_v45  ;;  %651 = vmatmul.f32.gmra.mxu1 %v367_v47  ;;  %v735_v47 = vld [vmem:[%s7121_s21 + $0x102] sm:$0xff] }
  0xc6   : > { %829 = vmatmul.f32.gmra.mxu2 %v7405_v48  ;;  %1199 = vmatpush.msrb.mxu0 %v6250_v0  ;;  %v6288_v0 = vld [vmem:[%s11368_s2 + $0x330] sm:$0xff] }
  0xc8   : > { %v7414_v52 = vpop.f32.mrf.mxu3 }
  0xc9   : > { %v7416_v53 = vpop.f32.mrf.mxu2  ;;  %v7418_v54 = vpop.f32.mrf.mxu0 }
  0xca   : > { %v7425_v59 = vpop.f32.mrf.mxu1 }
  0xcc   : > { %529 = vmatmul.f32.gmra.mxu0 %v420_v55 }
  0xcd   : > { %862 = vmatmul.f32.gmra.mxu3 %v733_v57  ;;  %654 = vmatmul.f32.gmra.mxu1 %v368_v60  ;;  %v370_v57 = vld [vmem:[%s7121_s21 + $0xb0] sm:$0xff]  ;;  %v6294_v60 = vld [vmem:[%s11368_s2 + $0x360] sm:$0xff] }
  0xce   : > { %832 = vmatmul.f32.gmra.mxu2 %v7429_v61 }
  0xcf   : > { %1615 = vmatpush.msrb.mxu2 %v6294_v60  ;;  %v6274_v60 = vld [vmem:[%s11368_s2 + $0x2c0] sm:$0xff] }
  0xd0   : > { %v7438_v6 = vpop.f32.mrf.mxu3 }
  0xd1   : > { %v7440_v7 = vpop.f32.mrf.mxu2  ;;  %v7442_v10 = vpop.f32.mrf.mxu0  ;;  %1616 = vmatpush.msrb.mxu2 %v6293_v3 }
  0xd2   : > { %v7446_v24 = vpop.f32.mrf.mxu1 }
  0xd4   : > { %532 = vmatmul.f32.gmra.mxu0 %v421_v15 }
  0xd5   : > { %865 = vmatmul.f32.gmra.mxu3 %v734_v16  ;;  %657 = vmatmul.f32.gmra.mxu1 %v369_v2  ;;  %v6292_v16 = vld [vmem:[%s11368_s2 + $0x350] sm:$0xff]  ;;  %v6277_v2 = vld [vmem:[%s11368_s2 + $0x2d8] sm:$0xff] }
  0xd6   : > { %835 = vmatmul.f32.gmra.mxu2 %v7450_v5  ;;  %1402 = vmatpush.msrb.mxu1 %v6277_v2  ;;  %v6273_v2 = vld [vmem:[%s11368_s2 + $0x2b8] sm:$0xff] }
  0xd7   : > { %1617 = vmatpush.msrb.mxu2 %v6292_v16  ;;  %v6289_v16 = vld [vmem:[%s11368_s2 + $0x338] sm:$0xff] }
  0xd8   : > { %v7465_v29 = vpop.f32.mrf.mxu3  ;;  %1403 = vmatpush.msrb.mxu1 %v6276_v34 }
  0xd9   : > { %v7473_v38 = vpop.f32.mrf.mxu2  ;;  %v7476_v45 = vpop.f32.mrf.mxu0  ;;  %1618 = vmatpush.msrb.mxu2 %v6291_v49  ;;  %v737_v49 = vld [vmem:[%s7121_s21 + $0x112] sm:$0xff] }
  0xda   : > { %v7485_v55 = vpop.f32.mrf.mxu1  ;;  %1404 = vmatpush.msrb.mxu1 %v6275_v51 }
  0xdc   : > { %535 = vmatmul.f32.gmra.mxu0 %v422_v43  ;;  %v371_v43 = vld [vmem:[%s7121_s21 + $0xb8] sm:$0xff]  ;;  %1405 = vmatpush.msrb.mxu1 %v6274_v60  ;;  %v6271_v60 = vld [vmem:[%s11368_s2 + $0x2a8] sm:$0xff] }
  0xdd   : > { %868 = vmatmul.f32.gmra.mxu3 %v735_v47  ;;  %660 = vmatmul.f32.gmra.mxu1 %v370_v57  ;;  %v7522_v47 = vld [vmem:[%s7121_s21 + $0xba] sm:$0xff] }
  0xde   : > { %838 = vmatmul.f32.gmra.mxu2 %v7489_v58  ;;  %v6290_v57 = vld [vmem:[%s11368_s2 + $0x340] sm:$0xff]  ;;  %1406 = vmatpush.msrb.mxu1 %v6273_v2 }
  0xdf   : > { %1619 = vmatpush.msrb.mxu2 %v6290_v57  ;;  %v6287_v57 = vld [vmem:[%s11368_s2 + $0x328] sm:$0xff] }
  0xe0   : > { %v7501_v15 = vpop.f32.mrf.mxu3 }
  0xe1   : > { %v7509_v27 = vpop.f32.mrf.mxu2  ;;  %v7511_v14 = vpop.f32.mrf.mxu0  ;;  %1620 = vmatpush.msrb.mxu2 %v6289_v16  ;;  %v6286_v16 = vld [vmem:[%s11368_s2 + $0x320] sm:$0xff] }
  0xe2   : > { %v7518_v37 = vpop.f32.mrf.mxu1 }
  0xe3   : > { %11412 = vst [vmem:[#allocation3_spill] sm:$0xff] %v7518_v37  ;;  %v372_v37 = vld [vmem:[%s7121_s21 + $0xc0] sm:$0xff]  ;;  %1621 = vmatpush.msrb.mxu2 %v6288_v0  ;;  %v6285_v0 = vld [vmem:[%s11368_s2 + $0x318] sm:$0xff] }
  0xe4   : > { %538 = vmatmul.f32.gmra.mxu0 %v423_v23 }
  0xe5   : > { %871 = vmatmul.f32.gmra.mxu3 %v736_v26  ;;  %663 = vmatmul.f32.gmra.mxu1 %v371_v43  ;;  %v424_v43 = vld [vmem:[%s7121_s21 + $0xc1] sm:$0xff] }
  0xe6   : > { %841 = vmatmul.f32.gmra.mxu2 %v7522_v47 }
  0xe7   : > { %1622 = vmatpush.msrb.mxu2 %v6287_v57 }
  0xe8   : > { %v682_v3 = vpop.f32.mrf.mxu3 }
  0xe9   : > { %v7547_v23 = vadd.f32 %v682_v3, %v7348_v19  ;;  %v7549_v26 = vpop.f32.mrf.mxu2  ;;  %v7551_v34 = vpop.f32.mrf.mxu0  ;;  %v6272_v19 = vld [vmem:[%s11368_s2 + $0x2b0] sm:$0xff]  ;;  %v6313_v3 = vld [vmem:[%s11368_s2 + $0x3f8] sm:$0xff]  ;;  %1623 = vmatpush.msrb.mxu2 %v6286_v16  ;;  %v6283_v16 = vld [vmem:[%s11368_s2 + $0x308] sm:$0xff] }
  0xea   : > { %11413 = vst [vmem:[#allocation4_spill] sm:$0xff] %v7551_v34  ;;  %v7555_v51 = vpop.f32.mrf.mxu1  ;;  %1407 = vmatpush.msrb.mxu1 %v6272_v19  ;;  %1826 = vmatpush.msra.mxu3 %v6313_v3  ;;  %v738_v3 = vld [vmem:[%s7121_s21 + $0x11a] sm:$0x3f]  ;;  %v373_v34 = vld [vmem:[%s7121_s21 + $0xc8] sm:$0xff] }
  0xeb   : > { %11414 = vst [vmem:[#allocation5_spill] sm:$0xff] %v7555_v51  ;;  %v425_v51 = vld [vmem:[%s7121_s21 + $0xc9] sm:$0xff]  ;;  %1624 = vmatpush.msrb.mxu2 %v6285_v0 }
  0xec   : > { %541 = vmatmul.f32.gmra.mxu0 %v424_v43  ;;  %1408 = vmatpush.msrb.mxu1 %v6271_v60  ;;  %v6269_v60 = vld [vmem:[%s11368_s2 + $0x298] sm:$0xff] }
  0xed   : > { %874 = vmatmul.f32.gmra.mxu3 %v737_v49  ;;  %666 = vmatmul.f32.gmra.mxu1 %v372_v37  ;;  %v6270_v37 = vld [vmem:[%s11368_s2 + $0x2a0] sm:$0xff] }
  0xee   : > { %1409 = vmatpush.msrb.mxu1 %v6270_v37  ;;  %v6268_v37 = vld [vmem:[%s11368_s2 + $0x290] sm:$0xff] }
  0xf0   : > { %v685_v2 = vpop.f32.mrf.mxu3  ;;  %1410 = vmatpush.msrb.mxu1 %v6269_v60 }
  0xf1   : > { %v7580_v43 = vadd.f32 %v685_v2, %v7369_v30  ;;  %v7582_v49 = vpop.f32.mrf.mxu2  ;;  %v7587_v19 = vpop.f32.mrf.mxu0  ;;  %v6284_v30 = vld [vmem:[%s11368_s2 + $0x310] sm:$0xff]  ;;  %v6329_v2 = vld [vmem:[%s11368_s2 + $0x478] sm:$0xff] }
  0xf2   : > { %11415 = vst [vmem:[#allocation6_spill] sm:$0xff] %v7587_v19  ;;  %v7591_v57 = vpop.f32.mrf.mxu1  ;;  %1625 = vmatpush.msrb.mxu2 %v6284_v30  ;;  %2040 = vmatpush.msra.mxu0 %v6329_v2  ;;  %v426_v19 = vld [vmem:[%s7121_s21 + $0xd1] sm:$0xff] }
  0xf3   : > { %11416 = vst [vmem:[#allocation7_spill] sm:$0xff] %v7591_v57  ;;  %1411 = vmatpush.msrb.mxu1 %v6268_v37  ;;  %v6312_v37 = vld [vmem:[%s11368_s2 + $0x3f0] sm:$0xff] }
  0xf4   : > { %544 = vmatmul.f32.gmra.mxu0 %v425_v51  ;;  %v6282_v51 = vld [vmem:[%s11368_s2 + $0x300] sm:$0xff]  ;;  %1626 = vmatpush.msrb.mxu2 %v6283_v16  ;;  %v374_v16 = vld [vmem:[%s7121_s21 + $0xd0] sm:$0xff] }
  0xf5   : > { %877 = vmatmul.f32.gmra.mxu3 %v738_v3  ;;  %669 = vmatmul.f32.gmra.mxu1 %v373_v34  ;;  %v7613_v3 = vld [vmem:[%s7121_s21 + $0x24] sm:$0xff] }
  0xf6   : > { %v6267_v34 = vld [vmem:[%s11368_s2 + $0x288] sm:$0xff]  ;;  %1627 = vmatpush.msrb.mxu2 %v6282_v51  ;;  %1827 = vmatpush.msra.mxu3 %v6312_v37  ;;  %v7657_v37 = vld [vmem:[%s7121_s21 + $0x34] sm:$0xff] }
  0xf7   : > { %1628 = vmatmul.f32.vlgmr.msrb.gmra.mxu2 %v7613_v3  ;;  %1412 = vmatpush.msrb.mxu1 %v6267_v34 }
  0xf8   : > { %v688_v0 = vpop.f32.mrf.mxu3 }
  0xf9   : > { %v7619_v30 = vadd.f32 %v688_v0, %v7393_v39  ;;  %v7621_v57 = vpop.f32.mrf.mxu2  ;;  %v7623_v60 = vpop.f32.mrf.mxu0  ;;  %v6266_v39 = vld [vmem:[%s11368_s2 + $0x280] sm:$0xff]  ;;  %v7638_v0 = vld [vmem:[%s7121_s21 + $0x2c] sm:$0xff] }
  0xfa   : > { %11417 = vst [vmem:[#allocation8_spill] sm:$0xff] %v7623_v60  ;;  %v7626_v2 = vpop.f32.mrf.mxu1  ;;  %1413 = vmatpush.msrb.mxu1 %v6266_v39  ;;  %v375_v60 = vld [vmem:[%s7121_s21 + $0xd8] sm:$0xff] }
  0xfb   : > { %11418 = vst [vmem:[#allocation9_spill] sm:$0xff] %v7626_v2 }
  0xfc   : > { %547 = vmatmul.f32.gmra.mxu0 %v426_v19 }
  0xfd   : > { %986 = vmatmul.f32.vlgmr.msrb.gmra.mxu3 %v7171_v63  ;;  %672 = vmatmul.f32.gmra.mxu1 %v374_v16  ;;  %v427_v63 = vld [vmem:[%s7121_s21 + $0xd9] sm:$0xff] }
  0xff   : > { %1631 = vmatmul.f32.gmra.mxu2 %v7638_v0 }
 0x100   : > { %v691_v51 = vpop.f32.mrf.mxu3 }
 0x101   : > { %v7641_v34 = vadd.f32 %v691_v51, %v7414_v52  ;;  %v7643_v2 = vpop.f32.mrf.mxu2  ;;  %v7645_v19 = vpop.f32.mrf.mxu0  ;;  %v6328_v52 = vld [vmem:[%s11368_s2 + $0x470] sm:$0xff] }
 0x102   : > { %11419 = vst [vmem:[#allocation10_spill] sm:$0xff] %v7643_v2  ;;  %v7648_v16 = vpop.f32.mrf.mxu1  ;;  %2041 = vmatpush.msra.mxu0 %v6328_v52  ;;  %v7673_v2 = vld [vmem:[%s7121_s21 + $0x3c] sm:$0xff] }
 0x103   : > { %11420 = vst [vmem:[#allocation11_spill] sm:$0xff] %v7645_v19 }
 0x104   : > { %11421 = vst [vmem:[#allocation12_spill] sm:$0xff] %v7648_v16  ;;  %550 = vmatmul.f32.gmra.mxu0 %v427_v63  ;;  %v376_v63 = vld [vmem:[%s7121_s21 + $0xe0] sm:$0xff] }
 0x105   : > { %989 = vmatmul.f32.gmra.mxu3 %v7181_v4  ;;  %675 = vmatmul.f32.gmra.mxu1 %v375_v60  ;;  %v428_v4 = vld [vmem:[%s7121_s21 + $0xe1] sm:$0xff] }
 0x107   : > { %1634 = vmatmul.f32.gmra.mxu2 %v7657_v37 }
 0x108   : > { %v694_v39 = vpop.f32.mrf.mxu3 }
 0x109   : > { %v7660_v51 = vadd.f32 %v694_v39, %v7438_v6  ;;  %v7662_v16 = vpop.f32.mrf.mxu2  ;;  %v7664_v19 = vpop.f32.mrf.mxu0 }
 0x10a   : > { %11422 = vst [vmem:[#allocation13_spill] sm:$0xff] %v7662_v16  ;;  %v7667_v60 = vpop.f32.mrf.mxu1 }
 0x10b   : > { %11423 = vst [vmem:[#allocation14_spill] sm:$0xff] %v7664_v19 }
 0x10c   : > { %11424 = vst [vmem:[#allocation15_spill] sm:$0xff] %v7667_v60  ;;  %553 = vmatmul.f32.gmra.mxu0 %v428_v4  ;;  %v1131_v60 = vld [vmem:[%s7121_s21 + $0x13] sm:$0xff]  ;;  %v6311_v4 = vld [vmem:[%s11368_s2 + $0x3e8] sm:$0xff] }
 0x10d   : > { %992 = vmatmul.f32.gmra.mxu3 %v7194_v12  ;;  %678 = vmatmul.f32.gmra.mxu1 %v376_v63  ;;  %v1345_v63 = vld [vmem:[%s7121_s21 + $0x14] sm:$0xff] }
 0x10e   : > { %1828 = vmatpush.msra.mxu3 %v6311_v4  ;;  %v6327_v4 = vld [vmem:[%s11368_s2 + $0x468] sm:$0xff] }
 0x10f   : > { %1637 = vmatmul.f32.gmra.mxu2 %v7673_v2  ;;  %2042 = vmatpush.msra.mxu0 %v6327_v4  ;;  %v7731_v4 = vld [vmem:[%s7121_s21 + $0x54] sm:$0xff] }
 0x110   : > { %v697_v52 = vpop.f32.mrf.mxu3 }
 0x111   : > { %v7676_v6 = vadd.f32 %v697_v52, %v7465_v29  ;;  %v7678_v39 = vpop.f32.mrf.mxu2  ;;  %v7680_v19 = vpop.f32.mrf.mxu0  ;;  %v7692_v52 = vld [vmem:[%s7121_s21 + $0x44] sm:$0xff] }
 0x112   : > { %11425 = vst [vmem:[#allocation16_spill] sm:$0xff] %v7678_v39  ;;  %v7686_v12 = vpop.f32.mrf.mxu1 }
 0x113   : > { %11426 = vst [vmem:[#allocation17_spill] sm:$0xff] %v7680_v19 }
 0x114   : > { %11427 = vst [vmem:[#allocation18_spill] sm:$0xff] %v7686_v12  ;;  %1200 = vmatmul.f32.vlgmr.msrb.gmra.mxu0 %v1131_v60  ;;  %v1132_v12 = vld [vmem:[%s7121_s21 + $0x1b] sm:$0xff] }
 0x115   : > { %995 = vmatmul.f32.gmra.mxu3 %v7204_v18  ;;  %1414 = vmatmul.f32.vlgmr.msrb.gmra.mxu1 %v1345_v63  ;;  %v1346_v60 = vld [vmem:[%s7121_s21 + $0x1c] sm:$0xff]  ;;  %v7713_v63 = vld [vmem:[%s7121_s21 + $0x4c] sm:$0xff] }
 0x117   : > { %1640 = vmatmul.f32.gmra.mxu2 %v7692_v52 }
 0x118   : > { %v700_v29 = vpop.f32.mrf.mxu3 }
 0x119   : > { %v7695_v19 = vadd.f32 %v700_v29, %v7501_v15  ;;  %v7697_v39 = vpop.f32.mrf.mxu2  ;;  %v7699_v16 = vpop.f32.mrf.mxu0 }
 0x11a   : > { %11428 = vst [vmem:[#allocation19_spill] sm:$0xff] %v7697_v39  ;;  %v7705_v18 = vpop.f32.mrf.mxu1  ;;  %v1133_v39 = vld [vmem:[%s7121_s21 + $0x23] sm:$0xff] }
 0x11b   : > { %11429 = vst [vmem:[#allocation20_spill] sm:$0xff] %v7699_v16 }
 0x11c   : > { %11430 = vst [vmem:[#allocation21_spill] sm:$0xff] %v7705_v18  ;;  %1203 = vmatmul.f32.gmra.mxu0 %v1132_v12 }
 0x11d   : > { %998 = vmatmul.f32.gmra.mxu3 %v7218_v25  ;;  %1417 = vmatmul.f32.gmra.mxu1 %v1346_v60  ;;  %v6310_v25 = vld [vmem:[%s11368_s2 + $0x3e0] sm:$0xff] }
 0x11e   : > { %1829 = vmatpush.msra.mxu3 %v6310_v25 }
 0x11f   : > { %1643 = vmatmul.f32.gmra.mxu2 %v7713_v63 }
 0x120   : > { %v7710_v15 = vpop.f32.mrf.mxu3 }
 0x121   : > { %11431 = vst [vmem:[#allocation22_spill] sm:$0xff] %v7710_v15  ;;  %v7715_v29 = vpop.f32.mrf.mxu2  ;;  %v7717_v16 = vpop.f32.mrf.mxu0 }
 0x122   : > { %11432 = vst [vmem:[#allocation23_spill] sm:$0xff] %v7717_v16  ;;  %v7720_v18 = vpop.f32.mrf.mxu1 }
 0x123   : > { %11433 = vst [vmem:[#allocation24_spill] sm:$0xff] %v7720_v18  ;;  %v1134_v18 = vld [vmem:[%s7121_s21 + $0x2b] sm:$0xff] }
 0x124   : > { %1206 = vmatmul.f32.gmra.mxu0 %v1133_v39  ;;  %v7749_v39 = vld [vmem:[%s7121_s21 + $0x5c] sm:$0xff] }
 0x125   : > { %1001 = vmatmul.f32.gmra.mxu3 %v7231_v28  ;;  %1420 = vmatmul.f32.gmra.mxu1 %v7613_v3  ;;  %v6326_v28 = vld [vmem:[%s11368_s2 + $0x460] sm:$0xff] }
 0x126   : > { %2043 = vmatpush.msra.mxu0 %v6326_v28 }
 0x127   : > { %1646 = vmatmul.f32.gmra.mxu2 %v7731_v4 }
 0x128   : > { %v7728_v12 = vpop.f32.mrf.mxu3 }
 0x129   : > { %11434 = vst [vmem:[#allocation25_spill] sm:$0xff] %v7728_v12  ;;  %v7733_v60 = vpop.f32.mrf.mxu2  ;;  %v7735_v15 = vpop.f32.mrf.mxu0 }
 0x12a   : > { %11435 = vst [vmem:[#allocation26_spill] sm:$0xff] %v7735_v15  ;;  %v7738_v16 = vpop.f32.mrf.mxu1 }
 0x12b   : > { %11436 = vst [vmem:[#allocation27_spill] sm:$0xff] %v7738_v16  ;;  %v1135_v16 = vld [vmem:[%s7121_s21 + $0x33] sm:$0xff] }
 0x12c   : > { %1209 = vmatmul.f32.gmra.mxu0 %v1134_v18  ;;  %v7767_v18 = vld [vmem:[%s7121_s21 + $0x64] sm:$0xff] }
 0x12d   : > { %1004 = vmatmul.f32.gmra.mxu3 %v7241_v31  ;;  %1423 = vmatmul.f32.gmra.mxu1 %v7638_v0  ;;  %v6309_v31 = vld [vmem:[%s11368_s2 + $0x3d8] sm:$0xff] }
 0x12e   : > { %1830 = vmatpush.msra.mxu3 %v6309_v31  ;;  %v7785_v31 = vld [vmem:[%s7121_s21 + $0x6c] sm:$0xff] }
 0x12f   : > { %1649 = vmatmul.f32.gmra.mxu2 %v7749_v39 }
 0x130   : > { %v7746_v3 = vpop.f32.mrf.mxu3 }
 0x131   : > { %11437 = vst [vmem:[#allocation28_spill] sm:$0xff] %v7746_v3  ;;  %v7751_v25 = vpop.f32.mrf.mxu2  ;;  %v7753_v12 = vpop.f32.mrf.mxu0 }
 0x132   : > { %v7756_v15 = vpop.f32.mrf.mxu1 }
 0x133   : > { %11438 = vst [vmem:[#allocation29_spill] sm:$0xff] %v7756_v15  ;;  %v1136_v15 = vld [vmem:[%s7121_s21 + $0x3b] sm:$0xff] }
 0x134   : > { %1212 = vmatmul.f32.gmra.mxu0 %v1135_v16  ;;  %v6325_v16 = vld [vmem:[%s11368_s2 + $0x458] sm:$0xff] }
 0x135   : > { %1007 = vmatmul.f32.gmra.mxu3 %v7254_v33  ;;  %1426 = vmatmul.f32.gmra.mxu1 %v7657_v37 }
 0x136   : > { %2044 = vmatpush.msra.mxu0 %v6325_v16  ;;  %v7801_v16 = vld [vmem:[%s7121_s21 + $0x74] sm:$0xff] }
 0x137   : > { %1652 = vmatmul.f32.gmra.mxu2 %v7767_v18 }
 0x138   : > { %v7764_v0 = vpop.f32.mrf.mxu3 }
 0x139   : > { %11439 = vst [vmem:[#allocation30_spill] sm:$0xff] %v7764_v0  ;;  %v7769_v28 = vpop.f32.mrf.mxu2  ;;  %v7771_v3 = vpop.f32.mrf.mxu0 }
 0x13a   : > { %11440 = vst [vmem:[#allocation31_spill] sm:$0xff] %v7771_v3  ;;  %v7774_v33 = vpop.f32.mrf.mxu1 }
 0x13b   : > { %11441 = vst [vmem:[#allocation32_spill] sm:$0xff] %v7774_v33  ;;  %v1137_v33 = vld [vmem:[%s7121_s21 + $0x43] sm:$0xff] }
 0x13c   : > { %1215 = vmatmul.f32.gmra.mxu0 %v1136_v15 }
 0x13d   : > { %1010 = vmatmul.f32.gmra.mxu3 %v7264_v36  ;;  %1429 = vmatmul.f32.gmra.mxu1 %v7673_v2  ;;  %v6308_v2 = vld [vmem:[%s11368_s2 + $0x3d0] sm:$0xff] }
 0x13e   : > { %1831 = vmatpush.msra.mxu3 %v6308_v2  ;;  %v7820_v2 = vld [vmem:[%s7121_s21 + $0x7c] sm:$0xff] }
 0x13f   : > { %1655 = vmatmul.f32.gmra.mxu2 %v7785_v31 }
 0x140   : > { %v7782_v37 = vpop.f32.mrf.mxu3 }
 0x141   : > { %11442 = vst [vmem:[#allocation33_spill] sm:$0xff] %v7782_v37  ;;  %v7787_v0 = vpop.f32.mrf.mxu0  ;;  %v7793_v36 = vpop.f32.mrf.mxu2 }
 0x142   : > { %11443 = vst [vmem:[#allocation34_spill] sm:$0xff] %v7787_v0  ;;  %v7790_v3 = vpop.f32.mrf.mxu1  ;;  %v1138_v0 = vld [vmem:[%s7121_s21 + $0x4b] sm:$0xff] }
 0x143   : > { %11444 = vst [vmem:[#allocation35_spill] sm:$0xff] %v7790_v3 }
 0x144   : > { %1218 = vmatmul.f32.gmra.mxu0 %v1137_v33 }
 0x145   : > { %1013 = vmatmul.f32.gmra.mxu3 %v7276_v40  ;;  %1432 = vmatmul.f32.gmra.mxu1 %v7692_v52 }
 0x147   : > { %1658 = vmatmul.f32.gmra.mxu2 %v7801_v16 }
 0x148   : > { %v860_v15 = vpop.f32.mrf.mxu3 }
 0x149   : > { %v7804_v37 = vadd.f32 %v860_v15, %v7547_v23  ;;  %v7806_v3 = vpop.f32.mrf.mxu0  ;;  %v7813_v52 = vpop.f32.mrf.mxu2  ;;  %v6324_v23 = vld [vmem:[%s11368_s2 + $0x450] sm:$0xff] }
 0x14a   : > { %11445 = vst [vmem:[#allocation36_spill] sm:$0xff] %v7806_v3  ;;  %v7809_v40 = vpop.f32.mrf.mxu1  ;;  %2045 = vmatpush.msra.mxu0 %v6324_v23  ;;  %v7836_v3 = vld [vmem:[%s7121_s21 + $0x84] sm:$0xff] }
 0x14b   : > { %11446 = vst [vmem:[#allocation37_spill] sm:$0xff] %v7809_v40 }
 0x14c   : > { %1221 = vmatmul.f32.gmra.mxu0 %v1138_v0  ;;  %11447 = vst [vmem:[#allocation38_spill] sm:$0xff] %v7813_v52 }
 0x14d   : > { %1016 = vmatmul.f32.gmra.mxu3 %v7283_v44  ;;  %1435 = vmatmul.f32.gmra.mxu1 %v7713_v63  ;;  %v1139_v44 = vld [vmem:[%s7121_s21 + $0x53] sm:$0xff] }
 0x14f   : > { %1661 = vmatmul.f32.gmra.mxu2 %v7820_v2 }
 0x150   : > { %v863_v33 = vpop.f32.mrf.mxu3 }
 0x151   : > { %v7823_v15 = vadd.f32 %v863_v33, %v7580_v43  ;;  %v7825_v40 = vpop.f32.mrf.mxu0  ;;  %v7833_v63 = vpop.f32.mrf.mxu2  ;;  %v6307_v33 = vld [vmem:[%s11368_s2 + $0x3c8] sm:$0xff] }
 0x152   : > { %11448 = vst [vmem:[#allocation39_spill] sm:$0xff] %v7825_v40  ;;  %v7828_v0 = vpop.f32.mrf.mxu1  ;;  %1832 = vmatpush.msra.mxu3 %v6307_v33  ;;  %v6323_v33 = vld [vmem:[%s11368_s2 + $0x448] sm:$0xff] }
 0x153   : > { %11449 = vst [vmem:[#allocation40_spill] sm:$0xff] %v7828_v0  ;;  %2046 = vmatpush.msra.mxu0 %v6323_v33  ;;  %v1142_v33 = vld [vmem:[%s7121_s21 + $0x6b] sm:$0xff] }
 0x154   : > { %1224 = vmatmul.f32.gmra.mxu0 %v1139_v44  ;;  %11450 = vst [vmem:[#allocation41_spill] sm:$0xff] %v7833_v63 }
 0x155   : > { %1019 = vmatmul.f32.gmra.mxu3 %v7296_v50  ;;  %1438 = vmatmul.f32.gmra.mxu1 %v7731_v4  ;;  %v1140_v50 = vld [vmem:[%s7121_s21 + $0x5b] sm:$0xff]  ;;  %v7853_v4 = vld [vmem:[%s7121_s21 + $0x8c] sm:$0xff] }
 0x157   : > { %1664 = vmatmul.f32.gmra.mxu2 %v7836_v3 }
 0x158   : > { %v866_v23 = vpop.f32.mrf.mxu3 }
 0x159   : > { %v7839_v43 = vadd.f32 %v866_v23, %v7619_v30  ;;  %v7844_v0 = vpop.f32.mrf.mxu0 }
 0x15a   : > { %11451 = vst [vmem:[#allocation42_spill] sm:$0xff] %v7844_v0  ;;  %v7847_v44 = vpop.f32.mrf.mxu1 }
 0x15b   : > { %11452 = vst [vmem:[#allocation43_spill] sm:$0xff] %v7847_v44  ;;  %v7861_v44 = vpop.f32.mrf.mxu2 }
 0x15c   : > { %1227 = vmatmul.f32.gmra.mxu0 %v1140_v50  ;;  %11453 = vst [vmem:[#allocation44_spill] sm:$0xff] %v7861_v44 }
 0x15d   : > { %1022 = vmatmul.f32.gmra.mxu3 %v7309_v56  ;;  %1441 = vmatmul.f32.gmra.mxu1 %v7749_v39  ;;  %v1141_v56 = vld [vmem:[%s7121_s21 + $0x63] sm:$0xff]  ;;  %v7872_v39 = vld [vmem:[%s7121_s21 + $0x94] sm:$0xff] }
 0x15f   : > { %1667 = vmatmul.f32.gmra.mxu2 %v7853_v4 }
 0x160   : > { %v869_v30 = vpop.f32.mrf.mxu3 }
 0x161   : > { %v7856_v23 = vadd.f32 %v869_v30, %v7641_v34  ;;  %v7863_v0 = vpop.f32.mrf.mxu0 }
 0x162   : > { %11454 = vst [vmem:[#allocation45_spill] sm:$0xff] %v7863_v0  ;;  %v7866_v50 = vpop.f32.mrf.mxu1 }
 0x163   : > { %11455 = vst [vmem:[#allocation46_spill] sm:$0xff] %v7866_v50  ;;  %v7883_v50 = vpop.f32.mrf.mxu2 }
 0x164   : > { %1230 = vmatmul.f32.gmra.mxu0 %v1141_v56  ;;  %11458 = vst [vmem:[#allocation49_spill] sm:$0xff] %v7883_v50 }
 0x165   : > { %1025 = vmatmul.f32.gmra.mxu3 %v7322_v62  ;;  %1444 = vmatmul.f32.gmra.mxu1 %v7767_v18  ;;  %v6306_v62 = vld [vmem:[%s11368_s2 + $0x3c0] sm:$0xff] }
 0x166   : > { %1833 = vmatpush.msra.mxu3 %v6306_v62  ;;  %v7891_v18 = vld [vmem:[%s7121_s21 + $0x9c] sm:$0xff] }
 0x167   : > { %1670 = vmatmul.f32.gmra.mxu2 %v7872_v39 }
 0x168   : > { %v872_v34 = vpop.f32.mrf.mxu3 }
 0x169   : > { %v7875_v30 = vadd.f32 %v872_v34, %v7660_v51  ;;  %v7877_v0 = vpop.f32.mrf.mxu0 }
 0x16a   : > { %11456 = vst [vmem:[#allocation47_spill] sm:$0xff] %v7877_v0  ;;  %v7880_v44 = vpop.f32.mrf.mxu1 }
 0x16b   : > { %11457 = vst [vmem:[#allocation48_spill] sm:$0xff] %v7880_v44  ;;  %v1143_v44 = vld [vmem:[%s7121_s21 + $0x73] sm:$0xff] }
 0x16c   : > { %1233 = vmatmul.f32.gmra.mxu0 %v1142_v33  ;;  %v7910_v33 = vld [vmem:[%s7121_s21 + $0xa4] sm:$0xff] }
 0x16d   : > { %1028 = vmatmul.f32.gmra.mxu3 %v7339_v13  ;;  %1447 = vmatmul.f32.gmra.mxu1 %v7785_v31  ;;  %v6322_v13 = vld [vmem:[%s11368_s2 + $0x440] sm:$0xff]  ;;  %v7906_v31 = vpop.f32.mrf.mxu2 }
 0x16e   : > { %2047 = vmatpush.msra.mxu0 %v6322_v13  ;;  %11461 = vst [vmem:[#allocation52_spill] sm:$0xff] %v7906_v31 }
 0x16f   : > { %1673 = vmatmul.f32.gmra.mxu2 %v7891_v18 }
 0x170   : > { %v875_v51 = vpop.f32.mrf.mxu3 }
 0x171   : > { %v7894_v56 = vadd.f32 %v875_v51, %v7676_v6  ;;  %v7896_v34 = vpop.f32.mrf.mxu0 }
 0x172   : > { %11459 = vst [vmem:[#allocation50_spill] sm:$0xff] %v7896_v34  ;;  %v7899_v0 = vpop.f32.mrf.mxu1 }
 0x173   : > { %11460 = vst [vmem:[#allocation51_spill] sm:$0xff] %v7899_v0  ;;  %v1144_v0 = vld [vmem:[%s7121_s21 + $0x7b] sm:$0xff] }
 0x174   : > { %1236 = vmatmul.f32.gmra.mxu0 %v1143_v44  ;;  %v7927_v44 = vld [vmem:[%s7121_s21 + $0xac] sm:$0xff] }
 0x175   : > { %1031 = vmatmul.f32.gmra.mxu3 %v7363_v11  ;;  %1450 = vmatmul.f32.gmra.mxu1 %v7801_v16  ;;  %v6305_v11 = vld [vmem:[%s11368_s2 + $0x3b8] sm:$0xff] }
 0x176   : > { %1834 = vmatpush.msra.mxu3 %v6305_v11  ;;  %v7941_v11 = vld [vmem:[%s7121_s21 + $0xb4] sm:$0xff] }
 0x177   : > { %1676 = vmatmul.f32.gmra.mxu2 %v7910_v33 }
 0x178   : > { %v878_v6 = vpop.f32.mrf.mxu3 }
 0x179   : > { %v7913_v62 = vadd.f32 %v878_v6, %v7695_v19  ;;  %v7915_v51 = vpop.f32.mrf.mxu0  ;;  %v1145_v6 = vld [vmem:[%s7121_s21 + $0x83] sm:$0xff] }
 0x17a   : > { %11462 = vst [vmem:[#allocation53_spill] sm:$0xff] %v7915_v51  ;;  %v7918_v34 = vpop.f32.mrf.mxu1  ;;  %v1629_v16 = vpop.f32.mrf.mxu2 }
 0x17b   : > { %11463 = vst [vmem:[#allocation54_spill] sm:$0xff] %v7918_v34 }
 0x17c   : > { %1239 = vmatmul.f32.gmra.mxu0 %v1144_v0 }
 0x17d   : > { %1034 = vmatmul.f32.gmra.mxu3 %v7384_v35  ;;  %1453 = vmatmul.f32.gmra.mxu1 %v7820_v2  ;;  %v6321_v35 = vld [vmem:[%s11368_s2 + $0x438] sm:$0xff] }
 0x17e   : > { %2048 = vmatpush.msra.mxu0 %v6321_v35 }
 0x17f   : > { %1679 = vmatmul.f32.gmra.mxu2 %v7927_v44 }
 0x180   : > { %v987_v19 = vpop.f32.mrf.mxu3 }
 0x181   : > { %v7929_v13 = vpop.f32.mrf.mxu0 }
 0x182   : > { %11464 = vst [vmem:[#allocation55_spill] sm:$0xff] %v7929_v13  ;;  %v7932_v34 = vpop.f32.mrf.mxu1  ;;  %v1632_v0 = vpop.f32.mrf.mxu2 }
 0x183   : > { %11465 = vst [vmem:[#allocation56_spill] sm:$0xff] %v7932_v34  ;;  %v1146_v34 = vld [vmem:[%s7121_s21 + $0x8b] sm:$0xff] }
 0x184   : > { %1242 = vmatmul.f32.gmra.mxu0 %v1145_v6  ;;  %v6304_v6 = vld [vmem:[%s11368_s2 + $0x3b0] sm:$0xff] }
 0x185   : > { %1037 = vmatmul.f32.gmra.mxu3 %v7405_v48  ;;  %1456 = vmatmul.f32.gmra.mxu1 %v7836_v3  ;;  %v596_v48 = vadd.f32 %v7335_v9, %v7328_v1  ;;  %v6345_v1 = vld [vmem:[%s11370_s4 + $0xf8] sm:$0xff] }
 0x186   : > { %1835 = vmatpush.msra.mxu3 %v6304_v6  ;;  %3318 = vmatpush.msra.mxu1 %v6345_v1  ;;  %v7976_v1 = vld [vmem:[%s7121_s21 + $0xc4] sm:$0xff] }
 0x187   : > { %1682 = vmatmul.f32.gmra.mxu2 %v7941_v11  ;;  %v881_v3 = vadd.f32 %v7350_v21, %v596_v48  ;;  %v599_v48 = vadd.f32 %v7359_v8, %v7352_v22 }
 0x188   : > { %v990_v2 = vpop.f32.mrf.mxu3 }
 0x189   : > { %v7943_v13 = vpop.f32.mrf.mxu0 }
 0x18a   : > { %11466 = vst [vmem:[#allocation57_spill] sm:$0xff] %v7943_v13  ;;  %v7946_v51 = vpop.f32.mrf.mxu1  ;;  %v7958_v13 = vld [vmem:[%s7121_s21 + $0xbc] sm:$0xff] }
 0x18b   : > { %11467 = vst [vmem:[#allocation58_spill] sm:$0xff] %v7946_v51  ;;  %v1095_v51 = vadd.f32 %v987_v19, %v881_v3  ;;  %v882_v19 = vadd.f32 %v7371_v17, %v599_v48 }
 0x18c   : > { %1245 = vmatmul.f32.gmra.mxu0 %v1146_v34  ;;  %v1635_v34 = vpop.f32.mrf.mxu2 }
 0x18d   : > { %1040 = vmatmul.f32.gmra.mxu3 %v7429_v61  ;;  %1459 = vmatmul.f32.gmra.mxu1 %v7853_v4  ;;  %v1147_v61 = vld [vmem:[%s7121_s21 + $0x93] sm:$0xff]  ;;  %v1096_v22 = vadd.f32 %v990_v2, %v882_v19  ;;  %v6303_v19 = vld [vmem:[%s11368_s2 + $0x3a8] sm:$0xff] }
 0x18e   : > { %1836 = vmatpush.msra.mxu3 %v6303_v19 }
 0x18f   : > { %1685 = vmatmul.f32.gmra.mxu2 %v7958_v13 }
 0x190   : > { %v993_v35 = vpop.f32.mrf.mxu3 }
 0x191   : > { %v1201_v9 = vpop.f32.mrf.mxu0 }
 0x192   : > { %v1309_v4 = vadd.f32 %v1201_v9, %v1095_v51  ;;  %v1415_v21 = vpop.f32.mrf.mxu1  ;;  %v6320_v51 = vld [vmem:[%s11368_s2 + $0x430] sm:$0xff]  ;;  %v1148_v9 = vld [vmem:[%s7121_s21 + $0x9b] sm:$0xff] }
 0x193   : > { %2049 = vmatpush.msra.mxu0 %v6320_v51 }
 0x194   : > { %v1523_v31 = vadd.f32 %v1415_v21, %v1309_v4  ;;  %1248 = vmatmul.f32.gmra.mxu0 %v1147_v61  ;;  %v1638_v17 = vpop.f32.mrf.mxu2  ;;  %v7988_v21 = vld [vmem:[%s7121_s21 + $0xcc] sm:$0xff] }
 0x195   : > { %1043 = vmatmul.f32.gmra.mxu3 %v7450_v5  ;;  %1462 = vmatmul.f32.gmra.mxu1 %v7872_v39  ;;  %v602_v39 = vadd.f32 %v7380_v32, %v7373_v20  ;;  %v1149_v20 = vld [vmem:[%s7121_s21 + $0xa3] sm:$0xff] }
 0x196   : > { %v7970_v3 = vadd.f32 %v1629_v16, %v1523_v31 }
 0x197   : > { %1688 = vmatmul.f32.gmra.mxu2 %v7976_v1  ;;  %v883_v16 = vadd.f32 %v7395_v41, %v602_v39  ;;  %v6344_v41 = vld [vmem:[%s11370_s4 + $0xf0] sm:$0xff]  ;;  %v6319_v39 = vld [vmem:[%s11368_s2 + $0x428] sm:$0xff] }
 0x198   : > { %v996_v6 = vpop.f32.mrf.mxu3  ;;  %3319 = vmatpush.msra.mxu1 %v6344_v41  ;;  %2050 = vmatpush.msra.mxu0 %v6319_v39  ;;  %v1151_v41 = vld [vmem:[%s7121_s21 + $0xb3] sm:$0xff] }
 0x199   : > { %v1204_v8 = vpop.f32.mrf.mxu0  ;;  %v1097_v48 = vadd.f32 %v993_v35, %v883_v16 }
 0x19a   : > { %v1310_v5 = vadd.f32 %v1204_v8, %v1096_v22  ;;  %v1418_v61 = vpop.f32.mrf.mxu1 }
 0x19c   : > { %v1524_v31 = vadd.f32 %v1418_v61, %v1310_v5  ;;  %1251 = vmatmul.f32.gmra.mxu0 %v1148_v9  ;;  %v1641_v35 = vpop.f32.mrf.mxu2  ;;  %v8006_v5 = vld [vmem:[%s7121_s21 + $0xd4] sm:$0xff] }
 0x19d   : > { %1046 = vmatmul.f32.gmra.mxu3 %v7489_v58  ;;  %1465 = vmatmul.f32.gmra.mxu1 %v7891_v18  ;;  %v605_v18 = vadd.f32 %v7401_v46, %v7397_v42  ;;  %v939_v46 = vld [vmem:[%s7121_s21 + $0xc2] sm:$0xff] }
 0x19e   : > { %v7985_v2 = vadd.f32 %v1632_v0, %v1524_v31 }
 0x19f   : > { %1691 = vmatmul.f32.gmra.mxu2 %v7988_v21  ;;  %v884_v22 = vadd.f32 %v7416_v53, %v605_v18  ;;  %v608_v53 = vadd.f32 %v7425_v59, %v7418_v54  ;;  %v6302_v59 = vld [vmem:[%s11368_s2 + $0x3a0] sm:$0xff] }
 0x1a0   : > { %v999_v4 = vpop.f32.mrf.mxu3  ;;  %1837 = vmatpush.msra.mxu3 %v6302_v59  ;;  %v6342_v59 = vld [vmem:[%s11370_s4 + $0xe0] sm:$0xff] }
 0x1a1   : > { %v1207_v51 = vpop.f32.mrf.mxu0  ;;  %v1098_v61 = vadd.f32 %v996_v6, %v884_v22  ;;  %v885_v6 = vadd.f32 %v7440_v7, %v608_v53  ;;  %v611_v7 = vadd.f32 %v7446_v24, %v7442_v10  ;;  %v941_v10 = vld [vmem:[%s7121_s21 + $0xd2] sm:$0xff]  ;;  %v1152_v24 = vld [vmem:[%s7121_s21 + $0xbb] sm:$0xff] }
 0x1a2   : > { %v1311_v32 = vadd.f32 %v1207_v51, %v1097_v48  ;;  %v1421_v58 = vpop.f32.mrf.mxu1  ;;  %v8021_v51 = vld [vmem:[%s7121_s21 + $0xdc] sm:$0xff] }
 0x1a4   : > { %v1525_v0 = vadd.f32 %v1421_v58, %v1311_v32  ;;  %1254 = vmatmul.f32.gmra.mxu0 %v1149_v20  ;;  %v1644_v19 = vpop.f32.mrf.mxu2  ;;  %v1099_v20 = vadd.f32 %v999_v4, %v885_v6  ;;  %v940_v58 = vld [vmem:[%s7121_s21 + $0xca] sm:$0xff]  ;;  %v886_v4 = vadd.f32 %v7473_v38, %v611_v7  ;;  %v6318_v38 = vld [vmem:[%s11368_s2 + $0x420] sm:$0xff]  ;;  %v8072_v7 = vld [vmem:[%s7121_s21 + $0xf4] sm:$0xff] }
 0x1a5   : > { %1049 = vmatmul.f32.gmra.mxu3 %v7522_v47  ;;  %1468 = vmatmul.f32.gmra.mxu1 %v7910_v33  ;;  %v1150_v47 = vld [vmem:[%s7121_s21 + $0xab] sm:$0xff] }
 0x1a6   : > { %v8003_v8 = vadd.f32 %v1635_v34, %v1525_v0  ;;  %2051 = vmatpush.msra.mxu0 %v6318_v38 }
 0x1a7   : > { %1694 = vmatmul.f32.gmra.mxu2 %v8006_v5 }
 0x1a8   : > { %v1002_v9 = vpop.f32.mrf.mxu3 }
 0x1a9   : > { %v1210_v42 = vpop.f32.mrf.mxu0  ;;  %v1100_v39 = vadd.f32 %v1002_v9, %v886_v4  ;;  %v943_v4 = vld [vmem:[%s7121_s21 + $0xe2] sm:$0xff] }
 0x1aa   : > { %v1312_v33 = vadd.f32 %v1210_v42, %v1098_v61  ;;  %v1424_v31 = vpop.f32.mrf.mxu1  ;;  %v8039_v61 = vld [vmem:[%s7121_s21 + $0xe4] sm:$0xff] }
 0x1ac   : > { %v1526_v34 = vadd.f32 %v1424_v31, %v1312_v33  ;;  %1257 = vmatmul.f32.gmra.mxu0 %v1150_v47 }
 0x1ad   : > { %1052 = vmatmul.f32.gmra.mxu3 %v939_v46  ;;  %1471 = vmatmul.f32.gmra.mxu1 %v7927_v44  ;;  %v1647_v46 = vpop.f32.mrf.mxu2 }
 0x1ae   : > { %v8018_v16 = vadd.f32 %v1638_v17, %v1526_v34  ;;  %v6343_v17 = vld [vmem:[%s11370_s4 + $0xe8] sm:$0xff] }
 0x1af   : > { %1697 = vmatmul.f32.gmra.mxu2 %v8021_v51  ;;  %3320 = vmatpush.msra.mxu1 %v6343_v17  ;;  %v8054_v34 = vld [vmem:[%s7121_s21 + $0xec] sm:$0xff] }
 0x1b0   : > { %v1005_v48 = vpop.f32.mrf.mxu3 }
 0x1b1   : > { %v1213_v32 = vpop.f32.mrf.mxu0  ;;  %3321 = vmatpush.msra.mxu1 %v6342_v59 }
 0x1b2   : > { %v1313_v18 = vadd.f32 %v1213_v32, %v1099_v20  ;;  %v1427_v54 = vpop.f32.mrf.mxu1  ;;  %v942_v32 = vld [vmem:[%s7121_s21 + $0xda] sm:$0xff] }
 0x1b4   : > { %v1527_v44 = vadd.f32 %v1427_v54, %v1313_v18  ;;  %1260 = vmatmul.f32.gmra.mxu0 %v1151_v41 }
 0x1b5   : > { %1055 = vmatmul.f32.gmra.mxu3 %v940_v58  ;;  %1474 = vmatmul.f32.gmra.mxu1 %v7941_v11  ;;  %v614_v11 = vadd.f32 %v7485_v55, %v7476_v45  ;;  %v1153_v58 = vld [vmem:[%s7121_s21 + $0xc3] sm:$0xff]  ;;  %v1650_v45 = vpop.f32.mrf.mxu2 }
 0x1b6   : > { %v8036_v0 = vadd.f32 %v1641_v35, %v1527_v44  ;;  %v11468_v55 = vld [vmem:[#allocation3_spill] sm:$0xff] }
 0x1b7   : > { %1700 = vmatmul.f32.gmra.mxu2 %v8039_v61  ;;  %v887_v9 = vadd.f32 %v7509_v27, %v614_v11 }
 0x1b8   : > { %v1008_v22 = vpop.f32.mrf.mxu3 }
 0x1b9   : > { %v1216_v42 = vpop.f32.mrf.mxu0  ;;  %v1101_v6 = vadd.f32 %v1005_v48, %v887_v9  ;;  %v6301_v48 = vld [vmem:[%s11368_s2 + $0x398] sm:$0xff] }
 0x1ba   : > { %v1314_v47 = vadd.f32 %v1216_v42, %v1100_v39  ;;  %v1430_v33 = vpop.f32.mrf.mxu1  ;;  %1838 = vmatpush.msra.mxu3 %v6301_v48  ;;  %v1154_v39 = vld [vmem:[%s7121_s21 + $0xcb] sm:$0xff] }
 0x1bc   : > { %v1528_v35 = vadd.f32 %v1430_v33, %v1314_v47  ;;  %1263 = vmatmul.f32.gmra.mxu0 %v1152_v24 }
 0x1bd   : > { %1058 = vmatmul.f32.gmra.mxu3 %v941_v10  ;;  %1477 = vmatmul.f32.gmra.mxu1 %v7958_v13  ;;  %v617_v13 = vadd.f32 %v11468_v55, %v7511_v14  ;;  %v11470_v10 = vld [vmem:[#allocation5_spill] sm:$0xff]  ;;  %v1653_v47 = vpop.f32.mrf.mxu2 }
 0x1be   : > { %v8051_v31 = vadd.f32 %v1644_v19, %v1528_v35  ;;  %v8087_v35 = vld [vmem:[%s7121_s21 + $0xfc] sm:$0xff] }
 0x1bf   : > { %1703 = vmatmul.f32.gmra.mxu2 %v8054_v34  ;;  %v888_v19 = vadd.f32 %v7549_v26, %v617_v13  ;;  %v11469_v26 = vld [vmem:[#allocation4_spill] sm:$0xff] }
 0x1c0   : > { %v1011_v53 = vpop.f32.mrf.mxu3  ;;  %v620_v24 = vadd.f32 %v11470_v10, %v11469_v26  ;;  %v6300_v13 = vld [vmem:[%s11368_s2 + $0x390] sm:$0xff] }
 0x1c1   : > { %v1219_v20 = vpop.f32.mrf.mxu0  ;;  %v1102_v44 = vadd.f32 %v1008_v22, %v888_v19  ;;  %v6317_v22 = vld [vmem:[%s11368_s2 + $0x418] sm:$0xff]  ;;  %v8102_v19 = vld [vmem:[%s7121_s21 + $0x104] sm:$0xff]  ;;  %1839 = vmatpush.msra.mxu3 %v6300_v13 }
 0x1c2   : > { %v1315_v41 = vadd.f32 %v1219_v20, %v1101_v6  ;;  %v1433_v18 = vpop.f32.mrf.mxu1  ;;  %2052 = vmatpush.msra.mxu0 %v6317_v22  ;;  %v889_v33 = vadd.f32 %v7582_v49, %v620_v24  ;;  %v944_v20 = vld [vmem:[%s7121_s21 + $0xea] sm:$0xff] }
 0x1c3   : > { %v6316_v22 = vld [vmem:[%s11368_s2 + $0x410] sm:$0xff] }
 0x1c4   : > { %v1529_v27 = vadd.f32 %v1433_v18, %v1315_v41  ;;  %1266 = vmatmul.f32.gmra.mxu0 %v1153_v58  ;;  %v1103_v9 = vadd.f32 %v1011_v53, %v889_v33  ;;  %v11471_v18 = vld [vmem:[#allocation6_spill] sm:$0xff]  ;;  %v8122_v33 = vld [vmem:[%s7121_s21 + $0x10c] sm:$0xff] }
 0x1c5   : > { %1061 = vmatmul.f32.gmra.mxu3 %v942_v32  ;;  %1480 = vmatmul.f32.gmra.mxu1 %v7976_v1  ;;  %v1155_v32 = vld [vmem:[%s7121_s21 + $0xd3] sm:$0xff]  ;;  %v1656_v48 = vpop.f32.mrf.mxu2 }
 0x1c6   : > { %v8066_v54 = vadd.f32 %v1647_v46, %v1529_v27  ;;  %2053 = vmatpush.msra.mxu0 %v6316_v22  ;;  %v8156_v22 = vld [vmem:[%s7121_s21 + $0x11c] sm:$0xff] }
 0x1c7   : > { %1706 = vmatmul.f32.gmra.mxu2 %v8072_v7 }
 0x1c8   : > { %v1014_v14 = vpop.f32.mrf.mxu3 }
 0x1c9   : > { %v1222_v17 = vpop.f32.mrf.mxu0 }
 0x1ca   : > { %v1316_v42 = vadd.f32 %v1222_v17, %v1102_v44  ;;  %v1436_v1 = vpop.f32.mrf.mxu1  ;;  %v6341_v44 = vld [vmem:[%s11370_s4 + $0xd8] sm:$0xff] }
 0x1cb   : > { %3322 = vmatpush.msra.mxu1 %v6341_v44 }
 0x1cc   : > { %v1530_v46 = vadd.f32 %v1436_v1, %v1316_v42  ;;  %1269 = vmatmul.f32.gmra.mxu0 %v1154_v39  ;;  %v11473_v42 = vld [vmem:[#allocation8_spill] sm:$0xff]  ;;  %v11474_v1 = vld [vmem:[#allocation9_spill] sm:$0xff] }
 0x1cd   : > { %1064 = vmatmul.f32.gmra.mxu3 %v943_v4  ;;  %1483 = vmatmul.f32.gmra.mxu1 %v7988_v21  ;;  %v11472_v21 = vld [vmem:[#allocation7_spill] sm:$0xff]  ;;  %v626_v26 = vadd.f32 %v11474_v1, %v11473_v42 }
 0x1ce   : > { %v8084_v38 = vadd.f32 %v1650_v45, %v1530_v46  ;;  %v623_v55 = vadd.f32 %v11472_v21, %v11471_v18  ;;  %v11476_v18 = vld [vmem:[#allocation11_spill] sm:$0xff]  ;;  %v11477_v21 = vld [vmem:[#allocation12_spill] sm:$0xff] }
 0x1cf   : > { %1709 = vmatmul.f32.gmra.mxu2 %v8087_v35 }
 0x1d0   : > { %v1017_v11 = vpop.f32.mrf.mxu3  ;;  %v890_v53 = vadd.f32 %v7621_v57, %v623_v55  ;;  %v1156_v57 = vld [vmem:[%s7121_s21 + $0xdb] sm:$0xff]  ;;  %v629_v55 = vadd.f32 %v11477_v21, %v11476_v18  ;;  %v949_v18 = vld [vmem:[%s7121_s21 + $0x112] sm:$0xff] }
 0x1d1   : > { %v1225_v6 = vpop.f32.mrf.mxu0  ;;  %v1160_v21 = vld [vmem:[%s7121_s21 + $0xfb] sm:$0xff] }
 0x1d2   : > { %v1317_v58 = vadd.f32 %v1225_v6, %v1103_v9  ;;  %v1439_v41 = vpop.f32.mrf.mxu1  ;;  %v1104_v59 = vadd.f32 %v1014_v14, %v890_v53  ;;  %v11475_v14 = vld [vmem:[#allocation10_spill] sm:$0xff] }
 0x1d3   : > { %v891_v24 = vadd.f32 %v11475_v14, %v626_v26  ;;  %v6827_v26 = vmov 0  }
 0x1d4   : > { %v1531_v49 = vadd.f32 %v1439_v41, %v1317_v58  ;;  %1272 = vmatmul.f32.gmra.mxu0 %v1155_v32  ;;  %v1157_v32 = vld [vmem:[%s7121_s21 + $0xe3] sm:$0xff]  ;;  %v1659_v58 = vpop.f32.mrf.mxu2  ;;  %6519 = vset.pattern.permute.xlu0 %v6827_v26 }
 0x1d5   : > { %1067 = vmatmul.f32.gmra.mxu3 %v944_v20  ;;  %1486 = vmatmul.f32.gmra.mxu1 %v8006_v5  ;;  %v945_v5 = vld [vmem:[%s7121_s21 + $0xf2] sm:$0xff]  ;;  %v1105_v9 = vadd.f32 %v1017_v11, %v891_v24  ;;  %v946_v20 = vld [vmem:[%s7121_s21 + $0xfa] sm:$0xff] }
 0x1d6   : > { %v8096_v45 = vadd.f32 %v1653_v47, %v1531_v49  ;;  %v11478_v11 = vld [vmem:[#allocation13_spill] sm:$0xff]  ;;  %6520 = vset.pattern.permute.xlu1 %v6827_v26  ;;  %6521 = vset.pattern.permute.xlu2 %v6827_v26  ;;  %v1162_v26 = vld [vmem:[%s7121_s21 + $0x10b] sm:$0xff] }
 0x1d7   : > { %1712 = vmatmul.f32.gmra.mxu2 %v8102_v19  ;;  %v892_v53 = vadd.f32 %v11478_v11, %v629_v55  ;;  %v6298_v55 = vld [vmem:[%s11368_s2 + $0x380] sm:$0xff]  ;;  %v6339_v11 = vld [vmem:[%s11370_s4 + $0xc8] sm:$0xff] }
 0x1d8   : > { %v1020_v27 = vpop.f32.mrf.mxu3 }
 0x1d9   : > { %v1228_v17 = vpop.f32.mrf.mxu0  ;;  %v1106_v44 = vadd.f32 %v1020_v27, %v892_v53  ;;  %v306_v27 = vld [vmem:[%s11367_s1] sm:$0xff] }
 0x1da   : > { %v1318_v4 = vadd.f32 %v1228_v17, %v1104_v59  ;;  %v1442_v39 = vpop.f32.mrf.mxu1  ;;  %v8136_v59 = vld [vmem:[%s7121_s21 + $0x114] sm:$0xff]  ;;  %v6299_v17 = vld [vmem:[%s11368_s2 + $0x388] sm:$0xff]  ;;  %2963 = vperm.xlu0 %6519, %v306_v27  }
 0x1db   : > { %1840 = vmatpush.msra.mxu3 %v6299_v17 }
 0x1dc   : > { %v1532_v10 = vadd.f32 %v1442_v39, %v1318_v4  ;;  %1275 = vmatmul.f32.gmra.mxu0 %v1156_v57  ;;  %v947_v57 = vld [vmem:[%s7121_s21 + $0x102] sm:$0xff]  ;;  %v1158_v4 = vld [vmem:[%s7121_s21 + $0xeb] sm:$0xff]  ;;  %v1662_v1 = vpop.f32.mrf.mxu2 }
 0x1dd   : > { %1070 = vmatmul.f32.gmra.mxu3 %v945_v5  ;;  %1489 = vmatmul.f32.gmra.mxu1 %v8021_v51 }
 0x1de   : > { %v8114_v46 = vadd.f32 %v1656_v48, %v1532_v10  ;;  %1841 = vmatpush.msra.mxu3 %v6298_v55  ;;  %v321_v55 = vld [vmem:[%s11367_s1 + $0x78] sm:$0xff] }
 0x1df   : > { %1715 = vmatmul.f32.gmra.mxu2 %v8122_v33 }
 0x1e0   : > { %v8119_v47 = vpop.f32.mrf.mxu3 }
 0x1e1   : > { %v1231_v6 = vpop.f32.mrf.mxu0 }
 0x1e2   : > { %v1319_v51 = vadd.f32 %v1231_v6, %v1105_v9  ;;  %v1445_v41 = vpop.f32.mrf.mxu1  ;;  %v6315_v9 = vld [vmem:[%s11368_s2 + $0x408] sm:$0xff] }
 0x1e3   : > { %2054 = vmatpush.msra.mxu0 %v6315_v9  ;;  %v6338_v9 = vld [vmem:[%s11370_s4 + $0xc0] sm:$0xff] }
 0x1e4   : > { %v1533_v49 = vadd.f32 %v1445_v41, %v1319_v51  ;;  %1278 = vmatmul.f32.gmra.mxu0 %v1157_v32  ;;  %v307_v32 = vld [vmem:[%s11367_s1 + $0x8] sm:$0xff] }
 0x1e5   : > { %1073 = vmatmul.f32.gmra.mxu3 %v946_v20  ;;  %1492 = vmatmul.f32.gmra.mxu1 %v8039_v61  ;;  %v6340_v61 = vld [vmem:[%s11370_s4 + $0xd0] sm:$0xff]  ;;  %v8173_v51 = vld [vmem:[%s7121_s21 + $0x124] sm:$0xff] }
 0x1e6   : > { %v8131_v13 = vadd.f32 %v1659_v58, %v1533_v49  ;;  %3323 = vmatpush.msra.mxu1 %v6340_v61  ;;  %v948_v20 = vld [vmem:[%s7121_s21 + $0x10a] sm:$0xff]  ;;  %2968 = vperm.xlu0 %6519, %v307_v32   ;;  %v1593_v61 = vld [vmem:[%s7121_s21 + $0x134] sm:$0xff] }
 0x1e7   : > { %1718 = vmatmul.f32.gmra.mxu2 %v8136_v59  ;;  %v312_v49 = vld [vmem:[%s11367_s1 + $0x30] sm:$0xff] }
 0x1e8   : > { %v8133_v48 = vpop.f32.mrf.mxu3  ;;  %3324 = vmatpush.msra.mxu1 %v6339_v11  ;;  %v1164_v11 = vld [vmem:[%s7121_s21 + $0x11b] sm:$0xff] }
 0x1e9   : > { %v1234_v5 = vpop.f32.mrf.mxu0 }
 0x1ea   : > { %v1320_v39 = vadd.f32 %v1234_v5, %v1106_v44  ;;  %v1448_v42 = vpop.f32.mrf.mxu1  ;;  %v1592_v44 = vld [vmem:[%s7121_s21 + $0x12c] sm:$0xff]  ;;  %v950_v5 = vld [vmem:[%s7121_s21 + $0x11a] sm:$0xff]  ;;  %3325 = vmatpush.msra.mxu1 %v6338_v9 }
 0x1eb   : > { %v1166_v9 = vld [vmem:[%s7121_s21 + $0x12b] sm:$0x3f] }
 0x1ec   : > { %v1534_v10 = vadd.f32 %v1448_v42, %v1320_v39  ;;  %1281 = vmatmul.f32.gmra.mxu0 %v1158_v4  ;;  %v6314_v4 = vld [vmem:[%s11368_s2 + $0x400] sm:$0xff]  ;;  %v315_v39 = vld [vmem:[%s11367_s1 + $0x48] sm:$0xff] }
 0x1ed   : > { %1076 = vmatmul.f32.gmra.mxu3 %v947_v57  ;;  %1495 = vmatmul.f32.gmra.mxu1 %v8054_v34  ;;  %v1159_v34 = vld [vmem:[%s7121_s21 + $0xf3] sm:$0xff]  ;;  %v1161_v57 = vld [vmem:[%s7121_s21 + $0x103] sm:$0xff] }
 0x1ee   : > { %v8151_v14 = vadd.f32 %v1662_v1, %v1534_v10  ;;  %2993 = vperm.xlu0 %6519, %v312_v49   ;;  %2055 = vmatpush.msra.mxu0 %v6314_v4  ;;  %v951_v1 = vld [vmem:[%s7121_s21 + $0x122] sm:$0xff]  ;;  %v313_v10 = vld [vmem:[%s11367_s1 + $0x38] sm:$0xff] }
 0x1ef   : > { %1721 = vmatmul.f32.gmra.mxu2 %v8156_v22  ;;  %v6337_v4 = vld [vmem:[%s11370_s4 + $0xb8] sm:$0xff] }
 0x1f0   : > { %v8153_v24 = vpop.f32.mrf.mxu3  ;;  %3326 = vmatpush.msra.mxu1 %v6337_v4  ;;  %v6336_v4 = vld [vmem:[%s11370_s4 + $0xb0] sm:$0xff] }
 0x1f1   : > { %v8161_v6 = vpop.f32.mrf.mxu0 }
 0x1f2   : > { %3327 = vmatpush.msra.mxu1 %v6336_v4  ;;  %v1989_v4 = vld [vmem:[%s7121_s21 + $0x36] sm:$0xff] }
 0x1f4   : > { %1284 = vmatmul.f32.gmra.mxu0 %v1159_v34  ;;  %v1594_v34 = vld [vmem:[%s7121_s21 + $0x13c] sm:$0x3f] }
 0x1f5   : > { %1079 = vmatmul.f32.gmra.mxu3 %v948_v20  ;;  %1498 = vmatmul.f32.gmra.mxu1 %v8072_v7  ;;  %v308_v7 = vld [vmem:[%s11367_s1 + $0x10] sm:$0xff] }
 0x1f6   : > { %2973 = vperm.xlu1 %6520, %v308_v7   ;;  %3008 = vperm.xlu0 %6519, %v315_v39   ;;  %v1165_v39 = vld [vmem:[%s7121_s21 + $0x123] sm:$0xff] }
 0x1f7   : > { %1724 = vmatmul.f32.gmra.mxu2 %v8173_v51 }
 0x1f8   : > { %v8170_v58 = vpop.f32.mrf.mxu3 }
 0x1f9   : > { %v8175_v41 = vpop.f32.mrf.mxu0 }
 0x1fc   : > { %1287 = vmatmul.f32.gmra.mxu0 %v1160_v21  ;;  %v1163_v21 = vld [vmem:[%s7121_s21 + $0x113] sm:$0xff] }
 0x1fd   : > { %1082 = vmatmul.f32.gmra.mxu3 %v949_v18  ;;  %1501 = vmatmul.f32.gmra.mxu1 %v8087_v35  ;;  %v309_v35 = vld [vmem:[%s11367_s1 + $0x18] sm:$0xff]  ;;  %v952_v18 = vld [vmem:[%s7121_s21 + $0x12a] sm:$0x3f] }
 0x1fe   : > { %2978 = vperm.xlu1 %6520, %v309_v35  }
 0x1ff   : > { %1727 = vmatmul.f32.gmra.mxu2 %v1592_v44  ;;  %v1773_v44 = vld [vmem:[%s7121_s21 + $0x25] sm:$0xff] }
 0x200   : > { %v8193_v53 = vpop.f32.mrf.mxu3 }
 0x201   : > { %v8196_v17 = vpop.f32.mrf.mxu0 }
 0x204   : > { %1290 = vmatmul.f32.gmra.mxu0 %v1161_v57  ;;  %v324_v57 = vld [vmem:[%s11367_s1 + $0x90] sm:$0xff] }
 0x205   : > { %1085 = vmatmul.f32.gmra.mxu3 %v950_v5  ;;  %1504 = vmatmul.f32.gmra.mxu1 %v8102_v19  ;;  %v318_v19 = vld [vmem:[%s11367_s1 + $0x60] sm:$0xff]  ;;  %v319_v5 = vld [vmem:[%s11367_s1 + $0x68] sm:$0xff] }
 0x206   : > { %2998 = vperm.xlu1 %6520, %v313_v10   ;;  %3023 = vperm.xlu0 %6519, %v318_v19  }
 0x207   : > { %1730 = vmatmul.f32.gmra.mxu2 %v1593_v61  ;;  %v1774_v61 = vld [vmem:[%s7121_s21 + $0x2d] sm:$0xff] }
 0x208   : > { %v8210_v42 = vpop.f32.mrf.mxu3 }
 0x209   : > { %v8213_v27 = vpop.f32.mrf.mxu0 }
 0x20c   : > { %1293 = vmatmul.f32.gmra.mxu0 %v1162_v26  ;;  %v327_v26 = vld [vmem:[%s11367_s1 + $0xa8] sm:$0xff] }
 0x20d   : > { %1088 = vmatmul.f32.gmra.mxu3 %v951_v1  ;;  %1507 = vmatmul.f32.gmra.mxu1 %v8122_v33  ;;  %v316_v33 = vld [vmem:[%s11367_s1 + $0x50] sm:$0xff]  ;;  %v310_v1 = vld [vmem:[%s11367_s1 + $0x20] sm:$0xff] }
 0x20e   : > { %3013 = vperm.xlu1 %6520, %v316_v33   ;;  %3038 = vperm.xlu0 %6519, %v321_v55   ;;  %v325_v33 = vld [vmem:[%s11367_s1 + $0x98] sm:$0xff] }
 0x20f   : > { %1733 = vmatmul.f32.gmra.mxu2 %v1594_v34  ;;  %2983 = vperm.xlu2 %6521, %v310_v1   ;;  %v1775_v34 = vld [vmem:[%s7121_s21 + $0x35] sm:$0xff] }
 0x210   : > { %v8227_v20 = vpop.f32.mrf.mxu3  ;;  %v3264_v55 = vld [vmem:[%s11370_s4 + $0x78] sm:$0xff] }
 0x211   : > { %11479 = vst [vmem:[#allocation3_spill] sm:$0xff] %v8227_v20  ;;  %v8230_v32 = vpop.f32.mrf.mxu0  ;;  %3443 = vmatpush.msra.mxu2 %v3264_v55  ;;  %v333_v1 = vld [vmem:[%s11367_s1 + $0xd8] sm:$0xff] }
 0x214   : > { %1296 = vmatmul.f32.gmra.mxu0 %v1163_v21  ;;  %v311_v21 = vld [vmem:[%s11367_s1 + $0x28] sm:$0xff] }
 0x215   : > { %1091 = vmatmul.f32.gmra.mxu3 %v952_v18  ;;  %1510 = vmatmul.f32.gmra.mxu1 %v8136_v59  ;;  %v1380_v18 = vld [vmem:[%s7121_s21 + $0x12c] sm:$0x3f] }
 0x216   : > { %3028 = vperm.xlu1 %6520, %v319_v5   ;;  %3053 = vperm.xlu0 %6519, %v324_v57   ;;  %v1776_v5 = vld [vmem:[%s7121_s21 + $0x3d] sm:$0xff]  ;;  %v1987_v57 = vld [vmem:[%s7121_s21 + $0x26] sm:$0xff] }
 0x217   : > { %2988 = vperm.xlu2 %6521, %v311_v21   ;;  %v331_v21 = vld [vmem:[%s11367_s1 + $0xc8] sm:$0xff] }
 0x218   : > { %v8241_v7 = vpop.f32.mrf.mxu3 }
 0x219   : > { %11480 = vst [vmem:[#allocation4_spill] sm:$0xff] %v8241_v7  ;;  %v8243_v49 = vpop.f32.mrf.mxu0  ;;  %v2004_v7 = vld [vmem:[%s7121_s21 + $0xae] sm:$0xff] }
 0x21c   : > { %1299 = vmatmul.f32.gmra.mxu0 %v1164_v11 }
 0x21d   : > { %1842 = vmatmul.f32.vlgmr.msra.gmra.mxu3 %v1773_v44  ;;  %1513 = vmatmul.f32.gmra.mxu1 %v8156_v22  ;;  %v322_v22 = vld [vmem:[%s11367_s1 + $0x80] sm:$0xff] }
 0x21e   : > { %3043 = vperm.xlu1 %6520, %v322_v22   ;;  %3068 = vperm.xlu0 %6519, %v327_v26  }
 0x220   : > { %v8254_v59 = vpop.f32.mrf.mxu3 }
 0x221   : > { %11481 = vst [vmem:[#allocation5_spill] sm:$0xff] %v8254_v59  ;;  %v8259_v35 = vpop.f32.mrf.mxu0 }
 0x222   : > { %11482 = vst [vmem:[#allocation6_spill] sm:$0xff] %v8259_v35 }
 0x224   : > { %1302 = vmatmul.f32.gmra.mxu0 %v1165_v39  ;;  %v314_v39 = vld [vmem:[%s11367_s1 + $0x40] sm:$0xff] }
 0x225   : > { %1845 = vmatmul.f32.gmra.mxu3 %v1774_v61  ;;  %1516 = vmatmul.f32.gmra.mxu1 %v8173_v51  ;;  %v330_v51 = vld [vmem:[%s11367_s1 + $0xc0] sm:$0xff]  ;;  %v328_v61 = vld [vmem:[%s11367_s1 + $0xb0] sm:$0xff] }
 0x226   : > { %3058 = vperm.xlu1 %6520, %v325_v33   ;;  %3083 = vperm.xlu0 %6519, %v330_v51   ;;  %v336_v33 = vld [vmem:[%s11367_s1 + $0xf0] sm:$0xff] }
 0x227   : > { %3003 = vperm.xlu2 %6521, %v314_v39   ;;  %v3263_v51 = vld [vmem:[%s11370_s4 + $0x70] sm:$0xff] }
 0x228   : > { %v8273_v10 = vpop.f32.mrf.mxu3  ;;  %3444 = vmatpush.msra.mxu2 %v3263_v51  ;;  %v320_v39 = vld [vmem:[%s11367_s1 + $0x70] sm:$0xff]  ;;  %v323_v51 = vld [vmem:[%s11367_s1 + $0x88] sm:$0xff] }
 0x229   : > { %11483 = vst [vmem:[#allocation7_spill] sm:$0xff] %v8273_v10  ;;  %v8275_v19 = vpop.f32.mrf.mxu0  ;;  %v1791_v10 = vld [vmem:[%s7121_s21 + $0xb5] sm:$0xff] }
 0x22a   : > { %11484 = vst [vmem:[#allocation8_spill] sm:$0xff] %v8275_v19 }
 0x22c   : > { %1305 = vmatmul.f32.gmra.mxu0 %v1166_v9  ;;  %v1777_v9 = vld [vmem:[%s7121_s21 + $0x45] sm:$0xff] }
 0x22d   : > { %1848 = vmatmul.f32.gmra.mxu3 %v1775_v34  ;;  %1519 = vmatmul.f32.gmra.mxu1 %v1380_v18  ;;  %v1988_v34 = vld [vmem:[%s7121_s21 + $0x2e] sm:$0xff]  ;;  %v317_v18 = vld [vmem:[%s11367_s1 + $0x58] sm:$0xff] }
 0x22e   : > { %3073 = vperm.xlu1 %6520, %v328_v61   ;;  %3098 = vperm.xlu0 %6519, %v333_v1   ;;  %v334_v61 = vld [vmem:[%s11367_s1 + $0xe0] sm:$0xff]  ;;  %v339_v1 = vld [vmem:[%s11367_s1 + $0x108] sm:$0xff] }
 0x22f   : > { %3018 = vperm.xlu2 %6521, %v317_v18  }
 0x230   : > { %v8292_v11 = vpop.f32.mrf.mxu3 }
 0x231   : > { %11485 = vst [vmem:[#allocation9_spill] sm:$0xff] %v8292_v11  ;;  %v8294_v44 = vpop.f32.mrf.mxu0 }
 0x232   : > { %11486 = vst [vmem:[#allocation10_spill] sm:$0xff] %v8294_v44  ;;  %v2002_v44 = vld [vmem:[%s7121_s21 + $0x9e] sm:$0xff] }
 0x234   : > { %2056 = vmatmul.f32.vlgmr.msra.gmra.mxu0 %v1987_v57  ;;  %v1778_v57 = vld [vmem:[%s7121_s21 + $0x4d] sm:$0xff] }
 0x235   : > { %1851 = vmatmul.f32.gmra.mxu3 %v1776_v5 }
 0x236   : > { %3088 = vperm.xlu1 %6520, %v331_v21   ;;  %3113 = vperm.xlu0 %6519, %v336_v33   ;;  %v1779_v21 = vld [vmem:[%s7121_s21 + $0x55] sm:$0xff]  ;;  %v1990_v33 = vld [vmem:[%s7121_s21 + $0x3e] sm:$0xff] }
 0x237   : > { %3033 = vperm.xlu2 %6521, %v320_v39   ;;  %v3262_v39 = vld [vmem:[%s11370_s4 + $0x68] sm:$0xff] }
 0x238   : > { %v8310_v22 = vpop.f32.mrf.mxu3  ;;  %3445 = vmatpush.msra.mxu2 %v3262_v39 }
 0x239   : > { %11487 = vst [vmem:[#allocation11_spill] sm:$0xff] %v8310_v22  ;;  %v8312_v26 = vpop.f32.mrf.mxu0  ;;  %v1994_v22 = vld [vmem:[%s7121_s21 + $0x5e] sm:$0xff] }
 0x23a   : > { %11488 = vst [vmem:[#allocation12_spill] sm:$0xff] %v8312_v26 }
 0x23c   : > { %2059 = vmatmul.f32.gmra.mxu0 %v1988_v34 }
 0x23d   : > { %1854 = vmatmul.f32.gmra.mxu3 %v1777_v9  ;;  %v6335_v9 = vld [vmem:[%s11370_s4 + $0xa8] sm:$0xff] }
 0x23e   : > { %3103 = vperm.xlu1 %6520, %v334_v61   ;;  %3128 = vperm.xlu0 %6519, %v339_v1   ;;  %v1780_v1 = vld [vmem:[%s7121_s21 + $0x5d] sm:$0xff] }
 0x23f   : > { %3328 = vmatpush.msra.mxu1 %v6335_v9  ;;  %3048 = vperm.xlu2 %6521, %v323_v51   ;;  %v1991_v9 = vld [vmem:[%s7121_s21 + $0x46] sm:$0xff] }
 0x240   : > { %v8328_v55 = vpop.f32.mrf.mxu3  ;;  %v326_v51 = vld [vmem:[%s11367_s1 + $0xa0] sm:$0xff] }
 0x241   : > { %11489 = vst [vmem:[#allocation13_spill] sm:$0xff] %v8328_v55  ;;  %v8330_v5 = vpop.f32.mrf.mxu0 }
 0x242   : > { %11490 = vst [vmem:[#allocation59_spill] sm:$0xff] %v8330_v5  ;;  %v1997_v5 = vld [vmem:[%s7121_s21 + $0x76] sm:$0xff] }
 0x244   : > { %2062 = vmatmul.f32.gmra.mxu0 %v1989_v4 }
 0x245   : > { %1857 = vmatmul.f32.gmra.mxu3 %v1778_v57  ;;  %v337_v57 = vld [vmem:[%s11367_s1 + $0xf8] sm:$0xff] }
 0x246   : > { %3118 = vperm.xlu1 %6520, %v337_v57  }
 0x247   : > { %3063 = vperm.xlu2 %6521, %v326_v51   ;;  %v329_v51 = vld [vmem:[%s11367_s1 + $0xb8] sm:$0xff] }
 0x248   : > { %v8346_v34 = vpop.f32.mrf.mxu3 }
 0x249   : > { %11491 = vst [vmem:[#allocation60_spill] sm:$0xff] %v8346_v34  ;;  %v8348_v18 = vpop.f32.mrf.mxu0  ;;  %v1992_v34 = vld [vmem:[%s7121_s21 + $0x4e] sm:$0xff] }
 0x24a   : > { %11492 = vst [vmem:[#allocation61_spill] sm:$0xff] %v8348_v18  ;;  %v1783_v18 = vld [vmem:[%s7121_s21 + $0x75] sm:$0xff] }
 0x24c   : > { %2065 = vmatmul.f32.gmra.mxu0 %v1990_v33  ;;  %v6334_v33 = vld [vmem:[%s11370_s4 + $0xa0] sm:$0xff] }
 0x24d   : > { %1860 = vmatmul.f32.gmra.mxu3 %v1779_v21  ;;  %v340_v21 = vld [vmem:[%s11367_s1 + $0x110] sm:$0xff]  ;;  %3329 = vmatpush.msra.mxu1 %v6334_v33 }
 0x24e   : > { %3133 = vperm.xlu1 %6520, %v340_v21   ;;  %v1782_v33 = vld [vmem:[%s7121_s21 + $0x6d] sm:$0xff] }
 0x24f   : > { %3078 = vperm.xlu2 %6521, %v329_v51   ;;  %v332_v51 = vld [vmem:[%s11367_s1 + $0xd0] sm:$0xff] }
 0x250   : > { %v8358_v4 = vpop.f32.mrf.mxu3 }
 0x251   : > { %11493 = vst [vmem:[#allocation62_spill] sm:$0xff] %v8358_v4  ;;  %v8363_v61 = vpop.f32.mrf.mxu0  ;;  %v1781_v4 = vld [vmem:[%s7121_s21 + $0x65] sm:$0xff] }
 0x252   : > { %11494 = vst [vmem:[#allocation63_spill] sm:$0xff] %v8363_v61  ;;  %v3261_v61 = vld [vmem:[%s11370_s4 + $0x60] sm:$0xff] }
 0x253   : > { %3446 = vmatpush.msra.mxu2 %v3261_v61  ;;  %v335_v61 = vld [vmem:[%s11367_s1 + $0xe8] sm:$0xff] }
 0x254   : > { %2068 = vmatmul.f32.gmra.mxu0 %v1991_v9 }
 0x255   : > { %1863 = vmatmul.f32.gmra.mxu3 %v1780_v1  ;;  %v8385_v1 = vpop.f32.mrf.mxu1 }
 0x257   : > { %3093 = vperm.xlu2 %6521, %v332_v51  }
 0x258   : > { %v8376_v57 = vpop.f32.mrf.mxu3 }
 0x259   : > { %11495 = vst [vmem:[#allocation64_spill] sm:$0xff] %v8376_v57  ;;  %v8378_v39 = vpop.f32.mrf.mxu0  ;;  %v1993_v57 = vld [vmem:[%s7121_s21 + $0x56] sm:$0xff] }
 0x25a   : > { %11496 = vst [vmem:[#allocation65_spill] sm:$0xff] %v8378_v39  ;;  %v8393_v39 = vpop.f32.mrf.mxu2 }
 0x25c   : > { %2071 = vmatmul.f32.gmra.mxu0 %v1992_v34 }
 0x25d   : > { %1866 = vmatmul.f32.gmra.mxu3 %v1781_v4  ;;  %v8401_v34 = vpop.f32.mrf.mxu1 }
 0x25f   : > { %3108 = vperm.xlu2 %6521, %v335_v61   ;;  %v338_v61 = vld [vmem:[%s11367_s1 + $0x100] sm:$0xff] }
 0x260   : > { %v8387_v9 = vpop.f32.mrf.mxu3 }
 0x261   : > { %11497 = vst [vmem:[#allocation66_spill] sm:$0xff] %v8387_v9  ;;  %v8389_v21 = vpop.f32.mrf.mxu0 }
 0x262   : > { %11498 = vst [vmem:[#allocation67_spill] sm:$0xff] %v8389_v21  ;;  %v6333_v21 = vld [vmem:[%s11370_s4 + $0x98] sm:$0xff] }
 0x263   : > { %3330 = vmatpush.msra.mxu1 %v6333_v21  ;;  %v1784_v21 = vld [vmem:[%s7121_s21 + $0x7d] sm:$0xff] }
 0x264   : > { %2074 = vmatmul.f32.gmra.mxu0 %v1993_v57  ;;  %v8416_v57 = vpop.f32.mrf.mxu2 }
 0x265   : > { %1869 = vmatmul.f32.gmra.mxu3 %v1782_v33 }
 0x267   : > { %3123 = vperm.xlu2 %6521, %v338_v61   ;;  %v1785_v61 = vld [vmem:[%s7121_s21 + $0x85] sm:$0xff] }
 0x268   : > { %v1074_v4 = vpop.f32.mrf.mxu3 }
 0x269   : > { %v8404_v9 = vadd.f32 %v1074_v4, %v7804_v37  ;;  %v8409_v55 = vpop.f32.mrf.mxu0  ;;  %v8418_v37 = vpop.f32.mrf.mxu1 }
 0x26a   : > { %11500 = vst [vmem:[#allocation69_spill] sm:$0xff] %v8409_v55  ;;  %v1786_v55 = vld [vmem:[%s7121_s21 + $0x8d] sm:$0xff] }
 0x26b   : > { %11499 = vst [vmem:[#allocation68_spill] sm:$0xff] %v8404_v9  ;;  %v1995_v9 = vld [vmem:[%s7121_s21 + $0x66] sm:$0xff] }
 0x26c   : > { %2077 = vmatmul.f32.gmra.mxu0 %v1994_v22  ;;  %v3260_v22 = vld [vmem:[%s11370_s4 + $0x58] sm:$0xff] }
 0x26d   : > { %1872 = vmatmul.f32.gmra.mxu3 %v1783_v18  ;;  %3447 = vmatpush.msra.mxu2 %v3260_v22  ;;  %v8433_v18 = vpop.f32.mrf.mxu2  ;;  %v341_v22 = vld [vmem:[%s11367_s1 + $0x118] sm:$0x3f] }
 0x26f   : > { %3138 = vperm.xlu2 %6521, %v341_v22   ;;  %v1787_v22 = vld [vmem:[%s7121_s21 + $0x95] sm:$0xff] }
 0x270   : > { %v1077_v33 = vpop.f32.mrf.mxu3 }
 0x271   : > { %v8421_v51 = vadd.f32 %v1077_v33, %v7823_v15  ;;  %v8423_v4 = vpop.f32.mrf.mxu0 }
 0x272   : > { %11502 = vst [vmem:[#allocation71_spill] sm:$0xff] %v8423_v4 }
 0x273   : > { %11501 = vst [vmem:[#allocation70_spill] sm:$0xff] %v8421_v51  ;;  %v8438_v51 = vpop.f32.mrf.mxu1 }
 0x274   : > { %2080 = vmatmul.f32.gmra.mxu0 %v1995_v9  ;;  %v6332_v9 = vld [vmem:[%s11370_s4 + $0x90] sm:$0xff] }
 0x275   : > { %1875 = vmatmul.f32.gmra.mxu3 %v1784_v21  ;;  %v1996_v21 = vld [vmem:[%s7121_s21 + $0x6e] sm:$0xff]  ;;  %3331 = vmatpush.msra.mxu1 %v6332_v9 }
 0x278   : > { %v1080_v15 = vpop.f32.mrf.mxu3 }
 0x279   : > { %v8436_v33 = vadd.f32 %v1080_v15, %v7839_v43  ;;  %v8440_v4 = vpop.f32.mrf.mxu0  ;;  %v8450_v15 = vpop.f32.mrf.mxu2 }
 0x27a   : > { %11504 = vst [vmem:[#allocation73_spill] sm:$0xff] %v8440_v4 }
 0x27b   : > { %11503 = vst [vmem:[#allocation72_spill] sm:$0xff] %v8436_v33  ;;  %v8459_v11 = vpop.f32.mrf.mxu1 }
 0x27c   : > { %2083 = vmatmul.f32.gmra.mxu0 %v1996_v21 }
 0x27d   : > { %1878 = vmatmul.f32.gmra.mxu3 %v1785_v61  ;;  %v3259_v61 = vld [vmem:[%s11370_s4 + $0x50] sm:$0xff] }
 0x27e   : > { %3448 = vmatpush.msra.mxu2 %v3259_v61 }
 0x280   : > { %v1083_v43 = vpop.f32.mrf.mxu3 }
 0x281   : > { %v8453_v33 = vadd.f32 %v1083_v43, %v7856_v23  ;;  %v8455_v4 = vpop.f32.mrf.mxu0  ;;  %v1998_v43 = vld [vmem:[%s7121_s21 + $0x7e] sm:$0xff] }
 0x282   : > { %11506 = vst [vmem:[#allocation75_spill] sm:$0xff] %v8455_v4 }
 0x283   : > { %11505 = vst [vmem:[#allocation74_spill] sm:$0xff] %v8453_v33  ;;  %v8471_v33 = vpop.f32.mrf.mxu2 }
 0x284   : > { %2086 = vmatmul.f32.gmra.mxu0 %v1997_v5  ;;  %11509 = vst [vmem:[#allocation78_spill] sm:$0xff] %v8471_v33  ;;  %v8476_v5 = vpop.f32.mrf.mxu1  ;;  %v8622_v33 = vpop.permute.xlu0 %2963 }
 0x285   : > { %1881 = vmatmul.f32.gmra.mxu3 %v1786_v55  ;;  %v6331_v55 = vld [vmem:[%s11370_s4 + $0x88] sm:$0xff]  ;;  %11510 = vst [vmem:[#allocation79_spill] sm:$0xff] %v8476_v5 }
 0x286   : > { %3332 = vmatpush.msra.mxu1 %v6331_v55  ;;  %v3258_v55 = vld [vmem:[%s11370_s4 + $0x48] sm:$0xff]  ;;  %11532 = vst [vmem:[#allocation99_spill] sm:$0xff] %v8622_v33 }
 0x287   : > { %3449 = vmatpush.msra.mxu2 %v3258_v55 }
 0x288   : > { %v1086_v21 = vpop.f32.mrf.mxu3 }
 0x289   : > { %v8465_v9 = vadd.f32 %v1086_v21, %v7875_v30  ;;  %v8467_v23 = vpop.f32.mrf.mxu0 }
 0x28a   : > { %11508 = vst [vmem:[#allocation77_spill] sm:$0xff] %v8467_v23  ;;  %v1999_v23 = vld [vmem:[%s7121_s21 + $0x86] sm:$0xff] }
 0x28b   : > { %11507 = vst [vmem:[#allocation76_spill] sm:$0xff] %v8465_v9  ;;  %v1788_v9 = vld [vmem:[%s7121_s21 + $0x9d] sm:$0xff]  ;;  %v8485_v4 = vpop.f32.mrf.mxu2 }
 0x28c   : > { %2089 = vmatmul.f32.gmra.mxu0 %v1998_v43  ;;  %11513 = vst [vmem:[#allocation82_spill] sm:$0xff] %v8485_v4 }
 0x28d   : > { %1884 = vmatmul.f32.gmra.mxu3 %v1787_v22  ;;  %v8487_v22 = vpop.f32.mrf.mxu1 }
 0x28e   : > { %11514 = vst [vmem:[#allocation83_spill] sm:$0xff] %v8487_v22  ;;  %v1793_v22 = vld [vmem:[%s7121_s21 + $0xc5] sm:$0xff] }
 0x290   : > { %v1089_v61 = vpop.f32.mrf.mxu3 }
 0x291   : > { %v8479_v30 = vadd.f32 %v1089_v61, %v7894_v56  ;;  %v8481_v21 = vpop.f32.mrf.mxu0  ;;  %v1789_v61 = vld [vmem:[%s7121_s21 + $0xa5] sm:$0xff] }
 0x292   : > { %11512 = vst [vmem:[#allocation81_spill] sm:$0xff] %v8481_v21 }
 0x293   : > { %11511 = vst [vmem:[#allocation80_spill] sm:$0xff] %v8479_v30  ;;  %v2000_v30 = vld [vmem:[%s7121_s21 + $0x8e] sm:$0xff] }
 0x294   : > { %2092 = vmatmul.f32.gmra.mxu0 %v1999_v23  ;;  %v3256_v23 = vld [vmem:[%s11370_s4 + $0x38] sm:$0xff] }
 0x295   : > { %1887 = vmatmul.f32.gmra.mxu3 %v1788_v9  ;;  %v3257_v9 = vld [vmem:[%s11370_s4 + $0x40] sm:$0xff] }
 0x296   : > { %3450 = vmatpush.msra.mxu2 %v3257_v9  ;;  %v8513_v9 = vpop.f32.mrf.mxu1 }
 0x297   : > { %11518 = vst [vmem:[#allocation87_spill] sm:$0xff] %v8513_v9 }
 0x298   : > { %v1092_v43 = vpop.f32.mrf.mxu3  ;;  %3451 = vmatpush.msra.mxu2 %v3256_v23  ;;  %v3253_v23 = vld [vmem:[%s11370_s4 + $0x20] sm:$0xff] }
 0x299   : > { %v8493_v50 = vadd.f32 %v1092_v43, %v7913_v62  ;;  %v8495_v56 = vpop.f32.mrf.mxu0  ;;  %v3255_v62 = vld [vmem:[%s11370_s4 + $0x30] sm:$0xff]  ;;  %v8508_v43 = vpop.f32.mrf.mxu2 }
 0x29a   : > { %11516 = vst [vmem:[#allocation85_spill] sm:$0xff] %v8495_v56  ;;  %3452 = vmatpush.msra.mxu2 %v3255_v62  ;;  %v3252_v62 = vld [vmem:[%s11370_s4 + $0x18] sm:$0xff] }
 0x29b   : > { %11515 = vst [vmem:[#allocation84_spill] sm:$0xff] %v8493_v50  ;;  %v3254_v50 = vld [vmem:[%s11370_s4 + $0x28] sm:$0xff] }
 0x29c   : > { %2095 = vmatmul.f32.gmra.mxu0 %v2000_v30  ;;  %11517 = vst [vmem:[#allocation86_spill] sm:$0xff] %v8508_v43  ;;  %v2001_v30 = vld [vmem:[%s7121_s21 + $0x96] sm:$0xff]  ;;  %3453 = vmatpush.msra.mxu2 %v3254_v50  ;;  %v3250_v50 = vld [vmem:[%s11370_s4 + $0x8] sm:$0xff] }
 0x29d   : > { %1890 = vmatmul.f32.gmra.mxu3 %v1789_v61  ;;  %v1790_v61 = vld [vmem:[%s7121_s21 + $0xad] sm:$0xff] }
 0x29e   : > { %3454 = vmatpush.msra.mxu2 %v3253_v23 }
 0x2a0   : > { %v1843_v55 = vpop.f32.mrf.mxu3  ;;  %3455 = vmatpush.msra.mxu2 %v3252_v62 }
 0x2a1   : > { %v8515_v56 = vpop.f32.mrf.mxu0  ;;  %v8531_v26 = vpop.f32.mrf.mxu2 }
 0x2a2   : > { %11519 = vst [vmem:[#allocation88_spill] sm:$0xff] %v8515_v56  ;;  %v3251_v56 = vld [vmem:[%s11370_s4 + $0x10] sm:$0xff] }
 0x2a3   : > { %3456 = vmatpush.msra.mxu2 %v3251_v56  ;;  %11520 = vst [vmem:[#allocation89_spill] sm:$0xff] %v8531_v26  ;;  %v8540_v56 = vpop.f32.mrf.mxu1 }
 0x2a4   : > { %2098 = vmatmul.f32.gmra.mxu0 %v2001_v30  ;;  %v6828_v30 = vmov 0.0   ;;  %11522 = vst [vmem:[#allocation91_spill] sm:$0xff] %v8540_v56  ;;  %v8549_v56 = vld [vmem:[%s11369_s3] ss:$0 sm:$0xff] }
 0x2a5   : > { %1893 = vmatmul.f32.gmra.mxu3 %v1790_v61  ;;  %3457 = vmatpush.msra.mxu2 %v3250_v50  ;;  %v3249_v61 = vld [vmem:[%s11370_s4] sm:$0xff]  ;;  %342 = vst [vmem:[#allocation2] sm:$0xff] %v6828_v30 }
 0x2a6   : > { %343 = vst [vmem:[#allocation2 + $0x8] sm:$0xff] %v6828_v30  ;;  %v6330_v50 = vld [vmem:[%s11370_s4 + $0x80] sm:$0xff] }
 0x2a7   : > { %3458 = vmatpush.msra.mxu2 %v3249_v61  ;;  %344 = vst [vmem:[#allocation2 + $0x10] sm:$0x7] %v6828_v30  ;;  %3333 = vmatpush.msra.mxu1 %v6330_v50 }
 0x2a8   : > { %v1846_v21 = vpop.f32.mrf.mxu3  ;;  %345 = vst [vmem:[#allocation2 + $0x131] sm:$0xff] %v6828_v30  ;;  %3459 = vmatmul.f32.vlgmr.msra.gmra.mxu2 %v6828_v30 }
 0x2a9   : > { %v8533_v23 = vpop.f32.mrf.mxu0  ;;  %346 = vst [vmem:[#allocation2 + $0x139] sm:$0xff] %v6828_v30  ;;  %v8553_v59 = vpop.f32.mrf.mxu2  ;;  %v1952_v9 = vadd.f32 %v1846_v21, %v7985_v2 }
 0x2aa   : > { %11521 = vst [vmem:[#allocation90_spill] sm:$0xff] %v8533_v23  ;;  %v1951_v23 = vadd.f32 %v1843_v55, %v7970_v3 }
 0x2ab   : > { %347 = vst [vmem:[#allocation2 + $0x141] sm:$0x7] %v6828_v30  ;;  %v8558_v3 = vpop.f32.mrf.mxu1 }
 0x2ac   : > { %2101 = vmatmul.f32.gmra.mxu0 %v2002_v44  ;;  %v2003_v44 = vld [vmem:[%s7121_s21 + $0xa6] sm:$0xff]  ;;  %11523 = vst [vmem:[#allocation92_spill] sm:$0xff] %v8553_v59 }
 0x2ad   : > { %1896 = vmatmul.f32.gmra.mxu3 %v1791_v10  ;;  %v1792_v10 = vld [vmem:[%s7121_s21 + $0xbd] sm:$0xff]  ;;  %11524 = vst [vmem:[#allocation93_spill] sm:$0xff] %v8558_v3 }
 0x2ae   : > { %v3265_v26 = vld [vmem:[#allocation2 + $0x1] sm:$0xff]  ;;  %v3266_v59 = vld [vmem:[#allocation2 + $0x9] sm:$0xff] }
 0x2af   : > { %3334 = vmatmul.f32.vlgmr.msra.gmra.mxu1 %v3265_v26 }
 0x2b0   : > { %v1849_v62 = vpop.f32.mrf.mxu3  ;;  %3462 = vmatmul.f32.gmra.mxu2 %v6828_v30 }
 0x2b1   : > { %v2057_v61 = vpop.f32.mrf.mxu0  ;;  %v8564_v26 = vpop.f32.mrf.mxu2 }
 0x2b2   : > { %v2165_v40 = vadd.f32 %v2057_v61, %v1951_v23  ;;  %11525 = vst [vmem:[#allocation94_spill] sm:$0xff] %v8564_v26 }
 0x2b3   : > { %v8570_v2 = vpop.f32.mrf.mxu1 }
 0x2b4   : > { %v8556_v63 = vadd.f32 %v8549_v56, %v2165_v40  ;;  %2104 = vmatmul.f32.gmra.mxu0 %v2003_v44  ;;  %11526 = vst [vmem:[#allocation95_spill] sm:$0xff] %v8570_v2 }
 0x2b5   : > { %1899 = vmatmul.f32.gmra.mxu3 %v1792_v10  ;;  %v1953_v10 = vadd.f32 %v1849_v62, %v8003_v8 }
 0x2b6   : > { %v2241_v55 = vsub.f32 0.0, %v8556_v63 }
 0x2b7   : > { %3337 = vmatmul.f32.gmra.mxu1 %v3266_v59  ;;  %v2005_v59 = vld [vmem:[%s7121_s21 + $0xb6] sm:$0xff] }
 0x2b8   : > { %v1852_v50 = vpop.f32.mrf.mxu3  ;;  %v2277_v43 = vmul.f32 1.442695, %v2241_v55 }
 0x2b9   : > { %v2060_v19 = vpop.f32.mrf.mxu0 }
 0x2ba   : > { %6525 = vpow2.f32 %v2277_v43  ;;  %v2166_v40 = vadd.f32 %v2060_v19, %v1952_v9  ;;  %v1794_v19 = vld [vmem:[%s7121_s21 + $0xcd] sm:$0xff] }
 0x2bc   : > { %v8567_v23 = vadd.f32 %v8549_v56, %v2166_v40  ;;  %2107 = vmatmul.f32.gmra.mxu0 %v2004_v7  ;;  %v8578_v7 = vpop.f32.mrf.mxu2 }
 0x2bd   : > { %1902 = vmatmul.f32.gmra.mxu3 %v1793_v22  ;;  %11527 = vst [vmem:[#allocation96_spill] sm:$0xff] %v8578_v7  ;;  %v2006_v7 = vld [vmem:[%s7121_s21 + $0xbe] sm:$0xff] }
 0x2be   : > { %v2242_v30 = vsub.f32 0.0, %v8567_v23 }
 0x2c0   : > { %v1855_v21 = vpop.f32.mrf.mxu3  ;;  %v6526_v61 = vpop.eup %6525  ;;  %v2279_v44 = vmul.f32 1.442695, %v2242_v30  ;;  %v1954_v30 = vadd.f32 %v1852_v50, %v8018_v16 }
 0x2c1   : > { %v2349_v43 = vadd.f32 1.0, %v6526_v61  ;;  %v2063_v55 = vpop.f32.mrf.mxu0  ;;  %v1955_v35 = vadd.f32 %v1855_v21, %v8036_v0 }
 0x2c2   : > { %6527 = vpow2.f32 %v2279_v44  ;;  %v2167_v9 = vadd.f32 %v2063_v55, %v1953_v10  ;;  %v6361_v10 = vld [vmem:[%s11370_s4 + $0x178] sm:$0xff]  ;;  %v8587_v55 = vpop.f32.mrf.mxu1 }
 0x2c3   : > { %6529 = vrcp.f32 %v2349_v43  ;;  %11528 = vst [vmem:[#allocation97_spill] sm:$0xff] %v8587_v55  ;;  %3621 = vmatpush.msrb.mxu3 %v6361_v10  ;;  %vm2390_vm1 = vweird.f32 %v2349_v43 }
 0x2c4   : > { %v8576_v22 = vadd.f32 %v8549_v56, %v2167_v9  ;;  %2110 = vmatmul.f32.gmra.mxu0 %v2005_v59  ;;  %v1795_v59 = vld [vmem:[%s7121_s21 + $0xd5] sm:$0xff] }
 0x2c5   : > { %1905 = vmatmul.f32.gmra.mxu3 %v1794_v19 }
 0x2c6   : > { %v2243_v40 = vsub.f32 0.0, %v8576_v22 }
 0x2c8   : > { %v8581_v8 = vpop.f32.mrf.mxu3  ;;  %v6528_v62 = vpop.eup %6527  ;;  %v2281_v61 = vmul.f32 1.442695, %v2243_v40  ;;  %v2396_v40 = vand.u32 2147483648, %v2349_v43 }
 0x2c9   : > { %v6530_v44 = vpop.eup %6529  ;;  %v8589_v9 = vadd.f32 1.0, %v6528_v62  ;;  %v2066_v19 = vpop.f32.mrf.mxu0  ;;  %v2394_v62 = vand.u32 2147483647, %v2349_v43 }
 0x2ca   : > { %v2386_v2 = vmul.f32 %v6530_v44, %v2349_v43  ;;  %6531 = vpow2.f32 %v2281_v61  ;;  %v2168_v26 = vadd.f32 %v2066_v19, %v1954_v30  ;;  %vm2391_vm0 = vweird.f32 %v6530_v44  ;;  %v8600_v30 = vpop.f32.mrf.mxu2  ;;  %v1796_v43 = vld [vmem:[%s7121_s21 + $0xdd] sm:$0xff]  ;;  %v8620_v5 = vpop.f32.mrf.mxu1 }
 0x2cb   : > { %6533 = vrcp.f32 %v8589_v9  ;;  %11529 = vst [vmem:[#allocation98_spill] sm:$0xff] %v8600_v30  ;;  %vm8608_vm2 = vmor %vm2390_vm1, %vm2391_vm0  ;;  %vm2395_vm3 = vcmp.eq.f32.partialorder %v2394_v62, 8.507059e+37  ;;  %vm2405_vm5 = vweird.f32 %v8589_v9 }
 0x2cc   : > { %v2387_v16 = vsub.f32 1.0, %v2386_v2  ;;  %v8595_v50 = vadd.f32 %v8549_v56, %v2168_v26  ;;  %2113 = vmatmul.f32.gmra.mxu0 %v2006_v7  ;;  %v6377_v26 = vld [vmem:[%s11370_s4 + $0x1f8] sm:$0xff] }
 0x2cd   : > { %1908 = vmatmul.f32.gmra.mxu3 %v1795_v59  ;;  %v6393_v7 = vld [vmem:[%s11370_s4 + $0x278] sm:$0xff]  ;;  %3835 = vmatpush.msrb.mxu0 %v6377_v26  ;;  %v2409_v26 = vand.u32 2147483647, %v8589_v9 }
 0x2ce   : > { %v2388_v3 = vmul.f32 %v6530_v44, %v2387_v16  ;;  %v2244_v10 = vsub.f32 0.0, %v8595_v50  ;;  %v2397_v16 = vor.u32 1.1754944e-38, %v2396_v40  ;;  %4049 = vmatpush.msrb.mxu1 %v6393_v7 }
 0x2cf   : > { %vm2410_vm7 = vcmp.eq.f32.partialorder %v2409_v26, 8.507059e+37  ;;  %v8652_v26 = vpop.permute.xlu0 %2968 }
 0x2d0   : > { %v8598_v55 = vpop.f32.mrf.mxu3  ;;  %v6532_v52 = vpop.eup %6531  ;;  %v2389_v61 = vadd.f32 %v6530_v44, %v2388_v3  ;;  %v2283_v2 = vmul.f32 1.442695, %v2244_v10  ;;  %v2007_v10 = vld [vmem:[%s7121_s21 + $0xc6] sm:$0xff]  ;;  %11534 = vst [vmem:[#allocation101_spill] sm:$0xff] %v8652_v26 }
 0x2d1   : > { %v6534_v19 = vpop.eup %6533  ;;  %v8613_v30 = vadd.f32 1.0, %v6532_v52  ;;  %v2069_v3 = vpop.f32.mrf.mxu0 }
 0x2d2   : > { %v2393_v4 = vsel %vm8608_vm2, %v6530_v44, %v2389_v61  ;;  %v2401_v20 = vmul.f32 %v6534_v19, %v8589_v9  ;;  %6535 = vpow2.f32 %v2283_v2  ;;  %v2169_v21 = vadd.f32 %v2069_v3, %v1955_v35 }
 0x2d3   : > { %v2398_v40 = vsel %vm2395_vm3, %v2397_v16, %v2393_v4  ;;  %6537 = vrcp.f32 %v8613_v30  ;;  %v2411_v44 = vand.u32 2147483648, %v8589_v9  ;;  %vm2406_vm4 = vweird.f32 %v6534_v19  ;;  %v6360_v9 = vld [vmem:[%s11370_s4 + $0x170] sm:$0xff] }
 0x2d4   : > { %v2925_v52 = vmul.f32 %v2398_v40, %v8556_v63  ;;  %v2402_v0 = vsub.f32 1.0, %v2401_v20  ;;  %2116 = vmatmul.f32.gmra.mxu0 %v2007_v10  ;;  %v8630_v4 = vadd.f32 %v8549_v56, %v2169_v21  ;;  %vm2407_vm6 = vmor %vm2405_vm5, %vm2406_vm4  ;;  %v2008_v10 = vld [vmem:[%s7121_s21 + $0xce] sm:$0xff]  ;;  %v8640_v40 = vpop.f32.mrf.mxu2  ;;  %3622 = vmatpush.msrb.mxu3 %v6360_v9  ;;  %vm2420_vm9 = vweird.f32 %v8613_v30 }
 0x2d5   : > { %1911 = vmatmul.f32.gmra.mxu3 %v1796_v43  ;;  %v2412_v59 = vor.u32 1.1754944e-38, %v2411_v44  ;;  %v1797_v43 = vld [vmem:[%s7121_s21 + $0xe5] sm:$0xff]  ;;  %v1956_v44 = vadd.f32 %v8581_v8, %v8051_v31  ;;  %v2424_v31 = vand.u32 2147483647, %v8613_v30 }
 0x2d6   : > { %v3141_v62 = vmul.f32 %v8622_v33, %v2925_v52  ;;  %v2403_v61 = vmul.f32 %v6534_v19, %v2402_v0  ;;  %v2245_v35 = vsub.f32 0.0, %v8630_v4 }
 0x2d7   : > { %vm2425_vm11 = vcmp.eq.f32.partialorder %v2424_v31, 8.507059e+37 }
 0x2d8   : > { %v8632_v2 = vpop.f32.mrf.mxu3  ;;  %v6536_v63 = vpop.eup %6535  ;;  %3177 = vst [vmem:[#allocation2 + $0x13] sm:$0xff] %v3141_v62  ;;  %v2404_v20 = vadd.f32 %v6534_v19, %v2403_v61  ;;  %v2285_v21 = vmul.f32 1.442695, %v2245_v35 }
 0x2d9   : > { %v6538_v7 = vpop.eup %6537  ;;  %v8636_v16 = vadd.f32 1.0, %v6536_v63  ;;  %v2072_v3 = vpop.f32.mrf.mxu0 }
 0x2da   : > { %v2408_v52 = vsel %vm2407_vm6, %v6534_v19, %v2404_v20  ;;  %v2416_v0 = vmul.f32 %v6538_v7, %v8613_v30  ;;  %v8650_v19 = vpop.f32.mrf.mxu1  ;;  %v2426_v20 = vand.u32 2147483648, %v8613_v30  ;;  %v2170_v35 = vadd.f32 %v2072_v3, %v1956_v44  ;;  %v8669_v30 = vpop.permute.xlu1 %2973 }
 0x2db   : > { %v2413_v62 = vsel %vm2410_vm7, %v2412_v59, %v2408_v52  ;;  %6539 = vrcp.f32 %v8636_v16  ;;  %11533 = vst [vmem:[#allocation100_spill] sm:$0xff] %v8650_v19  ;;  %vm2421_vm8 = vweird.f32 %v6538_v7  ;;  %v1957_v3 = vadd.f32 %v8598_v55, %v8066_v54  ;;  %v6376_v19 = vld [vmem:[%s11370_s4 + $0x1f0] sm:$0xff] }
 0x2dc   : > { %v2926_v61 = vmul.f32 %v2413_v62, %v8567_v23  ;;  %v2417_v63 = vsub.f32 1.0, %v2416_v0  ;;  %6541 = vpow2.f32 %v2285_v21  ;;  %2119 = vmatmul.f32.gmra.mxu0 %v2008_v10  ;;  %v8658_v23 = vadd.f32 %v8549_v56, %v2170_v35  ;;  %vm2422_vm10 = vmor %vm2420_vm9, %vm2421_vm8  ;;  %11535 = vst [vmem:[#allocation102_spill] sm:$0xff] %v8669_v30 }
 0x2dd   : > { %1914 = vmatmul.f32.gmra.mxu3 %v1797_v43  ;;  %v2427_v9 = vor.u32 1.1754944e-38, %v2426_v20  ;;  %v2441_v31 = vand.u32 2147483648, %v8636_v16  ;;  %3836 = vmatpush.msrb.mxu0 %v6376_v19  ;;  %vm2435_vm13 = vweird.f32 %v8636_v16  ;;  %v1958_v19 = vadd.f32 %v8632_v2, %v8084_v38 }
 0x2de   : > { %v3142_v59 = vmul.f32 %v8652_v26, %v2926_v61  ;;  %v2418_v52 = vmul.f32 %v6538_v7, %v2417_v63  ;;  %v2246_v62 = vsub.f32 0.0, %v8658_v23  ;;  %v1798_v61 = vld [vmem:[%s7121_s21 + $0xed] sm:$0xff]  ;;  %v2009_v63 = vld [vmem:[%s7121_s21 + $0xd6] sm:$0xff] }
 0x2df   : > { %v3267_v43 = vld [vmem:[#allocation2 + $0x11] sm:$0xff] }
 0x2e0   : > { %v8660_v8 = vpop.f32.mrf.mxu3  ;;  %v3215_v10 = vld [vmem:[#allocation2 + $0x10] sm:$0xff]  ;;  %3178 = vst [vmem:[#allocation2 + $0x1b] sm:$0xff] %v3142_v59  ;;  %v2419_v0 = vadd.f32 %v6538_v7, %v2418_v52  ;;  %3340 = vmatmul.f32.gmra.mxu1 %v3267_v43  ;;  %v2287_v55 = vmul.f32 1.442695, %v2246_v62  ;;  %v8673_v43 = vpop.f32.mrf.mxu2 }
 0x2e1   : > { %3465 = vmatmul.f32.gmra.mxu2 %v3215_v10  ;;  %v6540_v21 = vpop.eup %6539  ;;  %v2075_v44 = vpop.f32.mrf.mxu0 }
 0x2e2   : > { %v6542_v35 = vpop.eup %6541  ;;  %v2423_v26 = vsel %vm2422_vm10, %v6538_v7, %v2419_v0  ;;  %v2431_v59 = vmul.f32 %v6540_v21, %v8636_v16  ;;  %v2171_v52 = vadd.f32 %v2075_v44, %v1957_v3  ;;  %vm2436_vm12 = vweird.f32 %v6540_v21  ;;  %v8687_v3 = vpop.f32.mrf.mxu1 }
 0x2e3   : > { %v2428_v33 = vsel %vm2425_vm11, %v2427_v9, %v2423_v26  ;;  %v8671_v54 = vadd.f32 1.0, %v6542_v35  ;;  %v2439_v26 = vand.u32 2147483647, %v8636_v16  ;;  %11536 = vst [vmem:[#allocation103_spill] sm:$0xff] %v8687_v3  ;;  %v6392_v35 = vld [vmem:[%s11370_s4 + $0x270] sm:$0xff]  ;;  %vm2437_vm14 = vmor %vm2435_vm13, %vm2436_vm12 }
 0x2e4   : > { %v2927_v20 = vmul.f32 %v2428_v33, %v8576_v22  ;;  %v2432_v10 = vsub.f32 1.0, %v2431_v59  ;;  %v8680_v7 = vadd.f32 %v8549_v56, %v2171_v52  ;;  %2122 = vmatmul.f32.gmra.mxu0 %v2009_v63  ;;  %v2442_v59 = vor.u32 1.1754944e-38, %v2441_v31  ;;  %4050 = vmatpush.msrb.mxu1 %v6392_v35  ;;  %v8705_v31 = vpop.permute.xlu1 %2978 }
 0x2e5   : > { %1917 = vmatmul.f32.gmra.mxu3 %v1798_v61  ;;  %6543 = vrcp.f32 %v8671_v54  ;;  %vm2440_vm15 = vcmp.eq.f32.partialorder %v2439_v26, 8.507059e+37  ;;  %11537 = vst [vmem:[#allocation104_spill] sm:$0xff] %v8705_v31  ;;  %vm2450_vm1 = vweird.f32 %v8671_v54 }
 0x2e6   : > { %v3143_v33 = vmul.f32 %v8669_v30, %v2927_v20  ;;  %v2433_v22 = vmul.f32 %v6540_v21, %v2432_v10  ;;  %6545 = vpow2.f32 %v2287_v55  ;;  %v2247_v0 = vsub.f32 0.0, %v8680_v7  ;;  %v1799_v55 = vld [vmem:[%s7121_s21 + $0xf5] sm:$0xff]  ;;  %v2010_v20 = vld [vmem:[%s7121_s21 + $0xde] sm:$0xff] }
 0x2e7   : > { %v3268_v62 = vld [vmem:[#allocation2 + $0x19] sm:$0xff]  ;;  %v2012_v30 = vld [vmem:[%s7121_s21 + $0xee] sm:$0xff] }
 0x2e8   : > { %v8689_v9 = vpop.f32.mrf.mxu3  ;;  %v3216_v44 = vld [vmem:[#allocation2 + $0x18] sm:$0xff]  ;;  %3179 = vst [vmem:[#allocation2 + $0x23] sm:$0xff] %v3143_v33  ;;  %v2434_v61 = vadd.f32 %v6540_v21, %v2433_v22  ;;  %v2289_v63 = vmul.f32 1.442695, %v2247_v0  ;;  %3343 = vmatmul.f32.gmra.mxu1 %v3268_v62 }
 0x2e9   : > { %3468 = vmatmul.f32.gmra.mxu2 %v3216_v44  ;;  %v2078_v52 = vpop.f32.mrf.mxu0 }
 0x2ea   : > { %v2438_v10 = vsel %vm2437_vm14, %v6540_v21, %v2434_v61  ;;  %6547 = vpow2.f32 %v2289_v63  ;;  %v2172_v16 = vadd.f32 %v2078_v52, %v1958_v19  ;;  %v8709_v21 = vpop.f32.mrf.mxu2  ;;  %v1959_v63 = vadd.f32 %v8660_v8, %v8096_v45  ;;  %v8723_v45 = vpop.f32.mrf.mxu1 }
 0x2eb   : > { %v6544_v33 = vpop.eup %6543  ;;  %v2443_v38 = vsel %vm2440_vm15, %v2442_v59, %v2438_v10  ;;  %11538 = vst [vmem:[#allocation105_spill] sm:$0xff] %v8709_v21  ;;  %v2454_v10 = vand.u32 2147483647, %v8671_v54 }
 0x2ec   : > { %v6546_v2 = vpop.eup %6545  ;;  %v2928_v22 = vmul.f32 %v2443_v38, %v8595_v50  ;;  %v2446_v0 = vmul.f32 %v6544_v33, %v8671_v54  ;;  %v8703_v62 = vadd.f32 %v8549_v56, %v2172_v16  ;;  %2125 = vmatmul.f32.gmra.mxu0 %v2010_v20  ;;  %v2456_v50 = vand.u32 2147483648, %v8671_v54  ;;  %v6359_v38 = vld [vmem:[%s11370_s4 + $0x168] sm:$0xff]  ;;  %11539 = vst [vmem:[#allocation106_spill] sm:$0xff] %v8723_v45 }
 0x2ed   : > { %1920 = vmatmul.f32.gmra.mxu3 %v1799_v55  ;;  %v8707_v44 = vadd.f32 1.0, %v6546_v2  ;;  %vm2451_vm0 = vweird.f32 %v6544_v33  ;;  %vm2455_vm3 = vcmp.eq.f32.partialorder %v2454_v10, 8.507059e+37  ;;  %v11543_v45 = vld [vmem:[#allocation15_spill] sm:$0xff] }
 0x2ee   : > { %v3144_v26 = vmul.f32 %v8705_v31, %v2928_v22  ;;  %v2447_v61 = vsub.f32 1.0, %v2446_v0  ;;  %v2248_v19 = vsub.f32 0.0, %v8703_v62  ;;  %3623 = vmatpush.msrb.mxu3 %v6359_v38  ;;  %v1800_v22 = vld [vmem:[%s7121_s21 + $0xfd] sm:$0xff]  ;;  %v2011_v0 = vld [vmem:[%s7121_s21 + $0xe6] sm:$0xff]  ;;  %vm2452_vm2 = vmor %vm2450_vm1, %vm2451_vm0 }
 0x2ef   : > { %6549 = vrcp.f32 %v8707_v44  ;;  %v3269_v59 = vld [vmem:[#allocation2 + $0x21] sm:$0xff]  ;;  %v2471_v31 = vand.u32 2147483648, %v8707_v44  ;;  %vm2465_vm5 = vweird.f32 %v8707_v44 }
 0x2f0   : > { %v8717_v35 = vpop.f32.mrf.mxu3  ;;  %v3217_v52 = vld [vmem:[#allocation2 + $0x20] sm:$0xff]  ;;  %v6548_v55 = vpop.eup %6547  ;;  %3180 = vst [vmem:[#allocation2 + $0x2b] sm:$0xff] %v3144_v26  ;;  %v2448_v20 = vmul.f32 %v6544_v33, %v2447_v61  ;;  %v2291_v16 = vmul.f32 1.442695, %v2248_v19  ;;  %3346 = vmatmul.f32.gmra.mxu1 %v3269_v59  ;;  %v2457_v19 = vor.u32 1.1754944e-38, %v2456_v50 }
 0x2f1   : > { %3471 = vmatmul.f32.gmra.mxu2 %v3217_v52  ;;  %v8725_v8 = vadd.f32 1.0, %v6548_v55  ;;  %v2081_v2 = vpop.f32.mrf.mxu0 }
 0x2f2   : > { %v2449_v26 = vadd.f32 %v6544_v33, %v2448_v20  ;;  %6551 = vpow2.f32 %v2291_v16  ;;  %v2173_v61 = vadd.f32 %v2081_v2, %v1959_v63  ;;  %v8738_v16 = vpop.permute.xlu2 %2983  ;;  %v8762_v3 = vpop.f32.mrf.mxu1 }
 0x2f3   : > { %6553 = vrcp.f32 %v8725_v8  ;;  %11540 = vst [vmem:[#allocation107_spill] sm:$0xff] %v8738_v16  ;;  %vm2480_vm9 = vweird.f32 %v8725_v8 }
 0x2f4   : > { %v2453_v59 = vsel %vm2452_vm2, %v6544_v33, %v2449_v26  ;;  %v8733_v52 = vadd.f32 %v8549_v56, %v2173_v61  ;;  %2128 = vmatmul.f32.gmra.mxu0 %v2011_v0  ;;  %v8742_v26 = vpop.f32.mrf.mxu2 }
 0x2f5   : > { %1923 = vmatmul.f32.gmra.mxu3 %v1800_v22  ;;  %v6550_v55 = vpop.eup %6549  ;;  %v2458_v38 = vsel %vm2455_vm3, %v2457_v19, %v2453_v59  ;;  %11541 = vst [vmem:[#allocation108_spill] sm:$0xff] %v8742_v26  ;;  %v6391_v19 = vld [vmem:[%s11370_s4 + $0x268] sm:$0xff] }
 0x2f6   : > { %v2929_v20 = vmul.f32 %v2458_v38, %v8630_v4  ;;  %v2461_v54 = vmul.f32 %v6550_v55, %v8707_v44  ;;  %v2249_v63 = vsub.f32 0.0, %v8733_v52  ;;  %v6375_v4 = vld [vmem:[%s11370_s4 + $0x1e8] sm:$0xff]  ;;  %v2469_v38 = vand.u32 2147483647, %v8707_v44  ;;  %4051 = vmatpush.msrb.mxu1 %v6391_v19  ;;  %v11545_v44 = vld [vmem:[#allocation16_spill] sm:$0xff] }
 0x2f7   : > { %v3270_v2 = vld [vmem:[#allocation2 + $0x29] sm:$0xff]  ;;  %3837 = vmatpush.msrb.mxu0 %v6375_v4  ;;  %vm2466_vm4 = vweird.f32 %v6550_v55 }
 0x2f8   : > { %v8740_v50 = vpop.f32.mrf.mxu3  ;;  %v3218_v33 = vld [vmem:[#allocation2 + $0x28] sm:$0xff]  ;;  %v6552_v10 = vpop.eup %6551  ;;  %v3145_v22 = vmul.f32 %v8738_v16, %v2929_v20  ;;  %v2462_v0 = vsub.f32 1.0, %v2461_v54  ;;  %v2293_v61 = vmul.f32 1.442695, %v2249_v63  ;;  %3349 = vmatmul.f32.gmra.mxu1 %v3270_v2  ;;  %v1960_v20 = vadd.f32 %v8689_v9, %v8114_v46  ;;  %vm2467_vm6 = vmor %vm2465_vm5, %vm2466_vm4 }
 0x2f9   : > { %3474 = vmatmul.f32.gmra.mxu2 %v3218_v33  ;;  %v6554_v59 = vpop.eup %6553  ;;  %v8755_v54 = vadd.f32 1.0, %v6552_v10  ;;  %v2084_v63 = vpop.f32.mrf.mxu0  ;;  %v1801_v16 = vld [vmem:[%s7121_s21 + $0x105] sm:$0xff]  ;;  %vm2470_vm7 = vcmp.eq.f32.partialorder %v2469_v38, 8.507059e+37 }
 0x2fa   : > { %3181 = vst [vmem:[#allocation2 + $0x33] sm:$0xff] %v3145_v22  ;;  %v2463_v26 = vmul.f32 %v6550_v55, %v2462_v0  ;;  %v2476_v2 = vmul.f32 %v6554_v59, %v8725_v8  ;;  %6555 = vpow2.f32 %v2293_v61  ;;  %v11542_v33 = vld [vmem:[#allocation14_spill] sm:$0xff]  ;;  %v2174_v10 = vadd.f32 %v2084_v63, %v1960_v20 }
 0x2fb   : > { %v632_v21 = vadd.f32 %v11543_v45, %v11542_v33  ;;  %11544 = vst [vmem:[#allocation14_spill] sm:$0xff] %v8762_v3  ;;  %6557 = vrcp.f32 %v8755_v54  ;;  %v2472_v22 = vor.u32 1.1754944e-38, %v2471_v31  ;;  %v2484_v0 = vand.u32 2147483647, %v8725_v8 }
 0x2fc   : > { %v2464_v46 = vadd.f32 %v6550_v55, %v2463_v26  ;;  %v2477_v9 = vsub.f32 1.0, %v2476_v2  ;;  %2131 = vmatmul.f32.gmra.mxu0 %v2012_v30  ;;  %v2486_v45 = vand.u32 2147483648, %v8725_v8  ;;  %vm2481_vm8 = vweird.f32 %v6554_v59  ;;  %v1802_v2 = vld [vmem:[%s7121_s21 + $0x10d] sm:$0xff] }
 0x2fd   : > { %1926 = vmatmul.f32.gmra.mxu3 %v1801_v16  ;;  %v8769_v26 = vadd.f32 %v8549_v56, %v2174_v10  ;;  %v893_v19 = vadd.f32 %v11545_v44, %v632_v21  ;;  %vm2482_vm10 = vmor %vm2480_vm9, %vm2481_vm8  ;;  %vm2485_vm11 = vcmp.eq.f32.partialorder %v2484_v0, 8.507059e+37  ;;  %v11548_v0 = vld [vmem:[#allocation17_spill] sm:$0xff]  ;;  %vm2495_vm13 = vweird.f32 %v8755_v54 }
 0x2fe   : > { %v2468_v61 = vsel %vm2467_vm6, %v6550_v55, %v2464_v46  ;;  %v2478_v4 = vmul.f32 %v6554_v59, %v2477_v9  ;;  %v2013_v55 = vld [vmem:[%s7121_s21 + $0xf6] sm:$0xff]  ;;  %v8780_v9 = vpop.permute.xlu2 %2988  ;;  %v2487_v21 = vor.u32 1.1754944e-38, %v2486_v45  ;;  %v1961_v45 = vadd.f32 %v8717_v35, %v8131_v13 }
 0x2ff   : > { %v2473_v20 = vsel %vm2470_vm7, %v2472_v22, %v2468_v61  ;;  %v2250_v63 = vsub.f32 0.0, %v8769_v26  ;;  %v1107_v46 = vadd.f32 %v8119_v47, %v893_v19  ;;  %11546 = vst [vmem:[#allocation15_spill] sm:$0xff] %v8780_v9  ;;  %v2499_v13 = vand.u32 2147483647, %v8755_v54 }
 0x300   : > { %v8772_v16 = vpop.f32.mrf.mxu3  ;;  %v6556_v30 = vpop.eup %6555  ;;  %v2930_v38 = vmul.f32 %v2473_v20, %v8658_v23  ;;  %v2479_v31 = vadd.f32 %v6554_v59, %v2478_v4  ;;  %v2501_v35 = vand.u32 2147483648, %v8755_v54 }
 0x301   : > { %v6558_v33 = vpop.eup %6557  ;;  %v8783_v10 = vadd.f32 1.0, %v6556_v30  ;;  %v3271_v22 = vld [vmem:[#allocation2 + $0x31] sm:$0xff]  ;;  %v2087_v23 = vpop.f32.mrf.mxu0  ;;  %v1321_v47 = vadd.f32 %v8161_v6, %v1107_v46  ;;  %v2295_v3 = vmul.f32 1.442695, %v2250_v63  ;;  %vm2500_vm15 = vcmp.eq.f32.partialorder %v2499_v13, 8.507059e+37 }
 0x302   : > { %v3219_v61 = vld [vmem:[#allocation2 + $0x30] sm:$0xff]  ;;  %v8785_v4 = vpop.f32.mrf.mxu2  ;;  %v3146_v8 = vmul.f32 %v8780_v9, %v2930_v38  ;;  %v2483_v44 = vsel %vm2482_vm10, %v6554_v59, %v2479_v31  ;;  %v2491_v20 = vmul.f32 %v6558_v33, %v8755_v54  ;;  %3352 = vmatmul.f32.gmra.mxu1 %v3271_v22  ;;  %v6358_v59 = vld [vmem:[%s11370_s4 + $0x160] sm:$0xff]  ;;  %v8799_v31 = vpop.f32.mrf.mxu1  ;;  %vm2496_vm12 = vweird.f32 %v6558_v33 }
 0x303   : > { %11547 = vst [vmem:[#allocation16_spill] sm:$0xff] %v8785_v4  ;;  %3477 = vmatmul.f32.gmra.mxu2 %v3219_v61  ;;  %v2488_v19 = vsel %vm2485_vm11, %v2487_v21, %v2483_v44  ;;  %6559 = vrcp.f32 %v8783_v10  ;;  %v11549_v38 = vld [vmem:[#allocation18_spill] sm:$0xff]  ;;  %v8801_v46 = vpop.permute.xlu0 %2993  ;;  %3624 = vmatpush.msrb.mxu3 %v6358_v59  ;;  %v1535_v22 = vadd.f32 %v8385_v1, %v1321_v47  ;;  %vm2497_vm14 = vmor %vm2495_vm13, %vm2496_vm12  ;;  %v2502_v1 = vor.u32 1.1754944e-38, %v2501_v35 }
 0x304   : > { %3182 = vst [vmem:[#allocation2 + $0x3b] sm:$0xff] %v3146_v8  ;;  %v2931_v30 = vmul.f32 %v2488_v19, %v8680_v7  ;;  %v2492_v4 = vsub.f32 1.0, %v2491_v20  ;;  %2134 = vmatmul.f32.gmra.mxu0 %v2013_v55  ;;  %v635_v6 = vadd.f32 %v11549_v38, %v11548_v0  ;;  %v2175_v7 = vadd.f32 %v2087_v23, %v1961_v45  ;;  %v6357_v19 = vld [vmem:[%s11370_s4 + $0x158] sm:$0xff]  ;;  %v6374_v0 = vld [vmem:[%s11370_s4 + $0x1e0] sm:$0xff] }
 0x305   : > { %1929 = vmatmul.f32.gmra.mxu3 %v1802_v2  ;;  %11550 = vst [vmem:[#allocation17_spill] sm:$0xff] %v8801_v46  ;;  %6561 = vpow2.f32 %v2295_v3  ;;  %v11551_v2 = vld [vmem:[#allocation19_spill] sm:$0xff]  ;;  %v1962_v23 = vadd.f32 %v8740_v50, %v8151_v14  ;;  %v1803_v50 = vld [vmem:[%s7121_s21 + $0x115] sm:$0xff]  ;;  %v6390_v38 = vld [vmem:[%s11370_s4 + $0x260] sm:$0xff]  ;;  %3838 = vmatpush.msrb.mxu0 %v6374_v0  ;;  %vm2510_vm1 = vweird.f32 %v8783_v10 }
 0x306   : > { %v3147_v63 = vmul.f32 %v8801_v46, %v2931_v30  ;;  %v2493_v21 = vmul.f32 %v6558_v33, %v2492_v4  ;;  %v894_v55 = vadd.f32 %v11551_v2, %v635_v6  ;;  %v8809_v61 = vadd.f32 %v8549_v56, %v2175_v7  ;;  %3625 = vmatpush.msrb.mxu3 %v6357_v19 }
 0x307   : > { %4052 = vmatpush.msrb.mxu1 %v6390_v38 }
 0x308   : > { %v8811_v8 = vpop.f32.mrf.mxu3  ;;  %3183 = vst [vmem:[#allocation2 + $0x43] sm:$0xff] %v3147_v63  ;;  %v2494_v44 = vadd.f32 %v6558_v33, %v2493_v21  ;;  %v1108_v3 = vadd.f32 %v8133_v48, %v894_v55  ;;  %v2251_v20 = vsub.f32 0.0, %v8809_v61  ;;  %v1749_v48 = vadd.f32 %v8393_v39, %v1535_v22  ;;  %v6356_v55 = vld [vmem:[%s11370_s4 + $0x150] sm:$0xff]  ;;  %v8844_v22 = vpop.permute.xlu1 %2998 }
 0x309   : > { %v8816_v4 = vpop.eup %6559  ;;  %v2090_v47 = vpop.f32.mrf.mxu0  ;;  %11552 = vst [vmem:[#allocation18_spill] sm:$0xff] %v8844_v22  ;;  %3626 = vmatpush.msrb.mxu3 %v6356_v55  ;;  %v11556_v55 = vld [vmem:[#allocation24_spill] sm:$0xff] }
 0x30a   : > { %v2498_v45 = vsel %vm2497_vm14, %v6558_v33, %v2494_v44  ;;  %v2506_v54 = vmul.f32 %v8816_v4, %v8783_v10  ;;  %v2176_v14 = vadd.f32 %v2090_v47, %v1962_v23  ;;  %v2297_v59 = vmul.f32 1.442695, %v2251_v20  ;;  %v2014_v33 = vld [vmem:[%s7121_s21 + $0xfe] sm:$0xff]  ;;  %v8835_v35 = vpop.f32.mrf.mxu2  ;;  %v6355_v20 = vld [vmem:[%s11370_s4 + $0x148] sm:$0xff]  ;;  %v8857_v47 = vpop.f32.mrf.mxu1 }
 0x30b   : > { %v2503_v30 = vsel %vm2500_vm15, %v2502_v1, %v2498_v45  ;;  %v6562_v6 = vpop.eup %6561  ;;  %v1322_v13 = vadd.f32 %v8175_v41, %v1108_v3  ;;  %v3272_v39 = vld [vmem:[#allocation2 + $0x39] sm:$0xff]  ;;  %v2514_v41 = vand.u32 2147483647, %v8783_v10  ;;  %v2516_v44 = vand.u32 2147483648, %v8783_v10  ;;  %3627 = vmatpush.msrb.mxu3 %v6355_v20 }
 0x30c   : > { %v2932_v7 = vmul.f32 %v2503_v30, %v8703_v62  ;;  %v2507_v63 = vsub.f32 1.0, %v2506_v54  ;;  %v3220_v21 = vld [vmem:[#allocation2 + $0x38] sm:$0xff]  ;;  %v8839_v2 = vadd.f32 %v8549_v56, %v2176_v14  ;;  %v8848_v23 = vadd.f32 1.0, %v6562_v6  ;;  %3355 = vmatmul.f32.gmra.mxu1 %v3272_v39  ;;  %2137 = vmatmul.f32.gmra.mxu0 %v2014_v33  ;;  %v11553_v30 = vld [vmem:[#allocation20_spill] sm:$0xff] }
 0x30d   : > { %6563 = vpow2.f32 %v2297_v59  ;;  %3480 = vmatmul.f32.gmra.mxu2 %v3220_v21  ;;  %vm2511_vm0 = vweird.f32 %v8816_v4  ;;  %1932 = vmatmul.f32.gmra.mxu3 %v1803_v50  ;;  %v1963_v54 = vadd.f32 %v8772_v16, %v1749_v48  ;;  %v6354_v50 = vld [vmem:[%s11370_s4 + $0x140] sm:$0xff]  ;;  %v11554_v59 = vld [vmem:[#allocation21_spill] sm:$0xff]  ;;  %v1536_v38 = vadd.f32 %v8401_v34, %v1322_v13  ;;  %v11555_v21 = vld [vmem:[#allocation23_spill] sm:$0xff] }
 0x30e   : > { %v3148_v62 = vmul.f32 %v8844_v22, %v2932_v7  ;;  %v2508_v3 = vmul.f32 %v8816_v4, %v2507_v63  ;;  %v2252_v1 = vsub.f32 0.0, %v8839_v2  ;;  %6565 = vrcp.f32 %v8848_v23  ;;  %vm2512_vm2 = vmor %vm2510_vm1, %vm2511_vm0  ;;  %3628 = vmatpush.msrb.mxu3 %v6354_v50 }
 0x30f   : > { %v638_v0 = vadd.f32 %v11554_v59, %v11553_v30  ;;  %v2517_v33 = vor.u32 1.1754944e-38, %v2516_v44  ;;  %vm2515_vm3 = vcmp.eq.f32.partialorder %v2514_v41, 8.507059e+37  ;;  %v3273_v10 = vld [vmem:[#allocation2 + $0x41] sm:$0xff]  ;;  %v641_v34 = vadd.f32 %v11556_v55, %v11555_v21  ;;  %v6353_v41 = vld [vmem:[%s11370_s4 + $0x138] sm:$0xff] }
 0x310   : > { %v8860_v19 = vpop.f32.mrf.mxu3  ;;  %3184 = vst [vmem:[#allocation2 + $0x4b] sm:$0xff] %v3148_v62  ;;  %v2509_v45 = vadd.f32 %v8816_v4, %v2508_v3  ;;  %v2299_v14 = vmul.f32 1.442695, %v2252_v1  ;;  %v3221_v48 = vld [vmem:[#allocation2 + $0x40] sm:$0xff]  ;;  %3629 = vmatpush.msrb.mxu3 %v6353_v41  ;;  %v6373_v21 = vld [vmem:[%s11370_s4 + $0x1d8] sm:$0xff]  ;;  %vm2525_vm5 = vweird.f32 %v8848_v23 }
 0x311   : > { %v2093_v6 = vpop.f32.mrf.mxu0  ;;  %v895_v39 = vadd.f32 %v7715_v29, %v638_v0  ;;  %v1804_v62 = vld [vmem:[%s7121_s21 + $0x11d] sm:$0xff]  ;;  %v2015_v3 = vld [vmem:[%s7121_s21 + $0x106] sm:$0xff]  ;;  %v896_v29 = vadd.f32 %v7733_v60, %v641_v34  ;;  %v6352_v60 = vld [vmem:[%s11370_s4 + $0x130] sm:$0xff]  ;;  %3839 = vmatpush.msrb.mxu0 %v6373_v21 }
 0x312   : > { %v2513_v16 = vsel %vm2512_vm2, %v8816_v4, %v2509_v45  ;;  %6567 = vpow2.f32 %v2299_v14  ;;  %v2177_v7 = vadd.f32 %v2093_v6, %v1963_v54  ;;  %v8892_v54 = vpop.permute.xlu2 %3003  ;;  %v8895_v14 = vpop.f32.mrf.mxu2  ;;  %3630 = vmatpush.msrb.mxu3 %v6352_v60  ;;  %v6389_v34 = vld [vmem:[%s11370_s4 + $0x258] sm:$0xff] }
 0x313   : > { %v6564_v63 = vpop.eup %6563  ;;  %v2518_v13 = vsel %vm2515_vm3, %v2517_v33, %v2513_v16  ;;  %v1109_v45 = vadd.f32 %v8153_v24, %v895_v39  ;;  %11557 = vst [vmem:[#allocation19_spill] sm:$0xff] %v8892_v54  ;;  %v1110_v24 = vadd.f32 %v8170_v58, %v896_v29  ;;  %v6351_v39 = vld [vmem:[%s11370_s4 + $0x128] sm:$0xff]  ;;  %4053 = vmatpush.msrb.mxu1 %v6389_v34 }
 0x314   : > { %v2933_v44 = vmul.f32 %v2518_v13, %v8733_v52  ;;  %v8880_v1 = vadd.f32 1.0, %v6564_v63  ;;  %v8883_v4 = vadd.f32 %v8549_v56, %v2177_v7  ;;  %v8888_v20 = vpop.eup %6565  ;;  %3358 = vmatmul.f32.gmra.mxu1 %v3273_v10  ;;  %v1750_v52 = vadd.f32 %v8416_v57, %v1536_v38  ;;  %2140 = vmatmul.f32.gmra.mxu0 %v2015_v3  ;;  %v8911_v10 = vpop.f32.mrf.mxu1  ;;  %v11559_v3 = vld [vmem:[#allocation27_spill] sm:$0xff] }
 0x315   : > { %3483 = vmatmul.f32.gmra.mxu2 %v3221_v48  ;;  %v2521_v30 = vmul.f32 %v8888_v20, %v8848_v23  ;;  %1935 = vmatmul.f32.gmra.mxu3 %v1804_v62  ;;  %v1323_v59 = vadd.f32 %v8196_v17, %v1109_v45  ;;  %v1324_v16 = vadd.f32 %v8213_v27, %v1110_v24  ;;  %v2531_v48 = vand.u32 2147483648, %v8848_v23  ;;  %v11558_v62 = vld [vmem:[#allocation26_spill] sm:$0xff]  ;;  %v2016_v45 = vld [vmem:[%s7121_s21 + $0x10e] sm:$0xff]  ;;  %v11560_v24 = vld [vmem:[#allocation29_spill] sm:$0xff] }
 0x316   : > { %v3149_v50 = vmul.f32 %v8892_v54, %v2933_v44  ;;  %6569 = vrcp.f32 %v8880_v1  ;;  %v2253_v57 = vsub.f32 0.0, %v8883_v4  ;;  %v1964_v6 = vadd.f32 %v8811_v8, %v1750_v52  ;;  %v1805_v29 = vld [vmem:[%s7121_s21 + $0x125] sm:$0xff]  ;;  %3631 = vmatpush.msrb.mxu3 %v6351_v39 }
 0x317   : > { %v2522_v33 = vsub.f32 1.0, %v2521_v30  ;;  %v3274_v17 = vld [vmem:[#allocation2 + $0x49] sm:$0xff]  ;;  %vm2526_vm4 = vweird.f32 %v8888_v20  ;;  %v2529_v27 = vand.u32 2147483647, %v8848_v23  ;;  %v644_v44 = vadd.f32 %v11559_v3, %v11558_v62 }
 0x318   : > { %v8907_v0 = vpop.f32.mrf.mxu3  ;;  %v6568_v38 = vpop.eup %6567  ;;  %3185 = vst [vmem:[#allocation2 + $0x53] sm:$0xff] %v3149_v50  ;;  %v2301_v58 = vmul.f32 1.442695, %v2253_v57  ;;  %v3222_v55 = vld [vmem:[#allocation2 + $0x48] sm:$0xff]  ;;  %v1537_v41 = vadd.f32 %v8418_v37, %v1323_v59  ;;  %v6350_v37 = vld [vmem:[%s11370_s4 + $0x120] sm:$0xff]  ;;  %v647_v59 = vadd.f32 %v11560_v24, %v7753_v12  ;;  %vm2527_vm6 = vmor %vm2525_vm5, %vm2526_vm4  ;;  %v2532_v57 = vor.u32 1.1754944e-38, %v2531_v48 }
 0x319   : > { %v8914_v7 = vadd.f32 1.0, %v6568_v38  ;;  %v2096_v63 = vpop.f32.mrf.mxu0  ;;  %v2523_v8 = vmul.f32 %v8888_v20, %v2522_v33  ;;  %v897_v60 = vadd.f32 %v7751_v25, %v644_v44  ;;  %vm2530_vm7 = vcmp.eq.f32.partialorder %v2529_v27, 8.507059e+37  ;;  %v6349_v12 = vld [vmem:[%s11370_s4 + $0x118] sm:$0xff]  ;;  %3632 = vmatpush.msrb.mxu3 %v6350_v37  ;;  %v8972_v27 = vpop.permute.xlu0 %3008 }
 0x31a   : > { %v2178_v13 = vadd.f32 %v2096_v63, %v1964_v6  ;;  %v898_v25 = vadd.f32 %v7769_v28, %v647_v59  ;;  %v1751_v6 = vadd.f32 %v8433_v18, %v1537_v41  ;;  %v2546_v63 = vand.u32 2147483648, %v8880_v1  ;;  %v6348_v28 = vld [vmem:[%s11370_s4 + $0x110] sm:$0xff]  ;;  %11561 = vst [vmem:[#allocation20_spill] sm:$0xff] %v8972_v27 }
 0x31b   : > { %6571 = vrcp.f32 %v8914_v7  ;;  %v2524_v50 = vadd.f32 %v8888_v20, %v2523_v8  ;;  %v1111_v18 = vadd.f32 %v8193_v53, %v897_v60  ;;  %3633 = vmatpush.msrb.mxu3 %v6349_v12  ;;  %vm2540_vm9 = vweird.f32 %v8880_v1  ;;  %v2017_v37 = vld [vmem:[%s7121_s21 + $0x116] sm:$0xff] }
 0x31c   : > { %v8934_v52 = vpop.eup %6569  ;;  %6573 = vpow2.f32 %v2301_v58  ;;  %v8939_v30 = vadd.f32 %v8549_v56, %v2178_v13  ;;  %3361 = vmatmul.f32.gmra.mxu1 %v3274_v17  ;;  %v1538_v56 = vadd.f32 %v8438_v51, %v1324_v16  ;;  %2143 = vmatmul.f32.gmra.mxu0 %v2016_v45  ;;  %v8961_v51 = vpop.f32.mrf.mxu2  ;;  %v2544_v16 = vand.u32 2147483647, %v8880_v1 }
 0x31d   : > { %v2536_v23 = vmul.f32 %v8934_v52, %v8880_v1  ;;  %3486 = vmatmul.f32.gmra.mxu2 %v3222_v55  ;;  %v2528_v38 = vsel %vm2527_vm6, %v8888_v20, %v2524_v50  ;;  %1938 = vmatmul.f32.gmra.mxu3 %v1805_v29  ;;  %vm2541_vm8 = vweird.f32 %v8934_v52  ;;  %v8981_v41 = vpop.f32.mrf.mxu1  ;;  %v1806_v50 = vld [vmem:[%s7121_s21 + $0x12d] sm:$0xff]  ;;  %v1325_v60 = vadd.f32 %v8230_v32, %v1111_v18 }
 0x31e   : > { %v2254_v33 = vsub.f32 0.0, %v8939_v30  ;;  %v2533_v48 = vsel %vm2530_vm7, %v2532_v57, %v2528_v38  ;;  %v1752_v13 = vadd.f32 %v8450_v15, %v1538_v56  ;;  %v6372_v15 = vld [vmem:[%s11370_s4 + $0x1d0] sm:$0xff]  ;;  %3634 = vmatpush.msrb.mxu3 %v6348_v28  ;;  %vm2542_vm10 = vmor %vm2540_vm9, %vm2541_vm8  ;;  %vm2545_vm11 = vcmp.eq.f32.partialorder %v2544_v16, 8.507059e+37  ;;  %v6347_v1 = vld [vmem:[%s11370_s4 + $0x108] sm:$0xff] }
 0x31f   : > { %v2537_v58 = vsub.f32 1.0, %v2536_v23  ;;  %v2934_v20 = vmul.f32 %v2533_v48, %v8769_v26  ;;  %v1965_v26 = vadd.f32 %v8860_v19, %v1751_v6  ;;  %v3275_v3 = vld [vmem:[#allocation2 + $0x51] sm:$0xff]  ;;  %v2547_v24 = vor.u32 1.1754944e-38, %v2546_v63  ;;  %3840 = vmatpush.msrb.mxu0 %v6372_v15  ;;  %v6371_v32 = vld [vmem:[%s11370_s4 + $0x1c8] sm:$0xff]  ;;  %v6346_v6 = vld [vmem:[%s11370_s4 + $0x100] sm:$0xff] }
 0x320   : > { %v8959_v17 = vpop.f32.mrf.mxu3  ;;  %v2303_v39 = vmul.f32 1.442695, %v2254_v33  ;;  %v3223_v44 = vld [vmem:[#allocation2 + $0x50] sm:$0xff]  ;;  %v2559_v23 = vand.u32 2147483647, %v8914_v7  ;;  %v2561_v56 = vand.u32 2147483648, %v8914_v7  ;;  %v1112_v48 = vadd.f32 %v8210_v42, %v898_v25  ;;  %3635 = vmatpush.msrb.mxu3 %v6347_v1 }
 0x321   : > { %v8969_v8 = vpop.eup %6571  ;;  %v2538_v21 = vmul.f32 %v8934_v52, %v2537_v58  ;;  %v2099_v55 = vpop.f32.mrf.mxu0  ;;  %v3150_v62 = vmul.f32 %v8972_v27, %v2934_v20  ;;  %3841 = vmatpush.msrb.mxu0 %v6371_v32  ;;  %v6370_v16 = vld [vmem:[%s11370_s4 + $0x1c0] sm:$0xff]  ;;  %vm2555_vm13 = vweird.f32 %v8914_v7  ;;  %v1966_v18 = vadd.f32 %v8907_v0, %v1752_v13  ;;  %v6369_v0 = vld [vmem:[%s11370_s4 + $0x1b8] sm:$0xff]  ;;  %v11565_v15 = vld [vmem:[#allocation31_spill] sm:$0xff] }
 0x322   : > { %v6574_v34 = vpop.eup %6573  ;;  %v2551_v53 = vmul.f32 %v8969_v8, %v8914_v7  ;;  %6575 = vpow2.f32 %v2303_v39  ;;  %v2179_v45 = vadd.f32 %v2099_v55, %v1965_v26  ;;  %vm2556_vm12 = vweird.f32 %v8969_v8  ;;  %v9025_v39 = vpop.permute.xlu1 %3013  ;;  %3636 = vmatpush.msrb.mxu3 %v6346_v6  ;;  %v6367_v6 = vld [vmem:[%s11370_s4 + $0x1a8] sm:$0xff] }
 0x323   : > { %v2539_v29 = vadd.f32 %v8934_v52, %v2538_v21  ;;  %v8985_v19 = vadd.f32 1.0, %v6574_v34  ;;  %3186 = vst [vmem:[#allocation2 + $0x5b] sm:$0xff] %v3150_v62  ;;  %vm9035_vm14 = vmor %vm2555_vm13, %vm2556_vm12  ;;  %v2562_v26 = vor.u32 1.1754944e-38, %v2561_v56  ;;  %3842 = vmatpush.msrb.mxu0 %v6370_v16  ;;  %vm2560_vm15 = vcmp.eq.f32.partialorder %v2559_v23, 8.507059e+37  ;;  %v11570_v21 = vld [vmem:[#allocation34_spill] sm:$0xff] }
 0x324   : > { %v2552_v59 = vsub.f32 1.0, %v2551_v53  ;;  %3364 = vmatmul.f32.gmra.mxu1 %v3275_v3  ;;  %2146 = vmatmul.f32.gmra.mxu0 %v2017_v37  ;;  %11562 = vst [vmem:[#allocation21_spill] sm:$0xff] %v9025_v39  ;;  %v1807_v53 = vld [vmem:[%s7121_s21 + $0x135] sm:$0xff]  ;;  %v2018_v37 = vld [vmem:[%s7121_s21 + $0x11e] sm:$0xff] }
 0x325   : > { %v2543_v57 = vsel %vm2542_vm10, %v8934_v52, %v2539_v29  ;;  %6577 = vrcp.f32 %v8985_v19  ;;  %3489 = vmatmul.f32.gmra.mxu2 %v3223_v44  ;;  %v9010_v52 = vld [vmem:[%s11369_s3] ss:$0 sm:$0xff]  ;;  %1941 = vmatmul.f32.gmra.mxu3 %v1806_v50  ;;  %v1326_v44 = vadd.f32 %v8243_v49, %v1112_v48  ;;  %v6368_v49 = vld [vmem:[%s11370_s4 + $0x1b0] sm:$0xff]  ;;  %v9063_v1 = vpop.f32.mrf.mxu1  ;;  %v11569_v48 = vld [vmem:[#allocation79_spill] sm:$0xff]  ;;  %v2574_v16 = vand.u32 2147483647, %v8985_v19 }
 0x326   : > { %v2548_v38 = vsel %vm2545_vm11, %v2547_v24, %v2543_v57  ;;  %v2553_v33 = vmul.f32 %v8969_v8, %v2552_v59  ;;  %v9013_v12 = vadd.f32 %v9010_v52, %v2179_v45  ;;  %3843 = vmatpush.msrb.mxu0 %v6369_v0  ;;  %v9065_v57 = vpop.permute.xlu2 %3018  ;;  %v11572_v0 = vld [vmem:[#allocation3_spill] sm:$0xff]  ;;  %vm2570_vm1 = vweird.f32 %v8985_v19 }
 0x327   : > { %v2935_v58 = vmul.f32 %v2548_v38, %v8809_v61  ;;  %v1539_v61 = vadd.f32 %v8459_v11, %v1325_v60  ;;  %v9044_v11 = vpop.f32.mrf.mxu2  ;;  %v11566_v60 = vld [vmem:[#allocation32_spill] sm:$0xff]  ;;  %11567 = vst [vmem:[#allocation23_spill] sm:$0xff] %v9065_v57  ;;  %vm2575_vm3 = vcmp.eq.f32.partialorder %v2574_v16, 8.507059e+37 }
 0x328   : > { %v9020_v20 = vpop.f32.mrf.mxu3  ;;  %v6576_v63 = vpop.eup %6575  ;;  %v2554_v28 = vadd.f32 %v8969_v8, %v2553_v33  ;;  %v2255_v42 = vsub.f32 0.0, %v9013_v12  ;;  %v650_v24 = vadd.f32 %v11566_v60, %v11565_v15  ;;  %3844 = vmatpush.msrb.mxu0 %v6368_v49  ;;  %v11573_v15 = vld [vmem:[#allocation82_spill] sm:$0xff] }
 0x329   : > { %v3151_v25 = vmul.f32 %v9025_v39, %v2935_v58  ;;  %v9039_v55 = vadd.f32 1.0, %v6576_v63  ;;  %v2102_v34 = vpop.f32.mrf.mxu0  ;;  %v1540_v58 = vadd.f32 %v11569_v48, %v1326_v44  ;;  %v2576_v63 = vand.u32 2147483648, %v8985_v19 }
 0x32a   : > { %v2558_v7 = vsel %vm9035_vm14, %v8969_v8, %v2554_v28  ;;  %v2305_v13 = vmul.f32 1.442695, %v2255_v42  ;;  %v2180_v62 = vadd.f32 %v2102_v34, %v1966_v18  ;;  %v3276_v45 = vld [vmem:[#allocation2 + $0x59] sm:$0xff]  ;;  %v899_v56 = vadd.f32 %v7793_v36, %v650_v24  ;;  %3845 = vmatpush.msrb.mxu0 %v6367_v6 }
 0x32b   : > { %v9050_v3 = vpop.eup %6577  ;;  %3187 = vst [vmem:[#allocation2 + $0x63] sm:$0xff] %v3151_v25  ;;  %v2563_v29 = vsel %vm2560_vm15, %v2562_v26, %v2558_v7  ;;  %6579 = vrcp.f32 %v9039_v55  ;;  %v3224_v50 = vld [vmem:[#allocation2 + $0x58] sm:$0xff]  ;;  %v11571_v26 = vld [vmem:[#allocation35_spill] sm:$0xff]  ;;  %v1754_v60 = vadd.f32 %v11573_v15, %v1540_v58  ;;  %v2577_v24 = vor.u32 1.1754944e-38, %v2576_v63 }
 0x32c   : > { %v2936_v8 = vmul.f32 %v2563_v29, %v8839_v2  ;;  %v2566_v59 = vmul.f32 %v9050_v3, %v8985_v19  ;;  %6581 = vpow2.f32 %v2305_v13  ;;  %3367 = vmatmul.f32.gmra.mxu1 %v3276_v45  ;;  %v9068_v23 = vadd.f32 %v9010_v52, %v2180_v62  ;;  %v11568_v2 = vld [vmem:[#allocation78_spill] sm:$0xff]  ;;  %2149 = vmatmul.f32.gmra.mxu0 %v2018_v37  ;;  %v6388_v62 = vld [vmem:[%s11370_s4 + $0x250] sm:$0xff] }
 0x32d   : > { %3492 = vmatmul.f32.gmra.mxu2 %v3224_v50  ;;  %v1753_v32 = vadd.f32 %v11568_v2, %v1539_v61  ;;  %1944 = vmatmul.f32.gmra.mxu3 %v1807_v53  ;;  %vm2571_vm0 = vweird.f32 %v9050_v3  ;;  %v6366_v61 = vld [vmem:[%s11370_s4 + $0x1a0] sm:$0xff]  ;;  %v653_v34 = vadd.f32 %v11571_v26, %v11570_v21  ;;  %v1113_v7 = vadd.f32 %v11572_v0, %v899_v56  ;;  %v9129_v21 = vpop.f32.mrf.mxu1 }
 0x32e   : > { %v3152_v38 = vmul.f32 %v9065_v57, %v2936_v8  ;;  %v2567_v33 = vsub.f32 1.0, %v2566_v59  ;;  %v2256_v28 = vsub.f32 0.0, %v9068_v23  ;;  %4054 = vmatpush.msrb.mxu1 %v6388_v62  ;;  %vm2572_vm2 = vmor %vm2570_vm1, %vm2571_vm0  ;;  %v1808_v8 = vld [vmem:[%s7121_s21 + $0x13d] sm:$0x3f]  ;;  %v2019_v59 = vld [vmem:[%s7121_s21 + $0x126] sm:$0xff]  ;;  %3846 = vmatpush.msrb.mxu0 %v6366_v61  ;;  %v2591_v16 = vand.u32 2147483648, %v9039_v55 }
 0x32f   : > { %v1967_v42 = vadd.f32 %v8959_v17, %v1753_v32  ;;  %v9105_v19 = vpop.f32.mrf.mxu2  ;;  %v2589_v58 = vand.u32 2147483647, %v9039_v55  ;;  %vm2585_vm5 = vweird.f32 %v9039_v55  ;;  %v6363_v62 = vld [vmem:[%s11370_s4 + $0x188] sm:$0xff]  ;;  %v4005_v22 = vld [vmem:[#allocation2 + $0x5b] sm:$0xff] }
 0x330   : > { %v9080_v36 = vpop.f32.mrf.mxu3  ;;  %3188 = vst [vmem:[#allocation2 + $0x6b] sm:$0xff] %v3152_v38  ;;  %v2568_v18 = vmul.f32 %v9050_v3, %v2567_v33  ;;  %v2307_v13 = vmul.f32 1.442695, %v2256_v28  ;;  %v6365_v38 = vld [vmem:[%s11370_s4 + $0x198] sm:$0xff]  ;;  %v11574_v33 = vld [vmem:[#allocation6_spill] sm:$0xff] }
 0x331   : > { %v9088_v25 = vpop.eup %6579  ;;  %v2105_v53 = vpop.f32.mrf.mxu0  ;;  %v1327_v6 = vadd.f32 %v11574_v33, %v1113_v7  ;;  %3847 = vmatpush.msrb.mxu0 %v6365_v38  ;;  %vm2590_vm7 = vcmp.eq.f32.partialorder %v2589_v58, 8.507059e+37  ;;  %v11579_v38 = vld [vmem:[#allocation8_spill] sm:$0xff] }
 0x332   : > { %v2569_v17 = vadd.f32 %v9050_v3, %v2568_v18  ;;  %v2581_v44 = vmul.f32 %v9088_v25, %v9039_v55  ;;  %v3277_v29 = vld [vmem:[#allocation2 + $0x61] sm:$0xff]  ;;  %v2181_v50 = vadd.f32 %v2105_v53, %v1967_v42  ;;  %v6582_v37 = vpop.eup %6581  ;;  %6583 = vpow2.f32 %v2307_v13  ;;  %v6364_v18 = vld [vmem:[%s11370_s4 + $0x190] sm:$0xff] }
 0x333   : > { %v3225_v45 = vld [vmem:[#allocation2 + $0x60] sm:$0xff]  ;;  %v9108_v2 = vadd.f32 1.0, %v6582_v37  ;;  %vm2586_vm4 = vweird.f32 %v9088_v25  ;;  %v1968_v13 = vadd.f32 %v9020_v20, %v1754_v60  ;;  %v11577_v53 = vld [vmem:[#allocation4_spill] sm:$0xff]  ;;  %3848 = vmatpush.msrb.mxu0 %v6364_v18 }
 0x334   : > { %v2573_v49 = vsel %vm2572_vm2, %v9050_v3, %v2569_v17  ;;  %v2582_v56 = vsub.f32 1.0, %v2581_v44  ;;  %v9111_v32 = vadd.f32 %v9010_v52, %v2181_v50  ;;  %3370 = vmatmul.f32.gmra.mxu1 %v3277_v29  ;;  %v9119_v3 = vpop.permute.xlu0 %3023  ;;  %2152 = vmatmul.f32.gmra.mxu0 %v2019_v59  ;;  %v11576_v42 = vld [vmem:[#allocation38_spill] sm:$0xff]  ;;  %v11578_v44 = vld [vmem:[#allocation83_spill] sm:$0xff]  ;;  %vm2587_vm6 = vmor %vm2585_vm5, %vm2586_vm4 }
 0x335   : > { %v2578_v48 = vsel %vm2575_vm3, %v2577_v24, %v2573_v49  ;;  %3495 = vmatmul.f32.gmra.mxu2 %v3225_v45  ;;  %11575 = vst [vmem:[#allocation24_spill] sm:$0xff] %v9119_v3  ;;  %6585 = vrcp.f32 %v9108_v2  ;;  %1947 = vmatmul.f32.gmra.mxu3 %v1808_v8  ;;  %v900_v61 = vadd.f32 %v11576_v42, %v653_v34  ;;  %v2592_v45 = vor.u32 1.1754944e-38, %v2591_v16  ;;  %v2020_v59 = vld [vmem:[%s7121_s21 + $0x12e] sm:$0xff]  ;;  %v3568_v49 = vld [vmem:[#allocation2 + $0x2] sm:$0xff] }
 0x336   : > { %v2937_v63 = vmul.f32 %v2578_v48, %v8883_v4  ;;  %v2583_v28 = vmul.f32 %v9088_v25, %v2582_v56  ;;  %v2257_v26 = vsub.f32 0.0, %v9111_v32  ;;  %v1541_v29 = vadd.f32 %v11578_v44, %v1327_v6  ;;  %3849 = vmatpush.msrb.mxu0 %v6363_v62  ;;  %v9155_v48 = vpop.permute.xlu1 %3028  ;;  %v11584_v62 = vld [vmem:[#allocation87_spill] sm:$0xff]  ;;  %v10012_v46 = vld [vmem:[#allocation2 + $0x5c] sm:$0xff] }
 0x337   : > { %v1114_v17 = vadd.f32 %v11577_v53, %v900_v61  ;;  %v3278_v15 = vld [vmem:[#allocation2 + $0x69] sm:$0xff]  ;;  %11580 = vst [vmem:[#allocation26_spill] sm:$0xff] %v9155_v48  ;;  %v9162_v18 = vpop.f32.mrf.mxu2  ;;  %v2606_v53 = vand.u32 2147483648, %v9108_v2  ;;  %vm2600_vm9 = vweird.f32 %v9108_v2 }
 0x338   : > { %v9132_v0 = vpop.f32.mrf.mxu3  ;;  %v3153_v4 = vmul.f32 %v9119_v3, %v2937_v63  ;;  %v2584_v7 = vadd.f32 %v9088_v25, %v2583_v28  ;;  %v6584_v34 = vpop.eup %6583  ;;  %v2309_v50 = vmul.f32 1.442695, %v2257_v26  ;;  %v3226_v60 = vld [vmem:[#allocation2 + $0x68] sm:$0xff]  ;;  %v11581_v63 = vld [vmem:[#allocation86_spill] sm:$0xff] }
 0x339   : > { %v2108_v37 = vpop.f32.mrf.mxu0  ;;  %v9146_v55 = vadd.f32 1.0, %v6584_v34  ;;  %v1328_v33 = vadd.f32 %v11579_v38, %v1114_v17  ;;  %v1755_v28 = vadd.f32 %v11581_v63, %v1541_v29  ;;  %v9173_v29 = vpop.f32.mrf.mxu1 }
 0x33a   : > { %3189 = vst [vmem:[#allocation2 + $0x73] sm:$0xff] %v3153_v4  ;;  %v2588_v20 = vsel %vm2587_vm6, %v9088_v25, %v2584_v7  ;;  %v2182_v24 = vadd.f32 %v2108_v37, %v1968_v13  ;;  %6587 = vpow2.f32 %v2309_v50  ;;  %v6362_v25 = vld [vmem:[%s11370_s4 + $0x180] sm:$0xff]  ;;  %v11582_v4 = vld [vmem:[#allocation36_spill] sm:$0xff]  ;;  %v11583_v7 = vld [vmem:[#allocation37_spill] sm:$0xff]  ;;  %v2604_v50 = vand.u32 2147483647, %v9108_v2 }
 0x33b   : > { %v2593_v8 = vsel %vm2590_vm7, %v2592_v45, %v2588_v20  ;;  %v6586_v56 = vpop.eup %6585  ;;  %6589 = vrcp.f32 %v9146_v55  ;;  %3850 = vmatpush.msrb.mxu0 %v6362_v25  ;;  %v656_v13 = vadd.f32 %v11583_v7, %v11582_v4  ;;  %v1542_v34 = vadd.f32 %v11584_v62, %v1328_v33  ;;  %v6387_v20 = vld [vmem:[%s11370_s4 + $0x248] sm:$0xff]  ;;  %v11589_v4 = vld [vmem:[#allocation89_spill] sm:$0xff] }
 0x33c   : > { %v2938_v6 = vmul.f32 %v2593_v8, %v8939_v30  ;;  %v2596_v58 = vmul.f32 %v6586_v56, %v9108_v2  ;;  %3373 = vmatmul.f32.gmra.mxu1 %v3278_v15  ;;  %v9159_v16 = vadd.f32 %v9010_v52, %v2182_v24  ;;  %2155 = vmatmul.f32.gmra.mxu0 %v2020_v59  ;;  %vm2601_vm8 = vweird.f32 %v6586_v56  ;;  %v11585_v24 = vld [vmem:[#allocation41_spill] sm:$0xff]  ;;  %v11586_v59 = vld [vmem:[#allocation39_spill] sm:$0xff] }
 0x33d   : > { %3498 = vmatmul.f32.gmra.mxu2 %v3226_v60  ;;  %3637 = vmatmul.f32.vlgmr.msrb.gmra.mxu3 %v3568_v49  ;;  %v1969_v17 = vadd.f32 %v9080_v36, %v1755_v28  ;;  %v901_v8 = vadd.f32 %v11585_v24, %v656_v13  ;;  %v11587_v36 = vld [vmem:[#allocation40_spill] sm:$0xff]  ;;  %v1756_v7 = vadd.f32 %v11589_v4, %v1542_v34  ;;  %vm2602_vm10 = vmor %vm2600_vm9, %vm2601_vm8  ;;  %v2607_v13 = vor.u32 1.1754944e-38, %v2606_v53 }
 0x33e   : > { %v3154_v30 = vmul.f32 %v9155_v48, %v2938_v6  ;;  %v2597_v42 = vsub.f32 1.0, %v2596_v58  ;;  %v2258_v61 = vsub.f32 0.0, %v9159_v16  ;;  %v659_v49 = vadd.f32 %v11587_v36, %v11586_v59  ;;  %4055 = vmatpush.msrb.mxu1 %v6387_v20  ;;  %v2021_v28 = vld [vmem:[%s7121_s21 + $0x136] sm:$0xff]  ;;  %v9209_v36 = vpop.permute.xlu2 %3033 }
 0x33f   : > { %vm2605_vm11 = vcmp.eq.f32.partialorder %v2604_v50, 8.507059e+37  ;;  %v2619_v20 = vand.u32 2147483647, %v9146_v55  ;;  %v2621_v34 = vand.u32 2147483648, %v9146_v55  ;;  %v11591_v24 = vld [vmem:[#allocation44_spill] sm:$0xff]  ;;  %v9207_v59 = vpop.f32.mrf.mxu2  ;;  %11592 = vst [vmem:[#allocation27_spill] sm:$0xff] %v9209_v36  ;;  %vm2615_vm13 = vweird.f32 %v9146_v55 }
 0x340   : > { %v9166_v26 = vpop.f32.mrf.mxu3  ;;  %3190 = vst [vmem:[#allocation2 + $0x7b] sm:$0xff] %v3154_v30  ;;  %v6588_v44 = vpop.eup %6587  ;;  %v2598_v45 = vmul.f32 %v6586_v56, %v2597_v42  ;;  %v2311_v37 = vmul.f32 1.442695, %v2258_v61  ;;  %v3569_v30 = vld [vmem:[#allocation2 + $0xa] sm:$0xff]  ;;  %v11588_v42 = vld [vmem:[#allocation5_spill] sm:$0xff] }
 0x341   : > { %v2111_v15 = vpop.f32.mrf.mxu0  ;;  %v9179_v60 = vpop.eup %6589  ;;  %v9184_v38 = vadd.f32 1.0, %v6588_v44  ;;  %v3279_v33 = vld [vmem:[#allocation2 + $0x71] sm:$0xff]  ;;  %v1115_v61 = vadd.f32 %v11588_v42, %v901_v8  ;;  %v11590_v44 = vld [vmem:[#allocation10_spill] sm:$0xff]  ;;  %v902_v8 = vadd.f32 %v11591_v24, %v659_v49  ;;  %v11593_v49 = vld [vmem:[#allocation91_spill] sm:$0xff]  ;;  %vm2620_vm15 = vcmp.eq.f32.partialorder %v2619_v20, 8.507059e+37 }
 0x342   : > { %v3227_v6 = vld [vmem:[#allocation2 + $0x70] sm:$0xff]  ;;  %v2183_v25 = vadd.f32 %v2111_v15, %v1969_v17  ;;  %v2599_v58 = vadd.f32 %v6586_v56, %v2598_v45  ;;  %v2611_v63 = vmul.f32 %v9179_v60, %v9146_v55  ;;  %6591 = vpow2.f32 %v2311_v37 }
 0x343   : > { %6593 = vrcp.f32 %v9184_v38  ;;  %v1329_v45 = vadd.f32 %v11590_v44, %v1115_v61  ;;  %vm2616_vm12 = vweird.f32 %v9179_v60  ;;  %v11594_v44 = vld [vmem:[#allocation7_spill] sm:$0xff]  ;;  %v3570_v20 = vld [vmem:[#allocation2 + $0x12] sm:$0xff]  ;;  %vm2630_vm1 = vweird.f32 %v9184_v38 }
 0x344   : > { %v2603_v62 = vsel %vm2602_vm10, %v6586_v56, %v2599_v58  ;;  %v2612_v17 = vsub.f32 1.0, %v2611_v63  ;;  %3376 = vmatmul.f32.gmra.mxu1 %v3279_v33  ;;  %v9195_v2 = vadd.f32 %v9010_v52, %v2183_v25  ;;  %2158 = vmatmul.f32.gmra.mxu0 %v2021_v28  ;;  %v1970_v33 = vadd.f32 %v9132_v0, %v1756_v7  ;;  %v9215_v28 = vpop.f32.mrf.mxu1  ;;  %vm2617_vm14 = vmor %vm2615_vm13, %vm2616_vm12 }
 0x345   : > { %3501 = vmatmul.f32.gmra.mxu2 %v3227_v6  ;;  %v2608_v37 = vsel %vm2605_vm11, %v2607_v13, %v2603_v62  ;;  %3640 = vmatmul.f32.gmra.mxu3 %v3569_v30  ;;  %v1543_v42 = vadd.f32 %v11593_v49, %v1329_v45  ;;  %v2622_v0 = vor.u32 1.1754944e-38, %v2621_v34  ;;  %v1116_v45 = vadd.f32 %v11594_v44, %v902_v8  ;;  %v11595_v34 = vld [vmem:[#allocation42_spill] sm:$0xff]  ;;  %v9238_v8 = vpop.permute.xlu0 %3038 }
 0x346   : > { %v2939_v53 = vmul.f32 %v2608_v37, %v9013_v12  ;;  %v2613_v56 = vmul.f32 %v9179_v60, %v2612_v17  ;;  %v2259_v50 = vsub.f32 0.0, %v9195_v2  ;;  %v2022_v17 = vld [vmem:[%s7121_s21 + $0x13e] sm:$0x3f]  ;;  %11599 = vst [vmem:[#allocation29_spill] sm:$0xff] %v9238_v8 }
 0x347   : > { %v3280_v4 = vld [vmem:[#allocation2 + $0x79] sm:$0xff] }
 0x348   : > { %v9204_v15 = vpop.f32.mrf.mxu3  ;;  %v6592_v6 = vpop.eup %6591  ;;  %v3155_v25 = vmul.f32 %v9209_v36, %v2939_v53  ;;  %v2614_v12 = vadd.f32 %v9179_v60, %v2613_v56  ;;  %v2313_v58 = vmul.f32 1.442695, %v2259_v50  ;;  %v3228_v7 = vld [vmem:[#allocation2 + $0x78] sm:$0xff]  ;;  %v11596_v53 = vld [vmem:[#allocation43_spill] sm:$0xff]  ;;  %v11602_v44 = vld [vmem:[#allocation46_spill] sm:$0xff] }
 0x349   : > { %v2114_v63 = vpop.f32.mrf.mxu0  ;;  %v9217_v30 = vpop.eup %6593  ;;  %v9222_v61 = vadd.f32 1.0, %v6592_v6  ;;  %v662_v56 = vadd.f32 %v11596_v53, %v11595_v34  ;;  %v6386_v53 = vld [vmem:[%s11370_s4 + $0x240] sm:$0xff] }
 0x34a   : > { %v2184_v13 = vadd.f32 %v2114_v63, %v1970_v33  ;;  %3191 = vst [vmem:[#allocation2 + $0x83] sm:$0xff] %v3155_v25  ;;  %v2618_v55 = vsel %vm2617_vm14, %v9179_v60, %v2614_v12  ;;  %v2626_v62 = vmul.f32 %v9217_v30, %v9184_v38  ;;  %6595 = vpow2.f32 %v2313_v58  ;;  %v11597_v33 = vld [vmem:[#allocation92_spill] sm:$0xff]  ;;  %v9254_v34 = vpop.f32.mrf.mxu2  ;;  %4056 = vmatpush.msrb.mxu1 %v6386_v53  ;;  %v11619_v36 = vld [vmem:[#allocation22_spill] sm:$0xff] }
 0x34b   : > { %v2623_v37 = vsel %vm2620_vm15, %v2622_v0, %v2618_v55  ;;  %6597 = vrcp.f32 %v9222_v61  ;;  %v1757_v6 = vadd.f32 %v11597_v33, %v1543_v42  ;;  %v11598_v25 = vld [vmem:[#allocation12_spill] sm:$0xff]  ;;  %v2634_v58 = vand.u32 2147483647, %v9184_v38  ;;  %v11600_v42 = vld [vmem:[#allocation49_spill] sm:$0xff] }
 0x34c   : > { %v2940_v50 = vmul.f32 %v2623_v37, %v9068_v23  ;;  %v2627_v24 = vsub.f32 1.0, %v2626_v62  ;;  %3379 = vmatmul.f32.gmra.mxu1 %v3280_v4  ;;  %v9234_v60 = vadd.f32 %v9010_v52, %v2184_v13  ;;  %v1330_v12 = vadd.f32 %v11598_v25, %v1116_v45  ;;  %2161 = vmatmul.f32.gmra.mxu0 %v2022_v17  ;;  %v11601_v62 = vld [vmem:[#allocation45_spill] sm:$0xff] }
 0x34d   : > { %3504 = vmatmul.f32.gmra.mxu2 %v3228_v7  ;;  %v2636_v63 = vand.u32 2147483648, %v9184_v38  ;;  %3643 = vmatmul.f32.gmra.mxu3 %v3570_v20  ;;  %vm2631_vm0 = vweird.f32 %v9217_v30  ;;  %v903_v7 = vadd.f32 %v11600_v42, %v662_v56  ;;  %v1971_v13 = vadd.f32 %v9166_v26, %v1757_v6  ;;  %v9266_v42 = vpop.f32.mrf.mxu1 }
 0x34e   : > { %v3156_v23 = vmul.f32 %v9238_v8, %v2940_v50  ;;  %v2628_v49 = vmul.f32 %v9217_v30, %v2627_v24  ;;  %v2260_v0 = vsub.f32 0.0, %v9234_v60  ;;  %v665_v45 = vadd.f32 %v11602_v44, %v11601_v62  ;;  %v11603_v24 = vld [vmem:[#allocation93_spill] sm:$0xff]  ;;  %vm2632_vm2 = vmor %vm2630_vm1, %vm2631_vm0  ;;  %v9277_v8 = vpop.permute.xlu1 %3043 }
 0x34f   : > { %v1544_v26 = vadd.f32 %v11603_v24, %v1330_v12  ;;  %v2637_v33 = vor.u32 1.1754944e-38, %v2636_v63  ;;  %vm2635_vm3 = vcmp.eq.f32.partialorder %v2634_v58, 8.507059e+37  ;;  %v11604_v62 = vld [vmem:[#allocation9_spill] sm:$0xff]  ;;  %v11605_v63 = vld [vmem:[#allocation52_spill] sm:$0xff]  ;;  %11608 = vst [vmem:[#allocation31_spill] sm:$0xff] %v9277_v8  ;;  %vm2645_vm5 = vweird.f32 %v9222_v61 }
 0x350   : > { %v9246_v4 = vpop.f32.mrf.mxu3  ;;  %v6596_v55 = vpop.eup %6595  ;;  %3192 = vst [vmem:[#allocation2 + $0x8b] sm:$0xff] %v3156_v23  ;;  %v2629_v17 = vadd.f32 %v9217_v30, %v2628_v49  ;;  %v2315_v37 = vmul.f32 1.442695, %v2260_v0  ;;  %v1117_v12 = vadd.f32 %v11604_v62, %v903_v7  ;;  %v3571_v58 = vld [vmem:[#allocation2 + $0x1a] sm:$0xff]  ;;  %v2649_v7 = vand.u32 2147483647, %v9222_v61 }
 0x351   : > { %v2117_v50 = vpop.f32.mrf.mxu0  ;;  %v6598_v56 = vpop.eup %6597  ;;  %v9262_v6 = vadd.f32 1.0, %v6596_v55  ;;  %v3281_v25 = vld [vmem:[#allocation2 + $0x81] sm:$0xff]  ;;  %v904_v55 = vadd.f32 %v11605_v63, %v665_v45 }
 0x352   : > { %v3229_v38 = vld [vmem:[#allocation2 + $0x80] sm:$0xff]  ;;  %v2185_v23 = vadd.f32 %v2117_v50, %v1971_v13  ;;  %v2633_v49 = vsel %vm2632_vm2, %v9217_v30, %v2629_v17  ;;  %v2641_v0 = vmul.f32 %v6598_v56, %v9222_v61  ;;  %6599 = vpow2.f32 %v2315_v37  ;;  %v11607_v37 = vld [vmem:[#allocation59_spill] sm:$0xff] }
 0x353   : > { %v2638_v44 = vsel %vm2635_vm3, %v2637_v33, %v2633_v49  ;;  %6601 = vrcp.f32 %v9262_v6  ;;  %v11606_v13 = vld [vmem:[#allocation94_spill] sm:$0xff]  ;;  %v1331_v50 = vadd.f32 %v11607_v37, %v1117_v12  ;;  %v2651_v33 = vand.u32 2147483648, %v9222_v61  ;;  %v11609_v49 = vld [vmem:[#allocation11_spill] sm:$0xff]  ;;  %v9295_v61 = vpop.f32.mrf.mxu2 }
 0x354   : > { %v2941_v53 = vmul.f32 %v2638_v44, %v9111_v32  ;;  %v2642_v24 = vsub.f32 1.0, %v2641_v0  ;;  %3382 = vmatmul.f32.gmra.mxu1 %v3281_v25  ;;  %v9273_v30 = vadd.f32 %v9010_v52, %v2185_v23  ;;  %v1758_v17 = vadd.f32 %v11606_v13, %v1544_v26  ;;  %3851 = vmatmul.f32.vlgmr.msrb.gmra.mxu0 %v3570_v20  ;;  %v11610_v63 = vld [vmem:[#allocation95_spill] sm:$0xff] }
 0x355   : > { %3507 = vmatmul.f32.gmra.mxu2 %v3229_v38  ;;  %3646 = vmatmul.f32.gmra.mxu3 %v3571_v58  ;;  %vm2646_vm4 = vweird.f32 %v6598_v56  ;;  %v1118_v0 = vadd.f32 %v11609_v49, %v904_v55  ;;  %vm2650_vm7 = vcmp.eq.f32.partialorder %v2649_v7, 8.507059e+37  ;;  %v11613_v49 = vld [vmem:[#allocation48_spill] sm:$0xff]  ;;  %vm2660_vm9 = vweird.f32 %v9262_v6 }
 0x356   : > { %v3157_v32 = vmul.f32 %v9277_v8, %v2941_v53  ;;  %v2643_v45 = vmul.f32 %v6598_v56, %v2642_v24  ;;  %v2261_v25 = vsub.f32 0.0, %v9273_v30  ;;  %v1972_v26 = vadd.f32 %v9204_v15, %v1758_v17  ;;  %vm2647_vm6 = vmor %vm2645_vm5, %vm2646_vm4 }
 0x357   : > { %v1545_v53 = vadd.f32 %v11610_v63, %v1331_v50  ;;  %v2652_v24 = vor.u32 1.1754944e-38, %v2651_v33  ;;  %v3282_v37 = vld [vmem:[#allocation2 + $0x89] sm:$0xff]  ;;  %v9306_v63 = vpop.permute.xlu2 %3048 }
 0x358   : > { %v9283_v38 = vpop.f32.mrf.mxu3  ;;  %v6600_v23 = vpop.eup %6599  ;;  %3193 = vst [vmem:[#allocation2 + $0x93] sm:$0xff] %v3157_v32  ;;  %v2644_v62 = vadd.f32 %v6598_v56, %v2643_v45  ;;  %v2317_v12 = vmul.f32 1.442695, %v2261_v25  ;;  %v3230_v8 = vld [vmem:[#allocation2 + $0x88] sm:$0xff]  ;;  %v11611_v45 = vld [vmem:[#allocation61_spill] sm:$0xff] }
 0x359   : > { %v2120_v44 = vpop.f32.mrf.mxu0  ;;  %v9288_v20 = vpop.eup %6601  ;;  %v9291_v13 = vadd.f32 1.0, %v6600_v23  ;;  %v1332_v50 = vadd.f32 %v11611_v45, %v1118_v0  ;;  %v11612_v23 = vld [vmem:[#allocation47_spill] sm:$0xff]  ;;  %11615 = vst [vmem:[#allocation32_spill] sm:$0xff] %v9306_v63  ;;  %v2666_v0 = vand.u32 2147483648, %v9262_v6 }
 0x35a   : > { %v2186_v15 = vadd.f32 %v2120_v44, %v1972_v26  ;;  %v2648_v17 = vsel %vm2647_vm6, %v6598_v56, %v2644_v62  ;;  %v2656_v55 = vmul.f32 %v9288_v20, %v9262_v6  ;;  %6603 = vpow2.f32 %v2317_v12  ;;  %v3572_v56 = vld [vmem:[#allocation2 + $0x22] sm:$0xff]  ;;  %v11614_v12 = vld [vmem:[#allocation96_spill] sm:$0xff] }
 0x35b   : > { %v2653_v32 = vsel %vm2650_vm7, %v2652_v24, %v2648_v17  ;;  %6605 = vrcp.f32 %v9291_v13  ;;  %v668_v62 = vadd.f32 %v11613_v49, %v11612_v23  ;;  %v1759_v44 = vadd.f32 %v11614_v12, %v1545_v53  ;;  %v11616_v17 = vld [vmem:[#allocation50_spill] sm:$0xff]  ;;  %v11617_v53 = vld [vmem:[#allocation51_spill] sm:$0xff]  ;;  %v11618_v23 = vld [vmem:[#allocation97_spill] sm:$0xff] }
 0x35c   : > { %v2942_v33 = vmul.f32 %v2653_v32, %v9159_v16  ;;  %v2657_v25 = vsub.f32 1.0, %v2656_v55  ;;  %3385 = vmatmul.f32.gmra.mxu1 %v3282_v37  ;;  %v9301_v26 = vadd.f32 %v9010_v52, %v2186_v15  ;;  %v2664_v24 = vand.u32 2147483647, %v9262_v6  ;;  %3854 = vmatmul.f32.gmra.mxu0 %v3571_v58 }
 0x35d   : > { %3510 = vmatmul.f32.gmra.mxu2 %v3230_v8  ;;  %v3341_v7 = vpop.f32.mrf.mxu1  ;;  %3649 = vmatmul.f32.gmra.mxu3 %v3572_v56  ;;  %vm2661_vm8 = vweird.f32 %v9288_v20  ;;  %v671_v55 = vadd.f32 %v11617_v53, %v11616_v17  ;;  %v1973_v32 = vadd.f32 %v9246_v4, %v1759_v44  ;;  %v1546_v49 = vadd.f32 %v11618_v23, %v1332_v50  ;;  %v11620_v53 = vld [vmem:[#allocation13_spill] sm:$0xff] }
 0x35e   : > { %v3158_v16 = vmul.f32 %v9306_v63, %v2942_v33  ;;  %v2658_v8 = vmul.f32 %v9288_v20, %v2657_v25  ;;  %v2262_v37 = vsub.f32 0.0, %v9301_v26  ;;  %v6385_v25 = vld [vmem:[%s11370_s4 + $0x238] sm:$0xff]  ;;  %v905_v48 = vadd.f32 %v11619_v36, %v668_v62  ;;  %vm2662_vm10 = vmor %vm2660_vm9, %vm2661_vm8 }
 0x35f   : > { %v2667_v4 = vor.u32 1.1754944e-38, %v2666_v0  ;;  %v3283_v50 = vld [vmem:[#allocation2 + $0x91] sm:$0xff]  ;;  %4057 = vmatpush.msrb.mxu1 %v6385_v25  ;;  %vm2665_vm11 = vcmp.eq.f32.partialorder %v2664_v24, 8.507059e+37  ;;  %v11622_v0 = vld [vmem:[#allocation98_spill] sm:$0xff]  ;;  %vm2675_vm13 = vweird.f32 %v9291_v13 }
 0x360   : > { %v9314_v15 = vpop.f32.mrf.mxu3  ;;  %v6604_v45 = vpop.eup %6603  ;;  %3194 = vst [vmem:[#allocation2 + $0x9b] sm:$0xff] %v3158_v16  ;;  %v2659_v58 = vadd.f32 %v9288_v20, %v2658_v8  ;;  %v2319_v33 = vmul.f32 1.442695, %v2262_v37  ;;  %v3231_v16 = vld [vmem:[#allocation2 + $0x90] sm:$0xff]  ;;  %v1119_v23 = vadd.f32 %v11620_v53, %v905_v48  ;;  %v11621_v36 = vld [vmem:[#allocation25_spill] sm:$0xff] }
 0x361   : > { %v2123_v12 = vpop.f32.mrf.mxu0  ;;  %v6606_v63 = vpop.eup %6605  ;;  %v9328_v44 = vadd.f32 1.0, %v6604_v45  ;;  %v906_v62 = vadd.f32 %v11621_v36, %v671_v55  ;;  %v1760_v45 = vadd.f32 %v11622_v0, %v1546_v49  ;;  %v3573_v24 = vld [vmem:[#allocation2 + $0x2a] sm:$0xff]  ;;  %v2679_v55 = vand.u32 2147483647, %v9291_v13 }
 0x362   : > { %v2187_v8 = vadd.f32 %v2123_v12, %v1973_v32  ;;  %v2663_v6 = vsel %vm2662_vm10, %v9288_v20, %v2659_v58  ;;  %v2671_v37 = vmul.f32 %v6606_v63, %v9291_v13  ;;  %6607 = vpow2.f32 %v2319_v33  ;;  %v11623_v58 = vld [vmem:[#allocation63_spill] sm:$0xff]  ;;  %v9341_v48 = vpop.permute.xlu0 %3053 }
 0x363   : > { %v2668_v3 = vsel %vm2665_vm11, %v2667_v4, %v2663_v6  ;;  %6609 = vrcp.f32 %v9328_v44  ;;  %v1333_v33 = vadd.f32 %v11623_v58, %v1119_v23  ;;  %11624 = vst [vmem:[#allocation78_spill] sm:$0xff] %v9341_v48  ;;  %v2681_v12 = vand.u32 2147483648, %v9291_v13  ;;  %v11625_v6 = vld [vmem:[#allocation60_spill] sm:$0xff]  ;;  %v11626_v58 = vld [vmem:[#allocation53_spill] sm:$0xff] }
 0x364   : > { %v3466_v17 = vpop.f32.mrf.mxu2  ;;  %v2943_v57 = vmul.f32 %v2668_v3, %v9195_v2  ;;  %v2672_v25 = vsub.f32 1.0, %v2671_v37  ;;  %3388 = vmatmul.f32.gmra.mxu1 %v3283_v50  ;;  %v9338_v20 = vadd.f32 %v9010_v52, %v2187_v8  ;;  %3857 = vmatmul.f32.gmra.mxu0 %v3572_v56  ;;  %vm2676_vm12 = vweird.f32 %v6606_v63 }
 0x365   : > { %3513 = vmatmul.f32.gmra.mxu2 %v3231_v16  ;;  %v3344_v32 = vpop.f32.mrf.mxu1  ;;  %v9345_v4 = vadd.f32 %v3466_v17, %v3341_v7  ;;  %3652 = vmatmul.f32.gmra.mxu3 %v3573_v24  ;;  %v1974_v16 = vadd.f32 %v9283_v38, %v1760_v45  ;;  %v1120_v37 = vadd.f32 %v11625_v6, %v906_v62  ;;  %vm2677_vm14 = vmor %vm2675_vm13, %vm2676_vm12  ;;  %v2682_v23 = vor.u32 1.1754944e-38, %v2681_v12 }
 0x366   : > { %v3159_v3 = vmul.f32 %v9341_v48, %v2943_v57  ;;  %v2673_v2 = vmul.f32 %v6606_v63, %v2672_v25  ;;  %v2263_v49 = vsub.f32 0.0, %v9338_v20  ;;  %v1547_v57 = vadd.f32 %v8620_v5, %v1333_v33  ;;  %v11628_v5 = vld [vmem:[#allocation65_spill] sm:$0xff] }
 0x367   : > { %v3284_v0 = vld [vmem:[#allocation2 + $0x99] sm:$0xff]  ;;  %vm2680_vm15 = vcmp.eq.f32.partialorder %v2679_v55, 8.507059e+37  ;;  %v1334_v33 = vadd.f32 %v11628_v5, %v1120_v37  ;;  %vm2690_vm1 = vweird.f32 %v9328_v44 }
 0x368   : > { %v9349_v50 = vpop.f32.mrf.mxu3  ;;  %v6608_v8 = vpop.eup %6607  ;;  %3195 = vst [vmem:[#allocation2 + $0xa3] sm:$0xff] %v3159_v3  ;;  %v2674_v53 = vadd.f32 %v6606_v63, %v2673_v2  ;;  %v2321_v7 = vmul.f32 1.442695, %v2263_v49  ;;  %v3232_v25 = vld [vmem:[#allocation2 + $0x98] sm:$0xff]  ;;  %v11627_v3 = vld [vmem:[#allocation54_spill] sm:$0xff]  ;;  %v1761_v6 = vadd.f32 %v8640_v40, %v1547_v57 }
 0x369   : > { %v2126_v17 = vpop.f32.mrf.mxu0  ;;  %v9354_v56 = vpop.eup %6609  ;;  %v9357_v36 = vadd.f32 1.0, %v6608_v8  ;;  %v674_v2 = vadd.f32 %v11627_v3, %v11626_v58  ;;  %v3574_v55 = vld [vmem:[#allocation2 + $0x32] sm:$0xff] }
 0x36a   : > { %v2188_v38 = vadd.f32 %v2126_v17, %v1974_v16  ;;  %v2678_v45 = vsel %vm2677_vm14, %v6606_v63, %v2674_v53  ;;  %v2686_v62 = vmul.f32 %v9354_v56, %v9328_v44  ;;  %6611 = vpow2.f32 %v2321_v7  ;;  %v9370_v53 = vpop.permute.xlu1 %3058  ;;  %v11631_v3 = vld [vmem:[#allocation28_spill] sm:$0xff] }
 0x36b   : > { %v2683_v49 = vsel %vm2680_vm15, %v2682_v23, %v2678_v45  ;;  %6613 = vrcp.f32 %v9357_v36  ;;  %11629 = vst [vmem:[#allocation79_spill] sm:$0xff] %v9370_v53  ;;  %v2694_v7 = vand.u32 2147483647, %v9328_v44  ;;  %v2696_v17 = vand.u32 2147483648, %v9328_v44 }
 0x36c   : > { %v3469_v13 = vpop.f32.mrf.mxu2  ;;  %v2944_v12 = vmul.f32 %v2683_v49, %v9234_v60  ;;  %v2687_v8 = vsub.f32 1.0, %v2686_v62  ;;  %3391 = vmatmul.f32.gmra.mxu1 %v3284_v0  ;;  %v9367_v63 = vadd.f32 %v9010_v52, %v2188_v38  ;;  %3860 = vmatmul.f32.gmra.mxu0 %v3573_v24  ;;  %vm2691_vm0 = vweird.f32 %v9354_v56  ;;  %v11630_v38 = vld [vmem:[#allocation100_spill] sm:$0xff]  ;;  %v6409_v62 = vld [vmem:[%s11370_s4 + $0x2f8] sm:$0xff] }
 0x36d   : > { %3516 = vmatmul.f32.gmra.mxu2 %v3232_v25  ;;  %v3347_v16 = vpop.f32.mrf.mxu1  ;;  %v9374_v23 = vadd.f32 %v3469_v13, %v3344_v32  ;;  %3655 = vmatmul.f32.gmra.mxu3 %v3574_v55  ;;  %v1975_v40 = vadd.f32 %v9314_v15, %v1761_v6  ;;  %v1548_v45 = vadd.f32 %v11630_v38, %v1334_v33  ;;  %vm2692_vm2 = vmor %vm2690_vm1, %vm2691_vm0  ;;  %v2697_v15 = vor.u32 1.1754944e-38, %v2696_v17 }
 0x36e   : > { %v3160_v60 = vmul.f32 %v9370_v53, %v2944_v12  ;;  %v2688_v37 = vmul.f32 %v9354_v56, %v2687_v8  ;;  %v2264_v0 = vsub.f32 0.0, %v9367_v63  ;;  %v907_v49 = vadd.f32 %v11631_v3, %v674_v2  ;;  %4263 = vmatpush.msrb.mxu2 %v6409_v62  ;;  %v11634_v2 = vld [vmem:[#allocation62_spill] sm:$0xff] }
 0x36f   : > { %v3285_v33 = vld [vmem:[#allocation2 + $0xa1] sm:$0xff]  ;;  %vm2695_vm3 = vcmp.eq.f32.partialorder %v2694_v7, 8.507059e+37  ;;  %vm2705_vm5 = vweird.f32 %v9357_v36 }
 0x370   : > { %v9380_v25 = vpop.f32.mrf.mxu3  ;;  %v6612_v57 = vpop.eup %6611  ;;  %3196 = vst [vmem:[#allocation2 + $0xab] sm:$0xff] %v3160_v60  ;;  %v2689_v32 = vadd.f32 %v9354_v56, %v2688_v37  ;;  %v2323_v24 = vmul.f32 1.442695, %v2264_v0  ;;  %v3233_v12 = vld [vmem:[#allocation2 + $0xa0] sm:$0xff]  ;;  %v11632_v37 = vld [vmem:[#allocation55_spill] sm:$0xff]  ;;  %v11633_v0 = vld [vmem:[#allocation56_spill] sm:$0xff]  ;;  %v1121_v3 = vadd.f32 %v11634_v2, %v907_v49 }
 0x371   : > { %v2129_v13 = vpop.f32.mrf.mxu0  ;;  %v9389_v58 = vpop.eup %6613  ;;  %v9392_v5 = vadd.f32 1.0, %v6612_v57  ;;  %v677_v38 = vadd.f32 %v11633_v0, %v11632_v37  ;;  %v1762_v57 = vadd.f32 %v8673_v43, %v1548_v45  ;;  %v3575_v7 = vld [vmem:[#allocation2 + $0x3a] sm:$0xff]  ;;  %v2709_v49 = vand.u32 2147483647, %v9357_v36 }
 0x372   : > { %v2189_v8 = vadd.f32 %v2129_v13, %v1975_v40  ;;  %v2693_v44 = vsel %vm2692_vm2, %v9354_v56, %v2689_v32  ;;  %v2701_v6 = vmul.f32 %v9389_v58, %v9357_v36  ;;  %6615 = vpow2.f32 %v2323_v24  ;;  %v11635_v32 = vld [vmem:[#allocation67_spill] sm:$0xff]  ;;  %v9407_v13 = vpop.permute.xlu2 %3063 }
 0x373   : > { %v2698_v17 = vsel %vm2695_vm3, %v2697_v15, %v2693_v44  ;;  %6617 = vrcp.f32 %v9392_v5  ;;  %v1335_v24 = vadd.f32 %v11635_v32, %v1121_v3  ;;  %11636 = vst [vmem:[#allocation34_spill] sm:$0xff] %v9407_v13  ;;  %v2711_v15 = vand.u32 2147483648, %v9357_v36  ;;  %v11638_v3 = vld [vmem:[#allocation103_spill] sm:$0xff] }
 0x374   : > { %v3472_v60 = vpop.f32.mrf.mxu2  ;;  %v2945_v40 = vmul.f32 %v2698_v17, %v9273_v30  ;;  %v2702_v62 = vsub.f32 1.0, %v2701_v6  ;;  %3394 = vmatmul.f32.gmra.mxu1 %v3285_v33  ;;  %v9404_v56 = vadd.f32 %v9010_v52, %v2189_v8  ;;  %3863 = vmatmul.f32.gmra.mxu0 %v3574_v55  ;;  %vm2706_vm4 = vweird.f32 %v9389_v58  ;;  %v11637_v6 = vld [vmem:[#allocation30_spill] sm:$0xff] }
 0x375   : > { %3519 = vmatmul.f32.gmra.mxu2 %v3233_v12  ;;  %v9411_v44 = vadd.f32 %v3472_v60, %v3347_v16  ;;  %3658 = vmatmul.f32.gmra.mxu3 %v3575_v7  ;;  %v3350_v43 = vpop.f32.mrf.mxu1  ;;  %v1976_v12 = vadd.f32 %v9349_v50, %v1762_v57  ;;  %v908_v37 = vadd.f32 %v11637_v6, %v677_v38  ;;  %v6384_v60 = vld [vmem:[%s11370_s4 + $0x230] sm:$0xff]  ;;  %vm2707_vm6 = vmor %vm2705_vm5, %vm2706_vm4  ;;  %vm2710_vm7 = vcmp.eq.f32.partialorder %v2709_v49, 8.507059e+37  ;;  %v3576_v49 = vld [vmem:[#allocation2 + $0x42] sm:$0xff] }
 0x376   : > { %v3161_v30 = vmul.f32 %v9407_v13, %v2945_v40  ;;  %v2703_v45 = vmul.f32 %v9389_v58, %v2702_v62  ;;  %v2265_v52 = vsub.f32 0.0, %v9404_v56  ;;  %v1549_v17 = vadd.f32 %v11638_v3, %v1335_v24  ;;  %4058 = vmatpush.msrb.mxu1 %v6384_v60  ;;  %v11640_v6 = vld [vmem:[#allocation105_spill] sm:$0xff] }
 0x377   : > { %v2712_v40 = vor.u32 1.1754944e-38, %v2711_v15  ;;  %v3286_v38 = vld [vmem:[#allocation2 + $0xa9] sm:$0xff]  ;;  %vm2720_vm9 = vweird.f32 %v9392_v5 }
 0x378   : > { %v9417_v33 = vpop.f32.mrf.mxu3  ;;  %v6616_v8 = vpop.eup %6615  ;;  %3197 = vst [vmem:[#allocation2 + $0xb3] sm:$0xff] %v3161_v30  ;;  %v2704_v16 = vadd.f32 %v9389_v58, %v2703_v45  ;;  %v2325_v55 = vmul.f32 1.442695, %v2265_v52  ;;  %v3234_v57 = vld [vmem:[#allocation2 + $0xa8] sm:$0xff]  ;;  %v11639_v52 = vld [vmem:[#allocation64_spill] sm:$0xff] }
 0x379   : > { %v2132_v0 = vpop.f32.mrf.mxu0  ;;  %v6618_v2 = vpop.eup %6617  ;;  %v9427_v50 = vadd.f32 1.0, %v6616_v8  ;;  %v1122_v24 = vadd.f32 %v11639_v52, %v908_v37  ;;  %v2724_v37 = vand.u32 2147483647, %v9392_v5 }
 0x37a   : > { %v2190_v62 = vadd.f32 %v2132_v0, %v1976_v12  ;;  %v2708_v32 = vsel %vm2707_vm6, %v9389_v58, %v2704_v16  ;;  %v2716_v36 = vmul.f32 %v6618_v2, %v9392_v5  ;;  %6619 = vpow2.f32 %v2325_v55  ;;  %v9437_v12 = vld [vmem:[%s11369_s3] ss:$0 sm:$0xff]  ;;  %v9443_v55 = vpop.permute.xlu0 %3068 }
 0x37b   : > { %v2713_v45 = vsel %vm2710_vm7, %v2712_v40, %v2708_v32  ;;  %6621 = vrcp.f32 %v9427_v50  ;;  %v1763_v16 = vadd.f32 %v11640_v6, %v1549_v17  ;;  %11641 = vst [vmem:[#allocation35_spill] sm:$0xff] %v9443_v55  ;;  %vm2721_vm8 = vweird.f32 %v6618_v2 }
 0x37c   : > { %v3475_v30 = vpop.f32.mrf.mxu2  ;;  %v2946_v15 = vmul.f32 %v2713_v45, %v9301_v26  ;;  %v2717_v8 = vsub.f32 1.0, %v2716_v36  ;;  %3397 = vmatmul.f32.gmra.mxu1 %v3286_v38  ;;  %v9440_v58 = vadd.f32 %v9437_v12, %v2190_v62  ;;  %v2726_v26 = vand.u32 2147483648, %v9392_v5  ;;  %3866 = vmatmul.f32.gmra.mxu0 %v3575_v7  ;;  %v6408_v7 = vld [vmem:[%s11370_s4 + $0x2f0] sm:$0xff]  ;;  %vm2722_vm10 = vmor %vm2720_vm9, %vm2721_vm8 }
 0x37d   : > { %3522 = vmatmul.f32.gmra.mxu2 %v3234_v57  ;;  %v9447_v60 = vadd.f32 %v3475_v30, %v3350_v43  ;;  %3661 = vmatmul.f32.gmra.mxu3 %v3576_v49  ;;  %v11642_v57 = vld [vmem:[#allocation69_spill] sm:$0xff]  ;;  %v1977_v62 = vadd.f32 %v9380_v25, %v1763_v16  ;;  %vm2725_vm11 = vcmp.eq.f32.partialorder %v2724_v37, 8.507059e+37  ;;  %vm2735_vm13 = vweird.f32 %v9427_v50 }
 0x37e   : > { %v3162_v0 = vmul.f32 %v9443_v55, %v2946_v15  ;;  %v2718_v3 = vmul.f32 %v6618_v2, %v2717_v8  ;;  %v2266_v40 = vsub.f32 0.0, %v9440_v58  ;;  %v1336_v17 = vadd.f32 %v11642_v57, %v1122_v24  ;;  %v11643_v15 = vld [vmem:[#allocation57_spill] sm:$0xff]  ;;  %v11644_v8 = vld [vmem:[#allocation58_spill] sm:$0xff]  ;;  %4264 = vmatpush.msrb.mxu2 %v6408_v7 }
 0x37f   : > { %v3353_v32 = vpop.f32.mrf.mxu1  ;;  %v680_v6 = vadd.f32 %v11644_v8, %v11643_v15  ;;  %v2727_v24 = vor.u32 1.1754944e-38, %v2726_v26  ;;  %v3287_v16 = vld [vmem:[#allocation2 + $0xb1] sm:$0xff]  ;;  %v11645_v57 = vld [vmem:[#allocation106_spill] sm:$0xff] }
 0x380   : > { %v9451_v38 = vpop.f32.mrf.mxu3  ;;  %v6620_v36 = vpop.eup %6619  ;;  %3198 = vst [vmem:[#allocation2 + $0xbb] sm:$0xff] %v3162_v0  ;;  %v2719_v45 = vadd.f32 %v6618_v2, %v2718_v3  ;;  %v2327_v43 = vmul.f32 1.442695, %v2266_v40  ;;  %v3235_v0 = vld [vmem:[#allocation2 + $0xb0] sm:$0xff]  ;;  %v1550_v55 = vadd.f32 %v11645_v57, %v1336_v17  ;;  %v2741_v17 = vand.u32 2147483648, %v9427_v50 }
 0x381   : > { %v2135_v30 = vpop.f32.mrf.mxu0  ;;  %v6622_v52 = vpop.eup %6621  ;;  %v9462_v25 = vadd.f32 1.0, %v6620_v36 }
 0x382   : > { %v2191_v3 = vadd.f32 %v2135_v30, %v1977_v62  ;;  %v2723_v5 = vsel %vm2722_vm10, %v6618_v2, %v2719_v45  ;;  %v2731_v40 = vmul.f32 %v6622_v52, %v9427_v50  ;;  %6623 = vpow2.f32 %v2327_v43  ;;  %v3577_v62 = vld [vmem:[#allocation2 + $0x4a] sm:$0xff]  ;;  %v11646_v2 = vld [vmem:[#allocation33_spill] sm:$0xff]  ;;  %v9472_v45 = vpop.permute.xlu1 %3073  ;;  %v9525_v53 = vpop.permute.xlu0 %3083 }
 0x383   : > { %v2728_v13 = vsel %vm2725_vm11, %v2727_v24, %v2723_v5  ;;  %6625 = vrcp.f32 %v9462_v25  ;;  %v909_v37 = vadd.f32 %v11646_v2, %v680_v6  ;;  %11647 = vst [vmem:[#allocation3_spill] sm:$0xff] %v9472_v45  ;;  %v2739_v43 = vand.u32 2147483647, %v9427_v50 }
 0x384   : > { %v2947_v15 = vmul.f32 %v2728_v13, %v9338_v20  ;;  %v2732_v8 = vsub.f32 1.0, %v2731_v40  ;;  %3400 = vmatmul.f32.gmra.mxu1 %v3287_v16  ;;  %v9469_v26 = vadd.f32 %v9437_v12, %v2191_v3  ;;  %3869 = vmatmul.f32.gmra.mxu0 %v3576_v49  ;;  %vm2736_vm12 = vweird.f32 %v6622_v52  ;;  %v11648_v16 = vld [vmem:[#allocation66_spill] sm:$0xff]  ;;  %v6383_v49 = vld [vmem:[%s11370_s4 + $0x228] sm:$0xff]  ;;  %11658 = vst [vmem:[#allocation6_spill] sm:$0xff] %v9525_v53 }
 0x385   : > { %3525 = vmatmul.f32.gmra.mxu2 %v3235_v0  ;;  %3664 = vmatmul.f32.gmra.mxu3 %v3577_v62  ;;  %v1123_v6 = vadd.f32 %v11648_v16, %v909_v37  ;;  %v11649_v0 = vld [vmem:[#allocation108_spill] sm:$0xff]  ;;  %vm2737_vm14 = vmor %vm2735_vm13, %vm2736_vm12  ;;  %vm2740_vm15 = vcmp.eq.f32.partialorder %v2739_v43, 8.507059e+37  ;;  %v2756_v43 = vand.u32 2147483648, %v9462_v25  ;;  %vm2750_vm1 = vweird.f32 %v9462_v25 }
 0x386   : > { %v3478_v36 = vpop.f32.mrf.mxu2  ;;  %v3163_v20 = vmul.f32 %v9472_v45, %v2947_v15  ;;  %v2733_v13 = vmul.f32 %v6622_v52, %v2732_v8  ;;  %v2267_v30 = vsub.f32 0.0, %v9469_v26  ;;  %v1764_v3 = vadd.f32 %v11649_v0, %v1550_v55  ;;  %v11650_v15 = vld [vmem:[#allocation71_spill] sm:$0xff]  ;;  %4059 = vmatpush.msrb.mxu1 %v6383_v49 }
 0x387   : > { %v9476_v7 = vadd.f32 %v3478_v36, %v3353_v32  ;;  %v1337_v8 = vadd.f32 %v11650_v15, %v1123_v6  ;;  %v2742_v36 = vor.u32 1.1754944e-38, %v2741_v17  ;;  %v9496_v15 = vpop.permute.xlu2 %3078 }
 0x388   : > { %v9480_v24 = vpop.f32.mrf.mxu3  ;;  %v6624_v5 = vpop.eup %6623  ;;  %3199 = vst [vmem:[#allocation2 + $0xc3] sm:$0xff] %v3163_v20  ;;  %v2734_v40 = vadd.f32 %v6622_v52, %v2733_v13  ;;  %v2329_v32 = vmul.f32 1.442695, %v2267_v30  ;;  %v1978_v2 = vadd.f32 %v9417_v33, %v1764_v3  ;;  %v3288_v20 = vld [vmem:[#allocation2 + $0xb9] sm:$0xff] }
 0x389   : > { %v6626_v57 = vpop.eup %6625  ;;  %v9490_v37 = vadd.f32 1.0, %v6624_v5  ;;  %v3356_v55 = vpop.f32.mrf.mxu1  ;;  %v3236_v13 = vld [vmem:[#allocation2 + $0xb8] sm:$0xff]  ;;  %v11651_v5 = vld [vmem:[#allocation14_spill] sm:$0xff]  ;;  %11652 = vst [vmem:[#allocation82_spill] sm:$0xff] %v9496_v15 }
 0x38a   : > { %v2738_v16 = vsel %vm2737_vm14, %v6622_v52, %v2734_v40  ;;  %v2746_v50 = vmul.f32 %v6626_v57, %v9462_v25  ;;  %6627 = vpow2.f32 %v2329_v32  ;;  %v2138_v30 = vpop.f32.mrf.mxu0  ;;  %v3578_v3 = vld [vmem:[#allocation2 + $0x52] sm:$0xff]  ;;  %v1551_v49 = vadd.f32 %v11651_v5, %v1337_v8 }
 0x38b   : > { %v2743_v0 = vsel %vm2740_vm15, %v2742_v36, %v2738_v16  ;;  %6629 = vrcp.f32 %v9490_v37  ;;  %v2192_v33 = vadd.f32 %v2138_v30, %v1978_v2  ;;  %v2754_v52 = vand.u32 2147483647, %v9462_v25  ;;  %v11653_v36 = vld [vmem:[#allocation68_spill] sm:$0xff]  ;;  %v11654_v2 = vld [vmem:[#allocation73_spill] sm:$0xff] }
 0x38c   : > { %v2948_v6 = vmul.f32 %v2743_v0, %v9367_v63  ;;  %v2747_v17 = vsub.f32 1.0, %v2746_v50  ;;  %3403 = vmatmul.f32.gmra.mxu1 %v3288_v20  ;;  %3872 = vmatmul.f32.gmra.mxu0 %v3577_v62  ;;  %vm2751_vm0 = vweird.f32 %v6626_v57  ;;  %v1338_v20 = vadd.f32 %v11654_v2, %v11653_v36 }
 0x38d   : > { %3528 = vmatmul.f32.gmra.mxu2 %v3236_v13  ;;  %3667 = vmatmul.f32.gmra.mxu3 %v3578_v3  ;;  %v9502_v63 = vadd.f32 %v9437_v12, %v2192_v33  ;;  %vm2752_vm2 = vmor %vm2750_vm1, %vm2751_vm0  ;;  %v2757_v33 = vor.u32 1.1754944e-38, %v2756_v43  ;;  %vm2755_vm3 = vcmp.eq.f32.partialorder %v2754_v52, 8.507059e+37  ;;  %v3579_v52 = vld [vmem:[#allocation2 + $0x5a] sm:$0xff]  ;;  %vm2765_vm5 = vweird.f32 %v9490_v37 }
 0x38e   : > { %v3164_v40 = vmul.f32 %v9496_v15, %v2948_v6  ;;  %v2748_v32 = vmul.f32 %v6626_v57, %v2747_v17  ;;  %v11655_v6 = vld [vmem:[#allocation16_spill] sm:$0xff]  ;;  %v1552_v45 = vadd.f32 %v8799_v31, %v1338_v20  ;;  %v2771_v31 = vand.u32 2147483648, %v9490_v37 }
 0x38f   : > { %v2268_v50 = vsub.f32 0.0, %v9502_v63  ;;  %v1765_v17 = vadd.f32 %v11655_v6, %v1551_v49  ;;  %v3289_v2 = vld [vmem:[#allocation2 + $0xc1] sm:$0xff] }
 0x390   : > { %v3481_v13 = vpop.f32.mrf.mxu2  ;;  %v6628_v8 = vpop.eup %6627  ;;  %3200 = vst [vmem:[#allocation2 + $0xcb] sm:$0xff] %v3164_v40  ;;  %v2749_v16 = vadd.f32 %v6626_v57, %v2748_v32  ;;  %v3237_v15 = vld [vmem:[#allocation2 + $0xc0] sm:$0xff] }
 0x391   : > { %v9508_v30 = vadd.f32 %v3481_v13, %v3356_v55  ;;  %v9510_v62 = vpop.f32.mrf.mxu3  ;;  %v6630_v0 = vpop.eup %6629  ;;  %v9513_v5 = vadd.f32 1.0, %v6628_v8  ;;  %v2331_v32 = vmul.f32 1.442695, %v2268_v50  ;;  %v6407_v55 = vld [vmem:[%s11370_s4 + $0x2e8] sm:$0xff]  ;;  %v1979_v43 = vadd.f32 %v9451_v38, %v1765_v17 }
 0x392   : > { %v3359_v36 = vpop.f32.mrf.mxu1  ;;  %v2753_v40 = vsel %vm2752_vm2, %v6626_v57, %v2749_v16  ;;  %v2761_v25 = vmul.f32 %v6630_v0, %v9490_v37  ;;  %v2141_v13 = vpop.f32.mrf.mxu0  ;;  %4265 = vmatpush.msrb.mxu2 %v6407_v55  ;;  %v11656_v16 = vld [vmem:[#allocation70_spill] sm:$0xff]  ;;  %v11657_v50 = vld [vmem:[#allocation75_spill] sm:$0xff]  ;;  %vm2766_vm4 = vweird.f32 %v6630_v0  ;;  %v2772_v55 = vor.u32 1.1754944e-38, %v2771_v31 }
 0x393   : > { %v2758_v49 = vsel %vm2755_vm3, %v2757_v33, %v2753_v40  ;;  %6631 = vrcp.f32 %v9513_v5  ;;  %v1339_v6 = vadd.f32 %v11657_v50, %v11656_v16  ;;  %v2193_v20 = vadd.f32 %v2141_v13, %v1979_v43  ;;  %vm2767_vm6 = vmor %vm2765_vm5, %vm2766_vm4 }
 0x394   : > { %v2949_v8 = vmul.f32 %v2758_v49, %v9404_v56  ;;  %v2762_v57 = vsub.f32 1.0, %v2761_v25  ;;  %6633 = vpow2.f32 %v2331_v32  ;;  %3406 = vmatmul.f32.gmra.mxu1 %v3289_v2  ;;  %3875 = vmatmul.f32.gmra.mxu0 %v3578_v3  ;;  %v2769_v56 = vand.u32 2147483647, %v9490_v37 }
 0x395   : > { %3531 = vmatmul.f32.gmra.mxu2 %v3237_v15  ;;  %3670 = vmatmul.f32.gmra.mxu3 %v3579_v52  ;;  %v1766_v33 = vadd.f32 %v8835_v35, %v1552_v45  ;;  %v9532_v15 = vadd.f32 %v9437_v12, %v2193_v20  ;;  %vm2780_vm9 = vweird.f32 %v9513_v5 }
 0x396   : > { %v3165_v38 = vmul.f32 %v9525_v53, %v2949_v8  ;;  %v2763_v17 = vmul.f32 %v6630_v0, %v2762_v57  ;;  %v1553_v57 = vadd.f32 %v8857_v47, %v1339_v6  ;;  %vm2770_vm7 = vcmp.eq.f32.partialorder %v2769_v56, 8.507059e+37  ;;  %v6382_v47 = vld [vmem:[%s11370_s4 + $0x220] sm:$0xff]  ;;  %v9551_v6 = vpop.permute.xlu1 %3088 }
 0x397   : > { %v1980_v13 = vadd.f32 %v9480_v24, %v1766_v33  ;;  %v2269_v49 = vsub.f32 0.0, %v9532_v15  ;;  %v3290_v45 = vld [vmem:[#allocation2 + $0xc9] sm:$0xff]  ;;  %v11660_v24 = vld [vmem:[#allocation77_spill] sm:$0xff]  ;;  %11661 = vst [vmem:[#allocation38_spill] sm:$0xff] %v9551_v6  ;;  %v2784_v56 = vand.u32 2147483647, %v9513_v5  ;;  %4060 = vmatpush.msrb.mxu1 %v6382_v47 }
 0x398   : > { %v3484_v2 = vpop.f32.mrf.mxu2  ;;  %3201 = vst [vmem:[#allocation2 + $0xd3] sm:$0xff] %v3165_v38  ;;  %v2764_v40 = vadd.f32 %v6630_v0, %v2763_v17  ;;  %v3238_v43 = vld [vmem:[#allocation2 + $0xc8] sm:$0xff]  ;;  %v11659_v17 = vld [vmem:[#allocation72_spill] sm:$0xff] }
 0x399   : > { %v9535_v25 = vadd.f32 %v3484_v2, %v3359_v36  ;;  %v9537_v32 = vpop.f32.mrf.mxu3  ;;  %v6632_v3 = vpop.eup %6631  ;;  %v2333_v38 = vmul.f32 1.442695, %v2269_v49  ;;  %v1340_v33 = vadd.f32 %v11660_v24, %v11659_v17  ;;  %v1767_v49 = vadd.f32 %v8895_v14, %v1553_v57 }
 0x39a   : > { %v3362_v35 = vpop.f32.mrf.mxu1  ;;  %v6634_v8 = vpop.eup %6633  ;;  %v2768_v16 = vsel %vm2767_vm6, %v6630_v0, %v2764_v40  ;;  %v2776_v37 = vmul.f32 %v6632_v3, %v9513_v5  ;;  %v3580_v0 = vld [vmem:[#allocation2 + $0x62] sm:$0xff]  ;;  %vm2781_vm8 = vweird.f32 %v6632_v3  ;;  %v2786_v40 = vand.u32 2147483648, %v9513_v5 }
 0x39b   : > { %v2144_v36 = vpop.f32.mrf.mxu0  ;;  %v2773_v50 = vsel %vm2770_vm7, %v2772_v55, %v2768_v16  ;;  %v9543_v20 = vadd.f32 1.0, %v6634_v8  ;;  %vm2782_vm10 = vmor %vm2780_vm9, %vm2781_vm8  ;;  %v1554_v14 = vadd.f32 %v8911_v10, %v1340_v33  ;;  %vm2785_vm11 = vcmp.eq.f32.partialorder %v2784_v56, 8.507059e+37 }
 0x39c   : > { %v2194_v31 = vadd.f32 %v2144_v36, %v1980_v13  ;;  %v2950_v2 = vmul.f32 %v2773_v50, %v9440_v58  ;;  %v2777_v53 = vsub.f32 1.0, %v2776_v37  ;;  %3409 = vmatmul.f32.gmra.mxu1 %v3290_v45  ;;  %3878 = vmatmul.f32.gmra.mxu0 %v3579_v52  ;;  %v1981_v36 = vadd.f32 %v9510_v62, %v1767_v49  ;;  %v3581_v62 = vld [vmem:[#allocation2 + $0x6a] sm:$0xff]  ;;  %v11664_v49 = vld [vmem:[#allocation81_spill] sm:$0xff] }
 0x39d   : > { %3534 = vmatmul.f32.gmra.mxu2 %v3238_v43  ;;  %6635 = vrcp.f32 %v9543_v20  ;;  %3673 = vmatmul.f32.gmra.mxu3 %v3580_v0  ;;  %vm2795_vm13 = vweird.f32 %v9543_v20 }
 0x39e   : > { %v3166_v58 = vmul.f32 %v9551_v6, %v2950_v2  ;;  %v2778_v55 = vmul.f32 %v6632_v3, %v2777_v53  ;;  %6637 = vpow2.f32 %v2333_v38  ;;  %v9558_v13 = vadd.f32 %v9437_v12, %v2194_v31  ;;  %v4003_v6 = vld [vmem:[#allocation2 + $0x4b] sm:$0xff] }
 0x39f   : > { %v2787_v53 = vor.u32 1.1754944e-38, %v2786_v40  ;;  %v3291_v52 = vld [vmem:[#allocation2 + $0xd1] sm:$0xff]  ;;  %v9572_v40 = vpop.permute.xlu2 %3093 }
 0x3a0   : > { %v3487_v45 = vpop.f32.mrf.mxu2  ;;  %3202 = vst [vmem:[#allocation2 + $0xdb] sm:$0xff] %v3166_v58  ;;  %v2779_v43 = vadd.f32 %v6632_v3, %v2778_v55  ;;  %v2270_v8 = vsub.f32 0.0, %v9558_v13  ;;  %v3239_v38 = vld [vmem:[#allocation2 + $0xd0] sm:$0xff] }
 0x3a1   : > { %v9563_v16 = vadd.f32 %v3487_v45, %v3362_v35  ;;  %v9565_v37 = vpop.f32.mrf.mxu3  ;;  %11662 = vst [vmem:[#allocation4_spill] sm:$0xff] %v9572_v40 }
 0x3a2   : > { %v3365_v50 = vpop.f32.mrf.mxu1  ;;  %v2783_v57 = vsel %vm2782_vm10, %v6632_v3, %v2779_v43  ;;  %v2335_v31 = vmul.f32 1.442695, %v2270_v8  ;;  %v1768_v3 = vadd.f32 %v8961_v51, %v1554_v14  ;;  %v2799_v43 = vand.u32 2147483647, %v9543_v20 }
 0x3a3   : > { %v2147_v5 = vpop.f32.mrf.mxu0  ;;  %v6636_v17 = vpop.eup %6635  ;;  %v2788_v24 = vsel %vm2785_vm11, %v2787_v53, %v2783_v57  ;;  %v2801_v8 = vand.u32 2147483648, %v9543_v20 }
 0x3a4   : > { %v2195_v35 = vadd.f32 %v2147_v5, %v1981_v36  ;;  %v6638_v2 = vpop.eup %6637  ;;  %v2951_v47 = vmul.f32 %v2788_v24, %v9469_v26  ;;  %v2791_v58 = vmul.f32 %v6636_v17, %v9543_v20  ;;  %6639 = vpow2.f32 %v2335_v31  ;;  %3412 = vmatmul.f32.gmra.mxu1 %v3291_v52  ;;  %3881 = vmatmul.f32.gmra.mxu0 %v3580_v0  ;;  %v11663_v26 = vld [vmem:[#allocation74_spill] sm:$0xff] }
 0x3a5   : > { %3537 = vmatmul.f32.gmra.mxu2 %v3239_v38  ;;  %v9574_v55 = vadd.f32 1.0, %v6638_v2  ;;  %3676 = vmatmul.f32.gmra.mxu3 %v3581_v62  ;;  %v1341_v45 = vadd.f32 %v11664_v49, %v11663_v26  ;;  %vm2796_vm12 = vweird.f32 %v6636_v17  ;;  %v1982_v0 = vadd.f32 %v9537_v32, %v1768_v3  ;;  %v6406_v2 = vld [vmem:[%s11370_s4 + $0x2e0] sm:$0xff] }
 0x3a6   : > { %v9577_v10 = vadd.f32 %v9437_v12, %v2195_v35  ;;  %v3167_v33 = vmul.f32 %v9572_v40, %v2951_v47  ;;  %v2792_v56 = vsub.f32 1.0, %v2791_v58  ;;  %vm2797_vm14 = vmor %vm2795_vm13, %vm2796_vm12  ;;  %v2802_v32 = vor.u32 1.1754944e-38, %v2801_v8  ;;  %4266 = vmatpush.msrb.mxu2 %v6406_v2 }
 0x3a7   : > { %6641 = vrcp.f32 %v9574_v55  ;;  %v3292_v57 = vld [vmem:[#allocation2 + $0xd9] sm:$0xff]  ;;  %v1555_v58 = vadd.f32 %v8981_v41, %v1341_v45  ;;  %vm2800_vm15 = vcmp.eq.f32.partialorder %v2799_v43, 8.507059e+37  ;;  %vm2810_vm1 = vweird.f32 %v9574_v55 }
 0x3a8   : > { %v3490_v53 = vpop.f32.mrf.mxu2  ;;  %3203 = vst [vmem:[#allocation2 + $0xe3] sm:$0xff] %v3167_v33  ;;  %v2793_v36 = vmul.f32 %v6636_v17, %v2792_v56  ;;  %v2271_v52 = vsub.f32 0.0, %v9577_v10  ;;  %v3240_v31 = vld [vmem:[#allocation2 + $0xd8] sm:$0xff]  ;;  %v11665_v33 = vld [vmem:[#allocation76_spill] sm:$0xff] }
 0x3a9   : > { %v9587_v51 = vadd.f32 %v3490_v53, %v3365_v50  ;;  %v9589_v38 = vpop.f32.mrf.mxu3  ;;  %v6381_v50 = vld [vmem:[%s11370_s4 + $0x218] sm:$0xff]  ;;  %v1769_v8 = vadd.f32 %v9044_v11, %v1555_v58 }
 0x3aa   : > { %v3368_v14 = vpop.f32.mrf.mxu1  ;;  %v6640_v5 = vpop.eup %6639  ;;  %v2794_v24 = vadd.f32 %v6636_v17, %v2793_v36  ;;  %v2337_v35 = vmul.f32 1.442695, %v2271_v52  ;;  %4061 = vmatpush.msrb.mxu1 %v6381_v50  ;;  %v11666_v56 = vld [vmem:[#allocation85_spill] sm:$0xff] }
 0x3ab   : > { %v2150_v47 = vpop.f32.mrf.mxu0  ;;  %v9601_v3 = vadd.f32 1.0, %v6640_v5  ;;  %v1342_v26 = vadd.f32 %v11666_v56, %v11665_v33  ;;  %v3582_v53 = vld [vmem:[#allocation2 + $0x72] sm:$0xff]  ;;  %v1983_v11 = vadd.f32 %v9565_v37, %v1769_v8 }
 0x3ac   : > { %v2196_v20 = vadd.f32 %v2150_v47, %v1982_v0  ;;  %v2798_v49 = vsel %vm2797_vm14, %v6636_v17, %v2794_v24  ;;  %6643 = vpow2.f32 %v2337_v35  ;;  %3415 = vmatmul.f32.gmra.mxu1 %v3292_v57  ;;  %3884 = vmatmul.f32.gmra.mxu0 %v3581_v62  ;;  %v9609_v0 = vpop.permute.xlu0 %3098  ;;  %v2816_v62 = vand.u32 2147483648, %v9574_v55  ;;  %v11669_v8 = vld [vmem:[#allocation88_spill] sm:$0xff] }
 0x3ad   : > { %3540 = vmatmul.f32.gmra.mxu2 %v3240_v31  ;;  %v6642_v36 = vpop.eup %6641  ;;  %v2803_v52 = vsel %vm2800_vm15, %v2802_v32, %v2798_v49  ;;  %6645 = vrcp.f32 %v9601_v3  ;;  %3679 = vmatmul.f32.gmra.mxu3 %v3582_v53  ;;  %11667 = vst [vmem:[#allocation83_spill] sm:$0xff] %v9609_v0  ;;  %v1556_v57 = vadd.f32 %v9063_v1, %v1342_v26  ;;  %vm2825_vm5 = vweird.f32 %v9601_v3 }
 0x3ae   : > { %v2952_v41 = vmul.f32 %v2803_v52, %v9502_v63  ;;  %v2806_v45 = vmul.f32 %v6642_v36, %v9574_v55  ;;  %v9612_v17 = vadd.f32 %v9437_v12, %v2196_v20  ;;  %v2814_v63 = vand.u32 2147483647, %v9574_v55 }
 0x3af   : > { %v3293_v47 = vld [vmem:[#allocation2 + $0xe1] sm:$0xff]  ;;  %vm2811_vm0 = vweird.f32 %v6642_v36  ;;  %v1770_v49 = vadd.f32 %v9105_v19, %v1556_v57  ;;  %v2829_v57 = vand.u32 2147483647, %v9601_v3 }
 0x3b0   : > { %v3493_v43 = vpop.f32.mrf.mxu2  ;;  %v3168_v31 = vmul.f32 %v9609_v0, %v2952_v41  ;;  %v2807_v5 = vsub.f32 1.0, %v2806_v45  ;;  %v2272_v2 = vsub.f32 0.0, %v9612_v17  ;;  %v3241_v58 = vld [vmem:[#allocation2 + $0xe0] sm:$0xff]  ;;  %v11668_v45 = vld [vmem:[#allocation80_spill] sm:$0xff]  ;;  %vm2812_vm2 = vmor %vm2810_vm1, %vm2811_vm0  ;;  %vm2815_vm3 = vcmp.eq.f32.partialorder %v2814_v63, 8.507059e+37 }
 0x3b1   : > { %v9616_v24 = vadd.f32 %v3493_v43, %v3368_v14  ;;  %v9618_v35 = vpop.f32.mrf.mxu3  ;;  %v3583_v41 = vld [vmem:[#allocation2 + $0x7a] sm:$0xff]  ;;  %v1343_v43 = vadd.f32 %v11669_v8, %v11668_v45  ;;  %vm2830_vm7 = vcmp.eq.f32.partialorder %v2829_v57, 8.507059e+37 }
 0x3b2   : > { %v3371_v50 = vpop.f32.mrf.mxu1  ;;  %v6644_v32 = vpop.eup %6643  ;;  %3204 = vst [vmem:[#allocation2 + $0xeb] sm:$0xff] %v3168_v31  ;;  %v2808_v1 = vmul.f32 %v6642_v36, %v2807_v5  ;;  %v2339_v56 = vmul.f32 1.442695, %v2272_v2  ;;  %v2817_v31 = vor.u32 1.1754944e-38, %v2816_v62  ;;  %v2831_v2 = vand.u32 2147483648, %v9601_v3 }
 0x3b3   : > { %v2153_v20 = vpop.f32.mrf.mxu0  ;;  %v6646_v14 = vpop.eup %6645  ;;  %v9624_v33 = vadd.f32 1.0, %v6644_v32 }
 0x3b4   : > { %v2197_v26 = vadd.f32 %v2153_v20, %v1983_v11  ;;  %v2809_v52 = vadd.f32 %v6642_v36, %v2808_v1  ;;  %v2821_v37 = vmul.f32 %v6646_v14, %v9601_v3  ;;  %3418 = vmatmul.f32.gmra.mxu1 %v3293_v47  ;;  %3887 = vmatmul.f32.gmra.mxu0 %v3582_v53  ;;  %vm2826_vm4 = vweird.f32 %v6646_v14  ;;  %v9644_v20 = vpop.permute.xlu1 %3103 }
 0x3b5   : > { %3543 = vmatmul.f32.gmra.mxu2 %v3241_v58  ;;  %6647 = vrcp.f32 %v9624_v33  ;;  %3682 = vmatmul.f32.gmra.mxu3 %v3583_v41  ;;  %v1557_v1 = vadd.f32 %v9129_v21, %v1343_v43  ;;  %11670 = vst [vmem:[#allocation8_spill] sm:$0xff] %v9644_v20  ;;  %v1984_v53 = vadd.f32 %v9589_v38, %v1770_v49  ;;  %vm2827_vm6 = vmor %vm2825_vm5, %vm2826_vm4  ;;  %v2832_v21 = vor.u32 1.1754944e-38, %v2831_v2 }
 0x3b6   : > { %v2813_v5 = vsel %vm2812_vm2, %v6642_v36, %v2809_v52  ;;  %v2822_v11 = vsub.f32 1.0, %v2821_v37  ;;  %6649 = vpow2.f32 %v2339_v56  ;;  %v9633_v19 = vadd.f32 %v9437_v12, %v2197_v26 }
 0x3b7   : > { %v2818_v55 = vsel %vm2815_vm3, %v2817_v31, %v2813_v5  ;;  %v3584_v5 = vld [vmem:[#allocation2 + $0x82] sm:$0xff]  ;;  %v1771_v2 = vadd.f32 %v9162_v18, %v1557_v1  ;;  %v6404_v18 = vld [vmem:[%s11370_s4 + $0x2d0] sm:$0xff]  ;;  %vm2840_vm9 = vweird.f32 %v9624_v33 }
 0x3b8   : > { %v3496_v47 = vpop.f32.mrf.mxu2  ;;  %v2953_v63 = vmul.f32 %v2818_v55, %v9532_v15  ;;  %v2823_v62 = vmul.f32 %v6646_v14, %v2822_v11  ;;  %v2273_v58 = vsub.f32 0.0, %v9633_v19 }
 0x3b9   : > { %v9639_v32 = vadd.f32 %v3496_v47, %v3371_v50  ;;  %v9641_v36 = vpop.f32.mrf.mxu3  ;;  %v3294_v26 = vld [vmem:[#allocation2 + $0xe9] sm:$0xff]  ;;  %v6405_v50 = vld [vmem:[%s11370_s4 + $0x2d8] sm:$0xff] }
 0x3ba   : > { %v3374_v56 = vpop.f32.mrf.mxu1  ;;  %v3242_v52 = vld [vmem:[#allocation2 + $0xe8] sm:$0xff]  ;;  %v3169_v37 = vmul.f32 %v9644_v20, %v2953_v63  ;;  %v2824_v45 = vadd.f32 %v6646_v14, %v2823_v62  ;;  %v2341_v15 = vmul.f32 1.442695, %v2273_v58  ;;  %4267 = vmatpush.msrb.mxu2 %v6405_v50  ;;  %v11671_v63 = vld [vmem:[#allocation84_spill] sm:$0xff]  ;;  %v11672_v62 = vld [vmem:[#allocation90_spill] sm:$0xff]  ;;  %v1985_v50 = vadd.f32 %v9618_v35, %v1771_v2 }
 0x3bb   : > { %v2156_v8 = vpop.f32.mrf.mxu0  ;;  %v9652_v31 = vpop.eup %6647  ;;  %v6380_v35 = vld [vmem:[%s11370_s4 + $0x210] sm:$0xff]  ;;  %v4002_v20 = vld [vmem:[#allocation2 + $0x43] sm:$0xff] }
 0x3bc   : > { %v2198_v38 = vadd.f32 %v2156_v8, %v1984_v53  ;;  %v6650_v49 = vpop.eup %6649  ;;  %3205 = vst [vmem:[#allocation2 + $0xf3] sm:$0xff] %v3169_v37  ;;  %v2828_v43 = vsel %vm2827_vm6, %v6646_v14, %v2824_v45  ;;  %v2836_v3 = vmul.f32 %v9652_v31, %v9624_v33  ;;  %6651 = vpow2.f32 %v2341_v15  ;;  %3421 = vmatmul.f32.gmra.mxu1 %v3294_v26  ;;  %v9666_v53 = vpop.permute.xlu2 %3108  ;;  %v3597_v40 = vld [vmem:[#allocation2 + $0xea] sm:$0xff] }
 0x3bd   : > { %3546 = vmatmul.f32.gmra.mxu2 %v3242_v52  ;;  %v2833_v11 = vsel %vm2830_vm7, %v2832_v21, %v2828_v43  ;;  %v9657_v55 = vadd.f32 1.0, %v6650_v49  ;;  %3685 = vmatmul.f32.gmra.mxu3 %v3584_v5  ;;  %v1344_v14 = vadd.f32 %v11672_v62, %v11671_v63  ;;  %11673 = vst [vmem:[#allocation86_spill] sm:$0xff] %v9666_v53  ;;  %vm2841_vm8 = vweird.f32 %v9652_v31  ;;  %v6403_v21 = vld [vmem:[%s11370_s4 + $0x2c8] sm:$0xff] }
 0x3be   : > { %v9660_v47 = vadd.f32 %v9437_v12, %v2198_v38  ;;  %v2954_v57 = vmul.f32 %v2833_v11, %v9558_v13  ;;  %v2837_v58 = vsub.f32 1.0, %v2836_v3  ;;  %3890 = vmatmul.f32.gmra.mxu0 %v3583_v41  ;;  %v2844_v26 = vand.u32 2147483647, %v9624_v33  ;;  %4268 = vmatpush.msrb.mxu2 %v6404_v18  ;;  %vm9690_vm10 = vmor %vm2840_vm9, %vm2841_vm8  ;;  %v6401_v18 = vld [vmem:[%s11370_s4 + $0x2b8] sm:$0xff] }
 0x3bf   : > { %v2846_v52 = vand.u32 2147483648, %v9624_v33  ;;  %6653 = vrcp.f32 %v9657_v55  ;;  %v1558_v3 = vadd.f32 %v9173_v29, %v1344_v14  ;;  %4062 = vmatpush.msrb.mxu1 %v6380_v35  ;;  %v3585_v29 = vld [vmem:[#allocation2 + $0x8a] sm:$0xff]  ;;  %vm2855_vm13 = vweird.f32 %v9657_v55 }
 0x3c0   : > { %v3499_v37 = vpop.f32.mrf.mxu2  ;;  %v3170_v1 = vmul.f32 %v9666_v53, %v2954_v57  ;;  %v2838_v13 = vmul.f32 %v9652_v31, %v2837_v58  ;;  %v2274_v41 = vsub.f32 0.0, %v9660_v47  ;;  %4269 = vmatpush.msrb.mxu2 %v6403_v21  ;;  %v6402_v58 = vld [vmem:[%s11370_s4 + $0x2c0] sm:$0xff]  ;;  %vm2845_vm11 = vcmp.eq.f32.partialorder %v2844_v26, 8.507059e+37  ;;  %v9713_v26 = vpop.permute.xlu0 %3113  ;;  %v6400_v21 = vld [vmem:[%s11370_s4 + $0x2b0] sm:$0xff] }
 0x3c1   : > { %v9678_v45 = vadd.f32 %v3499_v37, %v3374_v56  ;;  %v9680_v15 = vpop.f32.mrf.mxu3  ;;  %v2847_v11 = vor.u32 1.1754944e-38, %v2846_v52  ;;  %11676 = vst [vmem:[#allocation36_spill] sm:$0xff] %v9713_v26 }
 0x3c2   : > { %v3377_v8 = vpop.f32.mrf.mxu1  ;;  %v6652_v38 = vpop.eup %6651  ;;  %3206 = vst [vmem:[#allocation2 + $0xfb] sm:$0xff] %v3170_v1  ;;  %v2839_v49 = vadd.f32 %v9652_v31, %v2838_v13  ;;  %v2343_v43 = vmul.f32 1.442695, %v2274_v41  ;;  %4270 = vmatpush.msrb.mxu2 %v6402_v58 }
 0x3c3   : > { %v2159_v33 = vpop.f32.mrf.mxu0  ;;  %v9698_v2 = vadd.f32 1.0, %v6652_v38  ;;  %v3295_v63 = vld [vmem:[#allocation2 + $0xf1] sm:$0xff] }
 0x3c4   : > { %v3243_v62 = vld [vmem:[#allocation2 + $0xf0] sm:$0xff]  ;;  %v2199_v57 = vadd.f32 %v2159_v33, %v1985_v50  ;;  %v2843_v37 = vsel %vm9690_vm10, %v9652_v31, %v2839_v49  ;;  %6655 = vpow2.f32 %v2343_v43  ;;  %3424 = vmatmul.f32.gmra.mxu1 %v3295_v63  ;;  %v1772_v31 = vadd.f32 %v9207_v59, %v1558_v3  ;;  %4271 = vmatpush.msrb.mxu2 %v6401_v18  ;;  %v6399_v63 = vld [vmem:[%s11370_s4 + $0x2a8] sm:$0xff]  ;;  %v6398_v18 = vld [vmem:[%s11370_s4 + $0x2a0] sm:$0xff] }
 0x3c5   : > { %3549 = vmatmul.f32.gmra.mxu2 %v3243_v62  ;;  %v6654_v14 = vpop.eup %6653  ;;  %v2848_v52 = vsel %vm2845_vm11, %v2847_v11, %v2843_v37  ;;  %6657 = vrcp.f32 %v9698_v2  ;;  %3688 = vmatmul.f32.gmra.mxu3 %v3585_v29  ;;  %v2861_v59 = vand.u32 2147483648, %v9657_v55  ;;  %vm2870_vm1 = vweird.f32 %v9698_v2  ;;  %v3598_v39 = vld [vmem:[#allocation2 + $0xf2] sm:$0xff] }
 0x3c6   : > { %v2955_v1 = vmul.f32 %v2848_v52, %v9577_v10  ;;  %v2851_v13 = vmul.f32 %v6654_v14, %v9657_v55  ;;  %3893 = vmatmul.f32.gmra.mxu0 %v3584_v5  ;;  %v9716_v41 = vadd.f32 %v9437_v12, %v2199_v57  ;;  %v2859_v10 = vand.u32 2147483647, %v9657_v55  ;;  %4272 = vmatpush.msrb.mxu2 %v6400_v21  ;;  %v6397_v21 = vld [vmem:[%s11370_s4 + $0x298] sm:$0xff] }
 0x3c7   : > { %v1986_v43 = vadd.f32 %v9641_v36, %v1772_v31  ;;  %vm2856_vm12 = vweird.f32 %v6654_v14  ;;  %v9743_v31 = vld [vmem:[#allocation2 + $0x92] sm:$0xff] }
 0x3c8   : > { %v3502_v50 = vpop.f32.mrf.mxu2  ;;  %v3171_v38 = vmul.f32 %v9713_v26, %v2955_v1  ;;  %v2852_v49 = vsub.f32 1.0, %v2851_v13  ;;  %v2275_v35 = vsub.f32 0.0, %v9716_v41  ;;  %4273 = vmatpush.msrb.mxu2 %v6399_v63  ;;  %vm2857_vm14 = vmor %vm2855_vm13, %vm2856_vm12  ;;  %vm2860_vm15 = vcmp.eq.f32.partialorder %v2859_v10, 8.507059e+37 }
 0x3c9   : > { %v9723_v56 = vadd.f32 %v3502_v50, %v3377_v8  ;;  %v9725_v5 = vpop.f32.mrf.mxu3  ;;  %v3296_v3 = vld [vmem:[#allocation2 + $0xf9] sm:$0xff]  ;;  %v2862_v50 = vor.u32 1.1754944e-38, %v2861_v59  ;;  %v2874_v10 = vand.u32 2147483647, %v9698_v2  ;;  %v2876_v59 = vand.u32 2147483648, %v9698_v2 }
 0x3ca   : > { %v3380_v33 = vpop.f32.mrf.mxu1  ;;  %v3244_v11 = vld [vmem:[#allocation2 + $0xf8] sm:$0xff]  ;;  %v6656_v62 = vpop.eup %6655  ;;  %3207 = vst [vmem:[#allocation2 + $0x103] sm:$0xff] %v3171_v38  ;;  %v2853_v8 = vmul.f32 %v6654_v14, %v2852_v49  ;;  %v2345_v36 = vmul.f32 1.442695, %v2275_v35  ;;  %4274 = vmatpush.msrb.mxu2 %v6398_v18 }
 0x3cb   : > { %v2162_v57 = vpop.f32.mrf.mxu0  ;;  %v9733_v58 = vpop.eup %6657  ;;  %v9735_v37 = vadd.f32 1.0, %v6656_v62  ;;  %vm2875_vm3 = vcmp.eq.f32.partialorder %v2874_v10, 8.507059e+37 }
 0x3cc   : > { %v2200_v52 = vadd.f32 %v2162_v57, %v1986_v43  ;;  %v2854_v1 = vadd.f32 %v6654_v14, %v2853_v8  ;;  %v2866_v13 = vmul.f32 %v9733_v58, %v9698_v2  ;;  %3427 = vmatmul.f32.gmra.mxu1 %v3296_v3  ;;  %vm2871_vm0 = vweird.f32 %v9733_v58  ;;  %4275 = vmatpush.msrb.mxu2 %v6397_v21  ;;  %v6396_v3 = vld [vmem:[%s11370_s4 + $0x290] sm:$0xff]  ;;  %v9764_v62 = vpop.permute.xlu1 %3118  ;;  %v6379_v8 = vld [vmem:[%s11370_s4 + $0x208] sm:$0xff] }
 0x3cd   : > { %3552 = vmatmul.f32.gmra.mxu2 %v3244_v11  ;;  %6659 = vrcp.f32 %v9735_v37  ;;  %3691 = vmatmul.f32.gmra.mxu3 %v9743_v31  ;;  %11677 = vst [vmem:[#allocation37_spill] sm:$0xff] %v9764_v62  ;;  %v6395_v21 = vld [vmem:[%s11370_s4 + $0x288] sm:$0xff]  ;;  %vm9788_vm2 = vmor %vm2870_vm1, %vm2871_vm0  ;;  %vm2885_vm5 = vweird.f32 %v9735_v37 }
 0x3ce   : > { %v2858_v55 = vsel %vm2857_vm14, %v6654_v14, %v2854_v1  ;;  %v2867_v38 = vsub.f32 1.0, %v2866_v13  ;;  %6661 = vpow2.f32 %v2345_v36  ;;  %v9751_v49 = vadd.f32 %v9437_v12, %v2200_v52  ;;  %3896 = vmatmul.f32.gmra.mxu0 %v3585_v29  ;;  %4276 = vmatpush.msrb.mxu2 %v6396_v3 }
 0x3cf   : > { %v2863_v43 = vsel %vm2860_vm15, %v2862_v50, %v2858_v55  ;;  %4063 = vmatpush.msrb.mxu1 %v6379_v8  ;;  %v6378_v50 = vld [vmem:[%s11370_s4 + $0x200] sm:$0xff] }
 0x3d0   : > { %v3505_v35 = vpop.f32.mrf.mxu2  ;;  %v2956_v14 = vmul.f32 %v2863_v43, %v9612_v17  ;;  %v2868_v11 = vmul.f32 %v9733_v58, %v2867_v38  ;;  %v2276_v12 = vsub.f32 0.0, %v9751_v49  ;;  %v2877_v38 = vor.u32 1.1754944e-38, %v2876_v59  ;;  %4277 = vmatpush.msrb.mxu2 %v6395_v21  ;;  %v6394_v43 = vld [vmem:[%s11370_s4 + $0x280] sm:$0xff]  ;;  %v6441_v59 = vld [vmem:[%s11370_s4 + $0x3f8] sm:$0xff] }
 0x3d1   : > { %v9762_v29 = vadd.f32 %v3505_v35, %v3380_v33  ;;  %v3644_v63 = vpop.f32.mrf.mxu3  ;;  %v3297_v52 = vld [vmem:[#allocation2 + $0x101] sm:$0xff]  ;;  %4064 = vmatpush.msrb.mxu1 %v6378_v50  ;;  %4691 = vmatpush.msra.mxu0 %v6441_v59 }
 0x3d2   : > { %v3383_v57 = vpop.f32.mrf.mxu1  ;;  %v9770_v36 = vadd.f32 %v3644_v63, %v9345_v4  ;;  %v3245_v18 = vld [vmem:[#allocation2 + $0x100] sm:$0xff]  ;;  %v3172_v17 = vmul.f32 %v9764_v62, %v2956_v14  ;;  %v2869_v1 = vadd.f32 %v9733_v58, %v2868_v11  ;;  %v2347_v33 = vmul.f32 1.442695, %v2276_v12  ;;  %v6425_v4 = vld [vmem:[%s11370_s4 + $0x378] sm:$0xff]  ;;  %4278 = vmatpush.msrb.mxu2 %v6394_v43 }
 0x3d3   : > { %v9775_v13 = vpop.f32.mrf.mxu0  ;;  %v6660_v55 = vpop.eup %6659  ;;  %4477 = vmatpush.msra.mxu3 %v6425_v4  ;;  %v3587_v11 = vld [vmem:[#allocation2 + $0x9a] sm:$0xff] }
 0x3d4   : > { %v6662_v35 = vpop.eup %6661  ;;  %3208 = vst [vmem:[#allocation2 + $0x10b] sm:$0xff] %v3172_v17  ;;  %v2873_v3 = vsel %vm9788_vm2, %v9733_v58, %v2869_v1  ;;  %v2881_v14 = vmul.f32 %v6660_v55, %v9735_v37  ;;  %6663 = vpow2.f32 %v2347_v33  ;;  %3430 = vmatmul.f32.gmra.mxu1 %v3297_v52  ;;  %v6457_v12 = vld [vmem:[%s11370_s4 + $0x478] sm:$0xff]  ;;  %v9809_v52 = vpop.permute.xlu2 %3123  ;;  %v2891_v17 = vand.u32 2147483648, %v9735_v37 }
 0x3d5   : > { %3555 = vmatmul.f32.gmra.mxu2 %v3245_v18  ;;  %v2878_v63 = vsel %vm2875_vm3, %v2877_v38, %v2873_v3  ;;  %v9805_v8 = vadd.f32 1.0, %v6662_v35  ;;  %3694 = vmatmul.f32.gmra.mxu3 %v3587_v11  ;;  %11680 = vst [vmem:[#allocation87_spill] sm:$0xff] %v9809_v52  ;;  %v2889_v18 = vand.u32 2147483647, %v9735_v37  ;;  %vm2886_vm4 = vweird.f32 %v6660_v55  ;;  %v4001_v62 = vld [vmem:[#allocation2 + $0x3b] sm:$0xff] }
 0x3d6   : > { %v2957_v58 = vmul.f32 %v2878_v63, %v9633_v19  ;;  %v2882_v10 = vsub.f32 1.0, %v2881_v14  ;;  %3899 = vmatmul.f32.gmra.mxu0 %v9743_v31  ;;  %4905 = vmatpush.msra.mxu1 %v6457_v12  ;;  %vm2887_vm6 = vmor %vm2885_vm5, %vm2886_vm4  ;;  %v2892_v35 = vor.u32 1.1754944e-38, %v2891_v17  ;;  %v3588_v12 = vld [vmem:[#allocation2 + $0xa2] sm:$0xff] }
 0x3d7   : > { %6665 = vrcp.f32 %v9805_v8  ;;  %vm2890_vm7 = vcmp.eq.f32.partialorder %v2889_v18, 8.507059e+37  ;;  %vm2900_vm9 = vweird.f32 %v9805_v8 }
 0x3d8   : > { %v3508_v1 = vpop.f32.mrf.mxu2  ;;  %v3173_v33 = vmul.f32 %v9809_v52, %v2957_v58  ;;  %v2883_v50 = vmul.f32 %v6660_v55, %v2882_v10  ;;  %v9856_v52 = vpop.permute.xlu1 %3133 }
 0x3d9   : > { %v9815_v19 = vadd.f32 %v3508_v1, %v3383_v57  ;;  %v3647_v4 = vpop.f32.mrf.mxu3  ;;  %11682 = vst [vmem:[#allocation39_spill] sm:$0xff] %v9856_v52 }
 0x3da   : > { %v3386_v31 = vpop.f32.mrf.mxu1  ;;  %v9818_v21 = vadd.f32 %v3647_v4, %v9374_v23  ;;  %v6664_v2 = vpop.eup %6663  ;;  %3209 = vst [vmem:[#allocation2 + $0x113] sm:$0xff] %v3173_v33  ;;  %v2884_v38 = vadd.f32 %v6660_v55, %v2883_v50  ;;  %v6424_v23 = vld [vmem:[%s11370_s4 + $0x370] sm:$0xff]  ;;  %v2906_v4 = vand.u32 2147483648, %v9805_v8 }
 0x3db   : > { %v9821_v43 = vpop.f32.mrf.mxu0  ;;  %v9823_v3 = vadd.f32 1.0, %v6664_v2  ;;  %v3298_v14 = vld [vmem:[#allocation2 + $0x109] sm:$0xff]  ;;  %4478 = vmatpush.msra.mxu3 %v6424_v23 }
 0x3dc   : > { %v3246_v59 = vld [vmem:[#allocation2 + $0x108] sm:$0xff]  ;;  %v2888_v57 = vsel %vm2887_vm6, %v6660_v55, %v2884_v38  ;;  %3433 = vmatmul.f32.gmra.mxu1 %v3298_v14  ;;  %v9831_v55 = vpop.permute.xlu0 %3128  ;;  %v2904_v14 = vand.u32 2147483647, %v9805_v8 }
 0x3dd   : > { %3558 = vmatmul.f32.gmra.mxu2 %v3246_v59  ;;  %v6666_v63 = vpop.eup %6665  ;;  %v2893_v58 = vsel %vm2890_vm7, %v2892_v35, %v2888_v57  ;;  %6667 = vrcp.f32 %v9823_v3  ;;  %3697 = vmatmul.f32.gmra.mxu3 %v3588_v12  ;;  %11681 = vst [vmem:[#allocation41_spill] sm:$0xff] %v9831_v55  ;;  %vm2915_vm13 = vweird.f32 %v9823_v3 }
 0x3de   : > { %v2958_v37 = vmul.f32 %v2893_v58, %v9660_v47  ;;  %v2896_v10 = vmul.f32 %v6666_v63, %v9805_v8  ;;  %3902 = vmatmul.f32.gmra.mxu0 %v3587_v11  ;;  %vm2901_vm8 = vweird.f32 %v6666_v63  ;;  %v3589_v58 = vld [vmem:[#allocation2 + $0xaa] sm:$0xff]  ;;  %vm2905_vm11 = vcmp.eq.f32.partialorder %v2904_v14, 8.507059e+37 }
 0x3df   : > { %vm2902_vm10 = vmor %vm2900_vm9, %vm2901_vm8 }
 0x3e0   : > { %v3511_v18 = vpop.f32.mrf.mxu2  ;;  %v3174_v17 = vmul.f32 %v9831_v55, %v2958_v37  ;;  %v2897_v1 = vsub.f32 1.0, %v2896_v10  ;;  %v6456_v37 = vld [vmem:[%s11370_s4 + $0x470] sm:$0xff]  ;;  %v2907_v10 = vor.u32 1.1754944e-38, %v2906_v4 }
 0x3e1   : > { %v9834_v33 = vadd.f32 %v3511_v18, %v3386_v31  ;;  %v3650_v50 = vpop.f32.mrf.mxu3  ;;  %v3299_v47 = vld [vmem:[#allocation2 + $0x111] sm:$0xff]  ;;  %4906 = vmatpush.msra.mxu1 %v6456_v37 }
 0x3e2   : > { %v3389_v2 = vpop.f32.mrf.mxu1  ;;  %v9838_v38 = vadd.f32 %v3650_v50, %v9411_v44  ;;  %v3247_v35 = vld [vmem:[#allocation2 + $0x110] sm:$0xff]  ;;  %3210 = vst [vmem:[#allocation2 + $0x11b] sm:$0xff] %v3174_v17  ;;  %v2898_v11 = vmul.f32 %v6666_v63, %v2897_v1  ;;  %v2919_v1 = vand.u32 2147483647, %v9823_v3  ;;  %v2921_v50 = vand.u32 2147483648, %v9823_v3 }
 0x3e3   : > { %v9841_v59 = vpop.f32.mrf.mxu0  ;;  %v6668_v57 = vpop.eup %6667  ;;  %v6440_v44 = vld [vmem:[%s11370_s4 + $0x3f0] sm:$0xff] }
 0x3e4   : > { %v2899_v23 = vadd.f32 %v6666_v63, %v2898_v11  ;;  %v2911_v31 = vmul.f32 %v6668_v57, %v9823_v3  ;;  %3436 = vmatmul.f32.gmra.mxu1 %v3299_v47  ;;  %4692 = vmatpush.msra.mxu0 %v6440_v44  ;;  %vm2916_vm12 = vweird.f32 %v6668_v57  ;;  %vm2920_vm15 = vcmp.eq.f32.partialorder %v2919_v1, 8.507059e+37  ;;  %v9869_v3 = vpop.permute.xlu2 %3138 }
 0x3e5   : > { %3561 = vmatmul.f32.gmra.mxu2 %v3247_v35  ;;  %3700 = vmatmul.f32.gmra.mxu3 %v3589_v58  ;;  %vm2917_vm14 = vmor %vm2915_vm13, %vm2916_vm12  ;;  %11683 = vst [vmem:[#allocation40_spill] sm:$0xff] %v9869_v3 }
 0x3e6   : > { %v2903_v18 = vsel %vm2902_vm10, %v6666_v63, %v2899_v23  ;;  %v2912_v8 = vsub.f32 1.0, %v2911_v31  ;;  %3905 = vmatmul.f32.gmra.mxu0 %v3588_v12 }
 0x3e7   : > { %v2908_v17 = vsel %vm2905_vm11, %v2907_v10, %v2903_v18  ;;  %v3590_v10 = vld [vmem:[#allocation2 + $0xb2] sm:$0xff] }
 0x3e8   : > { %v3514_v47 = vpop.f32.mrf.mxu2  ;;  %v2959_v35 = vmul.f32 %v2908_v17, %v9716_v41  ;;  %v2913_v11 = vmul.f32 %v6668_v57, %v2912_v8  ;;  %v2922_v41 = vor.u32 1.1754944e-38, %v2921_v50 }
 0x3e9   : > { %v9854_v55 = vadd.f32 %v3514_v47, %v3389_v2  ;;  %v3653_v4 = vpop.f32.mrf.mxu3  ;;  %v3300_v12 = vld [vmem:[#allocation2 + $0x119] sm:$0x3f] }
 0x3ea   : > { %v3392_v63 = vpop.f32.mrf.mxu1  ;;  %v9859_v14 = vadd.f32 %v3653_v4, %v9447_v60  ;;  %v3248_v23 = vld [vmem:[#allocation2 + $0x118] sm:$0x3f]  ;;  %v3175_v31 = vmul.f32 %v9856_v52, %v2959_v35  ;;  %v2914_v44 = vadd.f32 %v6668_v57, %v2913_v11  ;;  %v6423_v60 = vld [vmem:[%s11370_s4 + $0x368] sm:$0xff] }
 0x3eb   : > { %v9863_v37 = vpop.f32.mrf.mxu0  ;;  %4479 = vmatpush.msra.mxu3 %v6423_v60  ;;  %v3996_v4 = vld [vmem:[#allocation2 + $0x13] sm:$0xff]  ;;  %v3997_v60 = vld [vmem:[#allocation2 + $0x1b] sm:$0xff] }
 0x3ec   : > { %3211 = vst [vmem:[#allocation2 + $0x123] sm:$0xff] %v3175_v31  ;;  %v2918_v2 = vsel %vm2917_vm14, %v6668_v57, %v2914_v44  ;;  %3439 = vmatmul.f32.gmra.mxu1 %v3300_v12  ;;  %v4210_v12 = vld [vmem:[#allocation2 + $0x14] sm:$0xff]  ;;  %v6455_v31 = vld [vmem:[%s11370_s4 + $0x468] sm:$0xff] }
 0x3ed   : > { %3564 = vmatmul.f32.gmra.mxu2 %v3248_v23  ;;  %v2923_v18 = vsel %vm2920_vm15, %v2922_v41, %v2918_v2  ;;  %3703 = vmatmul.f32.gmra.mxu3 %v3590_v10 }
 0x3ee   : > { %v2960_v8 = vmul.f32 %v2923_v18, %v9751_v49  ;;  %3908 = vmatmul.f32.gmra.mxu0 %v3589_v58  ;;  %v3591_v49 = vld [vmem:[#allocation2 + $0xba] sm:$0xff]  ;;  %v6439_v58 = vld [vmem:[%s11370_s4 + $0x3e8] sm:$0xff]  ;;  %4907 = vmatpush.msra.mxu1 %v6455_v31 }
 0x3ef   : > { %4693 = vmatpush.msra.mxu0 %v6439_v58  ;;  %v4211_v18 = vld [vmem:[#allocation2 + $0x1c] sm:$0xff]  ;;  %v9902_v58 = vld [vmem:[#allocation2 + $0x24] sm:$0xff] }
 0x3f0   : > { %v3517_v17 = vpop.f32.mrf.mxu2  ;;  %v3176_v50 = vmul.f32 %v9869_v3, %v2960_v8  ;;  %v9931_v3 = vld [vmem:[#allocation2 + $0x34] sm:$0xff] }
 0x3f1   : > { %v9872_v57 = vadd.f32 %v3517_v17, %v3392_v63  ;;  %v3656_v1 = vpop.f32.mrf.mxu3 }
 0x3f2   : > { %v3395_v47 = vpop.f32.mrf.mxu1  ;;  %v9875_v35 = vadd.f32 %v3656_v1, %v9476_v7  ;;  %3212 = vst [vmem:[#allocation2 + $0x12b] sm:$0x3f] %v3176_v50  ;;  %v6422_v1 = vld [vmem:[%s11370_s4 + $0x360] sm:$0xff] }
 0x3f3   : > { %v9877_v11 = vpop.f32.mrf.mxu0  ;;  %4480 = vmatpush.msra.mxu3 %v6422_v1  ;;  %v3594_v1 = vld [vmem:[#allocation2 + $0xd2] sm:$0xff] }
 0x3f4   : > { %4065 = vmatmul.f32.vlgmr.msrb.gmra.mxu1 %v3996_v4 }
 0x3f5   : > { %4279 = vmatmul.f32.vlgmr.msrb.gmra.mxu2 %v4210_v12  ;;  %3706 = vmatmul.f32.gmra.mxu3 %v3591_v49  ;;  %v3998_v12 = vld [vmem:[#allocation2 + $0x23] sm:$0xff] }
 0x3f6   : > { %3911 = vmatmul.f32.gmra.mxu0 %v3590_v10  ;;  %v3592_v10 = vld [vmem:[#allocation2 + $0xc2] sm:$0xff] }
 0x3f8   : > { %v3520_v63 = vpop.f32.mrf.mxu2 }
 0x3f9   : > { %v9882_v23 = vadd.f32 %v3520_v63, %v3395_v47  ;;  %v3659_v7 = vpop.f32.mrf.mxu3 }
 0x3fa   : > { %v3398_v44 = vpop.f32.mrf.mxu1  ;;  %v9888_v41 = vadd.f32 %v3659_v7, %v9508_v30 }
 0x3fb   : > { %v9890_v2 = vpop.f32.mrf.mxu0 }
 0x3fc   : > { %4068 = vmatmul.f32.gmra.mxu1 %v3997_v60 }
 0x3fd   : > { %4282 = vmatmul.f32.gmra.mxu2 %v4211_v18  ;;  %3709 = vmatmul.f32.gmra.mxu3 %v3592_v10  ;;  %v6454_v18 = vld [vmem:[%s11370_s4 + $0x460] sm:$0xff] }
 0x3fe   : > { %3914 = vmatmul.f32.gmra.mxu0 %v3591_v49  ;;  %v3593_v49 = vld [vmem:[#allocation2 + $0xca] sm:$0xff]  ;;  %4908 = vmatpush.msra.mxu1 %v6454_v18 }
 0x400   : > { %v3523_v8 = vpop.f32.mrf.mxu2 }
 0x401   : > { %v9892_v17 = vadd.f32 %v3523_v8, %v3398_v44  ;;  %v3662_v50 = vpop.f32.mrf.mxu3 }
 0x402   : > { %v3401_v30 = vpop.f32.mrf.mxu1  ;;  %v9898_v47 = vadd.f32 %v3662_v50, %v9535_v25  ;;  %v6438_v25 = vld [vmem:[%s11370_s4 + $0x3e0] sm:$0xff]  ;;  %v9918_v50 = vld [vmem:[#allocation2 + $0x2c] sm:$0xff] }
 0x403   : > { %v9900_v4 = vpop.f32.mrf.mxu0  ;;  %4694 = vmatpush.msra.mxu0 %v6438_v25  ;;  %v6421_v25 = vld [vmem:[%s11370_s4 + $0x358] sm:$0xff] }
 0x404   : > { %4071 = vmatmul.f32.gmra.mxu1 %v3998_v12  ;;  %4481 = vmatpush.msra.mxu3 %v6421_v25  ;;  %v6437_v25 = vld [vmem:[%s11370_s4 + $0x3d8] sm:$0xff] }
 0x405   : > { %4285 = vmatmul.f32.gmra.mxu2 %v9902_v58  ;;  %3712 = vmatmul.f32.gmra.mxu3 %v3593_v49 }
 0x406   : > { %3917 = vmatmul.f32.gmra.mxu0 %v3592_v10  ;;  %v3999_v10 = vld [vmem:[#allocation2 + $0x2b] sm:$0xff] }
 0x407   : > { %4695 = vmatpush.msra.mxu0 %v6437_v25 }
 0x408   : > { %v3526_v63 = vpop.f32.mrf.mxu2 }
 0x409   : > { %v9905_v7 = vadd.f32 %v3526_v63, %v3401_v30  ;;  %v3665_v31 = vpop.f32.mrf.mxu3 }
 0x40a   : > { %v3404_v44 = vpop.f32.mrf.mxu1  ;;  %v9911_v60 = vadd.f32 %v3665_v31, %v9563_v16 }
 0x40b   : > { %v9916_v8 = vpop.f32.mrf.mxu0 }
 0x40c   : > { %4074 = vmatmul.f32.gmra.mxu1 %v3999_v10  ;;  %v4000_v10 = vld [vmem:[#allocation2 + $0x33] sm:$0xff] }
 0x40d   : > { %4288 = vmatmul.f32.gmra.mxu2 %v9918_v50  ;;  %3715 = vmatmul.f32.gmra.mxu3 %v3594_v1 }
 0x40e   : > { %3920 = vmatmul.f32.gmra.mxu0 %v3593_v49  ;;  %v3595_v49 = vld [vmem:[#allocation2 + $0xda] sm:$0xff] }
 0x410   : > { %v3529_v30 = vpop.f32.mrf.mxu2 }
 0x411   : > { %v9921_v16 = vadd.f32 %v3529_v30, %v3404_v44  ;;  %v3668_v12 = vpop.f32.mrf.mxu3 }
 0x412   : > { %v3407_v63 = vpop.f32.mrf.mxu1  ;;  %v9924_v31 = vadd.f32 %v3668_v12, %v9587_v51 }
 0x413   : > { %v9929_v18 = vpop.f32.mrf.mxu0 }
 0x414   : > { %4077 = vmatmul.f32.gmra.mxu1 %v4000_v10  ;;  %v9942_v10 = vld [vmem:[#allocation2 + $0x3c] sm:$0xff] }
 0x415   : > { %4291 = vmatmul.f32.gmra.mxu2 %v9931_v3  ;;  %3718 = vmatmul.f32.gmra.mxu3 %v3595_v49 }
 0x416   : > { %3923 = vmatmul.f32.gmra.mxu0 %v3594_v1  ;;  %v3596_v1 = vld [vmem:[#allocation2 + $0xe2] sm:$0xff] }
 0x418   : > { %v3532_v44 = vpop.f32.mrf.mxu2 }
 0x419   : > { %v9934_v30 = vadd.f32 %v3532_v44, %v3407_v63  ;;  %v3671_v51 = vpop.f32.mrf.mxu3  ;;  %v6453_v63 = vld [vmem:[%s11370_s4 + $0x458] sm:$0xff] }
 0x41a   : > { %v3410_v12 = vpop.f32.mrf.mxu1  ;;  %v9937_v52 = vadd.f32 %v3671_v51, %v9616_v24  ;;  %4909 = vmatpush.msra.mxu1 %v6453_v63 }
 0x41b   : > { %v9944_v26 = vpop.f32.mrf.mxu0 }
 0x41c   : > { %4080 = vmatmul.f32.gmra.mxu1 %v4001_v62  ;;  %v9955_v62 = vld [vmem:[#allocation2 + $0x44] sm:$0xff] }
 0x41d   : > { %4294 = vmatmul.f32.gmra.mxu2 %v9942_v10  ;;  %3721 = vmatmul.f32.gmra.mxu3 %v3596_v1 }
 0x41e   : > { %3926 = vmatmul.f32.gmra.mxu0 %v3595_v49  ;;  %v6420_v49 = vld [vmem:[%s11370_s4 + $0x350] sm:$0xff] }
 0x41f   : > { %4482 = vmatpush.msra.mxu3 %v6420_v49 }
 0x420   : > { %v3535_v24 = vpop.f32.mrf.mxu2 }
 0x421   : > { %v9950_v44 = vadd.f32 %v3535_v24, %v3410_v12  ;;  %v3674_v51 = vpop.f32.mrf.mxu3 }
 0x422   : > { %v3413_v25 = vpop.f32.mrf.mxu1  ;;  %v9953_v53 = vadd.f32 %v3674_v51, %v9639_v32 }
 0x423   : > { %v9957_v0 = vpop.f32.mrf.mxu0 }
 0x424   : > { %11684 = vst [vmem:[#allocation5_spill] sm:$0xff] %v9953_v53  ;;  %4083 = vmatmul.f32.gmra.mxu1 %v4002_v20  ;;  %v9968_v20 = vld [vmem:[#allocation2 + $0x4c] sm:$0xff] }
 0x425   : > { %4297 = vmatmul.f32.gmra.mxu2 %v9955_v62  ;;  %3724 = vmatmul.f32.gmra.mxu3 %v3597_v40 }
 0x426   : > { %3929 = vmatmul.f32.gmra.mxu0 %v3596_v1  ;;  %v6436_v1 = vld [vmem:[%s11370_s4 + $0x3d0] sm:$0xff] }
 0x427   : > { %4696 = vmatpush.msra.mxu0 %v6436_v1  ;;  %v6417_v1 = vld [vmem:[%s11370_s4 + $0x338] sm:$0xff] }
 0x428   : > { %v3538_v12 = vpop.f32.mrf.mxu2 }
 0x429   : > { %v9963_v63 = vadd.f32 %v3538_v12, %v3413_v25  ;;  %v3677_v32 = vpop.f32.mrf.mxu3  ;;  %v6419_v25 = vld [vmem:[%s11370_s4 + $0x348] sm:$0xff] }
 0x42a   : > { %v3416_v24 = vpop.f32.mrf.mxu1  ;;  %v9966_v51 = vadd.f32 %v3677_v32, %v9678_v45  ;;  %v6452_v45 = vld [vmem:[%s11370_s4 + $0x450] sm:$0xff]  ;;  %4483 = vmatpush.msra.mxu3 %v6419_v25  ;;  %v6418_v32 = vld [vmem:[%s11370_s4 + $0x340] sm:$0xff] }
 0x42b   : > { %v9970_v48 = vpop.f32.mrf.mxu0  ;;  %4910 = vmatpush.msra.mxu1 %v6452_v45  ;;  %v9993_v25 = vld [vmem:[#allocation2 + $0x54] sm:$0xff] }
 0x42c   : > { %11685 = vst [vmem:[#allocation89_spill] sm:$0xff] %v9966_v51  ;;  %4086 = vmatmul.f32.gmra.mxu1 %v4003_v6  ;;  %4484 = vmatpush.msra.mxu3 %v6418_v32 }
 0x42d   : > { %11686 = vst [vmem:[#allocation10_spill] sm:$0xff] %v9970_v48  ;;  %4300 = vmatmul.f32.gmra.mxu2 %v9968_v20  ;;  %3727 = vmatmul.f32.gmra.mxu3 %v3598_v39  ;;  %v4009_v48 = vld [vmem:[#allocation2 + $0x7b] sm:$0xff] }
 0x42e   : > { %3932 = vmatmul.f32.gmra.mxu0 %v3597_v40  ;;  %v4004_v40 = vld [vmem:[#allocation2 + $0x53] sm:$0xff]  ;;  %4485 = vmatpush.msra.mxu3 %v6417_v1  ;;  %v6414_v1 = vld [vmem:[%s11370_s4 + $0x320] sm:$0xff] }
 0x430   : > { %v3541_v49 = vpop.f32.mrf.mxu2 }
 0x431   : > { %v9982_v6 = vadd.f32 %v3541_v49, %v3416_v24  ;;  %v3680_v12 = vpop.f32.mrf.mxu3  ;;  %v6416_v24 = vld [vmem:[%s11370_s4 + $0x330] sm:$0xff]  ;;  %v6415_v49 = vld [vmem:[%s11370_s4 + $0x328] sm:$0xff] }
 0x432   : > { %v3419_v27 = vpop.f32.mrf.mxu1  ;;  %v9988_v54 = vadd.f32 %v3680_v12, %v9723_v56  ;;  %v3599_v56 = vld [vmem:[#allocation2 + $0xfa] sm:$0xff]  ;;  %4486 = vmatpush.msra.mxu3 %v6416_v24  ;;  %v6435_v24 = vld [vmem:[%s11370_s4 + $0x3c8] sm:$0xff] }
 0x433   : > { %v9995_v45 = vpop.f32.mrf.mxu0  ;;  %4697 = vmatpush.msra.mxu0 %v6435_v24 }
 0x434   : > { %11687 = vst [vmem:[#allocation44_spill] sm:$0xff] %v9988_v54  ;;  %4089 = vmatmul.f32.gmra.mxu1 %v4004_v40  ;;  %4487 = vmatpush.msra.mxu3 %v6415_v49 }
 0x435   : > { %11688 = vst [vmem:[#allocation91_spill] sm:$0xff] %v9995_v45  ;;  %4303 = vmatmul.f32.gmra.mxu2 %v9993_v25  ;;  %3730 = vmatmul.f32.gmra.mxu3 %v3599_v56 }
 0x436   : > { %3935 = vmatmul.f32.gmra.mxu0 %v3598_v39  ;;  %4488 = vmatpush.msra.mxu3 %v6414_v1  ;;  %v3600_v39 = vld [vmem:[#allocation2 + $0x102] sm:$0xff] }
 0x437   : > { %v6451_v1 = vld [vmem:[%s11370_s4 + $0x448] sm:$0xff] }
 0x438   : > { %v3544_v12 = vpop.f32.mrf.mxu2  ;;  %4911 = vmatpush.msra.mxu1 %v6451_v1 }
 0x439   : > { %v10004_v32 = vadd.f32 %v3544_v12, %v3419_v27  ;;  %v3683_v54 = vpop.f32.mrf.mxu3  ;;  %v6413_v27 = vld [vmem:[%s11370_s4 + $0x318] sm:$0xff] }
 0x43a   : > { %v3422_v40 = vpop.f32.mrf.mxu1  ;;  %v10010_v51 = vadd.f32 %v3683_v54, %v9762_v29  ;;  %v6412_v54 = vld [vmem:[%s11370_s4 + $0x310] sm:$0xff]  ;;  %4489 = vmatpush.msra.mxu3 %v6413_v27  ;;  %v10037_v27 = vld [vmem:[#allocation2 + $0x64] sm:$0xff] }
 0x43b   : > { %v10014_v45 = vpop.f32.mrf.mxu0 }
 0x43c   : > { %11689 = vst [vmem:[#allocation7_spill] sm:$0xff] %v10010_v51  ;;  %4092 = vmatmul.f32.gmra.mxu1 %v4005_v22  ;;  %v6411_v22 = vld [vmem:[%s11370_s4 + $0x308] sm:$0xff]  ;;  %4490 = vmatpush.msra.mxu3 %v6412_v54 }
 0x43d   : > { %11690 = vst [vmem:[#allocation42_spill] sm:$0xff] %v10014_v45  ;;  %4306 = vmatmul.f32.gmra.mxu2 %v10012_v46  ;;  %3733 = vmatmul.f32.gmra.mxu3 %v3600_v39  ;;  %v3601_v54 = vld [vmem:[#allocation2 + $0x10a] sm:$0xff] }
 0x43e   : > { %3938 = vmatmul.f32.gmra.mxu0 %v3599_v56  ;;  %4491 = vmatpush.msra.mxu3 %v6411_v22  ;;  %v4006_v56 = vld [vmem:[#allocation2 + $0x63] sm:$0xff] }
 0x440   : > { %v3547_v29 = vpop.f32.mrf.mxu2 }
 0x441   : > { %v10029_v49 = vadd.f32 %v3547_v29, %v3422_v40  ;;  %v3686_v12 = vpop.f32.mrf.mxu3  ;;  %v6410_v40 = vld [vmem:[%s11370_s4 + $0x300] sm:$0xff] }
 0x442   : > { %v3425_v51 = vpop.f32.mrf.mxu1  ;;  %v10035_v45 = vadd.f32 %v3686_v12, %v9815_v19  ;;  %4492 = vmatpush.msra.mxu3 %v6410_v40  ;;  %v6434_v12 = vld [vmem:[%s11370_s4 + $0x3c0] sm:$0xff]  ;;  %v10059_v40 = vld [vmem:[#allocation2 + $0x6c] sm:$0xff] }
 0x443   : > { %v10043_v24 = vpop.f32.mrf.mxu0  ;;  %4698 = vmatpush.msra.mxu0 %v6434_v12 }
 0x444   : > { %11691 = vst [vmem:[#allocation43_spill] sm:$0xff] %v10035_v45  ;;  %4095 = vmatmul.f32.gmra.mxu1 %v4006_v56  ;;  %v6433_v56 = vld [vmem:[%s11370_s4 + $0x3b8] sm:$0xff] }
 0x445   : > { %4309 = vmatmul.f32.gmra.mxu2 %v10037_v27  ;;  %11692 = vst [vmem:[#allocation92_spill] sm:$0xff] %v10043_v24  ;;  %3736 = vmatmul.f32.gmra.mxu3 %v3601_v54 }
 0x446   : > { %3941 = vmatmul.f32.gmra.mxu0 %v3600_v39  ;;  %v6432_v39 = vld [vmem:[%s11370_s4 + $0x3b0] sm:$0xff] }
 0x447   : > { %4699 = vmatpush.msra.mxu0 %v6433_v56  ;;  %v6430_v56 = vld [vmem:[%s11370_s4 + $0x3a0] sm:$0xff] }
 0x448   : > { %v3550_v19 = vpop.f32.mrf.mxu2 }
 0x449   : > { %v10045_v29 = vadd.f32 %v3550_v19, %v3425_v51  ;;  %v3689_v22 = vpop.f32.mrf.mxu3  ;;  %v4007_v51 = vld [vmem:[#allocation2 + $0x6b] sm:$0xff]  ;;  %4700 = vmatpush.msra.mxu0 %v6432_v39  ;;  %v6429_v39 = vld [vmem:[%s11370_s4 + $0x398] sm:$0xff] }
 0x44a   : > { %v3428_v1 = vpop.f32.mrf.mxu1  ;;  %v10051_v45 = vadd.f32 %v3689_v22, %v9834_v33  ;;  %v3602_v19 = vld [vmem:[#allocation2 + $0x112] sm:$0xff]  ;;  %v6431_v33 = vld [vmem:[%s11370_s4 + $0x3a8] sm:$0xff] }
 0x44b   : > { %v10065_v22 = vpop.f32.mrf.mxu0  ;;  %4701 = vmatpush.msra.mxu0 %v6431_v33  ;;  %v4008_v33 = vld [vmem:[#allocation2 + $0x73] sm:$0xff] }
 0x44c   : > { %11693 = vst [vmem:[#allocation12_spill] sm:$0xff] %v10051_v45  ;;  %4098 = vmatmul.f32.gmra.mxu1 %v4007_v51 }
 0x44d   : > { %4312 = vmatmul.f32.gmra.mxu2 %v10059_v40  ;;  %3739 = vmatmul.f32.gmra.mxu3 %v3602_v19  ;;  %11694 = vst [vmem:[#allocation49_spill] sm:$0xff] %v10065_v22 }
 0x44e   : > { %3944 = vmatmul.f32.gmra.mxu0 %v3601_v54  ;;  %v6450_v54 = vld [vmem:[%s11370_s4 + $0x440] sm:$0xff] }
 0x44f   : > { %4702 = vmatpush.msra.mxu0 %v6430_v56  ;;  %4912 = vmatpush.msra.mxu1 %v6450_v54 }
 0x450   : > { %v3553_v12 = vpop.f32.mrf.mxu2 }
 0x451   : > { %v10067_v45 = vadd.f32 %v3553_v12, %v3428_v1  ;;  %v3692_v24 = vpop.f32.mrf.mxu3  ;;  %v6428_v1 = vld [vmem:[%s11370_s4 + $0x390] sm:$0xff]  ;;  %4703 = vmatpush.msra.mxu0 %v6429_v39  ;;  %v6426_v39 = vld [vmem:[%s11370_s4 + $0x380] sm:$0xff] }
 0x452   : > { %v3431_v51 = vpop.f32.mrf.mxu1  ;;  %v10073_v53 = vadd.f32 %v3692_v24, %v9854_v55  ;;  %v10084_v12 = vld [vmem:[#allocation2 + $0x74] sm:$0xff]  ;;  %v6427_v24 = vld [vmem:[%s11370_s4 + $0x388] sm:$0xff] }
 0x453   : > { %v3603_v55 = vld [vmem:[#allocation2 + $0x11a] sm:$0x3f]  ;;  %4704 = vmatpush.msra.mxu0 %v6428_v1 }
 0x454   : > { %11695 = vst [vmem:[#allocation45_spill] sm:$0xff] %v10073_v53  ;;  %4101 = vmatmul.f32.gmra.mxu1 %v4008_v33  ;;  %v10090_v53 = vpop.f32.mrf.mxu0 }
 0x455   : > { %4315 = vmatmul.f32.gmra.mxu2 %v10084_v12  ;;  %3742 = vmatmul.f32.gmra.mxu3 %v3603_v55  ;;  %11696 = vst [vmem:[#allocation46_spill] sm:$0xff] %v10090_v53  ;;  %v10100_v55 = vld [vmem:[#allocation2 + $0x7c] sm:$0xff] }
 0x456   : > { %3947 = vmatmul.f32.gmra.mxu0 %v3602_v19  ;;  %v3815_v19 = vld [vmem:[#allocation2 + $0x11a] sm:$0xff] }
 0x457   : > { %4705 = vmatpush.msra.mxu0 %v6427_v24 }
 0x458   : > { %v3556_v56 = vpop.f32.mrf.mxu2 }
 0x459   : > { %v10092_v22 = vadd.f32 %v3556_v56, %v3431_v51  ;;  %v3695_v9 = vpop.f32.mrf.mxu3  ;;  %4706 = vmatpush.msra.mxu0 %v6426_v39  ;;  %v10111_v39 = vld [vmem:[#allocation2 + $0x84] sm:$0xff] }
 0x45a   : > { %v3434_v54 = vpop.f32.mrf.mxu1  ;;  %v10098_v33 = vadd.f32 %v3695_v9, %v9872_v57  ;;  %v4010_v57 = vld [vmem:[#allocation2 + $0x83] sm:$0xff] }
 0x45c   : > { %11697 = vst [vmem:[#allocation93_spill] sm:$0xff] %v10098_v33  ;;  %4104 = vmatmul.f32.gmra.mxu1 %v4009_v48  ;;  %v10109_v9 = vpop.f32.mrf.mxu0  ;;  %v6449_v48 = vld [vmem:[%s11370_s4 + $0x438] sm:$0xff] }
 0x45d   : > { %4318 = vmatmul.f32.gmra.mxu2 %v10100_v55  ;;  %4493 = vmatmul.f32.vlgmr.msra.gmra.mxu3 %v9902_v58  ;;  %11699 = vst [vmem:[#allocation52_spill] sm:$0xff] %v10109_v9  ;;  %v3816_v58 = vld [vmem:[#allocation2 + $0x122] sm:$0xff]  ;;  %v3817_v9 = vld [vmem:[#allocation2 + $0x12a] sm:$0x3f] }
 0x45e   : > { %3950 = vmatmul.f32.gmra.mxu0 %v3815_v19  ;;  %4913 = vmatpush.msra.mxu1 %v6449_v48 }
 0x460   : > { %v3559_v51 = vpop.f32.mrf.mxu2 }
 0x461   : > { %v10104_v1 = vadd.f32 %v3559_v51, %v3434_v54  ;;  %v3698_v24 = vpop.f32.mrf.mxu3 }
 0x462   : > { %v3437_v56 = vpop.f32.mrf.mxu1  ;;  %v10107_v53 = vadd.f32 %v3698_v24, %v9882_v23 }
 0x464   : > { %11698 = vst [vmem:[#allocation9_spill] sm:$0xff] %v10107_v53  ;;  %4107 = vmatmul.f32.gmra.mxu1 %v4010_v57  ;;  %v4011_v57 = vld [vmem:[#allocation2 + $0x8b] sm:$0xff]  ;;  %v10125_v33 = vpop.f32.mrf.mxu0 }
 0x465   : > { %4321 = vmatmul.f32.gmra.mxu2 %v10111_v39  ;;  %4496 = vmatmul.f32.gmra.mxu3 %v9918_v50  ;;  %v10123_v53 = vld [vmem:[#allocation2 + $0x8c] sm:$0xff] }
 0x466   : > { %3953 = vmatmul.f32.gmra.mxu0 %v3816_v58  ;;  %v5954_v58 = vld [vmem:[%s11372_s6 + $0x78] sm:$0xff] }
 0x467   : > { %5959 = vmatpush.msra.mxu2 %v5954_v58 }
 0x468   : > { %v3562_v54 = vpop.f32.mrf.mxu2 }
 0x469   : > { %v10118_v23 = vadd.f32 %v3562_v54, %v3437_v56  ;;  %v3701_v19 = vpop.f32.mrf.mxu3  ;;  %v3461_v56 = vadd.f32 %v9254_v34, %v9215_v28  ;;  %v6448_v28 = vld [vmem:[%s11370_s4 + $0x430] sm:$0xff]  ;;  %v4638_v34 = vld [vmem:[#allocation2 + $0x25] sm:$0xff] }
 0x46a   : > { %v3440_v51 = vpop.f32.mrf.mxu1  ;;  %v10121_v24 = vadd.f32 %v3701_v19, %v9892_v17  ;;  %4914 = vmatpush.msra.mxu1 %v6448_v28 }
 0x46c   : > { %11700 = vst [vmem:[#allocation94_spill] sm:$0xff] %v10121_v24  ;;  %4110 = vmatmul.f32.gmra.mxu1 %v4011_v57  ;;  %v3746_v57 = vadd.f32 %v9680_v15, %v3461_v56 }
 0x46d   : > { %4324 = vmatmul.f32.gmra.mxu2 %v10123_v53  ;;  %4499 = vmatmul.f32.gmra.mxu3 %v9931_v3  ;;  %v4012_v3 = vld [vmem:[#allocation2 + $0x93] sm:$0xff] }
 0x46e   : > { %3956 = vmatmul.f32.gmra.mxu0 %v3817_v9  ;;  %v10140_v9 = vld [vmem:[#allocation2 + $0x94] sm:$0xff]  ;;  %v3960_v24 = vadd.f32 %v9775_v13, %v3746_v57 }
 0x470   : > { %v3565_v50 = vpop.f32.mrf.mxu2 }
 0x471   : > { %v10131_v48 = vadd.f32 %v3565_v50, %v3440_v51  ;;  %v3704_v17 = vpop.f32.mrf.mxu3  ;;  %v3464_v50 = vadd.f32 %v9295_v61, %v9266_v42  ;;  %v4639_v42 = vld [vmem:[#allocation2 + $0x2d] sm:$0xff] }
 0x472   : > { %v4066_v54 = vpop.f32.mrf.mxu1  ;;  %v10137_v19 = vadd.f32 %v3704_v17, %v9905_v7  ;;  %v10148_v7 = vpop.f32.mrf.mxu0 }
 0x473   : > { %v4174_v51 = vadd.f32 %v4066_v54, %v3960_v24  ;;  %v3747_v57 = vadd.f32 %v9725_v5, %v3464_v50  ;;  %v10173_v50 = vld [vmem:[#allocation2 + $0xa4] sm:$0xff] }
 0x474   : > { %11701 = vst [vmem:[#allocation59_spill] sm:$0xff] %v10137_v19  ;;  %4113 = vmatmul.f32.gmra.mxu1 %v4012_v3  ;;  %v10158_v3 = vld [vmem:[#allocation2 + $0x9c] sm:$0xff]  ;;  %v4872_v19 = vld [vmem:[#allocation2 + $0xc6] sm:$0xff] }
 0x475   : > { %4327 = vmatmul.f32.gmra.mxu2 %v10140_v9  ;;  %4502 = vmatmul.f32.gmra.mxu3 %v9942_v10  ;;  %v4013_v10 = vld [vmem:[#allocation2 + $0x9b] sm:$0xff]  ;;  %v3961_v28 = vadd.f32 %v9821_v43, %v3747_v57  ;;  %v5953_v43 = vld [vmem:[%s11372_s6 + $0x70] sm:$0xff] }
 0x476   : > { %4707 = vmatmul.f32.vlgmr.msra.gmra.mxu0 %v4638_v34  ;;  %5960 = vmatpush.msra.mxu2 %v5953_v43 }
 0x478   : > { %v4280_v15 = vpop.f32.mrf.mxu2 }
 0x479   : > { %v10152_v13 = vadd.f32 %v4280_v15, %v4174_v51  ;;  %v3707_v56 = vpop.f32.mrf.mxu3  ;;  %v4014_v15 = vld [vmem:[#allocation2 + $0xa3] sm:$0xff] }
 0x47a   : > { %v4069_v17 = vpop.f32.mrf.mxu1  ;;  %v10155_v58 = vadd.f32 %v3707_v56, %v9921_v16  ;;  %v10163_v54 = vpop.f32.mrf.mxu0  ;;  %v4640_v56 = vld [vmem:[#allocation2 + $0x35] sm:$0xff] }
 0x47b   : > { %v4175_v61 = vadd.f32 %v4069_v17, %v3961_v28  ;;  %v6447_v28 = vld [vmem:[%s11370_s4 + $0x428] sm:$0xff] }
 0x47c   : > { %11702 = vst [vmem:[#allocation11_spill] sm:$0xff] %v10155_v58  ;;  %4116 = vmatmul.f32.gmra.mxu1 %v4013_v10 }
 0x47d   : > { %4330 = vmatmul.f32.gmra.mxu2 %v10158_v3  ;;  %4505 = vmatmul.f32.gmra.mxu3 %v9955_v62  ;;  %v3962_v62 = vadd.f32 %v9841_v59, %v9770_v36  ;;  %v4015_v59 = vld [vmem:[#allocation2 + $0xab] sm:$0xff] }
 0x47e   : > { %4710 = vmatmul.f32.gmra.mxu0 %v4639_v42  ;;  %4915 = vmatpush.msra.mxu1 %v6447_v28 }
 0x480   : > { %v4283_v24 = vpop.f32.mrf.mxu2 }
 0x481   : > { %v10165_v16 = vadd.f32 %v4283_v24, %v4175_v61  ;;  %v3710_v34 = vpop.f32.mrf.mxu3  ;;  %v3963_v24 = vadd.f32 %v9863_v37, %v9818_v21  ;;  %v3964_v21 = vadd.f32 %v9877_v11, %v9838_v38 }
 0x482   : > { %v4072_v5 = vpop.f32.mrf.mxu1  ;;  %v10168_v51 = vadd.f32 %v3710_v34, %v9934_v30  ;;  %v10187_v36 = vpop.f32.mrf.mxu0  ;;  %v4641_v34 = vld [vmem:[#allocation2 + $0x3d] sm:$0xff] }
 0x483   : > { %v4176_v17 = vadd.f32 %v4072_v5, %v3962_v62 }
 0x484   : > { %11703 = vst [vmem:[#allocation95_spill] sm:$0xff] %v10168_v51  ;;  %4119 = vmatmul.f32.gmra.mxu1 %v4014_v15 }
 0x485   : > { %4333 = vmatmul.f32.gmra.mxu2 %v10173_v50  ;;  %4508 = vmatmul.f32.gmra.mxu3 %v9968_v20  ;;  %v10189_v20 = vld [vmem:[#allocation2 + $0xac] sm:$0xff] }
 0x486   : > { %4713 = vmatmul.f32.gmra.mxu0 %v4640_v56 }
 0x488   : > { %v4286_v30 = vpop.f32.mrf.mxu2 }
 0x489   : > { %v10179_v57 = vadd.f32 %v4286_v30, %v4176_v17  ;;  %v3713_v10 = vpop.f32.mrf.mxu3  ;;  %v4016_v17 = vld [vmem:[#allocation2 + $0xb3] sm:$0xff] }
 0x48a   : > { %v4075_v42 = vpop.f32.mrf.mxu1  ;;  %v10185_v61 = vadd.f32 %v3713_v10, %v9950_v44  ;;  %v10200_v30 = vld [vmem:[#allocation2 + $0xb4] sm:$0xff]  ;;  %v10204_v37 = vpop.f32.mrf.mxu0  ;;  %v4642_v10 = vld [vmem:[#allocation2 + $0x45] sm:$0xff] }
 0x48b   : > { %v4177_v5 = vadd.f32 %v4075_v42, %v3963_v24  ;;  %11706 = vst [vmem:[#allocation48_spill] sm:$0xff] %v10204_v37  ;;  %v6446_v24 = vld [vmem:[%s11370_s4 + $0x420] sm:$0xff] }
 0x48c   : > { %11704 = vst [vmem:[#allocation61_spill] sm:$0xff] %v10185_v61  ;;  %4122 = vmatmul.f32.gmra.mxu1 %v4015_v59  ;;  %v4672_v61 = vld [vmem:[#allocation2 + $0x135] sm:$0xff] }
 0x48d   : > { %4336 = vmatmul.f32.gmra.mxu2 %v10189_v20  ;;  %4511 = vmatmul.f32.gmra.mxu3 %v9993_v25  ;;  %v5952_v25 = vld [vmem:[%s11372_s6 + $0x68] sm:$0xff] }
 0x48e   : > { %4716 = vmatmul.f32.gmra.mxu0 %v4641_v34  ;;  %5961 = vmatpush.msra.mxu2 %v5952_v25  ;;  %v4017_v34 = vld [vmem:[#allocation2 + $0xbb] sm:$0xff] }
 0x48f   : > { %4916 = vmatpush.msra.mxu1 %v6446_v24 }
 0x490   : > { %v4289_v43 = vpop.f32.mrf.mxu2 }
 0x491   : > { %v10195_v44 = vadd.f32 %v4289_v43, %v4177_v5  ;;  %v3716_v15 = vpop.f32.mrf.mxu3  ;;  %v10219_v5 = vld [vmem:[#allocation2 + $0xbc] sm:$0xff]  ;;  %v4643_v43 = vld [vmem:[#allocation2 + $0x4d] sm:$0xff] }
 0x492   : > { %v4078_v62 = vpop.f32.mrf.mxu1  ;;  %v10198_v56 = vadd.f32 %v3716_v15, %v9963_v63  ;;  %v10225_v15 = vpop.f32.mrf.mxu0 }
 0x493   : > { %v4178_v63 = vadd.f32 %v4078_v62, %v3964_v21  ;;  %11708 = vst [vmem:[#allocation50_spill] sm:$0xff] %v10225_v15 }
 0x494   : > { %11705 = vst [vmem:[#allocation47_spill] sm:$0xff] %v10198_v56  ;;  %4125 = vmatmul.f32.gmra.mxu1 %v4016_v17 }
 0x495   : > { %4339 = vmatmul.f32.gmra.mxu2 %v10200_v30  ;;  %4514 = vmatmul.f32.gmra.mxu3 %v10012_v46  ;;  %v3965_v46 = vadd.f32 %v9890_v2, %v9859_v14  ;;  %v10232_v14 = vld [vmem:[#allocation2 + $0xc4] sm:$0xff]  ;;  %v3966_v2 = vadd.f32 %v9900_v4, %v9875_v35 }
 0x496   : > { %4719 = vmatmul.f32.gmra.mxu0 %v4642_v10 }
 0x498   : > { %v4292_v28 = vpop.f32.mrf.mxu2 }
 0x499   : > { %v10211_v42 = vadd.f32 %v4292_v28, %v4178_v63  ;;  %v3719_v59 = vpop.f32.mrf.mxu3  ;;  %v4018_v63 = vld [vmem:[#allocation2 + $0xc3] sm:$0xff]  ;;  %v4644_v28 = vld [vmem:[#allocation2 + $0x55] sm:$0xff] }
 0x49a   : > { %v4081_v38 = vpop.f32.mrf.mxu1  ;;  %v10214_v11 = vadd.f32 %v3719_v59, %v9982_v6 }
 0x49b   : > { %v4179_v6 = vadd.f32 %v4081_v38, %v3965_v46  ;;  %v10241_v38 = vpop.f32.mrf.mxu0  ;;  %v4019_v46 = vld [vmem:[#allocation2 + $0xcb] sm:$0xff] }
 0x49c   : > { %11707 = vst [vmem:[#allocation96_spill] sm:$0xff] %v10214_v11  ;;  %4128 = vmatmul.f32.gmra.mxu1 %v4017_v34 }
 0x49d   : > { %4342 = vmatmul.f32.gmra.mxu2 %v10219_v5  ;;  %4517 = vmatmul.f32.gmra.mxu3 %v10037_v27  ;;  %v5951_v27 = vld [vmem:[%s11372_s6 + $0x60] sm:$0xff]  ;;  %11710 = vst [vmem:[#allocation97_spill] sm:$0xff] %v10241_v38 }
 0x49e   : > { %4722 = vmatmul.f32.gmra.mxu0 %v4643_v43  ;;  %5962 = vmatpush.msra.mxu2 %v5951_v27  ;;  %v10248_v43 = vld [vmem:[#allocation2 + $0xcc] sm:$0xff]  ;;  %v6815_v38 = vld [vmem:[#allocation2] sm:$0xff] }
 0x49f   : > { %v4020_v27 = vld [vmem:[#allocation2 + $0xd3] sm:$0xff] }
 0x4a0   : > { %v4295_v62 = vpop.f32.mrf.mxu2 }
 0x4a1   : > { %v10227_v17 = vadd.f32 %v4295_v62, %v4179_v6  ;;  %v3722_v21 = vpop.f32.mrf.mxu3  ;;  %v6445_v6 = vld [vmem:[%s11370_s4 + $0x418] sm:$0xff] }
 0x4a2   : > { %v4084_v25 = vpop.f32.mrf.mxu1  ;;  %v10230_v10 = vadd.f32 %v3722_v21, %v10004_v32  ;;  %v4645_v62 = vld [vmem:[#allocation2 + $0x5d] sm:$0xff]  ;;  %4917 = vmatpush.msra.mxu1 %v6445_v6 }
 0x4a3   : > { %v4180_v59 = vadd.f32 %v4084_v25, %v3966_v2 }
 0x4a4   : > { %11709 = vst [vmem:[#allocation51_spill] sm:$0xff] %v10230_v10  ;;  %4131 = vmatmul.f32.gmra.mxu1 %v4018_v63  ;;  %v4666_v10 = vld [vmem:[#allocation2 + $0x105] sm:$0xff] }
 0x4a5   : > { %4345 = vmatmul.f32.gmra.mxu2 %v10232_v14  ;;  %4520 = vmatmul.f32.gmra.mxu3 %v10059_v40  ;;  %v3967_v40 = vadd.f32 %v9916_v8, %v9888_v41  ;;  %v10262_v8 = vpop.f32.mrf.mxu0 }
 0x4a6   : > { %4725 = vmatmul.f32.gmra.mxu0 %v4644_v28  ;;  %11713 = vst [vmem:[#allocation25_spill] sm:$0xff] %v10262_v8  ;;  %v10264_v28 = vld [vmem:[#allocation2 + $0xd4] sm:$0xff] }
 0x4a8   : > { %v4298_v32 = vpop.f32.mrf.mxu2 }
 0x4a9   : > { %v10243_v24 = vadd.f32 %v4298_v32, %v4180_v59  ;;  %v3725_v34 = vpop.f32.mrf.mxu3  ;;  %v4646_v59 = vld [vmem:[#allocation2 + $0x65] sm:$0xff] }
 0x4aa   : > { %v4087_v35 = vpop.f32.mrf.mxu1  ;;  %v10246_v4 = vadd.f32 %v3725_v34, %v10029_v49 }
 0x4ab   : > { %v4181_v21 = vadd.f32 %v4087_v35, %v3967_v40 }
 0x4ac   : > { %11711 = vst [vmem:[#allocation22_spill] sm:$0xff] %v10246_v4  ;;  %4134 = vmatmul.f32.gmra.mxu1 %v4019_v46  ;;  %v5950_v46 = vld [vmem:[%s11372_s6 + $0x58] sm:$0xff] }
 0x4ad   : > { %4348 = vmatmul.f32.gmra.mxu2 %v10248_v43  ;;  %4523 = vmatmul.f32.gmra.mxu3 %v10084_v12  ;;  %v3968_v12 = vadd.f32 %v9929_v18, %v9898_v47  ;;  %v4021_v47 = vld [vmem:[#allocation2 + $0xdb] sm:$0xff] }
 0x4ae   : > { %4728 = vmatmul.f32.gmra.mxu0 %v4645_v62  ;;  %5963 = vmatpush.msra.mxu2 %v5950_v46  ;;  %v10278_v18 = vld [vmem:[#allocation2 + $0xdc] sm:$0xff]  ;;  %v10282_v62 = vpop.f32.mrf.mxu0 }
 0x4af   : > { %11715 = vst [vmem:[#allocation63_spill] sm:$0xff] %v10282_v62  ;;  %v4864_v62 = vld [vmem:[#allocation2 + $0x86] sm:$0xff] }
 0x4b0   : > { %v4301_v49 = vpop.f32.mrf.mxu2 }
 0x4b1   : > { %v10257_v25 = vadd.f32 %v4301_v49, %v4181_v21  ;;  %v3728_v63 = vpop.f32.mrf.mxu3  ;;  %v6444_v21 = vld [vmem:[%s11370_s4 + $0x410] sm:$0xff] }
 0x4b2   : > { %v4090_v2 = vpop.f32.mrf.mxu1  ;;  %v10260_v41 = vadd.f32 %v3728_v63, %v10045_v29  ;;  %4918 = vmatpush.msra.mxu1 %v6444_v21  ;;  %v10310_v21 = vld [vmem:[#allocation2 + $0xec] sm:$0xff] }
 0x4b3   : > { %v4182_v32 = vadd.f32 %v4090_v2, %v3968_v12  ;;  %v4022_v12 = vld [vmem:[#allocation2 + $0xe3] sm:$0xff] }
 0x4b4   : > { %11712 = vst [vmem:[#allocation13_spill] sm:$0xff] %v10260_v41  ;;  %4137 = vmatmul.f32.gmra.mxu1 %v4020_v27 }
 0x4b5   : > { %4351 = vmatmul.f32.gmra.mxu2 %v10264_v28  ;;  %4526 = vmatmul.f32.gmra.mxu3 %v10100_v55  ;;  %v3969_v55 = vadd.f32 %v9944_v26, %v9911_v60 }
 0x4b6   : > { %4731 = vmatmul.f32.gmra.mxu0 %v4646_v59  ;;  %v10294_v59 = vld [vmem:[#allocation2 + $0xe4] sm:$0xff] }
 0x4b8   : > { %v4304_v34 = vpop.f32.mrf.mxu2 }
 0x4b9   : > { %v10270_v35 = vadd.f32 %v4304_v34, %v4182_v32  ;;  %v3731_v29 = vpop.f32.mrf.mxu3  ;;  %v3970_v32 = vadd.f32 %v9957_v0, %v9924_v31  ;;  %v10300_v34 = vpop.f32.mrf.mxu0  ;;  %v5949_v0 = vld [vmem:[%s11372_s6 + $0x50] sm:$0xff] }
 0x4ba   : > { %v4093_v40 = vpop.f32.mrf.mxu1  ;;  %v10276_v6 = vadd.f32 %v3731_v29, %v10067_v45  ;;  %v4647_v45 = vld [vmem:[#allocation2 + $0x6d] sm:$0xff]  ;;  %11717 = vst [vmem:[#allocation53_spill] sm:$0xff] %v10300_v34  ;;  %5964 = vmatpush.msra.mxu2 %v5949_v0  ;;  %v4668_v34 = vld [vmem:[#allocation2 + $0x115] sm:$0xff] }
 0x4bb   : > { %v4183_v49 = vadd.f32 %v4093_v40, %v3969_v55  ;;  %v4023_v31 = vld [vmem:[#allocation2 + $0xeb] sm:$0xff] }
 0x4bc   : > { %11714 = vst [vmem:[#allocation98_spill] sm:$0xff] %v10276_v6  ;;  %4140 = vmatmul.f32.gmra.mxu1 %v4021_v47 }
 0x4bd   : > { %4354 = vmatmul.f32.gmra.mxu2 %v10278_v18  ;;  %4529 = vmatmul.f32.gmra.mxu3 %v10111_v39  ;;  %v4648_v39 = vld [vmem:[#allocation2 + $0x75] sm:$0xff] }
 0x4be   : > { %4734 = vmatmul.f32.gmra.mxu0 %v4647_v45 }
 0x4c0   : > { %v4307_v63 = vpop.f32.mrf.mxu2 }
 0x4c1   : > { %v10289_v2 = vadd.f32 %v4307_v63, %v4183_v49  ;;  %v3734_v27 = vpop.f32.mrf.mxu3  ;;  %v4649_v49 = vld [vmem:[#allocation2 + $0x7d] sm:$0xff] }
 0x4c2   : > { %v4096_v26 = vpop.f32.mrf.mxu1  ;;  %v10292_v60 = vadd.f32 %v3734_v27, %v10092_v22  ;;  %v10316_v27 = vpop.f32.mrf.mxu0 }
 0x4c3   : > { %v4184_v29 = vadd.f32 %v4096_v26, %v3970_v32  ;;  %11720 = vst [vmem:[#allocation65_spill] sm:$0xff] %v10316_v27  ;;  %v6443_v32 = vld [vmem:[%s11370_s4 + $0x408] sm:$0xff] }
 0x4c4   : > { %11716 = vst [vmem:[#allocation60_spill] sm:$0xff] %v10292_v60  ;;  %4143 = vmatmul.f32.gmra.mxu1 %v4022_v12  ;;  %v4860_v27 = vld [vmem:[#allocation2 + $0x66] sm:$0xff] }
 0x4c5   : > { %4357 = vmatmul.f32.gmra.mxu2 %v10294_v59  ;;  %4532 = vmatmul.f32.gmra.mxu3 %v10123_v53  ;;  %v11719_v53 = vld [vmem:[#allocation10_spill] sm:$0xff] }
 0x4c6   : > { %4737 = vmatmul.f32.gmra.mxu0 %v4648_v39  ;;  %v3971_v45 = vadd.f32 %v11719_v53, %v9937_v52  ;;  %4919 = vmatpush.msra.mxu1 %v6443_v32  ;;  %v10339_v53 = vld [vmem:[#allocation2 + $0xfc] sm:$0xff]  ;;  %v10354_v32 = vld [vmem:[#allocation2 + $0x104] sm:$0xff] }
 0x4c8   : > { %v4310_v46 = vpop.f32.mrf.mxu2 }
 0x4c9   : > { %v10302_v40 = vadd.f32 %v4310_v46, %v4184_v29  ;;  %v3737_v22 = vpop.f32.mrf.mxu3  ;;  %v10328_v29 = vld [vmem:[#allocation2 + $0xf4] sm:$0xff]  ;;  %v4650_v46 = vld [vmem:[#allocation2 + $0x85] sm:$0xff] }
 0x4ca   : > { %v4099_v47 = vpop.f32.mrf.mxu1  ;;  %v10305_v55 = vadd.f32 %v3737_v22, %v10104_v1 }
 0x4cb   : > { %v4185_v63 = vadd.f32 %v4099_v47, %v3971_v45  ;;  %v4651_v45 = vld [vmem:[#allocation2 + $0x8d] sm:$0xff] }
 0x4cc   : > { %11718 = vst [vmem:[#allocation54_spill] sm:$0xff] %v10305_v55  ;;  %4146 = vmatmul.f32.gmra.mxu1 %v4023_v31  ;;  %v10337_v31 = vpop.f32.mrf.mxu0  ;;  %v10404_v55 = vld [vmem:[#allocation2 + $0x124] sm:$0xff] }
 0x4cd   : > { %4360 = vmatmul.f32.gmra.mxu2 %v10310_v21  ;;  %4535 = vmatmul.f32.gmra.mxu3 %v10140_v9  ;;  %v4024_v9 = vld [vmem:[#allocation2 + $0xf3] sm:$0xff]  ;;  %11723 = vst [vmem:[#allocation55_spill] sm:$0xff] %v10337_v31 }
 0x4ce   : > { %4740 = vmatmul.f32.gmra.mxu0 %v4649_v49 }
 0x4d0   : > { %v4313_v1 = vpop.f32.mrf.mxu2 }
 0x4d1   : > { %v10318_v26 = vadd.f32 %v4313_v1, %v4185_v63  ;;  %v3740_v12 = vpop.f32.mrf.mxu3  ;;  %v6442_v1 = vld [vmem:[%s11370_s4 + $0x400] sm:$0xff] }
 0x4d2   : > { %v10323_v39 = vpop.f32.mrf.mxu1  ;;  %v10326_v52 = vadd.f32 %v3740_v12, %v10118_v23  ;;  %v4025_v23 = vld [vmem:[#allocation2 + $0xfb] sm:$0xff]  ;;  %v4026_v12 = vld [vmem:[#allocation2 + $0x103] sm:$0xff]  ;;  %4920 = vmatpush.msra.mxu1 %v6442_v1 }
 0x4d4   : > { %11721 = vst [vmem:[#allocation100_spill] sm:$0xff] %v10326_v52  ;;  %4149 = vmatmul.f32.gmra.mxu1 %v4024_v9  ;;  %v10356_v9 = vpop.f32.mrf.mxu0 }
 0x4d5   : > { %4363 = vmatmul.f32.gmra.mxu2 %v10328_v29  ;;  %4538 = vmatmul.f32.gmra.mxu3 %v10158_v3  ;;  %v5948_v3 = vld [vmem:[%s11372_s6 + $0x48] sm:$0xff]  ;;  %11724 = vst [vmem:[#allocation56_spill] sm:$0xff] %v10356_v9 }
 0x4d6   : > { %4743 = vmatmul.f32.gmra.mxu0 %v4650_v46  ;;  %5965 = vmatpush.msra.mxu2 %v5948_v3  ;;  %v10365_v3 = vld [vmem:[#allocation2 + $0x10c] sm:$0xff] }
 0x4d7   : > { %v4856_v9 = vld [vmem:[#allocation2 + $0x46] sm:$0xff] }
 0x4d9   : > { %v3743_v22 = vpop.f32.mrf.mxu3 }
 0x4da   : > { %v10332_v47 = vpop.f32.mrf.mxu1  ;;  %v10335_v0 = vadd.f32 %v3743_v22, %v10131_v48 }
 0x4dc   : > { %11722 = vst [vmem:[#allocation28_spill] sm:$0xff] %v10335_v0  ;;  %4152 = vmatmul.f32.gmra.mxu1 %v4025_v23  ;;  %v4027_v23 = vld [vmem:[#allocation2 + $0x10b] sm:$0xff] }
 0x4dd   : > { %4366 = vmatmul.f32.gmra.mxu2 %v10339_v53  ;;  %4541 = vmatmul.f32.gmra.mxu3 %v10173_v50  ;;  %v4652_v50 = vld [vmem:[#allocation2 + $0x95] sm:$0xff] }
 0x4de   : > { %4746 = vmatmul.f32.gmra.mxu0 %v4651_v45  ;;  %v5947_v45 = vld [vmem:[%s11372_s6 + $0x40] sm:$0xff] }
 0x4df   : > { %5966 = vmatpush.msra.mxu2 %v5947_v45 }
 0x4e1   : > { %v4494_v49 = vpop.f32.mrf.mxu3 }
 0x4e2   : > { %v10346_v48 = vpop.f32.mrf.mxu1  ;;  %v10349_v63 = vadd.f32 %v4494_v49, %v10152_v13  ;;  %v10372_v49 = vpop.f32.mrf.mxu0 }
 0x4e3   : > { %11725 = vst [vmem:[#allocation62_spill] sm:$0xff] %v10372_v49 }
 0x4e4   : > { %4155 = vmatmul.f32.gmra.mxu1 %v4026_v12 }
 0x4e5   : > { %4369 = vmatmul.f32.gmra.mxu2 %v10354_v32  ;;  %4544 = vmatmul.f32.gmra.mxu3 %v10189_v20  ;;  %v4653_v20 = vld [vmem:[#allocation2 + $0x9d] sm:$0xff] }
 0x4e6   : > { %4749 = vmatmul.f32.gmra.mxu0 %v4652_v50  ;;  %v4028_v50 = vld [vmem:[#allocation2 + $0x113] sm:$0xff] }
 0x4e9   : > { %v4497_v46 = vpop.f32.mrf.mxu3 }
 0x4ea   : > { %v10360_v13 = vpop.f32.mrf.mxu1  ;;  %v10363_v22 = vadd.f32 %v4497_v46, %v10165_v16  ;;  %v10379_v46 = vld [vmem:[#allocation2 + $0x114] sm:$0xff] }
 0x4ec   : > { %4158 = vmatmul.f32.gmra.mxu1 %v4027_v23  ;;  %v10383_v23 = vpop.f32.mrf.mxu0 }
 0x4ed   : > { %4372 = vmatmul.f32.gmra.mxu2 %v10365_v3  ;;  %4547 = vmatmul.f32.gmra.mxu3 %v10200_v30  ;;  %v4654_v30 = vld [vmem:[#allocation2 + $0xa5] sm:$0xff]  ;;  %11726 = vst [vmem:[#allocation67_spill] sm:$0xff] %v10383_v23 }
 0x4ee   : > { %4752 = vmatmul.f32.gmra.mxu0 %v4653_v20 }
 0x4f1   : > { %v4500_v1 = vpop.f32.mrf.mxu3 }
 0x4f2   : > { %v10374_v16 = vpop.f32.mrf.mxu1  ;;  %v10377_v12 = vadd.f32 %v4500_v1, %v10179_v57  ;;  %v4029_v57 = vld [vmem:[#allocation2 + $0x11b] sm:$0xff] }
 0x4f3   : > { %v10390_v1 = vld [vmem:[#allocation2 + $0x11c] sm:$0xff] }
 0x4f4   : > { %4161 = vmatmul.f32.gmra.mxu1 %v4028_v50  ;;  %v4655_v50 = vld [vmem:[#allocation2 + $0xad] sm:$0xff] }
 0x4f5   : > { %4375 = vmatmul.f32.gmra.mxu2 %v10379_v46  ;;  %4550 = vmatmul.f32.gmra.mxu3 %v10219_v5 }
 0x4f6   : > { %4755 = vmatmul.f32.gmra.mxu0 %v4654_v30  ;;  %v5946_v30 = vld [vmem:[%s11372_s6 + $0x38] sm:$0xff] }
 0x4f7   : > { %5967 = vmatpush.msra.mxu2 %v5946_v30 }
 0x4f9   : > { %v4503_v45 = vpop.f32.mrf.mxu3 }
 0x4fa   : > { %v10385_v20 = vpop.f32.mrf.mxu1  ;;  %v10388_v0 = vadd.f32 %v4503_v45, %v10195_v44  ;;  %v10402_v45 = vpop.f32.mrf.mxu0 }
 0x4fb   : > { %11727 = vst [vmem:[#allocation30_spill] sm:$0xff] %v10402_v45 }
 0x4fc   : > { %4164 = vmatmul.f32.gmra.mxu1 %v4029_v57  ;;  %v4030_v57 = vld [vmem:[#allocation2 + $0x123] sm:$0xff] }
 0x4fd   : > { %4378 = vmatmul.f32.gmra.mxu2 %v10390_v1  ;;  %4553 = vmatmul.f32.gmra.mxu3 %v10232_v14  ;;  %v4656_v14 = vld [vmem:[#allocation2 + $0xb5] sm:$0xff] }
 0x4fe   : > { %4758 = vmatmul.f32.gmra.mxu0 %v4655_v50 }
 0x501   : > { %v4506_v5 = vpop.f32.mrf.mxu3 }
 0x502   : > { %v10397_v52 = vpop.f32.mrf.mxu1  ;;  %v10400_v44 = vadd.f32 %v4506_v5, %v10211_v42  ;;  %v4031_v42 = vld [vmem:[#allocation2 + $0x12b] sm:$0x3f]  ;;  %v10413_v30 = vpop.f32.mrf.mxu0 }
 0x503   : > { %v4245_v5 = vld [vmem:[#allocation2 + $0x12c] sm:$0x3f]  ;;  %11728 = vst [vmem:[#allocation103_spill] sm:$0xff] %v10413_v30 }
 0x504   : > { %4167 = vmatmul.f32.gmra.mxu1 %v4030_v57  ;;  %v4657_v57 = vld [vmem:[#allocation2 + $0xbd] sm:$0xff] }
 0x505   : > { %4381 = vmatmul.f32.gmra.mxu2 %v10404_v55  ;;  %4556 = vmatmul.f32.gmra.mxu3 %v10248_v43 }
 0x506   : > { %4761 = vmatmul.f32.gmra.mxu0 %v4656_v14 }
 0x509   : > { %v4509_v50 = vpop.f32.mrf.mxu3 }
 0x50a   : > { %v10408_v23 = vpop.f32.mrf.mxu1  ;;  %v10411_v60 = vadd.f32 %v4509_v50, %v10227_v17  ;;  %v5945_v17 = vld [vmem:[%s11372_s6 + $0x30] sm:$0xff]  ;;  %v4852_v50 = vld [vmem:[#allocation2 + $0x26] sm:$0xff] }
 0x50b   : > { %5968 = vmatpush.msra.mxu2 %v5945_v17 }
 0x50c   : > { %4170 = vmatmul.f32.gmra.mxu1 %v4031_v42  ;;  %v4658_v42 = vld [vmem:[#allocation2 + $0xc5] sm:$0xff] }
 0x50d   : > { %4384 = vmatmul.f32.gmra.mxu2 %v4245_v5  ;;  %4559 = vmatmul.f32.gmra.mxu3 %v10264_v28  ;;  %v10425_v5 = vpop.f32.mrf.mxu0 }
 0x50e   : > { %4764 = vmatmul.f32.gmra.mxu0 %v4657_v57  ;;  %11729 = vst [vmem:[#allocation64_spill] sm:$0xff] %v10425_v5 }
 0x511   : > { %v4512_v45 = vpop.f32.mrf.mxu3 }
 0x512   : > { %v10416_v43 = vpop.f32.mrf.mxu1  ;;  %v10419_v14 = vadd.f32 %v4512_v45, %v10243_v24  ;;  %v4853_v24 = vld [vmem:[#allocation2 + $0x2e] sm:$0xff] }
 0x513   : > { %v4659_v45 = vld [vmem:[#allocation2 + $0xcd] sm:$0xff] }
 0x514   : > { %4921 = vmatmul.f32.vlgmr.msra.gmra.mxu1 %v4852_v50 }
 0x515   : > { %4562 = vmatmul.f32.gmra.mxu3 %v10278_v18  ;;  %v10433_v17 = vpop.f32.mrf.mxu0 }
 0x516   : > { %4767 = vmatmul.f32.gmra.mxu0 %v4658_v42  ;;  %v4854_v42 = vld [vmem:[#allocation2 + $0x36] sm:$0xff] }
 0x519   : > { %v4515_v28 = vpop.f32.mrf.mxu3 }
 0x51a   : > { %v10427_v57 = vpop.f32.mrf.mxu1  ;;  %v10430_v30 = vadd.f32 %v4515_v28, %v10257_v25  ;;  %v5944_v25 = vld [vmem:[%s11372_s6 + $0x28] sm:$0xff]  ;;  %v4660_v28 = vld [vmem:[#allocation2 + $0xd5] sm:$0xff] }
 0x51b   : > { %11730 = vst [vmem:[#allocation105_spill] sm:$0xff] %v10427_v57  ;;  %5969 = vmatpush.msra.mxu2 %v5944_v25 }
 0x51c   : > { %4924 = vmatmul.f32.gmra.mxu1 %v4853_v24 }
 0x51d   : > { %4565 = vmatmul.f32.gmra.mxu3 %v10294_v59  ;;  %v10444_v59 = vpop.f32.mrf.mxu2 }
 0x51e   : > { %4770 = vmatmul.f32.gmra.mxu0 %v4659_v45 }
 0x521   : > { %v4518_v50 = vpop.f32.mrf.mxu3 }
 0x522   : > { %v10435_v18 = vpop.f32.mrf.mxu1  ;;  %v10438_v5 = vadd.f32 %v4518_v50, %v10270_v35  ;;  %v10451_v35 = vpop.f32.mrf.mxu0  ;;  %v4855_v50 = vld [vmem:[#allocation2 + $0x3e] sm:$0xff] }
 0x523   : > { %11731 = vst [vmem:[#allocation69_spill] sm:$0xff] %v10435_v18  ;;  %v4817_v51 = vadd.f32 %v10451_v35, %v10363_v22 }
 0x524   : > { %4927 = vmatmul.f32.gmra.mxu1 %v4854_v42  ;;  %v4661_v42 = vld [vmem:[#allocation2 + $0xdd] sm:$0xff] }
 0x525   : > { %4568 = vmatmul.f32.gmra.mxu3 %v10310_v21 }
 0x526   : > { %4773 = vmatmul.f32.gmra.mxu0 %v4660_v28  ;;  %v10459_v28 = vpop.f32.mrf.mxu2 }
 0x529   : > { %v4521_v24 = vpop.f32.mrf.mxu3 }
 0x52a   : > { %v10446_v45 = vpop.f32.mrf.mxu1  ;;  %v10449_v49 = vadd.f32 %v4521_v24, %v10289_v2  ;;  %v10461_v41 = vpop.f32.mrf.mxu0  ;;  %v5943_v2 = vld [vmem:[%s11372_s6 + $0x20] sm:$0xff] }
 0x52b   : > { %11732 = vst [vmem:[#allocation57_spill] sm:$0xff] %v10446_v45  ;;  %5970 = vmatpush.msra.mxu2 %v5943_v2  ;;  %v4858_v2 = vld [vmem:[#allocation2 + $0x56] sm:$0xff] }
 0x52c   : > { %4930 = vmatmul.f32.gmra.mxu1 %v4855_v50 }
 0x52d   : > { %4571 = vmatmul.f32.gmra.mxu3 %v10328_v29  ;;  %v4662_v29 = vld [vmem:[#allocation2 + $0xe5] sm:$0xff] }
 0x52e   : > { %4776 = vmatmul.f32.gmra.mxu0 %v4661_v42  ;;  %v4857_v42 = vld [vmem:[#allocation2 + $0x4e] sm:$0xff] }
 0x531   : > { %v4524_v21 = vpop.f32.mrf.mxu3 }
 0x532   : > { %v10454_v6 = vpop.f32.mrf.mxu1  ;;  %v10457_v25 = vadd.f32 %v4524_v21, %v10302_v40  ;;  %v10472_v21 = vpop.f32.mrf.mxu2 }
 0x533   : > { %11733 = vst [vmem:[#allocation58_spill] sm:$0xff] %v10454_v6  ;;  %v10475_v31 = vpop.f32.mrf.mxu0 }
 0x534   : > { %4933 = vmatmul.f32.gmra.mxu1 %v4856_v9  ;;  %v4663_v9 = vld [vmem:[#allocation2 + $0xed] sm:$0xff] }
 0x535   : > { %4574 = vmatmul.f32.gmra.mxu3 %v10339_v53 }
 0x536   : > { %4779 = vmatmul.f32.gmra.mxu0 %v4662_v29  ;;  %v4664_v29 = vld [vmem:[#allocation2 + $0xf5] sm:$0xff] }
 0x539   : > { %v4527_v24 = vpop.f32.mrf.mxu3 }
 0x53a   : > { %v10467_v50 = vpop.f32.mrf.mxu1  ;;  %v10470_v40 = vadd.f32 %v4527_v24, %v10318_v26  ;;  %v10480_v4 = vpop.f32.mrf.mxu2 }
 0x53b   : > { %11734 = vst [vmem:[#allocation106_spill] sm:$0xff] %v10467_v50  ;;  %v10482_v26 = vpop.f32.mrf.mxu0  ;;  %v4671_v50 = vld [vmem:[#allocation2 + $0x12d] sm:$0xff] }
 0x53c   : > { %4936 = vmatmul.f32.gmra.mxu1 %v4857_v42  ;;  %v4859_v42 = vld [vmem:[#allocation2 + $0x5e] sm:$0xff] }
 0x53d   : > { %4577 = vmatmul.f32.gmra.mxu3 %v10354_v32  ;;  %v5942_v32 = vld [vmem:[%s11372_s6 + $0x18] sm:$0xff] }
 0x53e   : > { %4782 = vmatmul.f32.gmra.mxu0 %v4663_v9  ;;  %5971 = vmatpush.msra.mxu2 %v5942_v32  ;;  %v4665_v9 = vld [vmem:[#allocation2 + $0xfd] sm:$0xff] }
 0x542   : > { %v10477_v53 = vpop.f32.mrf.mxu1 }
 0x543   : > { %11735 = vst [vmem:[#allocation33_spill] sm:$0xff] %v10477_v53  ;;  %v4458_v53 = vld [vmem:[#allocation2 + $0x134] sm:$0xff] }
 0x544   : > { %4939 = vmatmul.f32.gmra.mxu1 %v4858_v2 }
 0x545   : > { %4580 = vmatmul.f32.gmra.mxu3 %v10365_v3  ;;  %v10490_v3 = vpop.f32.mrf.mxu2 }
 0x546   : > { %4785 = vmatmul.f32.gmra.mxu0 %v4664_v29  ;;  %v10494_v29 = vpop.f32.mrf.mxu0 }
 0x54a   : > { %v10487_v24 = vpop.f32.mrf.mxu1 }
 0x54b   : > { %11736 = vst [vmem:[#allocation66_spill] sm:$0xff] %v10487_v24 }
 0x54c   : > { %4942 = vmatmul.f32.gmra.mxu1 %v4859_v42  ;;  %v4861_v42 = vld [vmem:[#allocation2 + $0x6e] sm:$0xff] }
 0x54d   : > { %4583 = vmatmul.f32.gmra.mxu3 %v10379_v46  ;;  %v10499_v32 = vpop.f32.mrf.mxu2  ;;  %v5941_v46 = vld [vmem:[%s11372_s6 + $0x10] sm:$0xff] }
 0x54e   : > { %4788 = vmatmul.f32.gmra.mxu0 %v4665_v9  ;;  %5972 = vmatpush.msra.mxu2 %v5941_v46  ;;  %v10504_v9 = vpop.f32.mrf.mxu0 }
 0x552   : > { %v10492_v2 = vpop.f32.mrf.mxu1 }
 0x553   : > { %11737 = vst [vmem:[#allocation108_spill] sm:$0xff] %v10492_v2 }
 0x554   : > { %4945 = vmatmul.f32.gmra.mxu1 %v4860_v27  ;;  %v4667_v27 = vld [vmem:[#allocation2 + $0x10d] sm:$0xff] }
 0x555   : > { %4586 = vmatmul.f32.gmra.mxu3 %v10390_v1  ;;  %v10509_v2 = vpop.f32.mrf.mxu2 }
 0x556   : > { %4791 = vmatmul.f32.gmra.mxu0 %v4666_v10  ;;  %v4862_v10 = vld [vmem:[#allocation2 + $0x76] sm:$0xff]  ;;  %v10511_v11 = vpop.f32.mrf.mxu0 }
 0x55a   : > { %v10497_v24 = vpop.f32.mrf.mxu1 }
 0x55b   : > { %11738 = vst [vmem:[#allocation71_spill] sm:$0xff] %v10497_v24  ;;  %v4457_v24 = vld [vmem:[#allocation2 + $0x12c] sm:$0xff] }
 0x55c   : > { %4948 = vmatmul.f32.gmra.mxu1 %v4861_v42  ;;  %v4863_v42 = vld [vmem:[#allocation2 + $0x7e] sm:$0xff] }
 0x55d   : > { %4589 = vmatmul.f32.gmra.mxu3 %v10404_v55  ;;  %v5940_v55 = vld [vmem:[%s11372_s6 + $0x8] sm:$0xff] }
 0x55e   : > { %4794 = vmatmul.f32.gmra.mxu0 %v4667_v27  ;;  %v4669_v27 = vld [vmem:[#allocation2 + $0x11d] sm:$0xff]  ;;  %5973 = vmatpush.msra.mxu2 %v5940_v55  ;;  %v4865_v55 = vld [vmem:[#allocation2 + $0x8e] sm:$0xff] }
 0x562   : > { %v10507_v1 = vpop.f32.mrf.mxu1 }
 0x563   : > { %11739 = vst [vmem:[#allocation14_spill] sm:$0xff] %v10507_v1  ;;  %v10518_v1 = vpop.f32.mrf.mxu2 }
 0x564   : > { %4951 = vmatmul.f32.gmra.mxu1 %v4862_v10 }
 0x565   : > { %4592 = vmatmul.f32.gmra.mxu3 %v4457_v24  ;;  %v10520_v24 = vpop.f32.mrf.mxu0 }
 0x566   : > { %4797 = vmatmul.f32.gmra.mxu0 %v4668_v34  ;;  %v4459_v34 = vld [vmem:[#allocation2 + $0x13c] sm:$0x3f] }
 0x56a   : > { %v10513_v46 = vpop.f32.mrf.mxu1 }
 0x56b   : > { %11740 = vst [vmem:[#allocation68_spill] sm:$0xff] %v10513_v46  ;;  %v4670_v46 = vld [vmem:[#allocation2 + $0x125] sm:$0xff] }
 0x56c   : > { %4954 = vmatmul.f32.gmra.mxu1 %v4863_v42  ;;  %v10524_v42 = vpop.f32.mrf.mxu2 }
 0x56d   : > { %4595 = vmatmul.f32.gmra.mxu3 %v4458_v53  ;;  %v10528_v53 = vpop.f32.mrf.mxu0 }
 0x56e   : > { %4800 = vmatmul.f32.gmra.mxu0 %v4669_v27 }
 0x572   : > { %v10522_v10 = vpop.f32.mrf.mxu1 }
 0x573   : > { %11741 = vst [vmem:[#allocation73_spill] sm:$0xff] %v10522_v10  ;;  %v4866_v10 = vld [vmem:[#allocation2 + $0x96] sm:$0xff] }
 0x574   : > { %4957 = vmatmul.f32.gmra.mxu1 %v4864_v62  ;;  %v10532_v8 = vpop.f32.mrf.mxu2 }
 0x575   : > { %4598 = vmatmul.f32.gmra.mxu3 %v4459_v34  ;;  %11744 = vst [vmem:[#allocation75_spill] sm:$0xff] %v10532_v8  ;;  %v10534_v62 = vpop.f32.mrf.mxu0  ;;  %v4867_v34 = vld [vmem:[#allocation2 + $0x9e] sm:$0xff] }
 0x576   : > { %4803 = vmatmul.f32.gmra.mxu0 %v4670_v46 }
 0x57a   : > { %v10526_v56 = vpop.f32.mrf.mxu1 }
 0x57b   : > { %11742 = vst [vmem:[#allocation16_spill] sm:$0xff] %v10526_v56  ;;  %v4673_v56 = vld [vmem:[#allocation2 + $0x13d] sm:$0x3f] }
 0x57c   : > { %4960 = vmatmul.f32.gmra.mxu1 %v4865_v55  ;;  %v10538_v6 = vpop.f32.mrf.mxu2 }
 0x57d   : > { %11746 = vst [vmem:[#allocation77_spill] sm:$0xff] %v10538_v6  ;;  %v10540_v55 = vpop.f32.mrf.mxu0 }
 0x57e   : > { %4806 = vmatmul.f32.gmra.mxu0 %v4671_v50  ;;  %v4816_v50 = vadd.f32 %v10433_v17, %v10349_v63 }
 0x582   : > { %v10530_v27 = vpop.f32.mrf.mxu1 }
 0x583   : > { %11743 = vst [vmem:[#allocation70_spill] sm:$0xff] %v10530_v27  ;;  %v10547_v27 = vld [vmem:[%s11371_s5] ss:$0 sm:$0xff] }
 0x584   : > { %4963 = vmatmul.f32.gmra.mxu1 %v4866_v10  ;;  %v10555_v63 = vpop.f32.mrf.mxu2 }
 0x585   : > { %11747 = vst [vmem:[#allocation74_spill] sm:$0xff] %v10555_v63 }
 0x586   : > { %4809 = vmatmul.f32.gmra.mxu0 %v4672_v61  ;;  %v5939_v61 = vld [vmem:[%s11372_s6] sm:$0xff] }
 0x587   : > { %5974 = vmatpush.msra.mxu2 %v5939_v61 }
 0x588   : > { %5975 = vmatmul.f32.vlgmr.msra.gmra.mxu2 %v6815_v38 }
 0x58a   : > { %v10536_v46 = vpop.f32.mrf.mxu1 }
 0x58b   : > { %11745 = vst [vmem:[#allocation72_spill] sm:$0xff] %v10536_v46 }
 0x58c   : > { %4966 = vmatmul.f32.gmra.mxu1 %v4867_v34  ;;  %v4868_v34 = vld [vmem:[#allocation2 + $0xa6] sm:$0xff]  ;;  %v10566_v63 = vpop.f32.mrf.mxu2 }
 0x58d   : > { %11748 = vst [vmem:[#allocation81_spill] sm:$0xff] %v10566_v63 }
 0x58e   : > { %4812 = vmatmul.f32.gmra.mxu0 %v4673_v56 }
 0x590   : > { %5978 = vmatmul.f32.gmra.mxu2 %v6815_v38 }
 0x592   : > { %v4922_v10 = vpop.f32.mrf.mxu1 }
 0x593   : > { %v5030_v46 = vadd.f32 %v4922_v10, %v4816_v50  ;;  %v4869_v50 = vld [vmem:[#allocation2 + $0xae] sm:$0xff] }
 0x594   : > { %4969 = vmatmul.f32.gmra.mxu1 %v4868_v34  ;;  %v4818_v34 = vadd.f32 %v10461_v41, %v10377_v12 }
 0x595   : > { %v10553_v56 = vadd.f32 %v10547_v27, %v5030_v46 }
 0x597   : > { %v5106_v17 = vsub.f32 0.0, %v10553_v56 }
 0x599   : > { %v5142_v45 = vmul.f32 1.442695, %v5106_v17  ;;  %v4819_v17 = vadd.f32 %v10475_v31, %v10388_v0 }
 0x59a   : > { %v4925_v15 = vpop.f32.mrf.mxu1 }
 0x59b   : > { %6669 = vpow2.f32 %v5142_v45  ;;  %v5031_v58 = vadd.f32 %v4925_v15, %v4817_v51  ;;  %v4870_v51 = vld [vmem:[#allocation2 + $0xb6] sm:$0xff] }
 0x59c   : > { %4972 = vmatmul.f32.gmra.mxu1 %v4869_v50 }
 0x59d   : > { %v10561_v61 = vadd.f32 %v10547_v27, %v5031_v58 }
 0x59f   : > { %v5107_v46 = vsub.f32 0.0, %v10561_v61 }
 0x5a1   : > { %v6670_v10 = vpop.eup %6669  ;;  %v5144_v6 = vmul.f32 1.442695, %v5107_v46 }
 0x5a2   : > { %v5214_v22 = vadd.f32 1.0, %v6670_v10  ;;  %v4928_v35 = vpop.f32.mrf.mxu1  ;;  %v10574_v10 = vpop.f32.mrf.mxu2 }
 0x5a3   : > { %6671 = vpow2.f32 %v5144_v6  ;;  %v5032_v45 = vadd.f32 %v4928_v35, %v4818_v34  ;;  %11749 = vst [vmem:[#allocation76_spill] sm:$0xff] %v10574_v10  ;;  %v4871_v35 = vld [vmem:[#allocation2 + $0xbe] sm:$0xff] }
 0x5a4   : > { %6673 = vrcp.f32 %v5214_v22  ;;  %4975 = vmatmul.f32.gmra.mxu1 %v4870_v51  ;;  %v5261_v63 = vand.u32 2147483648, %v5214_v22  ;;  %v5259_v0 = vand.u32 2147483647, %v5214_v22  ;;  %vm5255_vm1 = vweird.f32 %v5214_v22 }
 0x5a5   : > { %v10569_v15 = vadd.f32 %v10547_v27, %v5032_v45 }
 0x5a6   : > { %vm5260_vm3 = vcmp.eq.f32.partialorder %v5259_v0, 8.507059e+37 }
 0x5a7   : > { %v5108_v58 = vsub.f32 0.0, %v10569_v15 }
 0x5a9   : > { %v6672_v38 = vpop.eup %6671  ;;  %v5146_v41 = vmul.f32 1.442695, %v5108_v58 }
 0x5aa   : > { %v6674_v12 = vpop.eup %6673  ;;  %v5215_v50 = vadd.f32 1.0, %v6672_v38  ;;  %v4931_v46 = vpop.f32.mrf.mxu1 }
 0x5ab   : > { %v5251_v6 = vmul.f32 %v6674_v12, %v5214_v22  ;;  %6675 = vpow2.f32 %v5146_v41  ;;  %v5033_v34 = vadd.f32 %v4931_v46, %v4819_v17  ;;  %vm5256_vm0 = vweird.f32 %v6674_v12 }
 0x5ac   : > { %6677 = vrcp.f32 %v5215_v50  ;;  %4978 = vmatmul.f32.gmra.mxu1 %v4871_v35  ;;  %v4820_v17 = vadd.f32 %v10482_v26, %v10400_v44  ;;  %vm5257_vm2 = vmor %vm5255_vm1, %vm5256_vm0  ;;  %v5262_v41 = vor.u32 1.1754944e-38, %v5261_v63  ;;  %v5274_v44 = vand.u32 2147483647, %v5215_v50  ;;  %v11750_v63 = vld [vmem:[#allocation99_spill] sm:$0xff] }
 0x5ad   : > { %v5252_v45 = vsub.f32 1.0, %v5251_v6  ;;  %v10577_v51 = vadd.f32 %v10547_v27, %v5033_v34  ;;  %v5276_v26 = vand.u32 2147483648, %v5215_v50  ;;  %vm5270_vm5 = vweird.f32 %v5215_v50 }
 0x5ae   : > { %vm5275_vm7 = vcmp.eq.f32.partialorder %v5274_v44, 8.507059e+37 }
 0x5af   : > { %v5253_v18 = vmul.f32 %v6674_v12, %v5252_v45  ;;  %v5109_v31 = vsub.f32 0.0, %v10577_v51 }
 0x5b1   : > { %v6676_v58 = vpop.eup %6675  ;;  %v5254_v38 = vadd.f32 %v6674_v12, %v5253_v18  ;;  %v5148_v10 = vmul.f32 1.442695, %v5109_v31  ;;  %v10585_v18 = vpop.f32.mrf.mxu2 }
 0x5b2   : > { %v6678_v37 = vpop.eup %6677  ;;  %v10582_v46 = vadd.f32 1.0, %v6676_v58  ;;  %v4934_v6 = vpop.f32.mrf.mxu1 }
 0x5b3   : > { %v5258_v34 = vsel %vm5257_vm2, %v6674_v12, %v5254_v38  ;;  %v5266_v35 = vmul.f32 %v6678_v37, %v5215_v50  ;;  %6679 = vpow2.f32 %v5148_v10  ;;  %v5034_v8 = vadd.f32 %v4934_v6, %v4820_v17 }
 0x5b4   : > { %v5263_v45 = vsel %vm5260_vm3, %v5262_v41, %v5258_v34  ;;  %6681 = vrcp.f32 %v10582_v46  ;;  %4981 = vmatmul.f32.gmra.mxu1 %v4872_v19  ;;  %vm5271_vm4 = vweird.f32 %v6678_v37  ;;  %vm5285_vm9 = vweird.f32 %v10582_v46 }
 0x5b5   : > { %v5790_v22 = vmul.f32 %v5263_v45, %v10553_v56  ;;  %v5267_v31 = vsub.f32 1.0, %v5266_v35  ;;  %v10590_v12 = vadd.f32 %v10547_v27, %v5034_v8  ;;  %vm5272_vm6 = vmor %vm5270_vm5, %vm5271_vm4  ;;  %v5277_v56 = vor.u32 1.1754944e-38, %v5276_v26 }
 0x5b6   : > { %v4821_v8 = vadd.f32 %v10494_v29, %v10411_v60  ;;  %v5289_v60 = vand.u32 2147483647, %v10582_v46  ;;  %v10607_v29 = vpop.f32.mrf.mxu0 }
 0x5b7   : > { %v5826_v58 = vmul.f32 %v5790_v22, %v11750_v63  ;;  %v5268_v57 = vmul.f32 %v6678_v37, %v5267_v31  ;;  %v5110_v38 = vsub.f32 0.0, %v10590_v12  ;;  %v10600_v31 = vpop.f32.mrf.mxu3  ;;  %v11751_v63 = vld [vmem:[#allocation101_spill] sm:$0xff] }
 0x5b8   : > { %vm5290_vm11 = vcmp.eq.f32.partialorder %v5289_v60, 8.507059e+37 }
 0x5b9   : > { %v6680_v10 = vpop.eup %6679  ;;  %5862 = vst [vmem:[#allocation2 + $0x13] sm:$0xff] %v5826_v58  ;;  %v5269_v0 = vadd.f32 %v6678_v37, %v5268_v57  ;;  %v5150_v35 = vmul.f32 1.442695, %v5110_v38  ;;  %v4873_v57 = vld [vmem:[#allocation2 + $0xce] sm:$0xff]  ;;  %v10603_v26 = vpop.f32.mrf.mxu2  ;;  %v4822_v38 = vadd.f32 %v10504_v9, %v10419_v14  ;;  %v4874_v9 = vld [vmem:[#allocation2 + $0xd6] sm:$0xff] }
 0x5ba   : > { %v6682_v41 = vpop.eup %6681  ;;  %v10593_v17 = vadd.f32 1.0, %v6680_v10  ;;  %v4937_v19 = vpop.f32.mrf.mxu1 }
 0x5bb   : > { %v5273_v6 = vsel %vm5272_vm6, %v6678_v37, %v5269_v0  ;;  %v5281_v34 = vmul.f32 %v6682_v41, %v10582_v46  ;;  %v5291_v37 = vand.u32 2147483648, %v10582_v46  ;;  %v5035_v44 = vadd.f32 %v4937_v19, %v4821_v8 }
 0x5bc   : > { %v5278_v45 = vsel %vm5275_vm7, %v5277_v56, %v5273_v6  ;;  %6683 = vrcp.f32 %v10593_v17  ;;  %4984 = vmatmul.f32.gmra.mxu1 %v4873_v57  ;;  %vm5286_vm8 = vweird.f32 %v6682_v41  ;;  %vm5300_vm13 = vweird.f32 %v10593_v17 }
 0x5bd   : > { %v5791_v50 = vmul.f32 %v5278_v45, %v10561_v61  ;;  %v5282_v22 = vsub.f32 1.0, %v5281_v34  ;;  %6685 = vpow2.f32 %v5150_v35  ;;  %v10610_v61 = vadd.f32 %v10547_v27, %v5035_v44  ;;  %vm5287_vm10 = vmor %vm5285_vm9, %vm5286_vm8 }
 0x5be   : > { %v5292_v6 = vor.u32 1.1754944e-38, %v5291_v37  ;;  %v5304_v37 = vand.u32 2147483647, %v10593_v17 }
 0x5bf   : > { %v5827_v58 = vmul.f32 %v5791_v50, %v11751_v63  ;;  %v5283_v10 = vmul.f32 %v6682_v41, %v5282_v22  ;;  %v5111_v34 = vsub.f32 0.0, %v10610_v61 }
 0x5c0   : > { %v5900_v0 = vld [vmem:[#allocation2 + $0x10] sm:$0xff]  ;;  %vm5305_vm15 = vcmp.eq.f32.partialorder %v5304_v37, 8.507059e+37 }
 0x5c1   : > { %5863 = vst [vmem:[#allocation2 + $0x1b] sm:$0xff] %v5827_v58  ;;  %v5284_v56 = vadd.f32 %v6682_v41, %v5283_v10  ;;  %5981 = vmatmul.f32.gmra.mxu2 %v5900_v0  ;;  %v5152_v14 = vmul.f32 1.442695, %v5111_v34  ;;  %v11752_v10 = vld [vmem:[#allocation102_spill] sm:$0xff]  ;;  %v10632_v34 = vpop.f32.mrf.mxu2 }
 0x5c2   : > { %v6684_v19 = vpop.eup %6683  ;;  %v4940_v35 = vpop.f32.mrf.mxu1 }
 0x5c3   : > { %v6686_v8 = vpop.eup %6685  ;;  %v5288_v45 = vsel %vm5287_vm10, %v6682_v41, %v5284_v56  ;;  %v5296_v57 = vmul.f32 %v6684_v19, %v10593_v17  ;;  %v5036_v50 = vadd.f32 %v4940_v35, %v4822_v38  ;;  %vm5301_vm12 = vweird.f32 %v6684_v19  ;;  %v10628_v56 = vpop.f32.mrf.mxu3 }
 0x5c4   : > { %v5293_v22 = vsel %vm5290_vm11, %v5292_v6, %v5288_v45  ;;  %v10617_v44 = vadd.f32 1.0, %v6686_v8  ;;  %4987 = vmatmul.f32.gmra.mxu1 %v4874_v9  ;;  %v5306_v41 = vand.u32 2147483648, %v10593_v17  ;;  %v4823_v6 = vadd.f32 %v10511_v11, %v10430_v30  ;;  %v10635_v45 = vpop.f32.mrf.mxu0  ;;  %vm5302_vm14 = vmor %vm5300_vm13, %vm5301_vm12  ;;  %v4875_v30 = vld [vmem:[#allocation2 + $0xde] sm:$0xff] }
 0x5c5   : > { %v5792_v46 = vmul.f32 %v5293_v22, %v10569_v15  ;;  %v5297_v63 = vsub.f32 1.0, %v5296_v57  ;;  %v10621_v58 = vadd.f32 %v10547_v27, %v5036_v50 }
 0x5c6   : > { %6687 = vrcp.f32 %v10617_v44  ;;  %v5307_v57 = vor.u32 1.1754944e-38, %v5306_v41  ;;  %v11753_v41 = vld [vmem:[#allocation104_spill] sm:$0xff]  ;;  %vm5315_vm1 = vweird.f32 %v10617_v44 }
 0x5c7   : > { %v5828_v60 = vmul.f32 %v5792_v46, %v11752_v10  ;;  %v5298_v0 = vmul.f32 %v6684_v19, %v5297_v63  ;;  %6689 = vpow2.f32 %v5152_v14  ;;  %v5112_v38 = vsub.f32 0.0, %v10621_v58 }
 0x5c8   : > { %v5901_v15 = vld [vmem:[#allocation2 + $0x18] sm:$0xff] }
 0x5c9   : > { %5864 = vst [vmem:[#allocation2 + $0x23] sm:$0xff] %v5828_v60  ;;  %v5299_v35 = vadd.f32 %v6684_v19, %v5298_v0  ;;  %v5154_v8 = vmul.f32 1.442695, %v5112_v38  ;;  %5984 = vmatmul.f32.gmra.mxu2 %v5901_v15  ;;  %v4824_v38 = vadd.f32 %v10520_v24, %v10438_v5  ;;  %v5321_v15 = vand.u32 2147483648, %v10617_v44 }
 0x5ca   : > { %v4943_v50 = vpop.f32.mrf.mxu1 }
 0x5cb   : > { %v5303_v22 = vsel %vm5302_vm14, %v6684_v19, %v5299_v35  ;;  %6691 = vpow2.f32 %v5154_v8  ;;  %v5037_v14 = vadd.f32 %v4943_v50, %v4823_v6  ;;  %v5319_v8 = vand.u32 2147483647, %v10617_v44  ;;  %v10652_v50 = vpop.f32.mrf.mxu3 }
 0x5cc   : > { %v6688_v9 = vpop.eup %6687  ;;  %v5308_v11 = vsel %vm5305_vm15, %v5307_v57, %v5303_v22  ;;  %4990 = vmatmul.f32.gmra.mxu1 %v4875_v30  ;;  %v10659_v30 = vpop.f32.mrf.mxu0 }
 0x5cd   : > { %v6690_v46 = vpop.eup %6689  ;;  %v5793_v63 = vmul.f32 %v5308_v11, %v10577_v51  ;;  %v5311_v17 = vmul.f32 %v6688_v9, %v10617_v44  ;;  %v10641_v10 = vadd.f32 %v10547_v27, %v5037_v14  ;;  %vm5316_vm0 = vweird.f32 %v6688_v9  ;;  %v10656_v11 = vpop.f32.mrf.mxu2 }
 0x5ce   : > { %v10643_v60 = vadd.f32 1.0, %v6690_v46  ;;  %11754 = vst [vmem:[#allocation85_spill] sm:$0xff] %v10656_v11  ;;  %vm5317_vm2 = vmor %vm5315_vm1, %vm5316_vm0  ;;  %v5322_v46 = vor.u32 1.1754944e-38, %v5321_v15  ;;  %vm5320_vm3 = vcmp.eq.f32.partialorder %v5319_v8, 8.507059e+37  ;;  %v11755_v15 = vld [vmem:[#allocation107_spill] sm:$0xff]  ;;  %v4825_v8 = vadd.f32 %v10528_v53, %v10449_v49 }
 0x5cf   : > { %v5829_v0 = vmul.f32 %v5793_v63, %v11753_v41  ;;  %v5312_v19 = vsub.f32 1.0, %v5311_v17  ;;  %v5113_v37 = vsub.f32 0.0, %v10641_v10  ;;  %v4876_v63 = vld [vmem:[#allocation2 + $0xe6] sm:$0xff] }
 0x5d0   : > { %6693 = vrcp.f32 %v10643_v60  ;;  %v5902_v51 = vld [vmem:[#allocation2 + $0x20] sm:$0xff]  ;;  %vm5330_vm5 = vweird.f32 %v10643_v60 }
 0x5d1   : > { %v6692_v6 = vpop.eup %6691  ;;  %5865 = vst [vmem:[#allocation2 + $0x2b] sm:$0xff] %v5829_v0  ;;  %v5313_v35 = vmul.f32 %v6688_v9, %v5312_v19  ;;  %v5156_v57 = vmul.f32 1.442695, %v5113_v37  ;;  %5987 = vmatmul.f32.gmra.mxu2 %v5902_v51 }
 0x5d2   : > { %v10654_v22 = vadd.f32 1.0, %v6692_v6  ;;  %v4946_v14 = vpop.f32.mrf.mxu1 }
 0x5d3   : > { %v5314_v5 = vadd.f32 %v6688_v9, %v5313_v35  ;;  %6695 = vpow2.f32 %v5156_v57  ;;  %v5038_v24 = vadd.f32 %v4946_v14, %v4824_v38 }
 0x5d4   : > { %6697 = vrcp.f32 %v10654_v22  ;;  %4993 = vmatmul.f32.gmra.mxu1 %v4876_v63  ;;  %vm5345_vm9 = vweird.f32 %v10654_v22 }
 0x5d5   : > { %v5318_v17 = vsel %vm5317_vm2, %v6688_v9, %v5314_v5  ;;  %v10663_v41 = vadd.f32 %v10547_v27, %v5038_v24  ;;  %v5334_v5 = vand.u32 2147483647, %v10643_v60  ;;  %v5336_v24 = vand.u32 2147483648, %v10643_v60 }
 0x5d6   : > { %v6694_v0 = vpop.eup %6693  ;;  %v5323_v19 = vsel %vm5320_vm3, %v5322_v46, %v5318_v17 }
 0x5d7   : > { %v5794_v37 = vmul.f32 %v5323_v19, %v10590_v12  ;;  %v5326_v44 = vmul.f32 %v6694_v0, %v10643_v60  ;;  %v5114_v38 = vsub.f32 0.0, %v10663_v41  ;;  %vm5331_vm4 = vweird.f32 %v6694_v0  ;;  %v10676_v19 = vpop.f32.mrf.mxu3 }
 0x5d8   : > { %v5903_v51 = vld [vmem:[#allocation2 + $0x28] sm:$0xff]  ;;  %vm5332_vm6 = vmor %vm5330_vm5, %vm5331_vm4  ;;  %vm5335_vm7 = vcmp.eq.f32.partialorder %v5334_v5, 8.507059e+37 }
 0x5d9   : > { %v6696_v6 = vpop.eup %6695  ;;  %v5830_v35 = vmul.f32 %v5794_v37, %v11755_v15  ;;  %v5327_v57 = vsub.f32 1.0, %v5326_v44  ;;  %v5158_v14 = vmul.f32 1.442695, %v5114_v38  ;;  %5990 = vmatmul.f32.gmra.mxu2 %v5903_v51  ;;  %v4877_v37 = vld [vmem:[#allocation2 + $0xee] sm:$0xff]  ;;  %v10679_v44 = vpop.f32.mrf.mxu2  ;;  %v5349_v15 = vand.u32 2147483647, %v10654_v22 }
 0x5da   : > { %v6698_v9 = vpop.eup %6697  ;;  %v10673_v12 = vadd.f32 1.0, %v6696_v6  ;;  %v4949_v46 = vpop.f32.mrf.mxu1  ;;  %11756 = vst [vmem:[#allocation80_spill] sm:$0xff] %v10679_v44  ;;  %v5337_v6 = vor.u32 1.1754944e-38, %v5336_v24 }
 0x5db   : > { %5866 = vst [vmem:[#allocation2 + $0x33] sm:$0xff] %v5830_v35  ;;  %v5328_v63 = vmul.f32 %v6694_v0, %v5327_v57  ;;  %v5341_v17 = vmul.f32 %v6698_v9, %v10654_v22  ;;  %6699 = vpow2.f32 %v5158_v14  ;;  %v5039_v38 = vadd.f32 %v4949_v46, %v4825_v8  ;;  %v10682_v51 = vpop.f32.mrf.mxu0 }
 0x5dc   : > { %6701 = vrcp.f32 %v10673_v12  ;;  %4996 = vmatmul.f32.gmra.mxu1 %v4877_v37  ;;  %v5351_v35 = vand.u32 2147483648, %v10654_v22  ;;  %vm5346_vm8 = vweird.f32 %v6698_v9  ;;  %vm5350_vm11 = vcmp.eq.f32.partialorder %v5349_v15, 8.507059e+37 }
 0x5dd   : > { %v5329_v49 = vadd.f32 %v6694_v0, %v5328_v63  ;;  %v5342_v53 = vsub.f32 1.0, %v5341_v17  ;;  %v10687_v44 = vadd.f32 %v10547_v27, %v5039_v38  ;;  %vm5347_vm10 = vmor %vm5345_vm9, %vm5346_vm8  ;;  %vm5360_vm13 = vweird.f32 %v10673_v12 }
 0x5de   : > { %v5352_v17 = vor.u32 1.1754944e-38, %v5351_v35 }
 0x5df   : > { %v5333_v57 = vsel %vm5332_vm6, %v6694_v0, %v5329_v49  ;;  %v5343_v14 = vmul.f32 %v6698_v9, %v5342_v53  ;;  %v5115_v5 = vsub.f32 0.0, %v10687_v44  ;;  %v11757_v53 = vld [vmem:[#allocation15_spill] sm:$0xff]  ;;  %v10702_v15 = vpop.f32.mrf.mxu3 }
 0x5e0   : > { %v5338_v63 = vsel %vm5335_vm7, %v5337_v6, %v5333_v57  ;;  %v4878_v57 = vld [vmem:[#allocation2 + $0xf6] sm:$0xff] }
 0x5e1   : > { %v6700_v60 = vpop.eup %6699  ;;  %v5795_v8 = vmul.f32 %v5338_v63, %v10610_v61  ;;  %v5344_v46 = vadd.f32 %v6698_v9, %v5343_v14  ;;  %v4826_v61 = vadd.f32 %v10534_v62, %v10457_v25  ;;  %v5160_v63 = vmul.f32 1.442695, %v5115_v5  ;;  %v10706_v62 = vpop.f32.mrf.mxu2 }
 0x5e2   : > { %v6702_v24 = vpop.eup %6701  ;;  %v10692_v37 = vadd.f32 1.0, %v6700_v60  ;;  %v5904_v0 = vld [vmem:[#allocation2 + $0x30] sm:$0xff]  ;;  %v4952_v49 = vpop.f32.mrf.mxu1  ;;  %v11758_v60 = vld [vmem:[#allocation5_spill] sm:$0xff] }
 0x5e3   : > { %v5831_v11 = vmul.f32 %v5795_v8, %v11757_v53  ;;  %v5348_v38 = vsel %vm5347_vm10, %v6698_v9, %v5344_v46  ;;  %v5356_v6 = vmul.f32 %v6702_v24, %v10673_v12  ;;  %5993 = vmatmul.f32.gmra.mxu2 %v5904_v0  ;;  %v11759_v8 = vld [vmem:[#allocation91_spill] sm:$0xff]  ;;  %v5364_v46 = vand.u32 2147483647, %v10673_v12  ;;  %v10710_v5 = vpop.f32.mrf.mxu0 }
 0x5e4   : > { %v5353_v22 = vsel %vm5350_vm11, %v5352_v17, %v5348_v38  ;;  %6703 = vrcp.f32 %v10692_v37  ;;  %4999 = vmatmul.f32.gmra.mxu1 %v4878_v57  ;;  %v3972_v9 = vadd.f32 %v11759_v8, %v11758_v60  ;;  %v5366_v0 = vand.u32 2147483648, %v10673_v12  ;;  %v11760_v17 = vld [vmem:[#allocation17_spill] sm:$0xff] }
 0x5e5   : > { %5867 = vst [vmem:[#allocation2 + $0x3b] sm:$0xff] %v5831_v11  ;;  %v5796_v35 = vmul.f32 %v5353_v22, %v10621_v58  ;;  %v5357_v14 = vsub.f32 1.0, %v5356_v6  ;;  %v5040_v25 = vadd.f32 %v4952_v49, %v4826_v61  ;;  %vm5361_vm12 = vweird.f32 %v6702_v24 }
 0x5e6   : > { %6705 = vpow2.f32 %v5160_v63  ;;  %v4186_v58 = vadd.f32 %v10323_v39, %v3972_v9  ;;  %v4827_v6 = vadd.f32 %v10540_v55, %v10470_v40  ;;  %vm5362_vm14 = vmor %vm5360_vm13, %vm5361_vm12  ;;  %v5367_v57 = vor.u32 1.1754944e-38, %v5366_v0  ;;  %v4879_v55 = vld [vmem:[#allocation2 + $0xfe] sm:$0xff] }
 0x5e7   : > { %v5832_v53 = vmul.f32 %v5796_v35, %v11760_v17  ;;  %v5358_v11 = vmul.f32 %v6702_v24, %v5357_v14  ;;  %v10713_v38 = vadd.f32 %v10547_v27, %v5040_v25  ;;  %vm5365_vm15 = vcmp.eq.f32.partialorder %v5364_v46, 8.507059e+37 }
 0x5e8   : > { %v4400_v61 = vadd.f32 %v10444_v59, %v4186_v58  ;;  %v5381_v46 = vand.u32 2147483648, %v10692_v37  ;;  %vm5375_vm1 = vweird.f32 %v10692_v37 }
 0x5e9   : > { %5868 = vst [vmem:[#allocation2 + $0x43] sm:$0xff] %v5832_v53  ;;  %v5359_v22 = vadd.f32 %v6702_v24, %v5358_v11  ;;  %v5116_v35 = vsub.f32 0.0, %v10713_v38  ;;  %v11761_v11 = vld [vmem:[#allocation18_spill] sm:$0xff] }
 0x5ea   : > { %v6704_v49 = vpop.eup %6703  ;;  %v4955_v39 = vpop.f32.mrf.mxu1  ;;  %v4614_v12 = vadd.f32 %v10600_v31, %v4400_v61 }
 0x5eb   : > { %v5363_v14 = vsel %vm5362_vm14, %v6702_v24, %v5359_v22  ;;  %v5371_v63 = vmul.f32 %v6704_v49, %v10692_v37  ;;  %v5041_v60 = vadd.f32 %v4955_v39, %v4827_v6  ;;  %v5162_v9 = vmul.f32 1.442695, %v5116_v35  ;;  %v11763_v22 = vld [vmem:[#allocation42_spill] sm:$0xff]  ;;  %v10738_v39 = vpop.f32.mrf.mxu2 }
 0x5ec   : > { %v5368_v8 = vsel %vm5365_vm15, %v5367_v57, %v5363_v14  ;;  %v5905_v40 = vld [vmem:[#allocation2 + $0x38] sm:$0xff]  ;;  %v6706_v25 = vpop.eup %6705  ;;  %5002 = vmatmul.f32.gmra.mxu1 %v4879_v55  ;;  %v5379_v24 = vand.u32 2147483647, %v10692_v37  ;;  %vm5376_vm0 = vweird.f32 %v6704_v49  ;;  %v10734_v57 = vpop.f32.mrf.mxu3  ;;  %v4828_v35 = vadd.f32 %v10607_v29, %v4614_v12 }
 0x5ed   : > { %v5797_v17 = vmul.f32 %v5368_v8, %v10641_v10  ;;  %v5372_v59 = vsub.f32 1.0, %v5371_v63  ;;  %5996 = vmatmul.f32.gmra.mxu2 %v5905_v40  ;;  %v10724_v0 = vadd.f32 %v10547_v27, %v5041_v60  ;;  %v10728_v53 = vadd.f32 1.0, %v6706_v25  ;;  %v11762_v10 = vld [vmem:[#allocation89_spill] sm:$0xff]  ;;  %v10742_v8 = vpop.f32.mrf.mxu0  ;;  %vm5377_vm2 = vmor %vm5375_vm1, %vm5376_vm0 }
 0x5ee   : > { %6707 = vpow2.f32 %v5162_v9  ;;  %v3973_v61 = vadd.f32 %v11763_v22, %v11762_v10  ;;  %v5382_v9 = vor.u32 1.1754944e-38, %v5381_v46  ;;  %vm5380_vm3 = vcmp.eq.f32.partialorder %v5379_v24, 8.507059e+37  ;;  %v11764_v24 = vld [vmem:[#allocation19_spill] sm:$0xff] }
 0x5ef   : > { %v5833_v58 = vmul.f32 %v5797_v17, %v11761_v11  ;;  %v5373_v6 = vmul.f32 %v6704_v49, %v5372_v59  ;;  %v5117_v31 = vsub.f32 0.0, %v10724_v0  ;;  %6709 = vrcp.f32 %v10728_v53  ;;  %v4880_v59 = vld [vmem:[#allocation2 + $0x106] sm:$0xff] }
 0x5f0   : > { %v4187_v60 = vadd.f32 %v10332_v47, %v3973_v61  ;;  %v5906_v40 = vld [vmem:[#allocation2 + $0x40] sm:$0xff]  ;;  %v11765_v61 = vld [vmem:[#allocation44_spill] sm:$0xff]  ;;  %vm5390_vm5 = vweird.f32 %v10728_v53 }
 0x5f1   : > { %5869 = vst [vmem:[#allocation2 + $0x4b] sm:$0xff] %v5833_v58  ;;  %v5374_v14 = vadd.f32 %v6704_v49, %v5373_v6  ;;  %v5164_v63 = vmul.f32 1.442695, %v5117_v31 }
 0x5f2   : > { %v4958_v55 = vpop.f32.mrf.mxu1  ;;  %v4401_v11 = vadd.f32 %v10459_v28, %v4187_v60 }
 0x5f3   : > { %v5378_v25 = vsel %vm5377_vm2, %v6704_v49, %v5374_v14  ;;  %6711 = vpow2.f32 %v5164_v63  ;;  %v5042_v17 = vadd.f32 %v4958_v55, %v4828_v35  ;;  %v11766_v35 = vld [vmem:[#allocation92_spill] sm:$0xff] }
 0x5f4   : > { %v6708_v29 = vpop.eup %6707  ;;  %v5383_v12 = vsel %vm5380_vm3, %v5382_v9, %v5378_v25  ;;  %5005 = vmatmul.f32.gmra.mxu1 %v4880_v59  ;;  %v4615_v49 = vadd.f32 %v10628_v56, %v4401_v11  ;;  %v3974_v14 = vadd.f32 %v11766_v35, %v11765_v61  ;;  %v10759_v63 = vpop.f32.mrf.mxu3  ;;  %v5396_v56 = vand.u32 2147483648, %v10728_v53  ;;  %v4881_v11 = vld [vmem:[#allocation2 + $0x10e] sm:$0xff] }
 0x5f5   : > { %v5798_v37 = vmul.f32 %v5383_v12, %v10663_v41  ;;  %v10746_v58 = vadd.f32 1.0, %v6708_v29  ;;  %5999 = vmatmul.f32.gmra.mxu2 %v5906_v40  ;;  %v10749_v47 = vadd.f32 %v10547_v27, %v5042_v17  ;;  %v6710_v46 = vpop.eup %6709  ;;  %v5394_v17 = vand.u32 2147483647, %v10728_v53  ;;  %v10766_v12 = vpop.f32.mrf.mxu2 }
 0x5f6   : > { %v5386_v31 = vmul.f32 %v6710_v46, %v10728_v53  ;;  %v4829_v41 = vadd.f32 %v10635_v45, %v4615_v49  ;;  %vm5391_vm4 = vweird.f32 %v6710_v46  ;;  %v4188_v45 = vadd.f32 %v10346_v48, %v3974_v14  ;;  %v10768_v59 = vpop.f32.mrf.mxu0 }
 0x5f7   : > { %v5834_v6 = vmul.f32 %v5798_v37, %v11764_v24  ;;  %6713 = vrcp.f32 %v10746_v58  ;;  %v5118_v28 = vsub.f32 0.0, %v10749_v47  ;;  %vm5392_vm6 = vmor %vm5390_vm5, %vm5391_vm4  ;;  %vm5395_vm7 = vcmp.eq.f32.partialorder %v5394_v17, 8.507059e+37 }
 0x5f8   : > { %v5387_v22 = vsub.f32 1.0, %v5386_v31  ;;  %v5907_v40 = vld [vmem:[#allocation2 + $0x48] sm:$0xff]  ;;  %v11768_v31 = vld [vmem:[#allocation49_spill] sm:$0xff]  ;;  %vm5405_vm9 = vweird.f32 %v10746_v58 }
 0x5f9   : > { %v6712_v10 = vpop.eup %6711  ;;  %5870 = vst [vmem:[#allocation2 + $0x53] sm:$0xff] %v5834_v6  ;;  %v5166_v9 = vmul.f32 1.442695, %v5118_v28  ;;  %v11767_v6 = vld [vmem:[#allocation7_spill] sm:$0xff]  ;;  %v4402_v28 = vadd.f32 %v10472_v21, %v4188_v45  ;;  %v5411_v21 = vand.u32 2147483648, %v10746_v58 }
 0x5fa   : > { %v10762_v60 = vadd.f32 1.0, %v6712_v10  ;;  %v4961_v55 = vpop.f32.mrf.mxu1  ;;  %v5388_v25 = vmul.f32 %v6710_v46, %v5387_v22  ;;  %v3975_v48 = vadd.f32 %v11768_v31, %v11767_v6  ;;  %v5397_v10 = vor.u32 1.1754944e-38, %v5396_v56 }
 0x5fb   : > { %v5043_v29 = vadd.f32 %v4961_v55, %v4829_v41  ;;  %v4616_v35 = vadd.f32 %v10652_v50, %v4402_v28  ;;  %v5409_v55 = vand.u32 2147483647, %v10746_v58  ;;  %v11769_v50 = vld [vmem:[#allocation20_spill] sm:$0xff] }
 0x5fc   : > { %6715 = vrcp.f32 %v10762_v60  ;;  %v5389_v49 = vadd.f32 %v6710_v46, %v5388_v25  ;;  %5008 = vmatmul.f32.gmra.mxu1 %v4881_v11  ;;  %v4189_v61 = vadd.f32 %v10360_v13, %v3975_v48  ;;  %v4882_v28 = vld [vmem:[#allocation2 + $0x116] sm:$0xff]  ;;  %vm5420_vm13 = vweird.f32 %v10762_v60 }
 0x5fd   : > { %v6714_v37 = vpop.eup %6713  ;;  %6717 = vpow2.f32 %v5166_v9  ;;  %6002 = vmatmul.f32.gmra.mxu2 %v5907_v40  ;;  %v10773_v24 = vadd.f32 %v10547_v27, %v5043_v29  ;;  %v4830_v29 = vadd.f32 %v10659_v30, %v4616_v35  ;;  %vm5410_vm11 = vcmp.eq.f32.partialorder %v5409_v55, 8.507059e+37  ;;  %v11771_v55 = vld [vmem:[#allocation46_spill] sm:$0xff] }
 0x5fe   : > { %v5401_v41 = vmul.f32 %v6714_v37, %v10746_v58  ;;  %v5393_v22 = vsel %vm5392_vm6, %v6710_v46, %v5389_v49  ;;  %vm5406_vm8 = vweird.f32 %v6714_v37  ;;  %v4403_v13 = vadd.f32 %v10480_v4, %v4189_v61 }
 0x5ff   : > { %v5119_v53 = vsub.f32 0.0, %v10773_v24  ;;  %v5398_v14 = vsel %vm5395_vm7, %v5397_v10, %v5393_v22  ;;  %vm5407_vm10 = vmor %vm5405_vm9, %vm5406_vm8  ;;  %v5412_v4 = vor.u32 1.1754944e-38, %v5411_v21  ;;  %v10797_v22 = vpop.f32.mrf.mxu2  ;;  %v5424_v58 = vand.u32 2147483647, %v10762_v60 }
 0x600   : > { %v5402_v9 = vsub.f32 1.0, %v5401_v41  ;;  %v5799_v40 = vmul.f32 %v5398_v14, %v10687_v44  ;;  %v5908_v17 = vld [vmem:[#allocation2 + $0x50] sm:$0xff]  ;;  %v10790_v44 = vpop.f32.mrf.mxu3  ;;  %v4617_v10 = vadd.f32 %v10676_v19, %v4403_v13  ;;  %v5426_v35 = vand.u32 2147483648, %v10762_v60 }
 0x601   : > { %v5168_v25 = vmul.f32 1.442695, %v5119_v53  ;;  %v10799_v53 = vpop.f32.mrf.mxu0  ;;  %vm5425_vm15 = vcmp.eq.f32.partialorder %v5424_v58, 8.507059e+37 }
 0x602   : > { %v6716_v56 = vpop.eup %6715  ;;  %v5403_v46 = vmul.f32 %v6714_v37, %v5402_v9  ;;  %v4964_v45 = vpop.f32.mrf.mxu1  ;;  %v5835_v49 = vmul.f32 %v5799_v40, %v11769_v50  ;;  %v11770_v40 = vld [vmem:[#allocation43_spill] sm:$0xff]  ;;  %v5427_v50 = vor.u32 1.1754944e-38, %v5426_v35 }
 0x603   : > { %v6718_v11 = vpop.eup %6717  ;;  %v5416_v6 = vmul.f32 %v6716_v56, %v10762_v60  ;;  %6719 = vpow2.f32 %v5168_v25  ;;  %v5044_v30 = vadd.f32 %v4964_v45, %v4830_v29  ;;  %vm5421_vm12 = vweird.f32 %v6716_v56  ;;  %v11773_v35 = vld [vmem:[#allocation23_spill] sm:$0xff] }
 0x604   : > { %v5404_v31 = vadd.f32 %v6714_v37, %v5403_v46  ;;  %v10793_v48 = vadd.f32 1.0, %v6718_v11  ;;  %5871 = vst [vmem:[#allocation2 + $0x5b] sm:$0xff] %v5835_v49  ;;  %5011 = vmatmul.f32.gmra.mxu1 %v4882_v28  ;;  %v3976_v21 = vadd.f32 %v11771_v55, %v11770_v40  ;;  %v11772_v11 = vld [vmem:[#allocation21_spill] sm:$0xff]  ;;  %vm5422_vm14 = vmor %vm5420_vm13, %vm5421_vm12  ;;  %v11774_v40 = vld [vmem:[#allocation12_spill] sm:$0xff] }
 0x605   : > { %v5417_v41 = vsub.f32 1.0, %v5416_v6  ;;  %6005 = vmatmul.f32.gmra.mxu2 %v5908_v17  ;;  %v10805_v9 = vadd.f32 %v10547_v27, %v5044_v30  ;;  %v11775_v55 = vld [vmem:[#allocation52_spill] sm:$0xff] }
 0x606   : > { %v5408_v61 = vsel %vm5407_vm10, %v6714_v37, %v5404_v31  ;;  %6721 = vrcp.f32 %v10793_v48  ;;  %v4831_v37 = vadd.f32 %v10682_v51, %v4617_v10  ;;  %v4190_v45 = vadd.f32 %v10374_v16, %v3976_v21  ;;  %v4883_v10 = vld [vmem:[#allocation2 + $0x11e] sm:$0xff] }
 0x607   : > { %v5413_v19 = vsel %vm5410_vm11, %v5412_v4, %v5408_v61  ;;  %v5418_v14 = vmul.f32 %v6716_v56, %v5417_v41  ;;  %v5120_v17 = vsub.f32 0.0, %v10805_v9  ;;  %v10830_v21 = vpop.f32.mrf.mxu2  ;;  %vm5435_vm1 = vweird.f32 %v10793_v48 }
 0x608   : > { %v5800_v25 = vmul.f32 %v5413_v19, %v10713_v38  ;;  %v4404_v16 = vadd.f32 %v10490_v3, %v4190_v45  ;;  %v10821_v61 = vpop.f32.mrf.mxu3  ;;  %v3977_v3 = vadd.f32 %v11775_v55, %v11774_v40 }
 0x609   : > { %v6720_v29 = vpop.eup %6719  ;;  %v5419_v46 = vadd.f32 %v6716_v56, %v5418_v14  ;;  %v5170_v38 = vmul.f32 1.442695, %v5120_v17 }
 0x60a   : > { %v5836_v13 = vmul.f32 %v5800_v25, %v11772_v11  ;;  %v10815_v49 = vadd.f32 1.0, %v6720_v29  ;;  %v4967_v6 = vpop.f32.mrf.mxu1  ;;  %v4618_v58 = vadd.f32 %v10702_v15, %v4404_v16  ;;  %v5439_v25 = vand.u32 2147483647, %v10793_v48 }
 0x60b   : > { %v5423_v31 = vsel %vm5422_vm14, %v6716_v56, %v5419_v46  ;;  %v5045_v30 = vadd.f32 %v4967_v6, %v4831_v37  ;;  %v5909_v60 = vld [vmem:[#allocation2 + $0x58] sm:$0xff]  ;;  %v5441_v29 = vand.u32 2147483648, %v10793_v48  ;;  %v4191_v45 = vadd.f32 %v10385_v20, %v3977_v3 }
 0x60c   : > { %v6722_v28 = vpop.eup %6721  ;;  %5872 = vst [vmem:[#allocation2 + $0x63] sm:$0xff] %v5836_v13  ;;  %v5428_v51 = vsel %vm5425_vm15, %v5427_v50, %v5423_v31  ;;  %6723 = vrcp.f32 %v10815_v49  ;;  %5014 = vmatmul.f32.gmra.mxu1 %v4883_v10  ;;  %v4832_v46 = vadd.f32 %v10710_v5, %v4618_v58  ;;  %vm5440_vm3 = vcmp.eq.f32.partialorder %v5439_v25, 8.507059e+37 }
 0x60d   : > { %v5801_v4 = vmul.f32 %v5428_v51, %v10724_v0  ;;  %v5431_v41 = vmul.f32 %v6722_v28, %v10793_v48  ;;  %6008 = vmatmul.f32.gmra.mxu2 %v5909_v60  ;;  %6725 = vpow2.f32 %v5170_v38  ;;  %v10824_v56 = vadd.f32 %v10547_v27, %v5045_v30  ;;  %v10832_v0 = vpop.f32.mrf.mxu0  ;;  %v4884_v60 = vld [vmem:[#allocation2 + $0x126] sm:$0xff] }
 0x60e   : > { %vm5436_vm0 = vweird.f32 %v6722_v28  ;;  %v4405_v51 = vadd.f32 %v10499_v32, %v4191_v45  ;;  %v5442_v5 = vor.u32 1.1754944e-38, %v5441_v29  ;;  %v5454_v32 = vand.u32 2147483647, %v10815_v49 }
 0x60f   : > { %v5837_v19 = vmul.f32 %v5801_v4, %v11773_v35  ;;  %v5432_v14 = vsub.f32 1.0, %v5431_v41  ;;  %v5121_v37 = vsub.f32 0.0, %v10824_v56  ;;  %vm5437_vm2 = vmor %vm5435_vm1, %vm5436_vm0  ;;  %v5456_v58 = vand.u32 2147483648, %v10815_v49  ;;  %v5976_v3 = vpop.f32.mrf.mxu2 }
 0x610   : > { %v4619_v48 = vadd.f32 %v10734_v57, %v4405_v51  ;;  %v10860_v40 = vpop.f32.mrf.mxu3  ;;  %vm5450_vm5 = vweird.f32 %v10815_v49  ;;  %vm5455_vm7 = vcmp.eq.f32.partialorder %v5454_v32, 8.507059e+37  ;;  %v11779_v32 = vld [vmem:[#allocation93_spill] sm:$0xff] }
 0x611   : > { %5873 = vst [vmem:[#allocation2 + $0x6b] sm:$0xff] %v5837_v19  ;;  %v5433_v15 = vmul.f32 %v6722_v28, %v5432_v14  ;;  %v5172_v11 = vmul.f32 1.442695, %v5121_v37 }
 0x612   : > { %v6724_v17 = vpop.eup %6723  ;;  %v4970_v13 = vpop.f32.mrf.mxu1  ;;  %v4833_v14 = vadd.f32 %v10742_v8, %v4619_v48 }
 0x613   : > { %v5434_v50 = vadd.f32 %v6722_v28, %v5433_v15  ;;  %v5446_v6 = vmul.f32 %v6724_v17, %v10815_v49  ;;  %v5910_v31 = vld [vmem:[#allocation2 + $0x60] sm:$0xff]  ;;  %v5046_v38 = vadd.f32 %v4970_v13, %v4832_v46  ;;  %v6726_v30 = vpop.eup %6725  ;;  %6727 = vpow2.f32 %v5172_v11 }
 0x614   : > { %v10842_v20 = vadd.f32 1.0, %v6726_v30  ;;  %5017 = vmatmul.f32.gmra.mxu1 %v4884_v60  ;;  %vm5451_vm4 = vweird.f32 %v6724_v17  ;;  %v5457_v15 = vor.u32 1.1754944e-38, %v5456_v58  ;;  %v3979_v58 = vadd.f32 %v10148_v7, %v11779_v32 }
 0x615   : > { %v5438_v10 = vsel %vm5437_vm2, %v6722_v28, %v5434_v50  ;;  %v5447_v16 = vsub.f32 1.0, %v5446_v6  ;;  %6011 = vmatmul.f32.gmra.mxu2 %v5910_v31  ;;  %v10845_v4 = vadd.f32 %v10547_v27, %v5046_v38  ;;  %v10855_v27 = vld [vmem:[%s11373_s7] ss:$0 sm:$0xff]  ;;  %v11776_v28 = vld [vmem:[#allocation45_spill] sm:$0xff]  ;;  %v10874_v46 = vpop.f32.mrf.mxu0  ;;  %vm5452_vm6 = vmor %vm5450_vm5, %vm5451_vm4 }
 0x616   : > { %v5443_v41 = vsel %vm5440_vm3, %v5442_v5, %v5438_v10  ;;  %6729 = vrcp.f32 %v10842_v20  ;;  %v3978_v57 = vadd.f32 %v10125_v33, %v11776_v28  ;;  %v5977_v33 = vadd.f32 %v10855_v27, %v5976_v3  ;;  %v4885_v38 = vld [vmem:[#allocation2 + $0x12e] sm:$0xff] }
 0x617   : > { %v5802_v35 = vmul.f32 %v5443_v41, %v10749_v47  ;;  %v5448_v19 = vmul.f32 %v6724_v17, %v5447_v16  ;;  %v5122_v55 = vsub.f32 0.0, %v10845_v4  ;;  %v11777_v47 = vld [vmem:[#allocation24_spill] sm:$0xff]  ;;  %v11778_v16 = vld [vmem:[#allocation26_spill] sm:$0xff]  ;;  %v5979_v41 = vpop.f32.mrf.mxu2  ;;  %vm5465_vm9 = vweird.f32 %v10842_v20 }
 0x618   : > { %v4192_v8 = vadd.f32 %v10397_v52, %v3978_v57  ;;  %v5911_v11 = vld [vmem:[#allocation2 + $0x68] sm:$0xff]  ;;  %6099 = vst [vmem:[%s10870_s19] sm:$0xff] %v5977_v33  ;;  %v5980_v28 = vadd.f32 %v10855_v27, %v5979_v41 }
 0x619   : > { %v5838_v25 = vmul.f32 %v5802_v35, %v11777_v47  ;;  %v5449_v29 = vadd.f32 %v6724_v17, %v5448_v19  ;;  %v6728_v37 = vpop.eup %6727  ;;  %v5174_v45 = vmul.f32 1.442695, %v5122_v55  ;;  %v5471_v19 = vand.u32 2147483648, %v10842_v20 }
 0x61a   : > { %v4973_v49 = vpop.f32.mrf.mxu1  ;;  %v10877_v50 = vadd.f32 1.0, %v6728_v37  ;;  %v4406_v52 = vadd.f32 %v10509_v2, %v4192_v8  ;;  %v5469_v55 = vand.u32 2147483647, %v10842_v20  ;;  %6100 = vst [vmem:[%s10870_s19 + $0x8] sm:$0xff] %v5980_v28 }
 0x61b   : > { %5874 = vst [vmem:[#allocation2 + $0x73] sm:$0xff] %v5838_v25  ;;  %v5453_v13 = vsel %vm5452_vm6, %v6724_v17, %v5449_v29  ;;  %v5047_v6 = vadd.f32 %v4973_v49, %v4833_v14  ;;  %6731 = vpow2.f32 %v5174_v45  ;;  %v10887_v17 = vld [vmem:[%s11371_s5] ss:$0 sm:$0xff]  ;;  %v10900_v14 = vpop.f32.mrf.mxu3  ;;  %v4886_v29 = vld [vmem:[#allocation2 + $0x136] sm:$0xff]  ;;  %v5472_v49 = vor.u32 1.1754944e-38, %v5471_v19 }
 0x61c   : > { %v5458_v31 = vsel %vm5455_vm7, %v5457_v15, %v5453_v13  ;;  %v6730_v30 = vpop.eup %6729  ;;  %6733 = vrcp.f32 %v10877_v50  ;;  %5020 = vmatmul.f32.gmra.mxu1 %v4885_v38  ;;  %v4620_v10 = vadd.f32 %v10759_v63, %v4406_v52  ;;  %vm5470_vm11 = vcmp.eq.f32.partialorder %v5469_v55, 8.507059e+37 }
 0x61d   : > { %v5803_v51 = vmul.f32 %v5458_v31, %v10773_v24  ;;  %6014 = vmatmul.f32.gmra.mxu2 %v5911_v11  ;;  %v5461_v5 = vmul.f32 %v6730_v30, %v10842_v20  ;;  %v10890_v60 = vadd.f32 %v10887_v17, %v5047_v6  ;;  %vm5466_vm8 = vweird.f32 %v6730_v30  ;;  %v10907_v8 = vpop.f32.mrf.mxu0 }
 0x61e   : > { %v4834_v35 = vadd.f32 %v10768_v59, %v4620_v10  ;;  %v4193_v59 = vadd.f32 %v10408_v23, %v3979_v58  ;;  %vm5467_vm10 = vmor %vm5465_vm9, %vm5466_vm8  ;;  %v5484_v38 = vand.u32 2147483647, %v10877_v50  ;;  %v11780_v10 = vld [vmem:[#allocation9_spill] sm:$0xff]  ;;  %vm5480_vm13 = vweird.f32 %v10877_v50 }
 0x61f   : > { %v5839_v2 = vmul.f32 %v5803_v51, %v11778_v16  ;;  %v5462_v48 = vsub.f32 1.0, %v5461_v5  ;;  %v5123_v24 = vsub.f32 0.0, %v10890_v60 }
 0x620   : > { %v4407_v11 = vadd.f32 %v10518_v1, %v4193_v59  ;;  %v5486_v1 = vand.u32 2147483648, %v10877_v50  ;;  %vm5485_vm15 = vcmp.eq.f32.partialorder %v5484_v38, 8.507059e+37 }
 0x621   : > { %5875 = vst [vmem:[#allocation2 + $0x7b] sm:$0xff] %v5839_v2  ;;  %v6732_v57 = vpop.eup %6731  ;;  %v5463_v63 = vmul.f32 %v6730_v30, %v5462_v48  ;;  %v5176_v3 = vmul.f32 1.442695, %v5123_v24  ;;  %v11781_v48 = vld [vmem:[#allocation27_spill] sm:$0xff] }
 0x622   : > { %v5912_v47 = vld [vmem:[#allocation2 + $0x70] sm:$0xff]  ;;  %v4976_v25 = vpop.f32.mrf.mxu1  ;;  %v6734_v7 = vpop.eup %6733  ;;  %v10904_v33 = vadd.f32 1.0, %v6732_v57  ;;  %v4621_v20 = vadd.f32 %v10790_v44, %v4407_v11  ;;  %v5487_v28 = vor.u32 1.1754944e-38, %v5486_v1  ;;  %v11784_v1 = vld [vmem:[#allocation105_spill] sm:$0xff] }
 0x623   : > { %v5048_v37 = vadd.f32 %v4976_v25, %v4834_v35  ;;  %v5464_v15 = vadd.f32 %v6730_v30, %v5463_v63  ;;  %v5476_v45 = vmul.f32 %v6734_v7, %v10877_v50  ;;  %6735 = vpow2.f32 %v5176_v3  ;;  %v4887_v35 = vld [vmem:[#allocation2 + $0x13e] sm:$0x3f]  ;;  %v10930_v63 = vpop.f32.mrf.mxu3 }
 0x624   : > { %6737 = vrcp.f32 %v10904_v33  ;;  %5023 = vmatmul.f32.gmra.mxu1 %v4886_v29  ;;  %vm5481_vm12 = vweird.f32 %v6734_v7  ;;  %v4835_v16 = vadd.f32 %v10799_v53, %v4621_v20  ;;  %v5499_v59 = vand.u32 2147483647, %v10904_v33 }
 0x625   : > { %6017 = vmatmul.f32.gmra.mxu2 %v5912_v47  ;;  %v5468_v23 = vsel %vm5467_vm10, %v6730_v30, %v5464_v15  ;;  %v5477_v13 = vsub.f32 1.0, %v5476_v45  ;;  %v10915_v6 = vadd.f32 %v10887_v17, %v5048_v37  ;;  %v3980_v30 = vadd.f32 %v10163_v54, %v11780_v10  ;;  %vm5482_vm14 = vmor %vm5480_vm13, %vm5481_vm12 }
 0x626   : > { %v5473_v31 = vsel %vm5470_vm11, %v5472_v49, %v5468_v23  ;;  %v5501_v37 = vand.u32 2147483648, %v10904_v33  ;;  %v11783_v49 = vld [vmem:[#allocation94_spill] sm:$0xff]  ;;  %vm5495_vm1 = vweird.f32 %v10904_v33  ;;  %vm5500_vm3 = vcmp.eq.f32.partialorder %v5499_v59, 8.507059e+37 }
 0x627   : > { %v5804_v52 = vmul.f32 %v5473_v31, %v10805_v9  ;;  %v5478_v51 = vmul.f32 %v6734_v7, %v5477_v13  ;;  %v5124_v5 = vsub.f32 0.0, %v10915_v6  ;;  %v4194_v19 = vadd.f32 %v10416_v43, %v3980_v30  ;;  %v10935_v43 = vpop.f32.mrf.mxu0 }
 0x628   : > { %v5913_v32 = vld [vmem:[#allocation2 + $0x78] sm:$0xff]  ;;  %v3981_v23 = vadd.f32 %v10187_v36, %v11783_v49 }
 0x629   : > { %v6736_v2 = vpop.eup %6735  ;;  %v5840_v24 = vmul.f32 %v5804_v52, %v11781_v48  ;;  %v5479_v44 = vadd.f32 %v6734_v7, %v5478_v51  ;;  %v5178_v41 = vmul.f32 1.442695, %v5124_v5  ;;  %v4408_v50 = vadd.f32 %v10524_v42, %v4194_v19  ;;  %v11782_v42 = vld [vmem:[#allocation29_spill] sm:$0xff]  ;;  %v11786_v19 = vld [vmem:[#allocation31_spill] sm:$0xff] }
 0x62a   : > { %v4979_v58 = vpop.f32.mrf.mxu1  ;;  %v6738_v9 = vpop.eup %6737  ;;  %v10928_v57 = vadd.f32 1.0, %v6736_v2  ;;  %v4195_v52 = vadd.f32 %v11784_v1, %v3981_v23  ;;  %v5502_v51 = vor.u32 1.1754944e-38, %v5501_v37 }
 0x62b   : > { %v5049_v54 = vadd.f32 %v4979_v58, %v4835_v16  ;;  %5876 = vst [vmem:[#allocation2 + $0x83] sm:$0xff] %v5840_v24  ;;  %v5483_v53 = vsel %vm5482_vm14, %v6734_v7, %v5479_v44  ;;  %v5491_v55 = vmul.f32 %v6738_v9, %v10904_v33  ;;  %6739 = vpow2.f32 %v5178_v41  ;;  %v10956_v33 = vpop.f32.mrf.mxu3 }
 0x62c   : > { %v5488_v3 = vsel %vm5485_vm15, %v5487_v28, %v5483_v53  ;;  %6741 = vrcp.f32 %v10928_v57  ;;  %5026 = vmatmul.f32.gmra.mxu1 %v4887_v35  ;;  %v4622_v7 = vadd.f32 %v10821_v61, %v4408_v50  ;;  %vm5496_vm0 = vweird.f32 %v6738_v9 }
 0x62d   : > { %6020 = vmatmul.f32.gmra.mxu2 %v5913_v32  ;;  %v5805_v47 = vmul.f32 %v5488_v3, %v10824_v56  ;;  %v5492_v25 = vsub.f32 1.0, %v5491_v55  ;;  %v10939_v29 = vadd.f32 %v10887_v17, %v5049_v54  ;;  %vm5497_vm2 = vmor %vm5495_vm1, %vm5496_vm0  ;;  %v5514_v58 = vand.u32 2147483647, %v10928_v57  ;;  %v11787_v55 = vld [vmem:[#allocation59_spill] sm:$0xff] }
 0x62e   : > { %v4836_v56 = vadd.f32 %v10832_v0, %v4622_v7  ;;  %v11785_v0 = vld [vmem:[#allocation75_spill] sm:$0xff]  ;;  %v5516_v35 = vand.u32 2147483648, %v10928_v57  ;;  %vm5510_vm5 = vweird.f32 %v10928_v57 }
 0x62f   : > { %v5841_v15 = vmul.f32 %v5805_v47, %v11782_v42  ;;  %v5493_v45 = vmul.f32 %v6738_v9, %v5492_v25  ;;  %v5125_v11 = vsub.f32 0.0, %v10939_v29  ;;  %v4409_v2 = vadd.f32 %v11785_v0, %v4195_v52  ;;  %v11789_v42 = vld [vmem:[#allocation69_spill] sm:$0xff]  ;;  %v11792_v0 = vld [vmem:[#allocation11_spill] sm:$0xff] }
 0x630   : > { %vm5515_vm7 = vcmp.eq.f32.partialorder %v5514_v58, 8.507059e+37 }
 0x631   : > { %v6740_v13 = vpop.eup %6739  ;;  %5877 = vst [vmem:[#allocation2 + $0x8b] sm:$0xff] %v5841_v15  ;;  %v5494_v20 = vadd.f32 %v6738_v9, %v5493_v45  ;;  %v5180_v61 = vmul.f32 1.442695, %v5125_v11  ;;  %v4623_v32 = vadd.f32 %v10860_v40, %v4409_v2  ;;  %v5517_v45 = vor.u32 1.1754944e-38, %v5516_v35 }
 0x632   : > { %v4982_v31 = vpop.f32.mrf.mxu1  ;;  %v6742_v38 = vpop.eup %6741  ;;  %v10951_v5 = vadd.f32 1.0, %v6740_v13  ;;  %v5914_v10 = vld [vmem:[#allocation2 + $0x80] sm:$0xff] }
 0x633   : > { %v5050_v30 = vadd.f32 %v4982_v31, %v4836_v56  ;;  %v5498_v16 = vsel %vm5497_vm2, %v6738_v9, %v5494_v20  ;;  %v5506_v36 = vmul.f32 %v6742_v38, %v10928_v57  ;;  %6743 = vpow2.f32 %v5180_v61  ;;  %v10965_v9 = vpop.f32.mrf.mxu0  ;;  %v11790_v56 = vld [vmem:[#allocation77_spill] sm:$0xff] }
 0x634   : > { %v5503_v48 = vsel %vm5500_vm3, %v5502_v51, %v5498_v16  ;;  %6745 = vrcp.f32 %v10951_v5  ;;  %vm5511_vm4 = vweird.f32 %v6742_v38  ;;  %v4837_v3 = vadd.f32 %v10874_v46, %v4623_v32  ;;  %v10986_v51 = vpop.f32.mrf.mxu3 }
 0x635   : > { %6023 = vmatmul.f32.gmra.mxu2 %v5914_v10  ;;  %v5806_v24 = vmul.f32 %v5503_v48, %v10845_v4  ;;  %v5507_v44 = vsub.f32 1.0, %v5506_v36  ;;  %v10960_v41 = vadd.f32 %v10887_v17, %v5050_v30  ;;  %v11788_v4 = vld [vmem:[#allocation48_spill] sm:$0xff]  ;;  %vm5512_vm6 = vmor %vm5510_vm5, %vm5511_vm4  ;;  %v5531_v52 = vand.u32 2147483648, %v10951_v5 }
 0x636   : > { %v3982_v50 = vadd.f32 %v11788_v4, %v11787_v55  ;;  %v11791_v10 = vld [vmem:[#allocation32_spill] sm:$0xff]  ;;  %vm5525_vm9 = vweird.f32 %v10951_v5 }
 0x637   : > { %v5842_v28 = vmul.f32 %v5806_v24, %v11786_v19  ;;  %v5508_v54 = vmul.f32 %v6742_v38, %v5507_v44  ;;  %v5126_v53 = vsub.f32 0.0, %v10960_v41 }
 0x638   : > { %v5915_v7 = vld [vmem:[#allocation2 + $0x88] sm:$0xff]  ;;  %v4196_v15 = vadd.f32 %v11789_v42, %v3982_v50 }
 0x639   : > { %v6744_v47 = vpop.eup %6743  ;;  %5878 = vst [vmem:[#allocation2 + $0x93] sm:$0xff] %v5842_v28  ;;  %v5509_v40 = vadd.f32 %v6742_v38, %v5508_v54  ;;  %v5182_v25 = vmul.f32 1.442695, %v5126_v53  ;;  %v11794_v28 = vld [vmem:[#allocation57_spill] sm:$0xff]  ;;  %v5532_v53 = vor.u32 1.1754944e-38, %v5531_v52 }
 0x63a   : > { %v4985_v59 = vpop.f32.mrf.mxu1  ;;  %v6746_v37 = vpop.eup %6745  ;;  %v10974_v11 = vadd.f32 1.0, %v6744_v47  ;;  %v4410_v13 = vadd.f32 %v11790_v56, %v4196_v15  ;;  %v11795_v47 = vld [vmem:[#allocation74_spill] sm:$0xff] }
 0x63b   : > { %v5051_v49 = vadd.f32 %v4985_v59, %v4837_v3  ;;  %v5513_v23 = vsel %vm5512_vm6, %v6742_v38, %v5509_v40  ;;  %v5521_v46 = vmul.f32 %v6746_v37, %v10951_v5  ;;  %6747 = vpow2.f32 %v5182_v25  ;;  %v10993_v44 = vpop.f32.mrf.mxu0 }
 0x63c   : > { %v5518_v20 = vsel %vm5515_vm7, %v5517_v45, %v5513_v23  ;;  %6749 = vrcp.f32 %v10974_v11  ;;  %v4624_v1 = vadd.f32 %v10900_v14, %v4410_v13  ;;  %v5529_v38 = vand.u32 2147483647, %v10951_v5  ;;  %v11797_v13 = vld [vmem:[#allocation95_spill] sm:$0xff] }
 0x63d   : > { %6026 = vmatmul.f32.gmra.mxu2 %v5915_v7  ;;  %v5807_v57 = vmul.f32 %v5518_v20, %v10890_v60  ;;  %v5522_v61 = vsub.f32 1.0, %v5521_v46  ;;  %v10981_v31 = vadd.f32 %v10887_v17, %v5051_v49  ;;  %vm5526_vm8 = vweird.f32 %v6746_v37  ;;  %v11793_v60 = vld [vmem:[#allocation50_spill] sm:$0xff] }
 0x63e   : > { %v3983_v2 = vadd.f32 %v11793_v60, %v11792_v0  ;;  %v4838_v48 = vadd.f32 %v10907_v8, %v4624_v1  ;;  %vm5527_vm10 = vmor %vm5525_vm9, %vm5526_vm8  ;;  %vm5530_vm11 = vcmp.eq.f32.partialorder %v5529_v38, 8.507059e+37  ;;  %v5544_v42 = vand.u32 2147483647, %v10974_v11  ;;  %v11796_v49 = vld [vmem:[#allocation78_spill] sm:$0xff] }
 0x63f   : > { %v5843_v30 = vmul.f32 %v5807_v57, %v11791_v10  ;;  %v5523_v16 = vmul.f32 %v6746_v37, %v5522_v61  ;;  %v5127_v36 = vsub.f32 0.0, %v10981_v31  ;;  %v5546_v15 = vand.u32 2147483648, %v10974_v11 }
 0x640   : > { %v5916_v58 = vld [vmem:[#allocation2 + $0x90] sm:$0xff]  ;;  %v4197_v54 = vadd.f32 %v11794_v28, %v3983_v2  ;;  %vm5540_vm13 = vweird.f32 %v10974_v11  ;;  %vm5545_vm15 = vcmp.eq.f32.partialorder %v5544_v42, 8.507059e+37 }
 0x641   : > { %v6748_v24 = vpop.eup %6747  ;;  %5879 = vst [vmem:[#allocation2 + $0x9b] sm:$0xff] %v5843_v30  ;;  %v5524_v14 = vadd.f32 %v6746_v37, %v5523_v16  ;;  %v5184_v32 = vmul.f32 1.442695, %v5127_v36  ;;  %v11799_v16 = vld [vmem:[#allocation58_spill] sm:$0xff]  ;;  %v5547_v0 = vor.u32 1.1754944e-38, %v5546_v15 }
 0x642   : > { %v4988_v35 = vpop.f32.mrf.mxu1  ;;  %v6750_v19 = vpop.eup %6749  ;;  %v10997_v55 = vadd.f32 1.0, %v6748_v24  ;;  %v4411_v40 = vadd.f32 %v11795_v47, %v4197_v54 }
 0x643   : > { %v5052_v4 = vadd.f32 %v4988_v35, %v4838_v48  ;;  %v5528_v50 = vsel %vm5527_vm10, %v6746_v37, %v5524_v14  ;;  %v5536_v8 = vmul.f32 %v6750_v19, %v10974_v11  ;;  %6751 = vpow2.f32 %v5184_v32  ;;  %v11023_v2 = vpop.f32.mrf.mxu0  ;;  %v11800_v14 = vld [vmem:[#allocation81_spill] sm:$0xff] }
 0x644   : > { %v5982_v3 = vpop.f32.mrf.mxu2  ;;  %v5533_v5 = vsel %vm5530_vm11, %v5532_v53, %v5528_v50  ;;  %6753 = vrcp.f32 %v10997_v55  ;;  %v4625_v37 = vadd.f32 %v10930_v63, %v4411_v40  ;;  %vm5541_vm12 = vweird.f32 %v6750_v19  ;;  %v11016_v63 = vpop.f32.mrf.mxu3 }
 0x645   : > { %6029 = vmatmul.f32.gmra.mxu2 %v5916_v58  ;;  %v5808_v25 = vmul.f32 %v5533_v5, %v10915_v6  ;;  %v5537_v7 = vsub.f32 1.0, %v5536_v8  ;;  %v11004_v59 = vadd.f32 %v10887_v17, %v5052_v4  ;;  %v5983_v45 = vadd.f32 %v10855_v27, %v5982_v3  ;;  %v11798_v6 = vld [vmem:[#allocation97_spill] sm:$0xff]  ;;  %vm5542_vm14 = vmor %vm5540_vm13, %vm5541_vm12  ;;  %v11801_v8 = vld [vmem:[#allocation79_spill] sm:$0xff] }
 0x646   : > { %v3984_v20 = vadd.f32 %v11798_v6, %v11797_v13  ;;  %v4839_v57 = vadd.f32 %v10935_v43, %v4625_v37  ;;  %v5559_v53 = vand.u32 2147483647, %v10997_v55  ;;  %v5561_v4 = vand.u32 2147483648, %v10997_v55  ;;  %v11802_v5 = vld [vmem:[#allocation61_spill] sm:$0xff] }
 0x647   : > { %v5844_v23 = vmul.f32 %v5808_v25, %v11796_v49  ;;  %v5538_v46 = vmul.f32 %v6750_v19, %v5537_v7  ;;  %v5128_v56 = vsub.f32 0.0, %v11004_v59  ;;  %6101 = vst [vmem:[%s10870_s19 + $0x10] sm:$0xff] %v5983_v45  ;;  %vm5555_vm1 = vweird.f32 %v10997_v55 }
 0x648   : > { %v5917_v52 = vld [vmem:[#allocation2 + $0x98] sm:$0xff]  ;;  %v4198_v36 = vadd.f32 %v11799_v16, %v3984_v20  ;;  %vm5560_vm3 = vcmp.eq.f32.partialorder %v5559_v53, 8.507059e+37 }
 0x649   : > { %v6752_v61 = vpop.eup %6751  ;;  %5880 = vst [vmem:[#allocation2 + $0xa3] sm:$0xff] %v5844_v23  ;;  %v5539_v1 = vadd.f32 %v6750_v19, %v5538_v46  ;;  %v5186_v38 = vmul.f32 1.442695, %v5128_v56  ;;  %v11804_v23 = vld [vmem:[#allocation106_spill] sm:$0xff]  ;;  %v5562_v56 = vor.u32 1.1754944e-38, %v5561_v4 }
 0x64a   : > { %v4991_v10 = vpop.f32.mrf.mxu1  ;;  %v6754_v30 = vpop.eup %6753  ;;  %v11021_v60 = vadd.f32 1.0, %v6752_v61  ;;  %v4412_v32 = vadd.f32 %v11800_v14, %v4198_v36 }
 0x64b   : > { %v5053_v43 = vadd.f32 %v4991_v10, %v4839_v57  ;;  %v5543_v48 = vsel %vm5542_vm14, %v6750_v19, %v5539_v1  ;;  %v5551_v24 = vmul.f32 %v6754_v30, %v10997_v55  ;;  %6755 = vpow2.f32 %v5186_v38  ;;  %v11805_v55 = vld [vmem:[#allocation76_spill] sm:$0xff] }
 0x64c   : > { %v5985_v11 = vpop.f32.mrf.mxu2  ;;  %v5548_v58 = vsel %vm5545_vm15, %v5547_v0, %v5543_v48  ;;  %6757 = vrcp.f32 %v11021_v60  ;;  %v4626_v19 = vadd.f32 %v10956_v33, %v4412_v32  ;;  %vm5556_vm0 = vweird.f32 %v6754_v30  ;;  %v11046_v20 = vpop.f32.mrf.mxu3 }
 0x64d   : > { %6032 = vmatmul.f32.gmra.mxu2 %v5917_v52  ;;  %v5809_v35 = vmul.f32 %v5548_v58, %v10939_v29  ;;  %v5552_v28 = vsub.f32 1.0, %v5551_v24  ;;  %v11030_v54 = vadd.f32 %v10887_v17, %v5053_v43  ;;  %v5986_v50 = vadd.f32 %v10855_v27, %v5985_v11  ;;  %v11803_v29 = vld [vmem:[#allocation25_spill] sm:$0xff]  ;;  %vm5557_vm2 = vmor %vm5555_vm1, %vm5556_vm0  ;;  %v11051_v52 = vpop.f32.mrf.mxu0  ;;  %v11806_v24 = vld [vmem:[#allocation34_spill] sm:$0xff] }
 0x64e   : > { %v3985_v25 = vadd.f32 %v11803_v29, %v11802_v5  ;;  %v4840_v7 = vadd.f32 %v10965_v9, %v4626_v19  ;;  %v5574_v0 = vand.u32 2147483647, %v11021_v60  ;;  %v5576_v43 = vand.u32 2147483648, %v11021_v60  ;;  %v11807_v58 = vld [vmem:[#allocation47_spill] sm:$0xff] }
 0x64f   : > { %v5845_v3 = vmul.f32 %v5809_v35, %v11801_v8  ;;  %v5553_v47 = vmul.f32 %v6754_v30, %v5552_v28  ;;  %v5129_v40 = vsub.f32 0.0, %v11030_v54  ;;  %6102 = vst [vmem:[%s10870_s19 + $0x18] sm:$0xff] %v5986_v50  ;;  %vm5570_vm5 = vweird.f32 %v11021_v60 }
 0x650   : > { %v5918_v15 = vld [vmem:[#allocation2 + $0xa0] sm:$0xff]  ;;  %v4199_v46 = vadd.f32 %v11804_v23, %v3985_v25  ;;  %vm5575_vm7 = vcmp.eq.f32.partialorder %v5574_v0, 8.507059e+37 }
 0x651   : > { %v6756_v37 = vpop.eup %6755  ;;  %5881 = vst [vmem:[#allocation2 + $0xab] sm:$0xff] %v5845_v3  ;;  %v5554_v33 = vadd.f32 %v6754_v30, %v5553_v47  ;;  %v5188_v42 = vmul.f32 1.442695, %v5129_v40  ;;  %v11809_v3 = vld [vmem:[#allocation33_spill] sm:$0xff]  ;;  %v5577_v40 = vor.u32 1.1754944e-38, %v5576_v43 }
 0x652   : > { %v4994_v45 = vpop.f32.mrf.mxu1  ;;  %v6758_v49 = vpop.eup %6757  ;;  %v11044_v13 = vadd.f32 1.0, %v6756_v37  ;;  %v4413_v1 = vadd.f32 %v11805_v55, %v4199_v46  ;;  %v11812_v55 = vld [vmem:[#allocation53_spill] sm:$0xff] }
 0x653   : > { %v5054_v6 = vadd.f32 %v4994_v45, %v4840_v7  ;;  %v5558_v9 = vsel %vm5557_vm2, %v6754_v30, %v5554_v33  ;;  %v5566_v57 = vmul.f32 %v6758_v49, %v11021_v60  ;;  %6759 = vpow2.f32 %v5188_v42 }
 0x654   : > { %v5988_v61 = vpop.f32.mrf.mxu2  ;;  %v5563_v38 = vsel %vm5560_vm3, %v5562_v56, %v5558_v9  ;;  %6761 = vrcp.f32 %v11044_v13  ;;  %v4627_v30 = vadd.f32 %v10986_v51, %v4413_v1  ;;  %vm5571_vm4 = vweird.f32 %v6758_v49  ;;  %v11074_v33 = vpop.f32.mrf.mxu3 }
 0x655   : > { %6035 = vmatmul.f32.gmra.mxu2 %v5918_v15  ;;  %v5810_v10 = vmul.f32 %v5563_v38, %v10960_v41  ;;  %v5567_v16 = vsub.f32 1.0, %v5566_v57  ;;  %v11055_v36 = vadd.f32 %v10887_v17, %v5054_v6  ;;  %v5989_v48 = vadd.f32 %v10855_v27, %v5988_v61  ;;  %v11808_v41 = vld [vmem:[#allocation63_spill] sm:$0xff]  ;;  %vm5572_vm6 = vmor %vm5570_vm5, %vm5571_vm4  ;;  %v11084_v56 = vpop.f32.mrf.mxu0  ;;  %v11811_v61 = vld [vmem:[#allocation96_spill] sm:$0xff] }
 0x656   : > { %v3986_v35 = vadd.f32 %v11808_v41, %v11807_v58  ;;  %v4841_v28 = vadd.f32 %v10993_v44, %v4627_v30  ;;  %v5589_v23 = vand.u32 2147483647, %v11044_v13  ;;  %v5591_v46 = vand.u32 2147483648, %v11044_v13  ;;  %v11810_v6 = vld [vmem:[#allocation35_spill] sm:$0xff] }
 0x657   : > { %v5846_v11 = vmul.f32 %v5810_v10, %v11806_v24  ;;  %v5568_v14 = vmul.f32 %v6758_v49, %v5567_v16  ;;  %v5130_v32 = vsub.f32 0.0, %v11055_v36  ;;  %6103 = vst [vmem:[%s10870_s19 + $0x20] sm:$0xff] %v5989_v48  ;;  %v3987_v1 = vadd.f32 %v11812_v55, %v11811_v61  ;;  %v11813_v48 = vld [vmem:[#allocation66_spill] sm:$0xff] }
 0x658   : > { %v5919_v4 = vld [vmem:[#allocation2 + $0xa8] sm:$0xff]  ;;  %v4200_v47 = vadd.f32 %v11809_v3, %v3986_v35  ;;  %vm5585_vm9 = vweird.f32 %v11044_v13  ;;  %vm5590_vm11 = vcmp.eq.f32.partialorder %v5589_v23, 8.507059e+37 }
 0x659   : > { %v6760_v19 = vpop.eup %6759  ;;  %5882 = vst [vmem:[#allocation2 + $0xb3] sm:$0xff] %v5846_v11  ;;  %v5569_v51 = vadd.f32 %v6758_v49, %v5568_v14  ;;  %v5190_v53 = vmul.f32 1.442695, %v5130_v32  ;;  %v4201_v24 = vadd.f32 %v11813_v48, %v3987_v1  ;;  %v5592_v11 = vor.u32 1.1754944e-38, %v5591_v46  ;;  %v11814_v3 = vld [vmem:[#allocation3_spill] sm:$0xff]  ;;  %v11817_v46 = vld [vmem:[#allocation108_spill] sm:$0xff] }
 0x65a   : > { %v4997_v50 = vpop.f32.mrf.mxu1  ;;  %v6762_v8 = vpop.eup %6761  ;;  %v11069_v5 = vadd.f32 1.0, %v6760_v19  ;;  %v4414_v37 = vadd.f32 %v10585_v18, %v4200_v47 }
 0x65b   : > { %v5055_v29 = vadd.f32 %v4997_v50, %v4841_v28  ;;  %v5573_v25 = vsel %vm5572_vm6, %v6758_v49, %v5569_v51  ;;  %v5581_v44 = vmul.f32 %v6762_v8, %v11044_v13  ;;  %6763 = vpow2.f32 %v5190_v53 }
 0x65c   : > { %v5991_v7 = vpop.f32.mrf.mxu2  ;;  %v5578_v60 = vsel %vm5575_vm7, %v5577_v40, %v5573_v25  ;;  %6765 = vrcp.f32 %v11069_v5  ;;  %v4628_v49 = vadd.f32 %v11016_v63, %v4414_v37  ;;  %vm5586_vm8 = vweird.f32 %v6762_v8  ;;  %v11816_v25 = vld [vmem:[#allocation65_spill] sm:$0xff] }
 0x65d   : > { %6038 = vmatmul.f32.gmra.mxu2 %v5919_v4  ;;  %v5811_v42 = vmul.f32 %v5578_v60, %v10981_v31  ;;  %v5582_v15 = vsub.f32 1.0, %v5581_v44  ;;  %v11078_v45 = vadd.f32 %v10887_v17, %v5055_v29  ;;  %v5992_v18 = vadd.f32 %v10855_v27, %v5991_v7  ;;  %vm5587_vm10 = vmor %vm5585_vm9, %vm5586_vm8  ;;  %v11815_v29 = vld [vmem:[#allocation51_spill] sm:$0xff]  ;;  %v11115_v37 = vpop.f32.mrf.mxu0 }
 0x65e   : > { %v4842_v38 = vadd.f32 %v11023_v2, %v4628_v49  ;;  %v4415_v41 = vadd.f32 %v10603_v26, %v4201_v24  ;;  %v5604_v4 = vand.u32 2147483647, %v11069_v5  ;;  %v5606_v50 = vand.u32 2147483648, %v11069_v5  ;;  %v11819_v24 = vld [vmem:[#allocation22_spill] sm:$0xff] }
 0x65f   : > { %v5847_v9 = vmul.f32 %v5811_v42, %v11810_v6  ;;  %v5583_v57 = vmul.f32 %v6762_v8, %v5582_v15  ;;  %v5131_v31 = vsub.f32 0.0, %v11078_v45  ;;  %6104 = vst [vmem:[%s10870_s19 + $0x28] sm:$0xff] %v5992_v18  ;;  %v3988_v44 = vadd.f32 %v11816_v25, %v11815_v29 }
 0x660   : > { %v5920_v30 = vld [vmem:[#allocation2 + $0xb0] sm:$0xff]  ;;  %v4629_v53 = vadd.f32 %v11046_v20, %v4415_v41  ;;  %vm5600_vm13 = vweird.f32 %v11069_v5  ;;  %v5607_v6 = vor.u32 1.1754944e-38, %v5606_v50  ;;  %vm5605_vm15 = vcmp.eq.f32.partialorder %v5604_v4, 8.507059e+37 }
 0x661   : > { %v6764_v63 = vpop.eup %6763  ;;  %5883 = vst [vmem:[#allocation2 + $0xbb] sm:$0xff] %v5847_v9  ;;  %v5584_v10 = vadd.f32 %v6762_v8, %v5583_v57  ;;  %v5192_v16 = vmul.f32 1.442695, %v5131_v31  ;;  %v4202_v18 = vadd.f32 %v11817_v46, %v3988_v44 }
 0x662   : > { %v5000_v0 = vpop.f32.mrf.mxu1  ;;  %v6766_v43 = vpop.eup %6765  ;;  %v11094_v14 = vadd.f32 1.0, %v6764_v63  ;;  %v4843_v7 = vadd.f32 %v11051_v52, %v4629_v53  ;;  %v11821_v53 = vld [vmem:[#allocation71_spill] sm:$0xff] }
 0x663   : > { %v5056_v32 = vadd.f32 %v5000_v0, %v4842_v38  ;;  %v5588_v58 = vsel %vm5587_vm10, %v6762_v8, %v5584_v10  ;;  %v5596_v2 = vmul.f32 %v6766_v43, %v11069_v5  ;;  %6767 = vpow2.f32 %v5192_v16  ;;  %v11107_v8 = vpop.f32.mrf.mxu3 }
 0x664   : > { %v5593_v35 = vsel %vm5590_vm11, %v5592_v11, %v5588_v58  ;;  %6769 = vrcp.f32 %v11094_v14  ;;  %vm5601_vm12 = vweird.f32 %v6766_v43  ;;  %v4416_v61 = vadd.f32 %v10632_v34, %v4202_v18  ;;  %v11820_v11 = vld [vmem:[#allocation55_spill] sm:$0xff] }
 0x665   : > { %6041 = vmatmul.f32.gmra.mxu2 %v5920_v30  ;;  %v5812_v13 = vmul.f32 %v5593_v35, %v11004_v59  ;;  %v5597_v28 = vsub.f32 1.0, %v5596_v2  ;;  %v11101_v19 = vadd.f32 %v10887_v17, %v5056_v32  ;;  %vm5602_vm14 = vmor %vm5600_vm13, %vm5601_vm12  ;;  %v5619_v10 = vand.u32 2147483647, %v11094_v14  ;;  %v11818_v30 = vld [vmem:[#allocation82_spill] sm:$0xff] }
 0x666   : > { %v5994_v51 = vpop.f32.mrf.mxu2  ;;  %v4630_v63 = vadd.f32 %v11074_v33, %v4416_v61  ;;  %v5621_v16 = vand.u32 2147483648, %v11094_v14  ;;  %vm5615_vm1 = vweird.f32 %v11094_v14 }
 0x667   : > { %v5995_v26 = vadd.f32 %v10855_v27, %v5994_v51  ;;  %v5848_v47 = vmul.f32 %v5812_v13, %v11814_v3  ;;  %v5598_v40 = vmul.f32 %v6766_v43, %v5597_v28  ;;  %v5132_v59 = vsub.f32 0.0, %v11101_v19  ;;  %v4798_v3 = vpop.f32.mrf.mxu0 }
 0x668   : > { %v5921_v15 = vld [vmem:[#allocation2 + $0xb8] sm:$0xff]  ;;  %v4844_v32 = vadd.f32 %v11084_v56, %v4630_v63  ;;  %v5622_v50 = vor.u32 1.1754944e-38, %v5621_v16  ;;  %vm5620_vm3 = vcmp.eq.f32.partialorder %v5619_v10, 8.507059e+37  ;;  %v11826_v10 = vld [vmem:[#allocation14_spill] sm:$0xff] }
 0x669   : > { %6105 = vst [vmem:[%s10870_s19 + $0x30] sm:$0xff] %v5995_v26  ;;  %v6768_v20 = vpop.eup %6767  ;;  %v5599_v60 = vadd.f32 %v6766_v43, %v5598_v40  ;;  %v5194_v42 = vmul.f32 1.442695, %v5132_v59 }
 0x66a   : > { %5884 = vst [vmem:[#allocation2 + $0xc3] sm:$0xff] %v5848_v47  ;;  %v5003_v49 = vpop.f32.mrf.mxu1  ;;  %v6770_v23 = vpop.eup %6769  ;;  %v11120_v9 = vadd.f32 1.0, %v6768_v20 }
 0x66b   : > { %v5057_v52 = vadd.f32 %v5003_v49, %v4843_v7  ;;  %v5603_v57 = vsel %vm5602_vm14, %v6766_v43, %v5599_v60  ;;  %v5611_v31 = vmul.f32 %v6770_v23, %v11094_v14  ;;  %6771 = vpow2.f32 %v5194_v42  ;;  %v11138_v2 = vpop.f32.mrf.mxu3  ;;  %v11822_v14 = vld [vmem:[#allocation85_spill] sm:$0xff] }
 0x66c   : > { %v5608_v5 = vsel %vm5605_vm15, %v5607_v6, %v5603_v57  ;;  %6773 = vrcp.f32 %v11120_v9  ;;  %vm5616_vm0 = vweird.f32 %v6770_v23  ;;  %v5634_v60 = vand.u32 2147483647, %v11120_v9  ;;  %v11824_v6 = vld [vmem:[#allocation13_spill] sm:$0xff] }
 0x66d   : > { %6044 = vmatmul.f32.gmra.mxu2 %v5921_v15  ;;  %v5813_v55 = vmul.f32 %v5608_v5, %v11030_v54  ;;  %v5612_v1 = vsub.f32 1.0, %v5611_v31  ;;  %v11127_v38 = vadd.f32 %v10887_v17, %v5057_v52  ;;  %v3989_v54 = vadd.f32 %v11820_v11, %v11819_v24  ;;  %vm5617_vm2 = vmor %vm5615_vm1, %vm5616_vm0  ;;  %v11823_v15 = vld [vmem:[#allocation6_spill] sm:$0xff]  ;;  %v11825_v52 = vld [vmem:[#allocation56_spill] sm:$0xff] }
 0x66e   : > { %v5636_v42 = vand.u32 2147483648, %v11120_v9  ;;  %vm5630_vm5 = vweird.f32 %v11120_v9  ;;  %vm5635_vm7 = vcmp.eq.f32.partialorder %v5634_v60, 8.507059e+37  ;;  %v11831_v60 = vld [vmem:[#allocation68_spill] sm:$0xff] }
 0x66f   : > { %v5849_v0 = vmul.f32 %v5813_v55, %v11818_v30  ;;  %v5613_v43 = vmul.f32 %v6770_v23, %v5612_v1  ;;  %v5133_v34 = vsub.f32 0.0, %v11127_v38  ;;  %v4203_v4 = vadd.f32 %v11821_v53, %v3989_v54  ;;  %v4801_v54 = vpop.f32.mrf.mxu0 }
 0x670   : > { %v5997_v48 = vpop.f32.mrf.mxu2  ;;  %v5637_v30 = vor.u32 1.1754944e-38, %v5636_v42 }
 0x671   : > { %v5998_v58 = vadd.f32 %v10855_v27, %v5997_v48  ;;  %v6772_v33 = vpop.eup %6771  ;;  %5885 = vst [vmem:[#allocation2 + $0xcb] sm:$0xff] %v5849_v0  ;;  %v5614_v41 = vadd.f32 %v6770_v23, %v5613_v43  ;;  %v5196_v35 = vmul.f32 1.442695, %v5133_v34  ;;  %v5922_v13 = vld [vmem:[#allocation2 + $0xc0] sm:$0xff]  ;;  %v4417_v59 = vadd.f32 %v11822_v14, %v4203_v4 }
 0x672   : > { %v5006_v28 = vpop.f32.mrf.mxu1  ;;  %v6774_v51 = vpop.eup %6773  ;;  %v11143_v26 = vadd.f32 1.0, %v6772_v33 }
 0x673   : > { %6106 = vst [vmem:[%s10870_s19 + $0x38] sm:$0xff] %v5998_v58  ;;  %v5058_v56 = vadd.f32 %v5006_v28, %v4844_v32  ;;  %v5618_v47 = vsel %vm5617_vm2, %v6770_v23, %v5614_v41  ;;  %v5626_v40 = vmul.f32 %v6774_v51, %v11120_v9  ;;  %6775 = vpow2.f32 %v5196_v35  ;;  %v4587_v43 = vpop.f32.mrf.mxu3  ;;  %v11827_v9 = vld [vmem:[#allocation80_spill] sm:$0xff]  ;;  %v11828_v28 = vld [vmem:[#allocation38_spill] sm:$0xff] }
 0x674   : > { %v5623_v29 = vsel %vm5620_vm3, %v5622_v50, %v5618_v47  ;;  %6777 = vrcp.f32 %v11143_v26  ;;  %v4631_v20 = vadd.f32 %v11107_v8, %v4417_v59  ;;  %vm5631_vm4 = vweird.f32 %v6774_v51  ;;  %v11830_v47 = vld [vmem:[#allocation62_spill] sm:$0xff] }
 0x675   : > { %6047 = vmatmul.f32.gmra.mxu2 %v5922_v13  ;;  %v5814_v25 = vmul.f32 %v5623_v29, %v11055_v36  ;;  %v5627_v44 = vsub.f32 1.0, %v5626_v40  ;;  %v11151_v7 = vadd.f32 %v10887_v17, %v5058_v56  ;;  %v3990_v36 = vadd.f32 %v11825_v52, %v11824_v6  ;;  %vm5632_vm6 = vmor %vm5630_vm5, %vm5631_vm4  ;;  %v11829_v56 = vld [vmem:[#allocation98_spill] sm:$0xff] }
 0x676   : > { %v4845_v57 = vadd.f32 %v11115_v37, %v4631_v20  ;;  %v5649_v35 = vand.u32 2147483647, %v11143_v26  ;;  %v5651_v13 = vand.u32 2147483648, %v11143_v26  ;;  %vm5645_vm9 = vweird.f32 %v11143_v26 }
 0x677   : > { %v5850_v49 = vmul.f32 %v5814_v25, %v11823_v15  ;;  %v5628_v23 = vmul.f32 %v6774_v51, %v5627_v44  ;;  %v5134_v46 = vsub.f32 0.0, %v11151_v7  ;;  %v4204_v16 = vadd.f32 %v11826_v10, %v3990_v36  ;;  %v11833_v10 = vld [vmem:[#allocation60_spill] sm:$0xff] }
 0x678   : > { %v6000_v18 = vpop.f32.mrf.mxu2  ;;  %v5923_v55 = vld [vmem:[#allocation2 + $0xc8] sm:$0xff]  ;;  %v5652_v15 = vor.u32 1.1754944e-38, %v5651_v13  ;;  %vm5650_vm11 = vcmp.eq.f32.partialorder %v5649_v35, 8.507059e+37 }
 0x679   : > { %v6001_v31 = vadd.f32 %v10855_v27, %v6000_v18  ;;  %v6776_v8 = vpop.eup %6775  ;;  %5886 = vst [vmem:[#allocation2 + $0xd3] sm:$0xff] %v5850_v49  ;;  %v5629_v61 = vadd.f32 %v6774_v51, %v5628_v23  ;;  %v5198_v5 = vmul.f32 1.442695, %v5134_v46  ;;  %v4418_v24 = vadd.f32 %v11827_v9, %v4204_v16  ;;  %v11834_v16 = vld [vmem:[#allocation67_spill] sm:$0xff] }
 0x67a   : > { %v5009_v1 = vpop.f32.mrf.mxu1  ;;  %v6778_v63 = vpop.eup %6777  ;;  %v11165_v0 = vadd.f32 1.0, %v6776_v8 }
 0x67b   : > { %6107 = vst [vmem:[%s10870_s19 + $0x40] sm:$0xff] %v6001_v31  ;;  %v5059_v37 = vadd.f32 %v5009_v1, %v4845_v57  ;;  %v5633_v34 = vsel %vm5632_vm6, %v6774_v51, %v5629_v61  ;;  %v5641_v48 = vmul.f32 %v6778_v63, %v11143_v26  ;;  %6779 = vpow2.f32 %v5198_v5  ;;  %v4590_v18 = vpop.f32.mrf.mxu3  ;;  %v4804_v61 = vpop.f32.mrf.mxu0  ;;  %v11832_v5 = vld [vmem:[#allocation4_spill] sm:$0xff] }
 0x67c   : > { %v5638_v11 = vsel %vm5635_vm7, %v5637_v30, %v5633_v34  ;;  %6781 = vrcp.f32 %v11165_v0  ;;  %v4632_v41 = vadd.f32 %v11138_v2, %v4418_v24  ;;  %vm5646_vm8 = vweird.f32 %v6778_v63 }
 0x67d   : > { %6050 = vmatmul.f32.gmra.mxu2 %v5923_v55  ;;  %v5815_v32 = vmul.f32 %v5638_v11, %v11078_v45  ;;  %v5642_v58 = vsub.f32 1.0, %v5641_v48  ;;  %v11173_v33 = vadd.f32 %v10887_v17, %v5059_v37  ;;  %v3991_v45 = vadd.f32 %v11830_v47, %v11829_v56  ;;  %vm5647_vm10 = vmor %vm5645_vm9, %vm5646_vm8 }
 0x67e   : > { %v4846_v40 = vadd.f32 %v4798_v3, %v4632_v41  ;;  %v5664_v31 = vand.u32 2147483647, %v11165_v0  ;;  %v5666_v8 = vand.u32 2147483648, %v11165_v0  ;;  %vm5660_vm13 = vweird.f32 %v11165_v0 }
 0x67f   : > { %v5851_v51 = vmul.f32 %v5815_v32, %v11828_v28  ;;  %v5643_v53 = vmul.f32 %v6778_v63, %v5642_v58  ;;  %v5135_v4 = vsub.f32 0.0, %v11173_v33  ;;  %v4205_v42 = vadd.f32 %v11831_v60, %v3991_v45  ;;  %v11835_v32 = vld [vmem:[#allocation73_spill] sm:$0xff] }
 0x680   : > { %v6003_v50 = vpop.f32.mrf.mxu2  ;;  %v5924_v25 = vld [vmem:[#allocation2 + $0xd0] sm:$0xff]  ;;  %vm5665_vm15 = vcmp.eq.f32.partialorder %v5664_v31, 8.507059e+37 }
 0x681   : > { %v6004_v14 = vadd.f32 %v10855_v27, %v6003_v50  ;;  %v6780_v59 = vpop.eup %6779  ;;  %5887 = vst [vmem:[#allocation2 + $0xdb] sm:$0xff] %v5851_v51  ;;  %v5644_v2 = vadd.f32 %v6778_v63, %v5643_v53  ;;  %v5200_v29 = vmul.f32 1.442695, %v5135_v4  ;;  %v4419_v26 = vadd.f32 %v10706_v62, %v4205_v42  ;;  %v11221_v50 = vld [vmem:[%s11371_s5] ss:$0 sm:$0xff] }
 0x682   : > { %v5012_v44 = vpop.f32.mrf.mxu1  ;;  %v6782_v20 = vpop.eup %6781  ;;  %v11186_v49 = vadd.f32 1.0, %v6780_v59 }
 0x683   : > { %6108 = vst [vmem:[%s10870_s19 + $0x48] sm:$0xff] %v6004_v14  ;;  %v5060_v3 = vadd.f32 %v5012_v44, %v4846_v40  ;;  %v5648_v23 = vsel %vm5647_vm10, %v6778_v63, %v5644_v2  ;;  %v5656_v27 = vmul.f32 %v6782_v20, %v11165_v0  ;;  %6783 = vpow2.f32 %v5200_v29  ;;  %v4593_v40 = vpop.f32.mrf.mxu3  ;;  %v11836_v14 = vld [vmem:[#allocation83_spill] sm:$0xff]  ;;  %v11838_v44 = vld [vmem:[#allocation30_spill] sm:$0xff] }
 0x684   : > { %v5653_v46 = vsel %vm5650_vm11, %v5652_v15, %v5648_v23  ;;  %6785 = vrcp.f32 %v11186_v49  ;;  %v4633_v57 = vadd.f32 %v4587_v43, %v4419_v26  ;;  %vm5661_vm12 = vweird.f32 %v6782_v20 }
 0x685   : > { %6053 = vmatmul.f32.gmra.mxu2 %v5924_v25  ;;  %v5816_v6 = vmul.f32 %v5653_v46, %v11101_v19  ;;  %v5657_v52 = vsub.f32 1.0, %v5656_v27  ;;  %v11194_v36 = vadd.f32 %v10887_v17, %v5060_v3  ;;  %v3992_v19 = vadd.f32 %v11834_v16, %v11833_v10  ;;  %v11205_v17 = vld [vmem:[%s11373_s7] ss:$0 sm:$0xff]  ;;  %vm5662_vm14 = vmor %vm5660_vm13, %vm5661_vm12  ;;  %v4807_v3 = vpop.f32.mrf.mxu0 }
 0x686   : > { %v4847_v30 = vadd.f32 %v4801_v54, %v4633_v57  ;;  %v5667_v54 = vor.u32 1.1754944e-38, %v5666_v8  ;;  %v5679_v45 = vand.u32 2147483647, %v11186_v49  ;;  %v11837_v25 = vld [vmem:[#allocation54_spill] sm:$0xff]  ;;  %vm5675_vm1 = vweird.f32 %v11186_v49 }
 0x687   : > { %v5852_v55 = vmul.f32 %v5816_v6, %v11832_v5  ;;  %v5658_v62 = vmul.f32 %v6782_v20, %v5657_v52  ;;  %v5136_v1 = vsub.f32 0.0, %v11194_v36  ;;  %v4206_v58 = vadd.f32 %v11835_v32, %v3992_v19  ;;  %v11839_v6 = vld [vmem:[#allocation16_spill] sm:$0xff] }
 0x688   : > { %v6006_v63 = vpop.f32.mrf.mxu2  ;;  %v5925_v9 = vld [vmem:[#allocation2 + $0xd8] sm:$0xff]  ;;  %vm5680_vm3 = vcmp.eq.f32.partialorder %v5679_v45, 8.507059e+37 }
 0x689   : > { %v6007_v37 = vadd.f32 %v11205_v17, %v6006_v63  ;;  %v6784_v43 = vpop.eup %6783  ;;  %5888 = vst [vmem:[#allocation2 + $0xe3] sm:$0xff] %v5852_v55  ;;  %v5659_v34 = vadd.f32 %v6782_v20, %v5658_v62  ;;  %v5202_v48 = vmul.f32 1.442695, %v5136_v1  ;;  %v4420_v0 = vadd.f32 %v10738_v39, %v4206_v58 }
 0x68a   : > { %v5015_v24 = vpop.f32.mrf.mxu1  ;;  %v6786_v11 = vpop.eup %6785  ;;  %v11211_v41 = vadd.f32 1.0, %v6784_v43  ;;  %v5681_v39 = vand.u32 2147483648, %v11186_v49 }
 0x68b   : > { %6109 = vst [vmem:[%s10870_s19 + $0x50] sm:$0xff] %v6007_v37  ;;  %v5061_v35 = vadd.f32 %v5015_v24, %v4847_v30  ;;  %v5663_v13 = vsel %vm5662_vm14, %v6782_v20, %v5659_v34  ;;  %v5671_v28 = vmul.f32 %v6786_v11, %v11186_v49  ;;  %6787 = vpow2.f32 %v5202_v48  ;;  %v11840_v30 = vld [vmem:[#allocation8_spill] sm:$0xff]  ;;  %v4596_v58 = vpop.f32.mrf.mxu3 }
 0x68c   : > { %v5668_v51 = vsel %vm5665_vm15, %v5667_v54, %v5663_v13  ;;  %6789 = vrcp.f32 %v11211_v41  ;;  %v4634_v47 = vadd.f32 %v4590_v18, %v4420_v0  ;;  %vm5676_vm0 = vweird.f32 %v6786_v11  ;;  %v11841_v48 = vld [vmem:[#allocation100_spill] sm:$0xff] }
 0x68d   : > { %6056 = vmatmul.f32.gmra.mxu2 %v5925_v9  ;;  %v5817_v53 = vmul.f32 %v5668_v51, %v11127_v38  ;;  %v5672_v4 = vsub.f32 1.0, %v5671_v28  ;;  %v11224_v56 = vadd.f32 %v11221_v50, %v5061_v35  ;;  %v3993_v20 = vadd.f32 %v11838_v44, %v11837_v25  ;;  %vm5677_vm2 = vmor %vm5675_vm1, %vm5676_vm0  ;;  %v11842_v9 = vld [vmem:[#allocation103_spill] sm:$0xff]  ;;  %v11843_v51 = vld [vmem:[#allocation70_spill] sm:$0xff] }
 0x68e   : > { %v4848_v60 = vadd.f32 %v4804_v61, %v4634_v47  ;;  %v5682_v57 = vor.u32 1.1754944e-38, %v5681_v39  ;;  %v5694_v16 = vand.u32 2147483647, %v11211_v41  ;;  %v5696_v19 = vand.u32 2147483648, %v11211_v41  ;;  %v4810_v39 = vpop.f32.mrf.mxu0 }
 0x68f   : > { %v5853_v59 = vmul.f32 %v5817_v53, %v11836_v14  ;;  %v5673_v2 = vmul.f32 %v6786_v11, %v5672_v4  ;;  %v5137_v38 = vsub.f32 0.0, %v11224_v56  ;;  %v4207_v52 = vadd.f32 %v11839_v6, %v3993_v20 }
 0x690   : > { %v6009_v29 = vpop.f32.mrf.mxu2  ;;  %v5926_v26 = vld [vmem:[#allocation2 + $0xe0] sm:$0xff]  ;;  %v3994_v24 = vadd.f32 %v11842_v9, %v11841_v48  ;;  %vm5690_vm5 = vweird.f32 %v11211_v41  ;;  %v5697_v4 = vor.u32 1.1754944e-38, %v5696_v19  ;;  %vm5695_vm7 = vcmp.eq.f32.partialorder %v5694_v16, 8.507059e+37 }
 0x691   : > { %v6010_v42 = vadd.f32 %v11205_v17, %v6009_v29  ;;  %v6788_v15 = vpop.eup %6787  ;;  %5889 = vst [vmem:[#allocation2 + $0xeb] sm:$0xff] %v5853_v59  ;;  %v5674_v23 = vadd.f32 %v6786_v11, %v5673_v2  ;;  %v5204_v27 = vmul.f32 1.442695, %v5137_v38  ;;  %v4421_v49 = vadd.f32 %v10766_v12, %v4207_v52 }
 0x692   : > { %v5018_v46 = vpop.f32.mrf.mxu1  ;;  %v6790_v18 = vpop.eup %6789  ;;  %v11236_v31 = vadd.f32 1.0, %v6788_v15  ;;  %v4208_v53 = vadd.f32 %v11843_v51, %v3994_v24 }
 0x693   : > { %6110 = vst [vmem:[%s10870_s19 + $0x58] sm:$0xff] %v6010_v42  ;;  %v5062_v8 = vadd.f32 %v5018_v46, %v4848_v60  ;;  %v5678_v61 = vsel %vm5677_vm2, %v6786_v11, %v5674_v23  ;;  %v5686_v5 = vmul.f32 %v6790_v18, %v11211_v41  ;;  %6791 = vpow2.f32 %v5204_v27  ;;  %v11844_v60 = vld [vmem:[#allocation86_spill] sm:$0xff]  ;;  %v11845_v23 = vld [vmem:[#allocation28_spill] sm:$0xff] }
 0x694   : > { %v5683_v55 = vsel %vm5680_vm3, %v5682_v57, %v5678_v61  ;;  %6793 = vrcp.f32 %v11236_v31  ;;  %v4635_v10 = vadd.f32 %v4593_v40, %v4421_v49  ;;  %vm5691_vm4 = vweird.f32 %v6790_v18  ;;  %v11846_v27 = vld [vmem:[#allocation64_spill] sm:$0xff] }
 0x695   : > { %6059 = vmatmul.f32.gmra.mxu2 %v5926_v26  ;;  %v5818_v62 = vmul.f32 %v5683_v55, %v11151_v7  ;;  %v5687_v1 = vsub.f32 1.0, %v5686_v5  ;;  %v11244_v63 = vadd.f32 %v11221_v50, %v5062_v8  ;;  %vm5692_vm6 = vmor %vm5690_vm5, %vm5691_vm4  ;;  %v4422_v41 = vadd.f32 %v10797_v22, %v4208_v53  ;;  %v11847_v5 = vld [vmem:[#allocation72_spill] sm:$0xff] }
 0x696   : > { %v4849_v7 = vadd.f32 %v4807_v3, %v4635_v10  ;;  %v5709_v44 = vand.u32 2147483647, %v11236_v31  ;;  %v5711_v20 = vand.u32 2147483648, %v11236_v31  ;;  %vm5705_vm9 = vweird.f32 %v11236_v31  ;;  %v4599_v10 = vpop.f32.mrf.mxu3 }
 0x697   : > { %v5854_v37 = vmul.f32 %v5818_v62, %v11840_v30  ;;  %v5688_v43 = vmul.f32 %v6790_v18, %v5687_v1  ;;  %v5138_v12 = vsub.f32 0.0, %v11244_v63  ;;  %v4636_v25 = vadd.f32 %v4596_v58, %v4422_v41 }
 0x698   : > { %v6012_v34 = vpop.f32.mrf.mxu2  ;;  %v5927_v13 = vld [vmem:[#allocation2 + $0xe8] sm:$0xff]  ;;  %v5712_v55 = vor.u32 1.1754944e-38, %v5711_v20  ;;  %vm5710_vm11 = vcmp.eq.f32.partialorder %v5709_v44, 8.507059e+37  ;;  %v11849_v44 = vld [vmem:[#allocation37_spill] sm:$0xff] }
 0x699   : > { %v6013_v11 = vadd.f32 %v11205_v17, %v6012_v34  ;;  %v6792_v32 = vpop.eup %6791  ;;  %5890 = vst [vmem:[#allocation2 + $0xf3] sm:$0xff] %v5854_v37  ;;  %v5689_v54 = vadd.f32 %v6790_v18, %v5688_v43  ;;  %v5206_v35 = vmul.f32 1.442695, %v5138_v12  ;;  %v4850_v26 = vadd.f32 %v4810_v39, %v4636_v25  ;;  %v4813_v37 = vpop.f32.mrf.mxu0 }
 0x69a   : > { %v5021_v28 = vpop.f32.mrf.mxu1  ;;  %v6794_v0 = vpop.eup %6793  ;;  %v11256_v47 = vadd.f32 1.0, %v6792_v32 }
 0x69b   : > { %6111 = vst [vmem:[%s10870_s19 + $0x60] sm:$0xff] %v6013_v11  ;;  %v5063_v45 = vadd.f32 %v5021_v28, %v4849_v7  ;;  %v5693_v40 = vsel %vm5692_vm6, %v6790_v18, %v5689_v54  ;;  %v5701_v14 = vmul.f32 %v6794_v0, %v11236_v31  ;;  %6795 = vpow2.f32 %v5206_v35  ;;  %v11848_v7 = vld [vmem:[#allocation36_spill] sm:$0xff] }
 0x69c   : > { %v5698_v59 = vsel %vm5695_vm7, %v5697_v4, %v5693_v40  ;;  %6797 = vrcp.f32 %v11256_v47  ;;  %vm5706_vm8 = vweird.f32 %v6794_v0  ;;  %v5724_v9 = vand.u32 2147483647, %v11256_v47 }
 0x69d   : > { %6062 = vmatmul.f32.gmra.mxu2 %v5927_v13  ;;  %v5819_v2 = vmul.f32 %v5698_v59, %v11173_v33  ;;  %v5702_v38 = vsub.f32 1.0, %v5701_v14  ;;  %v11264_v29 = vadd.f32 %v11221_v50, %v5063_v45  ;;  %v3995_v33 = vadd.f32 %v11846_v27, %v11845_v23  ;;  %vm5707_vm10 = vmor %vm5705_vm9, %vm5706_vm8 }
 0x69e   : > { %v5726_v24 = vand.u32 2147483648, %v11256_v47  ;;  %vm5720_vm13 = vweird.f32 %v11256_v47  ;;  %vm5725_vm15 = vcmp.eq.f32.partialorder %v5724_v9, 8.507059e+37 }
 0x69f   : > { %v5855_v42 = vmul.f32 %v5819_v2, %v11844_v60  ;;  %v5703_v15 = vmul.f32 %v6794_v0, %v5702_v38  ;;  %v5139_v22 = vsub.f32 0.0, %v11264_v29  ;;  %v4209_v49 = vadd.f32 %v11847_v5, %v3995_v33 }
 0x6a0   : > { %v6015_v3 = vpop.f32.mrf.mxu2  ;;  %v5928_v57 = vld [vmem:[#allocation2 + $0xf0] sm:$0xff]  ;;  %v5727_v4 = vor.u32 1.1754944e-38, %v5726_v24 }
 0x6a1   : > { %v6016_v46 = vadd.f32 %v11205_v17, %v6015_v3  ;;  %v6796_v18 = vpop.eup %6795  ;;  %5891 = vst [vmem:[#allocation2 + $0xfb] sm:$0xff] %v5855_v42  ;;  %v5704_v6 = vadd.f32 %v6794_v0, %v5703_v15  ;;  %v5208_v52 = vmul.f32 1.442695, %v5139_v22  ;;  %v4423_v31 = vadd.f32 %v10830_v21, %v4209_v49 }
 0x6a2   : > { %v5024_v8 = vpop.f32.mrf.mxu1  ;;  %v6798_v61 = vpop.eup %6797  ;;  %v11276_v62 = vadd.f32 1.0, %v6796_v18 }
 0x6a3   : > { %6112 = vst [vmem:[%s10870_s19 + $0x68] sm:$0xff] %v6016_v46  ;;  %v5064_v1 = vadd.f32 %v5024_v8, %v4850_v26  ;;  %v5708_v16 = vsel %vm5707_vm10, %v6794_v0, %v5704_v6  ;;  %v5716_v19 = vmul.f32 %v6798_v61, %v11256_v47  ;;  %6799 = vpow2.f32 %v5208_v52 }
 0x6a4   : > { %v5713_v30 = vsel %vm5710_vm11, %v5712_v55, %v5708_v16  ;;  %6801 = vrcp.f32 %v11276_v62  ;;  %v4637_v48 = vadd.f32 %v4599_v10, %v4423_v31  ;;  %vm5721_vm12 = vweird.f32 %v6798_v61 }
 0x6a5   : > { %6065 = vmatmul.f32.gmra.mxu2 %v5928_v57  ;;  %v5820_v43 = vmul.f32 %v5713_v30, %v11194_v36  ;;  %v5717_v12 = vsub.f32 1.0, %v5716_v19  ;;  %v11284_v34 = vadd.f32 %v11221_v50, %v5064_v1  ;;  %vm5722_vm14 = vmor %vm5720_vm13, %vm5721_vm12  ;;  %v5739_v38 = vand.u32 2147483647, %v11276_v62 }
 0x6a6   : > { %v4851_v54 = vadd.f32 %v4813_v37, %v4637_v48  ;;  %v5741_v25 = vand.u32 2147483648, %v11276_v62  ;;  %vm5735_vm1 = vweird.f32 %v11276_v62 }
 0x6a7   : > { %v5856_v11 = vmul.f32 %v5820_v43, %v11848_v7  ;;  %v5718_v32 = vmul.f32 %v6798_v61, %v5717_v12  ;;  %v5140_v21 = vsub.f32 0.0, %v11284_v34  ;;  %vm5740_vm3 = vcmp.eq.f32.partialorder %v5739_v38, 8.507059e+37  ;;  %v11851_v7 = vld [vmem:[#allocation41_spill] sm:$0xff] }
 0x6a8   : > { %v6018_v58 = vpop.f32.mrf.mxu2  ;;  %v5929_v0 = vld [vmem:[#allocation2 + $0xf8] sm:$0xff]  ;;  %v5742_v33 = vor.u32 1.1754944e-38, %v5741_v25 }
 0x6a9   : > { %v6019_v36 = vadd.f32 %v11205_v17, %v6018_v58  ;;  %v6800_v35 = vpop.eup %6799  ;;  %5892 = vst [vmem:[#allocation2 + $0x103] sm:$0xff] %v5856_v11  ;;  %v5719_v13 = vadd.f32 %v6798_v61, %v5718_v32  ;;  %v5210_v28 = vmul.f32 1.442695, %v5140_v21 }
 0x6aa   : > { %v5027_v51 = vpop.f32.mrf.mxu1  ;;  %v6802_v53 = vpop.eup %6801  ;;  %v5247_v45 = vadd.f32 1.0, %v6800_v35 }
 0x6ab   : > { %6113 = vst [vmem:[%s10870_s19 + $0x70] sm:$0xff] %v6019_v36  ;;  %v5065_v39 = vadd.f32 %v5027_v51, %v4851_v54  ;;  %v5723_v40 = vsel %vm5722_vm14, %v6798_v61, %v5719_v13  ;;  %v5731_v14 = vmul.f32 %v6802_v53, %v11276_v62  ;;  %6803 = vpow2.f32 %v5210_v28  ;;  %v11850_v61 = vld [vmem:[#allocation87_spill] sm:$0xff] }
 0x6ac   : > { %v5728_v41 = vsel %vm5725_vm15, %v5727_v4, %v5723_v40  ;;  %6805 = vrcp.f32 %v5247_v45  ;;  %vm5736_vm0 = vweird.f32 %v6802_v53  ;;  %v5756_v8 = vand.u32 2147483648, %v5247_v45 }
 0x6ad   : > { %6068 = vmatmul.f32.gmra.mxu2 %v5929_v0  ;;  %v5821_v59 = vmul.f32 %v5728_v41, %v11224_v56  ;;  %v5732_v47 = vsub.f32 1.0, %v5731_v14  ;;  %v11296_v2 = vadd.f32 %v11221_v50, %v5065_v39  ;;  %vm5737_vm2 = vmor %vm5735_vm1, %vm5736_vm0  ;;  %v5754_v55 = vand.u32 2147483647, %v5247_v45  ;;  %v11852_v39 = vld [vmem:[#allocation39_spill] sm:$0xff] }
 0x6ae   : > { %vm5750_vm5 = vweird.f32 %v5247_v45  ;;  %v5757_v30 = vor.u32 1.1754944e-38, %v5756_v8  ;;  %v5938_v8 = vld [vmem:[#allocation2 + $0x140] sm:$0xf] }
 0x6af   : > { %v5857_v20 = vmul.f32 %v5821_v59, %v11849_v44  ;;  %v5733_v60 = vmul.f32 %v6802_v53, %v5732_v47  ;;  %v5141_v42 = vsub.f32 0.0, %v11296_v2  ;;  %vm5755_vm7 = vcmp.eq.f32.partialorder %v5754_v55, 8.507059e+37 }
 0x6b0   : > { %v6021_v15 = vpop.f32.mrf.mxu2  ;;  %v5930_v23 = vld [vmem:[#allocation2 + $0x100] sm:$0xff] }
 0x6b1   : > { %v6022_v22 = vadd.f32 %v11205_v17, %v6021_v15  ;;  %v6804_v3 = vpop.eup %6803  ;;  %5893 = vst [vmem:[#allocation2 + $0x10b] sm:$0xff] %v5857_v20  ;;  %v5734_v56 = vadd.f32 %v6802_v53, %v5733_v60  ;;  %v5212_v50 = vmul.f32 1.442695, %v5141_v42  ;;  %v11853_v42 = vld [vmem:[#allocation40_spill] sm:$0xff] }
 0x6b2   : > { %v6806_v27 = vpop.eup %6805  ;;  %v5248_v26 = vadd.f32 1.0, %v6804_v3 }
 0x6b3   : > { %6114 = vst [vmem:[%s10870_s19 + $0x78] sm:$0xff] %v6022_v22  ;;  %v5738_v46 = vsel %vm5737_vm2, %v6802_v53, %v5734_v56  ;;  %v5746_v18 = vmul.f32 %v6806_v27, %v5247_v45  ;;  %6807 = vpow2.f32 %v5212_v50  ;;  %vm5751_vm4 = vweird.f32 %v6806_v27 }
 0x6b4   : > { %v5743_v6 = vsel %vm5740_vm3, %v5742_v33, %v5738_v46  ;;  %6809 = vrcp.f32 %v5248_v26  ;;  %vm5752_vm6 = vmor %vm5750_vm5, %vm5751_vm4  ;;  %v5771_v24 = vand.u32 2147483648, %v5248_v26  ;;  %v5769_v21 = vand.u32 2147483647, %v5248_v26 }
 0x6b5   : > { %6071 = vmatmul.f32.gmra.mxu2 %v5930_v23  ;;  %v5822_v52 = vmul.f32 %v5743_v6, %v11244_v63  ;;  %v5747_v57 = vsub.f32 1.0, %v5746_v18  ;;  %vm5765_vm9 = vweird.f32 %v5248_v26  ;;  %v5937_v6 = vld [vmem:[#allocation2 + $0x138] sm:$0xff] }
 0x6b6   : > { %v5772_v28 = vor.u32 1.1754944e-38, %v5771_v24  ;;  %vm5770_vm11 = vcmp.eq.f32.partialorder %v5769_v21, 8.507059e+37 }
 0x6b7   : > { %v5858_v5 = vmul.f32 %v5822_v52, %v11850_v61  ;;  %v5748_v49 = vmul.f32 %v6806_v27, %v5747_v57 }
 0x6b8   : > { %v6024_v62 = vpop.f32.mrf.mxu2  ;;  %v5931_v19 = vld [vmem:[#allocation2 + $0x108] sm:$0xff] }
 0x6b9   : > { %v6025_v1 = vadd.f32 %v11205_v17, %v6024_v62  ;;  %v6808_v10 = vpop.eup %6807  ;;  %5894 = vst [vmem:[#allocation2 + $0x113] sm:$0xff] %v5858_v5  ;;  %v5749_v16 = vadd.f32 %v6806_v27, %v5748_v49 }
 0x6ba   : > { %v6810_v31 = vpop.eup %6809  ;;  %v5249_v63 = vadd.f32 1.0, %v6808_v10 }
 0x6bb   : > { %6115 = vst [vmem:[%s10870_s19 + $0x80] sm:$0xff] %v6025_v1  ;;  %v5753_v37 = vsel %vm5752_vm6, %v6806_v27, %v5749_v16  ;;  %v5761_v43 = vmul.f32 %v6810_v31, %v5248_v26  ;;  %vm5766_vm8 = vweird.f32 %v6810_v31 }
 0x6bc   : > { %v5758_v12 = vsel %vm5755_vm7, %v5757_v30, %v5753_v37  ;;  %6811 = vrcp.f32 %v5249_v63  ;;  %vm5767_vm10 = vmor %vm5765_vm9, %vm5766_vm8  ;;  %v5786_v45 = vand.u32 2147483648, %v5249_v63  ;;  %v5784_v41 = vand.u32 2147483647, %v5249_v63 }
 0x6bd   : > { %6074 = vmatmul.f32.gmra.mxu2 %v5931_v19  ;;  %v5823_v48 = vmul.f32 %v5758_v12, %v11264_v29  ;;  %v5762_v9 = vsub.f32 1.0, %v5761_v43  ;;  %vm5780_vm13 = vweird.f32 %v5249_v63 }
 0x6be   : > { %v5787_v44 = vor.u32 1.1754944e-38, %v5786_v45  ;;  %vm5785_vm15 = vcmp.eq.f32.partialorder %v5784_v41, 8.507059e+37 }
 0x6bf   : > { %v5859_v11 = vmul.f32 %v5823_v48, %v11851_v7  ;;  %v5763_v32 = vmul.f32 %v6810_v31, %v5762_v9 }
 0x6c0   : > { %v6027_v58 = vpop.f32.mrf.mxu2  ;;  %v5932_v35 = vld [vmem:[#allocation2 + $0x110] sm:$0xff] }
 0x6c1   : > { %v6028_v54 = vadd.f32 %v11205_v17, %v6027_v58  ;;  %5895 = vst [vmem:[#allocation2 + $0x11b] sm:$0xff] %v5859_v11  ;;  %v5764_v36 = vadd.f32 %v6810_v31, %v5763_v32 }
 0x6c2   : > { %v6812_v13 = vpop.eup %6811 }
 0x6c3   : > { %6116 = vst [vmem:[%s10870_s19 + $0x88] sm:$0xff] %v6028_v54  ;;  %v5768_v29 = vsel %vm5767_vm10, %v6810_v31, %v5764_v36  ;;  %v5776_v0 = vmul.f32 %v6812_v13, %v5249_v63  ;;  %vm5781_vm12 = vweird.f32 %v6812_v13 }
 0x6c4   : > { %v5773_v51 = vsel %vm5770_vm11, %v5772_v28, %v5768_v29  ;;  %vm5782_vm14 = vmor %vm5780_vm13, %vm5781_vm12 }
 0x6c5   : > { %6077 = vmatmul.f32.gmra.mxu2 %v5932_v35  ;;  %v5824_v53 = vmul.f32 %v5773_v51, %v11284_v34  ;;  %v5777_v4 = vsub.f32 1.0, %v5776_v0 }
 0x6c7   : > { %v5860_v40 = vmul.f32 %v5824_v53, %v11852_v39  ;;  %v5778_v14 = vmul.f32 %v6812_v13, %v5777_v4 }
 0x6c8   : > { %v6030_v59 = vpop.f32.mrf.mxu2  ;;  %v5933_v25 = vld [vmem:[#allocation2 + $0x118] sm:$0xff] }
 0x6c9   : > { %v6031_v47 = vadd.f32 %v11205_v17, %v6030_v59  ;;  %5896 = vst [vmem:[#allocation2 + $0x123] sm:$0xff] %v5860_v40  ;;  %v5779_v38 = vadd.f32 %v6812_v13, %v5778_v14 }
 0x6cb   : > { %6117 = vst [vmem:[%s10870_s19 + $0x90] sm:$0xff] %v6031_v47  ;;  %v5783_v34 = vsel %vm5782_vm14, %v6812_v13, %v5779_v38 }
 0x6cc   : > { %v5788_v20 = vsel %vm5785_vm15, %v5787_v44, %v5783_v34 }
 0x6cd   : > { %6080 = vmatmul.f32.gmra.mxu2 %v5933_v25  ;;  %v5825_v60 = vmul.f32 %v5788_v20, %v11296_v2 }
 0x6cf   : > { %v5861_v15 = vmul.f32 %v5825_v60, %v11853_v42 }
 0x6d0   : > { %v6033_v22 = vpop.f32.mrf.mxu2  ;;  %v5934_v56 = vld [vmem:[#allocation2 + $0x120] sm:$0xff] }
 0x6d1   : > { %v6034_v3 = vadd.f32 %v11205_v17, %v6033_v22  ;;  %5897 = vst [vmem:[#allocation2 + $0x12b] sm:$0x3f] %v5861_v15 }
 0x6d3   : > { %6118 = vst [vmem:[%s10870_s19 + $0x98] sm:$0xff] %v6034_v3 }
 0x6d5   : > { %6083 = vmatmul.f32.gmra.mxu2 %v5934_v56 }
 0x6d8   : > { %v6036_v50 = vpop.f32.mrf.mxu2  ;;  %v5935_v27 = vld [vmem:[#allocation2 + $0x128] sm:$0xff]  ;;  %v5936_v26 = vld [vmem:[#allocation2 + $0x130] sm:$0xff] }
 0x6d9   : > { %v6037_v23 = vadd.f32 %v11205_v17, %v6036_v50 }
 0x6db   : > { %6119 = vst [vmem:[%s10870_s19 + $0xa0] sm:$0xff] %v6037_v23 }
 0x6dd   : > { %6086 = vmatmul.f32.gmra.mxu2 %v5935_v27 }
 0x6e0   : > { %v6039_v33 = vpop.f32.mrf.mxu2 }
 0x6e1   : > { %v6040_v2 = vadd.f32 %v11205_v17, %v6039_v33 }
 0x6e3   : > { %6120 = vst [vmem:[%s10870_s19 + $0xa8] sm:$0xff] %v6040_v2 }
 0x6e5   : > { %6089 = vmatmul.f32.gmra.mxu2 %v5936_v26 }
 0x6e8   : > { %v6042_v46 = vpop.f32.mrf.mxu2 }
 0x6e9   : > { %v6043_v18 = vadd.f32 %v11205_v17, %v6042_v46 }
 0x6eb   : > { %6121 = vst [vmem:[%s10870_s19 + $0xb0] sm:$0xff] %v6043_v18 }
 0x6ed   : > { %6092 = vmatmul.f32.gmra.mxu2 %v5937_v6 }
 0x6f0   : > { %v6045_v52 = vpop.f32.mrf.mxu2 }
 0x6f1   : > { %v6046_v57 = vadd.f32 %v11205_v17, %v6045_v52 }
 0x6f3   : > { %6122 = vst [vmem:[%s10870_s19 + $0xb8] sm:$0xff] %v6046_v57 }
 0x6f5   : > { %6095 = vmatmul.f32.gmra.mxu2 %v5938_v8 }
 0x6f8   : > { %v6048_v61 = vpop.f32.mrf.mxu2 }
 0x6f9   : > { %v6049_v5 = vadd.f32 %v11205_v17, %v6048_v61 }
 0x6fb   : > { %6123 = vst [vmem:[%s10870_s19 + $0xc0] sm:$0xff] %v6049_v5 }
 0x700   : > { %v6051_v49 = vpop.f32.mrf.mxu2 }
 0x701   : > { %v6052_v55 = vadd.f32 %v11205_v17, %v6051_v49 }
 0x703   : > { %6124 = vst [vmem:[%s10870_s19 + $0xc8] sm:$0xff] %v6052_v55 }
 0x708   : > { %v6054_v62 = vpop.f32.mrf.mxu2 }
 0x709   : > { %v6055_v1 = vadd.f32 %v11205_v17, %v6054_v62 }
 0x70b   : > { %6125 = vst [vmem:[%s10870_s19 + $0xd0] sm:$0xff] %v6055_v1 }
 0x710   : > { %v6057_v10 = vpop.f32.mrf.mxu2 }
 0x711   : > { %v6058_v16 = vadd.f32 %v11205_v17, %v6057_v10 }
 0x713   : > { %6126 = vst [vmem:[%s10870_s19 + $0xd8] sm:$0xff] %v6058_v16 }
 0x718   : > { %v6060_v19 = vpop.f32.mrf.mxu2 }
 0x719   : > { %v6061_v31 = vadd.f32 %v11205_v17, %v6060_v19 }
 0x71b   : > { %6127 = vst [vmem:[%s10870_s19 + $0xe0] sm:$0xff] %v6061_v31 }
 0x720   : > { %v6063_v30 = vpop.f32.mrf.mxu2 }
 0x721   : > { %v6064_v63 = vadd.f32 %v11205_v17, %v6063_v30 }
 0x723   : > { %6128 = vst [vmem:[%s10870_s19 + $0xe8] sm:$0xff] %v6064_v63 }
 0x728   : > { %v6066_v37 = vpop.f32.mrf.mxu2 }
 0x729   : > { %v6067_v43 = vadd.f32 %v11205_v17, %v6066_v37 }
 0x72b   : > { %6129 = vst [vmem:[%s10870_s19 + $0xf0] sm:$0xff] %v6067_v43 }
 0x730   : > { %v6069_v12 = vpop.f32.mrf.mxu2 }
 0x731   : > { %v6070_v48 = vadd.f32 %v11205_v17, %v6069_v12 }
 0x733   : > { %6130 = vst [vmem:[%s10870_s19 + $0xf8] sm:$0xff] %v6070_v48 }
 0x738   : > { %v6072_v9 = vpop.f32.mrf.mxu2 }
 0x739   : > { %v6073_v24 = vadd.f32 %v11205_v17, %v6072_v9 }
 0x73b   : > { %6131 = vst [vmem:[%s10870_s19 + $0x100] sm:$0xff] %v6073_v24 }
 0x740   : > { %v6075_v7 = vpop.f32.mrf.mxu2 }
 0x741   : > { %v6076_v11 = vadd.f32 %v11205_v17, %v6075_v7 }
 0x743   : > { %6132 = vst [vmem:[%s10870_s19 + $0x108] sm:$0xff] %v6076_v11 }
 0x748   : > { %v6078_v32 = vpop.f32.mrf.mxu2 }
 0x749   : > { %v6079_v21 = vadd.f32 %v11205_v17, %v6078_v32 }
 0x74b   : > { %6133 = vst [vmem:[%s10870_s19 + $0x110] sm:$0xff] %v6079_v21 }
 0x750   : > { %v6081_v58 = vpop.f32.mrf.mxu2 }
 0x751   : > { %v6082_v54 = vadd.f32 %v11205_v17, %v6081_v58 }
 0x753   : > { %6134 = vst [vmem:[%s10870_s19 + $0x118] sm:$0xff] %v6082_v54 }
 0x758   : > { %v6084_v36 = vpop.f32.mrf.mxu2 }
 0x759   : > { %v6085_v35 = vadd.f32 %v11205_v17, %v6084_v36 }
 0x75b   : > { %6135 = vst [vmem:[%s10870_s19 + $0x120] sm:$0xff] %v6085_v35 }
 0x760   : > { %v6087_v13 = vpop.f32.mrf.mxu2 }
 0x761   : > { %v6088_v28 = vadd.f32 %v11205_v17, %v6087_v13 }
 0x763   : > { %6136 = vst [vmem:[%s10870_s19 + $0x128] sm:$0xff] %v6088_v28 }
 0x768   : > { %v6090_v29 = vpop.f32.mrf.mxu2 }
 0x769   : > { %v6091_v0 = vadd.f32 %v11205_v17, %v6090_v29 }
 0x76b   : > { %6137 = vst [vmem:[%s10870_s19 + $0x130] sm:$0xff] %v6091_v0 }
 0x770   : > { %v6093_v51 = vpop.f32.mrf.mxu2 }
 0x771   : > { %v6094_v53 = vadd.f32 %v11205_v17, %v6093_v51 }
 0x773   : > { %6138 = vst [vmem:[%s10870_s19 + $0x138] sm:$0xff] %v6094_v53 }
 0x778   : > { %v6096_v4 = vpop.f32.mrf.mxu2 }
 0x779   : > { %v6097_v45 = vadd.f32 %v11205_v17, %v6096_v4 }
 0x77b   : > { %6139 = vst [vmem:[%s10870_s19 + $0x140] sm:$0xf] %v6097_v45 }
 0x77c PF: > { %s18_s27 = sadd.s32 1, %s6825_s27  }
 0x77d   : > { %p15_p4 = scmp.ge.s32.totalorder %s18_s27, 4  }
 0x77f   :  { %17 = sbr.rel (!%p15_p4) target bundleno = 1 (0x1), region = 98 }

</bundles_post_ra>
